<compile_context>
chip_gen: v7x
topology: tpu7x:2x2x1
jax: 0.10.0
libtpu: 0.0.40
codegen_flags: <defaults>
</compile_context>

<pallas_src>
import functools

import jax
import jax.numpy as jnp
from jax.experimental import pallas as pl
from jax.experimental.pallas import tpu as pltpu

NEG_SLOPE = 0.01          # nn.LeakyReLU default
CH1 = 16
CH2 = 16
HID1 = 25 * CH2           # 400
HID2 = 64
L_USED = 10000            # samples consumed by the conv stack: 25*2*10*2*10
N_GRP = 5                 # conv1 pair-groups per pool2 window (4 (even,odd) pairs each)
GRP_W = 256               # lane width of one group (240 data + 16 zero pad, vreg aligned)
ROW_W = N_GRP * GRP_W     # 1280 features per (example, pool2-position) row


def _leaky(v):
    return jnp.where(v > 0, v, NEG_SLOPE * v)


def _softmax(z):
    z = z - jnp.max(z, axis=-1, keepdims=True)
    e = jnp.exp(z)
    return e / jnp.sum(e, axis=-1, keepdims=True)


# ---------------------------------------------------------------------------
# Fused kernel: one block of B_TILE examples per grid step.
# Row index inside the block = t*B + b  (t = pool2 position, b = example).
# ---------------------------------------------------------------------------
def _fused_kernel(b_tile,
                  dp_ref,    # (25*B, 1280) bf16  conv1 patch rows
                  w1_ref,    # (256, 128)  bf16   conv1 group weight (even|odd lane halves)
                  b1_ref,    # (1, 128)    f32
                  w2_ref,    # (320, 32)   f32    conv2 even|odd block-diagonal weight
                  b2_ref,    # (1, 32)     f32
                  w3_ref,    # (25,128,16) f32    merged head-1 weight, flatten baked in
                  bh_ref,    # (1, 128)    f32
                  wh2_ref,   # (128, 16)   f32    merged head-2 weight (4 mod | 9 band | 3 pad)
                  bh2_ref,   # (1, 16)     f32
                  mod_ref,   # (B, 4)      f32
                  band_ref,  # (B, 9)      f32
                  p1_ref):   # scratch (25*B, 320) f32  pooled conv1 feats = conv2 patches
    w1 = w1_ref[...]
    b1 = b1_ref[...]

    # ---- Conv1d(3->16,k=10,s=10) + LeakyReLU + MaxPool1d(2,2): 5 dense group matmuls.
    # Each 256-lane slice holds 4 (even,odd) conv1 patch pairs; w1 is block structured so
    # lanes 0:64 of the product are the 4 even-position outputs and lanes 64:128 the odd.
    for g in range(N_GRP):
        y = jnp.dot(dp_ref[:, GRP_W * g:GRP_W * (g + 1)], w1,
                    preferred_element_type=jnp.float32) + b1
        y = _leaky(y)
        p1_ref[:, 64 * g:64 * (g + 1)] = jnp.maximum(y[:, :64], y[:, 64:])

    # ---- Conv1d(16->16,k=10,s=10) + LeakyReLU + MaxPool1d(2,2): ONE matmul, even/odd
    # conv2 positions produced in the two 16-lane halves of the block-diagonal weight.
    z = jnp.dot(p1_ref[...], w2_ref[...],
                preferred_element_type=jnp.float32) + b2_ref[...]
    z = _leaky(z)
    p2 = jnp.maximum(z[:, :CH2], z[:, CH2:])                 # (25*B, 16), rows t-major

    # ---- Flatten + merged first Linear of both heads.  The channel-major flatten
    # permutation is baked into w3; contraction is batched over the 25 pool2 positions
    # (one batched MXU op) and reduced with cheap VPU adds.
    p2_3 = p2.reshape(25, b_tile, CH2)                       # tile-aligned leading split
    hp = jnp.einsum("tbc,tjc->tbj", p2_3, w3_ref[...],
                    preferred_element_type=jnp.float32)      # (25, B, 128)
    h = _leaky(jnp.sum(hp, axis=0) + bh_ref[...])            # (B, 128)
    # Dropout(p=0.2) is identity at inference time.

    # ---- Merged second Linears of both heads + per-head softmax.
    logits = jnp.dot(h, wh2_ref[...],
                     preferred_element_type=jnp.float32) + bh2_ref[...]   # (B, 16)
    mod_ref[...] = _softmax(logits[:, 0:4])
    band_ref[...] = _softmax(logits[:, 4:13])


# ---------------------------------------------------------------------------
# Weight packing: folds conv strides, both MaxPools, the flatten permutation and the
# head merges into small dense matrices (built once per call, all tiny).
# ---------------------------------------------------------------------------
def _pack_weights(p):
    f32 = jnp.float32

    # conv1 as (30,16): row = c*10 + k, col = out channel.
    w1flat = jnp.transpose(p["w1"].astype(f32), (1, 2, 0)).reshape(30, CH1)
    w1grp = jnp.zeros((GRP_W, 128), f32)
    for j in range(4):                      # 4 conv1 (even,odd) pairs per group
        for eo in range(2):                 # 0 = even conv1 position, 1 = odd position
            w1grp = w1grp.at[j * 60 + eo * 30: j * 60 + eo * 30 + 30,
                             eo * 64 + j * CH1: eo * 64 + (j + 1) * CH1].set(w1flat)
    b1grp = jnp.tile(p["b1"].astype(f32), 8).reshape(1, 128)

    # conv2 as (160,16): row = k*16 + c_in; even/odd conv2 positions block-diagonal.
    w2flat = jnp.transpose(p["w2"].astype(f32), (2, 1, 0)).reshape(10 * CH1, CH2)
    w2pair = jnp.zeros((2 * 10 * CH1, 2 * CH2), f32)
    w2pair = w2pair.at[:160, :CH2].set(w2flat)
    w2pair = w2pair.at[160:, CH2:].set(w2flat)
    b2pair = jnp.tile(p["b2"].astype(f32), 2).reshape(1, 2 * CH2)

    # Merged head-1 weight: w3[t, j, c] = concat(wm1,wb1)^T[c*25 + t, j].
    wcat = jnp.concatenate([p["wm1"].astype(f32).T, p["wb1"].astype(f32).T], axis=1)  # (400,128)
    w3 = wcat.reshape(CH2, 25, 2 * HID2).transpose(1, 2, 0)                            # (25,128,16)
    bh = jnp.concatenate([p["bm1"], p["bb1"]]).astype(f32).reshape(1, 2 * HID2)

    # Merged head-2 weight (block diagonal, padded to 16 output lanes).
    wh2 = jnp.zeros((2 * HID2, 16), f32)
    wh2 = wh2.at[:HID2, 0:4].set(p["wm2"].astype(f32).T)
    wh2 = wh2.at[HID2:, 4:13].set(p["wb2"].astype(f32).T)
    bh2 = jnp.zeros((1, 16), f32)
    bh2 = bh2.at[0, 0:4].set(p["bm2"].astype(f32))
    bh2 = bh2.at[0, 4:13].set(p["bb2"].astype(f32))

    return (w1grp.astype(jnp.bfloat16), b1grp, w2pair, b2pair, w3, bh, wh2, bh2)


def _const_spec(shape):
    zeros = (0,) * len(shape)
    return pl.BlockSpec(shape, lambda i, _z=zeros: _z)


@functools.partial(jax.jit, static_argnames=("b_tile",))
def simple_conv_forward(x, params, b_tile=8):
    assert b_tile % 8 == 0, "b_tile must be a multiple of 8 (sublane tile)"
    N = x.shape[0]
    x = x.astype(jnp.float32)[:, :, :L_USED]

    n_pad = ((N + b_tile - 1) // b_tile) * b_tile
    if n_pad != N:
        x = jnp.pad(x, ((0, n_pad - N), (0, 0), (0, 0)))
    n_blk = n_pad // b_tile

    # One repack pass (fused by XLA with the bf16 cast; writes half the bytes it reads):
    #   row  = i*25*B + t*B + b          (i block, t pool2 position, b example in block)
    #   lane = g4*256 + j*60 + eo*30 + c*10 + k   (+16 zero-pad lanes per 256-lane group)
    xr = x.reshape(n_blk, b_tile, 3, 25, 20, 2, 10)
    xr = jnp.transpose(xr, (0, 3, 1, 4, 5, 2, 6))          # (i, t, b, g, eo, c, k)
    xr = xr.reshape(n_blk, 25, b_tile, N_GRP, 240)
    xr = jnp.pad(xr, ((0, 0),) * 4 + ((0, GRP_W - 240),))
    dp = xr.reshape(n_blk * 25 * b_tile, ROW_W).astype(jnp.bfloat16)

    w1grp, b1grp, w2pair, b2pair, w3, bh, wh2, bh2 = _pack_weights(params)

    rows = 25 * b_tile
    kernel = functools.partial(_fused_kernel, b_tile)
    pred_mod, pred_band = pl.pallas_call(
        kernel,
        out_shape=(jax.ShapeDtypeStruct((n_pad, 4), jnp.float32),
                   jax.ShapeDtypeStruct((n_pad, 9), jnp.float32)),
        grid=(n_blk,),
        in_specs=[
            pl.BlockSpec((rows, ROW_W), lambda i: (i, 0)),
            _const_spec(w1grp.shape), _const_spec(b1grp.shape),
            _const_spec(w2pair.shape), _const_spec(b2pair.shape),
            _const_spec(w3.shape), _const_spec(bh.shape),
            _const_spec(wh2.shape), _const_spec(bh2.shape),
        ],
        out_specs=(pl.BlockSpec((b_tile, 4), lambda i: (i, 0)),
                   pl.BlockSpec((b_tile, 9), lambda i: (i, 0))),
        scratch_shapes=[pltpu.VMEM((rows, 2 * 10 * CH1), jnp.float32)],
        compiler_params=pltpu.CompilerParams(
            dimension_semantics=("parallel",)),
    )(dp, w1grp, b1grp, w2pair, b2pair, w3, bh, wh2, bh2)
    return pred_mod[:N], pred_band[:N]


# ---------------------------------------------------------------------------
# Parameters (deterministic synthetic init; same shapes as the PyTorch module)
# ---------------------------------------------------------------------------
def init_params(key):
    hid1, hid2 = HID1, HID2
    ks = jax.random.split(key, 12)

    def u(k, shape, fan_in):
        bound = 1.0 / jnp.sqrt(fan_in)
        return jax.random.uniform(k, shape, jnp.float32, -bound, bound)

    return {
        "w1": u(ks[0], (CH1, 3, 10), 3 * 10),       "b1": u(ks[1], (CH1,), 3 * 10),
        "w2": u(ks[2], (CH2, CH1, 10), CH1 * 10),   "b2": u(ks[3], (CH2,), CH1 * 10),
        "wm1": u(ks[4], (hid2, hid1), hid1),        "bm1": u(ks[5], (hid2,), hid1),
        "wm2": u(ks[6], (4, hid2), hid2),           "bm2": u(ks[7], (4,), hid2),
        "wb1": u(ks[8], (hid2, hid1), hid1),        "bb1": u(ks[9], (hid2,), hid1),
        "wb2": u(ks[10], (9, hid2), hid2),          "bb2": u(ks[11], (9,), hid2),
    }


# ---------------------------------------------------------------------------
# Pure-JAX reference (mirrors PyTorch semantics) for a correctness check
# ---------------------------------------------------------------------------
def reference_forward(x, p):
    x = jnp.asarray(x, jnp.float32)[:, :, :L_USED]
    N = x.shape[0]
    hp = jax.lax.Precision.HIGHEST
    xp = x.reshape(N, 3, 1000, 10)
    y1 = jnp.einsum("ncpk,ock->nop", xp, p["w1"], precision=hp) + p["b1"][None, :, None]
    y1 = _leaky(y1)
    y1 = jnp.maximum(y1[:, :, 0::2], y1[:, :, 1::2])             # (N,16,500)
    xp2 = y1.reshape(N, CH1, 50, 10)
    y2 = jnp.einsum("ncqk,ock->noq", xp2, p["w2"], precision=hp) + p["b2"][None, :, None]
    y2 = _leaky(y2)
    y2 = jnp.maximum(y2[:, :, 0::2], y2[:, :, 1::2])             # (N,16,25)
    feat = y2.reshape(N, HID1)                                   # channel-major flatten (NCL)
    hm = _leaky(jnp.dot(feat, p["wm1"].T, precision=hp) + p["bm1"])
    hb = _leaky(jnp.dot(feat, p["wb1"].T, precision=hp) + p["bb1"])
    zm = jnp.dot(hm, p["wm2"].T, precision=hp) + p["bm2"]
    zb = jnp.dot(hb, p["wb2"].T, precision=hp) + p["bb2"]
    return jax.nn.softmax(zm, axis=1), jax.nn.softmax(zb, axis=1)


if __name__ == "__main__":
    key = jax.random.PRNGKey(0)
    k_x, k_p = jax.random.split(key)
    N, L = 16, L_USED                   # L=10000 -> 1000 -> 500 -> 50 -> 25 -> hid1=400
    x = jax.random.normal(k_x, (N, 3, L), dtype=jnp.float32)
    params = init_params(k_p)

    pred_mod, pred_band = simple_conv_forward(x, params, b_tile=8)
    jax.block_until_ready((pred_mod, pred_band))

    assert pred_mod.shape == (N, 4) and pred_band.shape == (N, 9)
    assert bool(jnp.all(jnp.isfinite(pred_mod))) and bool(jnp.all(jnp.isfinite(pred_band)))
    # softmax rows sum to 1
    assert bool(jnp.allclose(jnp.sum(pred_mod, axis=1), 1.0, atol=1e-5))
    assert bool(jnp.allclose(jnp.sum(pred_band, axis=1), 1.0, atol=1e-5))
    # match the pure-JAX reference of the PyTorch module (bf16 MXU operands, f32 epilogue)
    ref_mod, ref_band = reference_forward(x, params)
    assert bool(jnp.allclose(pred_mod, ref_mod, atol=5e-3)), "mod head mismatch vs reference"
    assert bool(jnp.allclose(pred_band, ref_band, atol=5e-3)), "band head mismatch vs reference"
    print("KERNEL_OK")
</pallas_src>

<mosaic_0001>
module attributes {stable_mosaic.version = 11 : i64} {
  func.func @_fused_kernel(%arg0: i32, %arg1: memref<200x1280xbf16, #tpu.memory_space<vmem>>, %arg2: memref<256x128xbf16, #tpu.memory_space<vmem>>, %arg3: memref<1x128xf32, #tpu.memory_space<vmem>>, %arg4: memref<320x32xf32, #tpu.memory_space<vmem>>, %arg5: memref<1x32xf32, #tpu.memory_space<vmem>>, %arg6: memref<25x128x16xf32, #tpu.memory_space<vmem>>, %arg7: memref<1x128xf32, #tpu.memory_space<vmem>>, %arg8: memref<128x16xf32, #tpu.memory_space<vmem>>, %arg9: memref<1x16xf32, #tpu.memory_space<vmem>>, %arg10: memref<8x4xf32, #tpu.memory_space<vmem>>, %arg11: memref<8x9xf32, #tpu.memory_space<vmem>>, %arg12: memref<200x320xf32, #tpu.memory_space<vmem>>) attributes {dimension_semantics = [#tpu.dimension_semantics<parallel>], iteration_bounds = array<i64: 2>, scalar_prefetch = 0 : i64, scratch_operands = 1 : i64, tpu.core_type = #tpu.core_type<tc>, window_params = [{transform_indices = @transform_0, window_bounds = array<i64: 200, 1280>}, {pipeline_mode = #tpu.pipeline_mode<synchronous>, transform_indices = @transform_1, window_bounds = array<i64: 256, 128>}, {pipeline_mode = #tpu.pipeline_mode<synchronous>, transform_indices = @transform_2, window_bounds = array<i64: 1, 128>}, {pipeline_mode = #tpu.pipeline_mode<synchronous>, transform_indices = @transform_3, window_bounds = array<i64: 320, 32>}, {pipeline_mode = #tpu.pipeline_mode<synchronous>, transform_indices = @transform_4, window_bounds = array<i64: 1, 32>}, {pipeline_mode = #tpu.pipeline_mode<synchronous>, transform_indices = @transform_5, window_bounds = array<i64: 25, 128, 16>}, {pipeline_mode = #tpu.pipeline_mode<synchronous>, transform_indices = @transform_6, window_bounds = array<i64: 1, 128>}, {pipeline_mode = #tpu.pipeline_mode<synchronous>, transform_indices = @transform_7, window_bounds = array<i64: 128, 16>}, {pipeline_mode = #tpu.pipeline_mode<synchronous>, transform_indices = @transform_8, window_bounds = array<i64: 1, 16>}, {transform_indices = @transform_9, window_bounds = array<i64: 8, 4>}, {transform_indices = @transform_10, window_bounds = array<i64: 8, 9>}]} {
    %c0 = arith.constant 0 : index
    %c0_0 = arith.constant 0 : index
    %0 = vector.load %arg2[%c0, %c0_0] : memref<256x128xbf16, #tpu.memory_space<vmem>>, vector<256x128xbf16>
    %c0_1 = arith.constant 0 : index
    %c0_2 = arith.constant 0 : index
    %1 = vector.load %arg3[%c0_1, %c0_2] : memref<1x128xf32, #tpu.memory_space<vmem>>, vector<1x128xf32>
    %c0_3 = arith.constant 0 : index
    %c0_4 = arith.constant 0 : index
    %2 = vector.load %arg1[%c0_3, %c0_4] : memref<200x1280xbf16, #tpu.memory_space<vmem>>, vector<200x256xbf16>
    %cst = arith.constant dense<0.000000e+00> : vector<200x128xf32>
    %3 = tpu.matmul %2, %0, %cst {dimension_numbers = #tpu.dot_dimension_numbers<[1], [0], [0], [1], [0, 0, 1, 1], [], []>} : vector<200x256xbf16>, vector<256x128xbf16>, vector<200x128xf32> -> vector<200x128xf32>
    %4 = vector.broadcast %1 : vector<1x128xf32> to vector<200x128xf32>
    %5 = arith.addf %3, %4 : vector<200x128xf32>
    %cst_5 = arith.constant 0.000000e+00 : f32
    %6 = vector.broadcast %cst_5 : f32 to vector<200x128xf32>
    %7 = arith.cmpf ogt, %5, %6 : vector<200x128xf32>
    %cst_6 = arith.constant 0.00999999977 : f32
    %8 = vector.broadcast %cst_6 : f32 to vector<200x128xf32>
    %9 = arith.mulf %8, %5 : vector<200x128xf32>
    %10 = arith.select %7, %5, %9 : vector<200x128xi1>, vector<200x128xf32>
    %11 = vector.extract_strided_slice %10 {offsets = [0, 0], sizes = [200, 64], strides = [1, 1]} : vector<200x128xf32> to vector<200x64xf32>
    %12 = vector.extract_strided_slice %10 {offsets = [0, 64], sizes = [200, 64], strides = [1, 1]} : vector<200x128xf32> to vector<200x64xf32>
    %13 = arith.maximumf %11, %12 : vector<200x64xf32>
    %c0_7 = arith.constant 0 : index
    %c0_8 = arith.constant 0 : index
    %14 = vector.load %arg12[%c0_7, %c0_8] : memref<200x320xf32, #tpu.memory_space<vmem>>, vector<200x64xf32>
    tpu.vector_store %arg12[%c0_7, %c0_8], %13 {strides = array<i32>} : memref<200x320xf32, #tpu.memory_space<vmem>>, vector<200x64xf32>,
    %c0_9 = arith.constant 0 : index
    %c256 = arith.constant 256 : index
    %15 = vector.load %arg1[%c0_9, %c256] : memref<200x1280xbf16, #tpu.memory_space<vmem>>, vector<200x256xbf16>
    %cst_10 = arith.constant dense<0.000000e+00> : vector<200x128xf32>
    %16 = tpu.matmul %15, %0, %cst_10 {dimension_numbers = #tpu.dot_dimension_numbers<[1], [0], [0], [1], [0, 0, 1, 1], [], []>} : vector<200x256xbf16>, vector<256x128xbf16>, vector<200x128xf32> -> vector<200x128xf32>
    %17 = vector.broadcast %1 : vector<1x128xf32> to vector<200x128xf32>
    %18 = arith.addf %16, %17 : vector<200x128xf32>
    %cst_11 = arith.constant 0.000000e+00 : f32
    %19 = vector.broadcast %cst_11 : f32 to vector<200x128xf32>
    %20 = arith.cmpf ogt, %18, %19 : vector<200x128xf32>
    %cst_12 = arith.constant 0.00999999977 : f32
    %21 = vector.broadcast %cst_12 : f32 to vector<200x128xf32>
    %22 = arith.mulf %21, %18 : vector<200x128xf32>
    %23 = arith.select %20, %18, %22 : vector<200x128xi1>, vector<200x128xf32>
    %24 = vector.extract_strided_slice %23 {offsets = [0, 0], sizes = [200, 64], strides = [1, 1]} : vector<200x128xf32> to vector<200x64xf32>
    %25 = vector.extract_strided_slice %23 {offsets = [0, 64], sizes = [200, 64], strides = [1, 1]} : vector<200x128xf32> to vector<200x64xf32>
    %26 = arith.maximumf %24, %25 : vector<200x64xf32>
    %c0_13 = arith.constant 0 : index
    %c64 = arith.constant 64 : index
    %27 = vector.load %arg12[%c0_13, %c64] : memref<200x320xf32, #tpu.memory_space<vmem>>, vector<200x64xf32>
    tpu.vector_store %arg12[%c0_13, %c64], %26 {strides = array<i32>} : memref<200x320xf32, #tpu.memory_space<vmem>>, vector<200x64xf32>,
    %c0_14 = arith.constant 0 : index
    %c512 = arith.constant 512 : index
    %28 = vector.load %arg1[%c0_14, %c512] : memref<200x1280xbf16, #tpu.memory_space<vmem>>, vector<200x256xbf16>
    %cst_15 = arith.constant dense<0.000000e+00> : vector<200x128xf32>
    %29 = tpu.matmul %28, %0, %cst_15 {dimension_numbers = #tpu.dot_dimension_numbers<[1], [0], [0], [1], [0, 0, 1, 1], [], []>} : vector<200x256xbf16>, vector<256x128xbf16>, vector<200x128xf32> -> vector<200x128xf32>
    %30 = vector.broadcast %1 : vector<1x128xf32> to vector<200x128xf32>
    %31 = arith.addf %29, %30 : vector<200x128xf32>
    %cst_16 = arith.constant 0.000000e+00 : f32
    %32 = vector.broadcast %cst_16 : f32 to vector<200x128xf32>
    %33 = arith.cmpf ogt, %31, %32 : vector<200x128xf32>
    %cst_17 = arith.constant 0.00999999977 : f32
    %34 = vector.broadcast %cst_17 : f32 to vector<200x128xf32>
    %35 = arith.mulf %34, %31 : vector<200x128xf32>
    %36 = arith.select %33, %31, %35 : vector<200x128xi1>, vector<200x128xf32>
    %37 = vector.extract_strided_slice %36 {offsets = [0, 0], sizes = [200, 64], strides = [1, 1]} : vector<200x128xf32> to vector<200x64xf32>
    %38 = vector.extract_strided_slice %36 {offsets = [0, 64], sizes = [200, 64], strides = [1, 1]} : vector<200x128xf32> to vector<200x64xf32>
    %39 = arith.maximumf %37, %38 : vector<200x64xf32>
    %c0_18 = arith.constant 0 : index
    %c128 = arith.constant 128 : index
    %40 = vector.load %arg12[%c0_18, %c128] : memref<200x320xf32, #tpu.memory_space<vmem>>, vector<200x64xf32>
    tpu.vector_store %arg12[%c0_18, %c128], %39 {strides = array<i32>} : memref<200x320xf32, #tpu.memory_space<vmem>>, vector<200x64xf32>,
    %c0_19 = arith.constant 0 : index
    %c768 = arith.constant 768 : index
    %41 = vector.load %arg1[%c0_19, %c768] : memref<200x1280xbf16, #tpu.memory_space<vmem>>, vector<200x256xbf16>
    %cst_20 = arith.constant dense<0.000000e+00> : vector<200x128xf32>
    %42 = tpu.matmul %41, %0, %cst_20 {dimension_numbers = #tpu.dot_dimension_numbers<[1], [0], [0], [1], [0, 0, 1, 1], [], []>} : vector<200x256xbf16>, vector<256x128xbf16>, vector<200x128xf32> -> vector<200x128xf32>
    %43 = vector.broadcast %1 : vector<1x128xf32> to vector<200x128xf32>
    %44 = arith.addf %42, %43 : vector<200x128xf32>
    %cst_21 = arith.constant 0.000000e+00 : f32
    %45 = vector.broadcast %cst_21 : f32 to vector<200x128xf32>
    %46 = arith.cmpf ogt, %44, %45 : vector<200x128xf32>
    %cst_22 = arith.constant 0.00999999977 : f32
    %47 = vector.broadcast %cst_22 : f32 to vector<200x128xf32>
    %48 = arith.mulf %47, %44 : vector<200x128xf32>
    %49 = arith.select %46, %44, %48 : vector<200x128xi1>, vector<200x128xf32>
    %50 = vector.extract_strided_slice %49 {offsets = [0, 0], sizes = [200, 64], strides = [1, 1]} : vector<200x128xf32> to vector<200x64xf32>
    %51 = vector.extract_strided_slice %49 {offsets = [0, 64], sizes = [200, 64], strides = [1, 1]} : vector<200x128xf32> to vector<200x64xf32>
    %52 = arith.maximumf %50, %51 : vector<200x64xf32>
    %c0_23 = arith.constant 0 : index
    %c192 = arith.constant 192 : index
    %53 = vector.load %arg12[%c0_23, %c192] : memref<200x320xf32, #tpu.memory_space<vmem>>, vector<200x64xf32>
    tpu.vector_store %arg12[%c0_23, %c192], %52 {strides = array<i32>} : memref<200x320xf32, #tpu.memory_space<vmem>>, vector<200x64xf32>,
    %c0_24 = arith.constant 0 : index
    %c1024 = arith.constant 1024 : index
    %54 = vector.load %arg1[%c0_24, %c1024] : memref<200x1280xbf16, #tpu.memory_space<vmem>>, vector<200x256xbf16>
    %cst_25 = arith.constant dense<0.000000e+00> : vector<200x128xf32>
    %55 = tpu.matmul %54, %0, %cst_25 {dimension_numbers = #tpu.dot_dimension_numbers<[1], [0], [0], [1], [0, 0, 1, 1], [], []>} : vector<200x256xbf16>, vector<256x128xbf16>, vector<200x128xf32> -> vector<200x128xf32>
    %56 = vector.broadcast %1 : vector<1x128xf32> to vector<200x128xf32>
    %57 = arith.addf %55, %56 : vector<200x128xf32>
    %cst_26 = arith.constant 0.000000e+00 : f32
    %58 = vector.broadcast %cst_26 : f32 to vector<200x128xf32>
    %59 = arith.cmpf ogt, %57, %58 : vector<200x128xf32>
    %cst_27 = arith.constant 0.00999999977 : f32
    %60 = vector.broadcast %cst_27 : f32 to vector<200x128xf32>
    %61 = arith.mulf %60, %57 : vector<200x128xf32>
    %62 = arith.select %59, %57, %61 : vector<200x128xi1>, vector<200x128xf32>
    %63 = vector.extract_strided_slice %62 {offsets = [0, 0], sizes = [200, 64], strides = [1, 1]} : vector<200x128xf32> to vector<200x64xf32>
    %64 = vector.extract_strided_slice %62 {offsets = [0, 64], sizes = [200, 64], strides = [1, 1]} : vector<200x128xf32> to vector<200x64xf32>
    %65 = arith.maximumf %63, %64 : vector<200x64xf32>
    %c0_28 = arith.constant 0 : index
    %c256_29 = arith.constant 256 : index
    %66 = vector.load %arg12[%c0_28, %c256_29] : memref<200x320xf32, #tpu.memory_space<vmem>>, vector<200x64xf32>
    tpu.vector_store %arg12[%c0_28, %c256_29], %65 {strides = array<i32>} : memref<200x320xf32, #tpu.memory_space<vmem>>, vector<200x64xf32>,
    %c0_30 = arith.constant 0 : index
    %c0_31 = arith.constant 0 : index
    %67 = vector.load %arg12[%c0_30, %c0_31] : memref<200x320xf32, #tpu.memory_space<vmem>>, vector<200x320xf32>
    %c0_32 = arith.constant 0 : index
    %c0_33 = arith.constant 0 : index
    %68 = vector.load %arg4[%c0_32, %c0_33] : memref<320x32xf32, #tpu.memory_space<vmem>>, vector<320x32xf32>
    %cst_34 = arith.constant dense<0.000000e+00> : vector<200x32xf32>
    %69 = tpu.matmul %67, %68, %cst_34 {dimension_numbers = #tpu.dot_dimension_numbers<[1], [0], [0], [1], [0, 0, 1, 1], [], []>} : vector<200x320xf32>, vector<320x32xf32>, vector<200x32xf32> -> vector<200x32xf32>
    %c0_35 = arith.constant 0 : index
    %c0_36 = arith.constant 0 : index
    %70 = vector.load %arg5[%c0_35, %c0_36] : memref<1x32xf32, #tpu.memory_space<vmem>>, vector<1x32xf32>
    %71 = vector.broadcast %70 : vector<1x32xf32> to vector<200x32xf32>
    %72 = arith.addf %69, %71 : vector<200x32xf32>
    %cst_37 = arith.constant 0.000000e+00 : f32
    %73 = vector.broadcast %cst_37 : f32 to vector<200x32xf32>
    %74 = arith.cmpf ogt, %72, %73 : vector<200x32xf32>
    %cst_38 = arith.constant 0.00999999977 : f32
    %75 = vector.broadcast %cst_38 : f32 to vector<200x32xf32>
    %76 = arith.mulf %75, %72 : vector<200x32xf32>
    %77 = arith.select %74, %72, %76 : vector<200x32xi1>, vector<200x32xf32>
    %78 = vector.extract_strided_slice %77 {offsets = [0, 0], sizes = [200, 16], strides = [1, 1]} : vector<200x32xf32> to vector<200x16xf32>
    %79 = vector.extract_strided_slice %77 {offsets = [0, 16], sizes = [200, 16], strides = [1, 1]} : vector<200x32xf32> to vector<200x16xf32>
    %80 = arith.maximumf %78, %79 : vector<200x16xf32>
    %81 = vector.shape_cast %80 : vector<200x16xf32> to vector<25x8x16xf32>
    %c0_39 = arith.constant 0 : index
    %c0_40 = arith.constant 0 : index
    %c0_41 = arith.constant 0 : index
    %82 = vector.load %arg6[%c0_39, %c0_40, %c0_41] : memref<25x128x16xf32, #tpu.memory_space<vmem>>, vector<25x128x16xf32>
    "tpu.trace_start"() <{level = 10 : i32, message = "tbc,tjc->tbj"}> : () -> ()
    %cst_42 = arith.constant dense<0.000000e+00> : vector<25x8x128xf32>
    %83 = tpu.matmul %81, %82, %cst_42 {dimension_numbers = #tpu.dot_dimension_numbers<[2], [2], [1], [1], [0, 0, 0, 1, 1, 1], [0], [0]>} : vector<25x8x16xf32>, vector<25x128x16xf32>, vector<25x8x128xf32> -> vector<25x8x128xf32>
    "tpu.trace_stop"() : () -> ()
    %cst_43 = arith.constant dense<0.000000e+00> : vector<8x128xf32>
    %84 = vector.multi_reduction <add>, %83, %cst_43 [0] : vector<25x8x128xf32> to vector<8x128xf32>
    %c0_44 = arith.constant 0 : index
    %c0_45 = arith.constant 0 : index
    %85 = vector.load %arg7[%c0_44, %c0_45] : memref<1x128xf32, #tpu.memory_space<vmem>>, vector<1x128xf32>
    %86 = vector.broadcast %85 : vector<1x128xf32> to vector<8x128xf32>
    %87 = arith.addf %84, %86 : vector<8x128xf32>
    %cst_46 = arith.constant 0.000000e+00 : f32
    %88 = vector.broadcast %cst_46 : f32 to vector<8x128xf32>
    %89 = arith.cmpf ogt, %87, %88 : vector<8x128xf32>
    %cst_47 = arith.constant 0.00999999977 : f32
    %90 = vector.broadcast %cst_47 : f32 to vector<8x128xf32>
    %91 = arith.mulf %90, %87 : vector<8x128xf32>
    %92 = arith.select %89, %87, %91 : vector<8x128xi1>, vector<8x128xf32>
    %c0_48 = arith.constant 0 : index
    %c0_49 = arith.constant 0 : index
    %93 = vector.load %arg8[%c0_48, %c0_49] : memref<128x16xf32, #tpu.memory_space<vmem>>, vector<128x16xf32>
    %cst_50 = arith.constant dense<0.000000e+00> : vector<8x16xf32>
    %94 = tpu.matmul %92, %93, %cst_50 {dimension_numbers = #tpu.dot_dimension_numbers<[1], [0], [0], [1], [0, 0, 1, 1], [], []>} : vector<8x128xf32>, vector<128x16xf32>, vector<8x16xf32> -> vector<8x16xf32>
    %c0_51 = arith.constant 0 : index
    %c0_52 = arith.constant 0 : index
    %95 = vector.load %arg9[%c0_51, %c0_52] : memref<1x16xf32, #tpu.memory_space<vmem>>, vector<1x16xf32>
    %96 = vector.broadcast %95 : vector<1x16xf32> to vector<8x16xf32>
    %97 = arith.addf %94, %96 : vector<8x16xf32>
    %98 = vector.extract_strided_slice %97 {offsets = [0, 0], sizes = [8, 4], strides = [1, 1]} : vector<8x16xf32> to vector<8x4xf32>
    %cst_53 = arith.constant dense<0xFF800000> : vector<8xf32>
    %99 = vector.multi_reduction <maximumf>, %98, %cst_53 [1] : vector<8x4xf32> to vector<8xf32>
    %100 = vector.shape_cast %99 : vector<8xf32> to vector<8x1xf32>
    %101 = vector.broadcast %100 : vector<8x1xf32> to vector<8x4xf32>
    %102 = arith.subf %98, %101 : vector<8x4xf32>
    %103 = math.exp %102 : vector<8x4xf32>
    %cst_54 = arith.constant dense<0.000000e+00> : vector<8xf32>
    %104 = vector.multi_reduction <add>, %103, %cst_54 [1] : vector<8x4xf32> to vector<8xf32>
    %105 = vector.shape_cast %104 : vector<8xf32> to vector<8x1xf32>
    %106 = vector.broadcast %105 : vector<8x1xf32> to vector<8x4xf32>
    %107 = arith.divf %103, %106 : vector<8x4xf32>
    %c0_55 = arith.constant 0 : index
    %c0_56 = arith.constant 0 : index
    %108 = vector.load %arg10[%c0_55, %c0_56] : memref<8x4xf32, #tpu.memory_space<vmem>>, vector<8x4xf32>
    tpu.vector_store %arg10[%c0_55, %c0_56], %107 {strides = array<i32>} : memref<8x4xf32, #tpu.memory_space<vmem>>, vector<8x4xf32>,
    %109 = vector.extract_strided_slice %97 {offsets = [0, 4], sizes = [8, 9], strides = [1, 1]} : vector<8x16xf32> to vector<8x9xf32>
    %cst_57 = arith.constant dense<0xFF800000> : vector<8xf32>
    %110 = vector.multi_reduction <maximumf>, %109, %cst_57 [1] : vector<8x9xf32> to vector<8xf32>
    %111 = vector.shape_cast %110 : vector<8xf32> to vector<8x1xf32>
    %112 = vector.broadcast %111 : vector<8x1xf32> to vector<8x9xf32>
    %113 = arith.subf %109, %112 : vector<8x9xf32>
    %114 = math.exp %113 : vector<8x9xf32>
    %cst_58 = arith.constant dense<0.000000e+00> : vector<8xf32>
    %115 = vector.multi_reduction <add>, %114, %cst_58 [1] : vector<8x9xf32> to vector<8xf32>
    %116 = vector.shape_cast %115 : vector<8xf32> to vector<8x1xf32>
    %117 = vector.broadcast %116 : vector<8x1xf32> to vector<8x9xf32>
    %118 = arith.divf %114, %117 : vector<8x9xf32>
    %c0_59 = arith.constant 0 : index
    %c0_60 = arith.constant 0 : index
    %119 = vector.load %arg11[%c0_59, %c0_60] : memref<8x9xf32, #tpu.memory_space<vmem>>, vector<8x9xf32>
    tpu.vector_store %arg11[%c0_59, %c0_60], %118 {strides = array<i32>} : memref<8x9xf32, #tpu.memory_space<vmem>>, vector<8x9xf32>,
    return
  }
  func.func @transform_0(%arg0: i32) -> (i32, i32) {
    %c0_i32 = arith.constant 0 : i32
    %c0_i32_0 = arith.constant 0 : i32
    return %arg0, %c0_i32 : i32, i32
  }
  func.func @transform_1(%arg0: i32) -> (i32, i32) {
    %c0_i32 = arith.constant 0 : i32
    %c0_i32_0 = arith.constant 0 : i32
    %c0_i32_1 = arith.constant 0 : i32
    return %c0_i32, %c0_i32_0 : i32, i32
  }
  func.func @transform_2(%arg0: i32) -> (i32, i32) {
    %c0_i32 = arith.constant 0 : i32
    %c0_i32_0 = arith.constant 0 : i32
    %c0_i32_1 = arith.constant 0 : i32
    return %c0_i32, %c0_i32_0 : i32, i32
  }
  func.func @transform_3(%arg0: i32) -> (i32, i32) {
    %c0_i32 = arith.constant 0 : i32
    %c0_i32_0 = arith.constant 0 : i32
    %c0_i32_1 = arith.constant 0 : i32
    return %c0_i32, %c0_i32_0 : i32, i32
  }
  func.func @transform_4(%arg0: i32) -> (i32, i32) {
    %c0_i32 = arith.constant 0 : i32
    %c0_i32_0 = arith.constant 0 : i32
    %c0_i32_1 = arith.constant 0 : i32
    return %c0_i32, %c0_i32_0 : i32, i32
  }
  func.func @transform_5(%arg0: i32) -> (i32, i32, i32) {
    %c0_i32 = arith.constant 0 : i32
    %c0_i32_0 = arith.constant 0 : i32
    %c0_i32_1 = arith.constant 0 : i32
    %c0_i32_2 = arith.constant 0 : i32
    return %c0_i32, %c0_i32_0, %c0_i32_1 : i32, i32, i32
  }
  func.func @transform_6(%arg0: i32) -> (i32, i32) {
    %c0_i32 = arith.constant 0 : i32
    %c0_i32_0 = arith.constant 0 : i32
    %c0_i32_1 = arith.constant 0 : i32
    return %c0_i32, %c0_i32_0 : i32, i32
  }
  func.func @transform_7(%arg0: i32) -> (i32, i32) {
    %c0_i32 = arith.constant 0 : i32
    %c0_i32_0 = arith.constant 0 : i32
    %c0_i32_1 = arith.constant 0 : i32
    return %c0_i32, %c0_i32_0 : i32, i32
  }
  func.func @transform_8(%arg0: i32) -> (i32, i32) {
    %c0_i32 = arith.constant 0 : i32
    %c0_i32_0 = arith.constant 0 : i32
    %c0_i32_1 = arith.constant 0 : i32
    return %c0_i32, %c0_i32_0 : i32, i32
  }
  func.func @transform_9(%arg0: i32) -> (i32, i32) {
    %c0_i32 = arith.constant 0 : i32
    %c0_i32_0 = arith.constant 0 : i32
    return %arg0, %c0_i32 : i32, i32
  }
  func.func @transform_10(%arg0: i32) -> (i32, i32) {
    %c0_i32 = arith.constant 0 : i32
    %c0_i32_0 = arith.constant 0 : i32
    return %arg0, %c0_i32 : i32, i32
  }
}

</mosaic_0001>

<bundles_post_ra>
// kernel: tile.13
= control target key start
LH: loop header
LB: loop body
LE: loop exit
PB: predicated region body
PF: predicated region fallthrough
CT: control target
= control target key end

     0   :  { %s22_s0 = inlined_call_operand.vmem [shape: f32[16], index: 0, kind: input, shape index: {}]   ;;  %s23_s1 = inlined_call_operand.vmem [shape: f32[8,16], index: 1, kind: output, shape index: {}]  }
   0x1   :  { %v4_v0 = vld [vmem:[%s22_s0] ss:$0 sm:$0xff] }
   0x2   :  { %5 = vst [vmem:[%s23_s1] sm:$0xff] %v4_v0 }

// kernel: tile.14
= control target key start
LH: loop header
LB: loop body
LE: loop exit
PB: predicated region body
PF: predicated region fallthrough
CT: control target
= control target key end

     0   :  { %s67_s10 = smov 112   ;;  %s68_s11 = smov 80   ;;  %vm3_vm0 = vcmask 130048   ;;  %vm9_vm1 = vcmask 1048448   ;;  %vm15_vm2 = vcmask 917248   ;;  %vm21_vm3 = vcmask 786048   ;;  %s111_s0 = inlined_call_operand.vmem [shape: f32[8,16], index: 0, kind: input, shape index: {}]   ;;  %s112_s1 = inlined_call_operand.vmem [shape: f32[1,128], index: 1, kind: output, shape index: {}]  }
   0x1   :  { %v53_v0 = vld [vmem:[%s111_s0 + $0x7] sm:$0x1]   ;;  %v55_v1 = vld [vmem:[%s111_s0 + $0x5] sm:$0x1]   ;;  %v54_v2 = vld [vmem:[%s111_s0 + $0x6] sm:$0x1]  }
   0x2   :  { %7 = vrot.lane.b32.xlu0 %v53_v0, %s67_s10  ;;  %19 = vrot.lane.b32.xlu1 %v55_v1, %s68_s11  ;;  %v56_v3 = vld [vmem:[%s111_s0 + $0x4] sm:$0x1]   ;;  %v2_v4 = vld [vmem:[%s111_s0] sm:$0x1]   ;;  %s69_s18 = smov 96   ;;  %s70_s19 = smov 64  }
   0x3   :  { %4 = vst.msk [vmem:[#allocation0] sm:$0x1] %vm3_vm0, %v2_v4   ;;  %v57_v5 = vld [vmem:[%s111_s0 + $0x3] sm:$0x1]   ;;  %v58_v6 = vld [vmem:[%s111_s0 + $0x2] sm:$0x1]  }
   0x4   :  { %s71_s24 = smov 48   ;;  %s72_s25 = smov 32   ;;  %v59_v7 = vld [vmem:[%s111_s0 + $0x1] sm:$0x1]   ;;  %vm27_vm4 = vcmask 654848   ;;  %vm33_vm5 = vcmask 523648  }
   0x5   :  { %s73_s0 = smov 16   ;;  %vm39_vm6 = vcmask 392448   ;;  %vm45_vm7 = vcmask 261248  }
   0x6   :  { %13 = vrot.lane.b32.xlu0 %v54_v2, %s69_s18  ;;  %25 = vrot.lane.b32.xlu1 %v56_v3, %s70_s19 }
   0xa   :  { %31 = vrot.lane.b32.xlu0 %v57_v5, %s71_s24  ;;  %37 = vrot.lane.b32.xlu1 %v58_v6, %s72_s25 }
   0xe   :  { %43 = vrot.lane.b32.xlu0 %v59_v7, %s73_s0 }
  0x74   :  { %v8_v8 = vpop.permute.xlu0 %7   ;;  %v20_v9 = vpop.permute.xlu1 %19  }
  0x75   :  { %10 = vst.msk [vmem:[#allocation0] sm:$0x1] %vm9_vm1, %v8_v8  }
  0x78   :  { %v14_v10 = vpop.permute.xlu0 %13   ;;  %v26_v11 = vpop.permute.xlu1 %25  }
  0x79   :  { %16 = vst.msk [vmem:[#allocation0] sm:$0x1] %vm15_vm2, %v14_v10  }
  0x7a   :  { %22 = vst.msk [vmem:[#allocation0] sm:$0x1] %vm21_vm3, %v20_v9  }
  0x7b   :  { %28 = vst.msk [vmem:[#allocation0] sm:$0x1] %vm27_vm4, %v26_v11  }
  0x7c   :  { %v32_v12 = vpop.permute.xlu0 %31   ;;  %v38_v13 = vpop.permute.xlu1 %37  }
  0x7d   :  { %34 = vst.msk [vmem:[#allocation0] sm:$0x1] %vm33_vm5, %v32_v12  }
  0x7e   :  { %40 = vst.msk [vmem:[#allocation0] sm:$0x1] %vm39_vm6, %v38_v13  }
  0x80   :  { %v44_v14 = vpop.permute.xlu0 %43  }
  0x81   :  { %46 = vst.msk [vmem:[#allocation0] sm:$0x1] %vm45_vm7, %v44_v14  }
  0x88   :  { %v50_v15 = vld [vmem:[#allocation0] sm:$0x1] }
  0x89   :  { %52 = vst [vmem:[%s112_s1] sm:$0x1] %v50_v15 }

// kernel: tile.18
= control target key start
LH: loop header
LB: loop body
LE: loop exit
PB: predicated region body
PF: predicated region fallthrough
CT: control target
= control target key end

     0   :  { %s22_s0 = inlined_call_operand.vmem [shape: f32[16], index: 0, kind: input, shape index: {}]   ;;  %s23_s1 = inlined_call_operand.vmem [shape: f32[2,16], index: 1, kind: output, shape index: {}]  }
   0x1   :  { %v4_v0 = vld [vmem:[%s22_s0] ss:$0 sm:$0xff] }
   0x2   :  { %5 = vst [vmem:[%s23_s1] sm:$0x3] %v4_v0 }

// kernel: tile.19
= control target key start
LH: loop header
LB: loop body
LE: loop exit
PB: predicated region body
PF: predicated region fallthrough
CT: control target
= control target key end

     0   :  { %vm7_vm0 = vcmask 130048   ;;  %vm13_vm1 = vcmask 261248   ;;  %s39_s0 = inlined_call_operand.vmem [shape: f32[2,16], index: 0, kind: input, shape index: {}]   ;;  %s40_s1 = inlined_call_operand.vmem [shape: f32[1,32], index: 1, kind: output, shape index: {}]  }
   0x1   :  { %v4_v0 = vld [vmem:[%s39_s0] sm:$0x3]  ;;  %s22_s0 = smov 16  }
   0x2   :  { %5 = vst [vmem:[#allocation1] sm:$0x3] %v4_v0 }
   0x9   :  { %v10_v1 = vld [vmem:[#allocation1 + $0x1] sm:$0x1]   ;;  %v6_v2 = vld [vmem:[#allocation1] sm:$0x1]  }
   0xa   :  { %11 = vrot.lane.b32.xlu0 %v10_v1, %s22_s0  ;;  %8 = vst.msk [vmem:[#allocation0] sm:$0x1] %vm7_vm0, %v6_v2  }
  0x7c   :  { %v12_v3 = vpop.permute.xlu0 %11  }
  0x7d   :  { %14 = vst.msk [vmem:[#allocation0] sm:$0x1] %vm13_vm1, %v12_v3  }
  0x84   :  { %v18_v4 = vld [vmem:[#allocation0] sm:$0x1] }
  0x85   :  { %20 = vst [vmem:[%s40_s1] sm:$0x1] %v18_v4 }

// kernel: simple_conv_forward.1
= control target key start
LH: loop header
LB: loop body
LE: loop exit
PB: predicated region body
PF: predicated region fallthrough
CT: control target
= control target key end

     0   :  { %s15634_s0 = inlined_call_operand.vmem [shape: bf16[400,1280], index: 0, kind: input, shape index: {}]   ;;  %s15635_s1 = inlined_call_operand.vmem [shape: bf16[256,128], index: 1, kind: input, shape index: {}]   ;;  %s15636_s2 = inlined_call_operand.vmem [shape: f32[1,128], index: 2, kind: input, shape index: {}]   ;;  %s15637_s3 = inlined_call_operand.vmem [shape: f32[320,32], index: 3, kind: input, shape index: {}]   ;;  %s15638_s4 = inlined_call_operand.vmem [shape: f32[1,32], index: 4, kind: input, shape index: {}]   ;;  %s15639_s5 = inlined_call_operand.vmem [shape: f32[25,128,16], index: 5, kind: input, shape index: {}]   ;;  %s15640_s6 = inlined_call_operand.vmem [shape: f32[1,128], index: 6, kind: input, shape index: {}]   ;;  %s15641_s7 = inlined_call_operand.vmem [shape: f32[128,16], index: 7, kind: input, shape index: {}]   ;;  %s15642_s8 = inlined_call_operand.vmem [shape: f32[1,16], index: 8, kind: input, shape index: {}]   ;;  %s15643_s9 = inlined_call_operand.vmem [shape: f32[16,4], index: 9, kind: output, shape index: {0}]   ;;  %s15644_s10 = inlined_call_operand.hbm [shape: f32[16,9], index: 10, kind: output, shape index: {1}]  }
   0x1   :  { %15672 = sst [smem:[#allocation44_spill]] %s15634_s0 }
   0x2   :  { %15673 = sst [smem:[#allocation45_spill]] %s15635_s1 }
   0x3   :  { %16 = vsyncpa [#allocation4], 0 }
   0x4   :  { %18 = vsyncpa [#allocation4 + $0x1], 0  ;;  %s11652_s13 = smov 0   ;;  %s11654_s14 = smov 0  }
   0x5   :  { %s11656_s15 = smov 0   ;;  %s11658_s16 = smov 0  }
   0x6 LB: > { %s11673_s17 = sadd.s32 4294967295, %s11588_s16   ;;  %s7747_s18 = sadd.s32 4294967294, %s11588_s16   ;;  %s11588_s16 = sphi %s11658_s16, %s15760_s16   ;;  %s11584_s15 = sphi %s11656_s15, %s15759_s15   ;;  %s11580_s14 = sphi %s11654_s14, %s15758_s14   ;;  %s11576_s13 = sphi %s11652_s13, %s15757_s13  }
   0x7   : > { %s11677_s19 = sadd.s32 1, %s11588_s16   ;;  %s251_s20 = sadd.s32 1, %s11584_s15 }
   0x8   : > { %s248_s21 = ssub.s32 %s11588_s16, %s11677_s19  ;;  %p261_p0 = scmp.ne.s32.totalorder %s11584_s15, %s11580_s14 }
   0x9   : > { %p249_p1 = scmp.eq.s32.totalorder %s248_s21, 0  ;;  %p262_p2 = scmp.eq.s32.totalorder %s11673_s17, 1 }
   0xa   : > { %p267_p3 = scmp.ne.s32.totalorder %s11580_s14, %s11576_s13  ;;  %p268_p4 = scmp.eq.s32.totalorder %s7747_s18, 1 }
   0xb   : > { %s11688_s22 = scalar_select %p249_p1, %s11584_s15, %s251_s20  }
   0xc   : > { %p11690_p5 = por %p262_p2, %p261_p0  ;;  %p11694_p6 = por %p268_p4, %p267_p3 }
   0xd   : > { %p7750_p7 = scmp.ge.s32.totalorder %s11588_s16, 1  ;;  %p320_p8 = scmp.lt.s32.totalorder %s11588_s16, 3 }
   0xf   : > { %p321_p9 = pnand %p7750_p7, %p320_p8 }
  0x11   : > { %324 = sbr.rel (%p321_p9) target bundleno = 2893 (0xb4d), region = 56 }
  0x18   : > { %s15676_s1 = sld [smem:[#allocation45_spill]]  ;;  %s363_s27 = smul.u32 25, %s11673_s17 }
  0x19   : > { %s15677_s0 = sld [smem:[#allocation44_spill]]  ;;  %s11590_s18 = smov 64  }
  0x1a   : > { %p364_p10 = scmp.lt.s32.totalorder %s363_s27, 49  ;;  %s11594_s28 = smov 112  }
  0x1b   : > { %s11595_s12 = smov 124   ;;  %p370_p11 = scmp.lt.s32.totalorder %s11673_s17, 1 }
  0x1c   : > { %s15762_s27 = smov (!%p364_p10, %s363_s27), 49  ;;  %s360_s26 = sand.u32 1, %s11580_s14  }
  0x1d   : > { %s11263_s30 = smul.u32 40, %s15762_s27  ;;  %s7751_s29 = sshll.u32 %s360_s26, 3 }
  0x1e   : > { %v11703_v0 = vld [vmem:[%s15676_s1 + $0x40] sm:$0xff]   ;;  %v11716_v2 = vld [vmem:[%s15676_s1 + $0x48] sm:$0xff]   ;;  %v11730_v4 = vld [vmem:[%s15676_s1 + $0x50] sm:$0xff]   ;;  %s371_s20 = scalar_select %p370_p11, %s11673_s17, 1 }
  0x1f   : > { %v11709_v1 = vld [vmem:[%s15676_s1] sm:$0xff]   ;;  %8358 = vmatprep.subr.bf16.mxu0 %v11703_v0  ;;  %8452 = vmatprep.subr.bf16.mxu1 %v11703_v0  ;;  %v11723_v3 = vld [vmem:[%s15676_s1 + $0x8] sm:$0xff]   ;;  %v11737_v5 = vld [vmem:[%s15676_s1 + $0x10] sm:$0xff]   ;;  %s11763_s25 = scalar_lea.vmem %s15677_s0, %s11263_s30  ;;  %s8355_s11 = sshll.u32 %s11673_s17, 7 }
  0x20   : > { %8359 = vmatpush3.bf16.msra.mxu0 %v11709_v1  ;;  %8453 = vmatpush3.bf16.msra.mxu1 %v11709_v1  ;;  %v11744_v6 = vld [vmem:[%s15676_s1 + $0x58] sm:$0xff]   ;;  %v11758_v8 = vld [vmem:[%s15676_s1 + $0x60] sm:$0xff]   ;;  %v11777_v10 = vld [vmem:[%s15676_s1 + $0x68] sm:$0xff]   ;;  %s7753_s21 = sshll.u32 %s371_s20, 3  ;;  %s362_s30 = scalar_lea.vmem [#allocation3], %s7751_s29 }
  0x21   : > { %8360 = vmatprep.subr.bf16.mxu0 %v11716_v2  ;;  %8454 = vmatprep.subr.bf16.mxu1 %v11716_v2  ;;  %v11751_v7 = vld [vmem:[%s15676_s1 + $0x18] sm:$0xff]   ;;  %v11770_v9 = vld [vmem:[%s15676_s1 + $0x20] sm:$0xff]   ;;  %v11330_v12 = vld [vmem:[%s11763_s25 + $0xc] ss:$40 sps:$4 sm:$0xff]   ;;  %s7648_s20 = scalar_lea.sflag [#allocation4], %s360_s26  ;;  %s11596_s17 = smov [#allocation3]  }
  0x22   : > { %v11327_v11 = vld [vmem:[%s11763_s25 + $0x4] ss:$40 sps:$4 sm:$0xff]   ;;  %v11793_v14 = vld [vmem:[%s15676_s1 + $0x70] sm:$0xff]   ;;  %1208 = vmatprep.mubr.bf16.mxu1 %v11330_v12  ;;  %v11807_v16 = vld [vmem:[%s15676_s1 + $0x78] sm:$0xff]   ;;  %s11530_s27 = sshll.u32 %s11596_s17, 4  ;;  %s11531_s27 = int_to_ptr.vmem [resolvable:$false] %s11530_s27 }
  0x23   : > { %v11786_v13 = vld [vmem:[%s15676_s1 + $0x28] sm:$0xff]   ;;  %694 = vmatprep.mubr.bf16.mxu0 %v11327_v11  ;;  %v11800_v15 = vld [vmem:[%s15676_s1 + $0x30] sm:$0xff]   ;;  %v11814_v17 = vld [vmem:[%s15676_s1 + $0x38] sm:$0xff]   ;;  %s15591_s1 = scalar_lea.hbm %s15644_s10, %s8355_s11  ;;  %s11532_s0 = scalar_lea.vmem %s11531_s27, 256 }
  0x24   : > { %8361 = vmatpush3.bf16.msra.mxu0 %v11723_v3  ;;  %8455 = vmatpush3.bf16.msra.mxu1 %v11723_v3  ;;  %v11325_v18 = vld [vmem:[%s11763_s25] ss:$40 sps:$4 sm:$0xff]   ;;  %v11331_v20 = vld [vmem:[%s11763_s25 + $0x54] ss:$40 sps:$4 sm:$0xff]   ;;  %v11335_v22 = vld [vmem:[%s11763_s25 + $0x50] ss:$40 sps:$4 sm:$0xff]  }
  0x25   : > { %8362 = vmatprep.subr.bf16.mxu0 %v11730_v4  ;;  %8456 = vmatprep.subr.bf16.mxu1 %v11730_v4  ;;  %v11328_v19 = vld [vmem:[%s11763_s25 + $0x8] ss:$40 sps:$4 sm:$0xff]   ;;  %v11333_v21 = vld [vmem:[%s11763_s25 + $0x5c] ss:$40 sps:$4 sm:$0xff]   ;;  %v11336_v23 = vld [vmem:[%s11763_s25 + $0x58] ss:$40 sps:$4 sm:$0xff]  }
  0x26   : > { %v11337_v24 = vld [vmem:[%s11763_s25 + $0xa4] ss:$40 sps:$4 sm:$0xff]   ;;  %v11341_v26 = vld [vmem:[%s11763_s25 + $0xa0] ss:$40 sps:$4 sm:$0xff]   ;;  %v11343_v28 = vld [vmem:[%s11763_s25 + $0xf4] ss:$40 sps:$4 sm:$0xff]  }
  0x27   : > { %v11339_v25 = vld [vmem:[%s11763_s25 + $0xac] ss:$40 sps:$4 sm:$0xff]   ;;  %v11342_v27 = vld [vmem:[%s11763_s25 + $0xa8] ss:$40 sps:$4 sm:$0xff]   ;;  %v11345_v29 = vld [vmem:[%s11763_s25 + $0xfc] ss:$40 sps:$4 sm:$0xff]  }
  0x28   : > { %8363 = vmatpush3.bf16.msra.mxu0 %v11737_v5  ;;  %8457 = vmatpush3.bf16.msra.mxu1 %v11737_v5  ;;  %v11347_v30 = vld [vmem:[%s11763_s25 + $0xf0] ss:$40 sps:$4 sm:$0xff]   ;;  %v11349_v32 = vld [vmem:[%s11763_s25 + $0x144] ss:$40 sps:$4 sm:$0xff]   ;;  %v11353_v34 = vld [vmem:[%s11763_s25 + $0x140] ss:$40 sps:$4 sm:$0xff]  }
  0x29   : > { %8364 = vmatprep.subr.bf16.mxu0 %v11744_v6  ;;  %8458 = vmatprep.subr.bf16.mxu1 %v11744_v6  ;;  %v11348_v31 = vld [vmem:[%s11763_s25 + $0xf8] ss:$40 sps:$4 sm:$0xff]   ;;  %v11351_v33 = vld [vmem:[%s11763_s25 + $0x14c] ss:$40 sps:$4 sm:$0xff]   ;;  %v11354_v35 = vld [vmem:[%s11763_s25 + $0x148] ss:$40 sps:$4 sm:$0xff]  }
  0x2a   : > { %v11355_v36 = vld [vmem:[%s11763_s25 + $0x194] ss:$40 sps:$4 sm:$0xff]   ;;  %v11359_v38 = vld [vmem:[%s11763_s25 + $0x190] ss:$40 sps:$4 sm:$0xff]   ;;  %v11361_v40 = vld [vmem:[%s11763_s25 + $0x1e4] ss:$40 sps:$4 sm:$0xff]  }
  0x2b   : > { %v11357_v37 = vld [vmem:[%s11763_s25 + $0x19c] ss:$40 sps:$4 sm:$0xff]   ;;  %v11360_v39 = vld [vmem:[%s11763_s25 + $0x198] ss:$40 sps:$4 sm:$0xff]   ;;  %v11363_v41 = vld [vmem:[%s11763_s25 + $0x1ec] ss:$40 sps:$4 sm:$0xff]  }
  0x2c   : > { %8365 = vmatpush3.bf16.msra.mxu0 %v11751_v7  ;;  %8459 = vmatpush3.bf16.msra.mxu1 %v11751_v7  ;;  %v11365_v42 = vld [vmem:[%s11763_s25 + $0x1e0] ss:$40 sps:$4 sm:$0xff]   ;;  %v11367_v44 = vld [vmem:[%s11763_s25 + $0x234] ss:$40 sps:$4 sm:$0xff]   ;;  %v11371_v46 = vld [vmem:[%s11763_s25 + $0x230] ss:$40 sps:$4 sm:$0xff]  }
  0x2d   : > { %8366 = vmatprep.subr.bf16.mxu0 %v11758_v8  ;;  %8460 = vmatprep.subr.bf16.mxu1 %v11758_v8  ;;  %v11366_v43 = vld [vmem:[%s11763_s25 + $0x1e8] ss:$40 sps:$4 sm:$0xff]   ;;  %v11369_v45 = vld [vmem:[%s11763_s25 + $0x23c] ss:$40 sps:$4 sm:$0xff]   ;;  %v11372_v47 = vld [vmem:[%s11763_s25 + $0x238] ss:$40 sps:$4 sm:$0xff]  }
  0x2e   : > { %v11373_v48 = vld [vmem:[%s11763_s25 + $0x284] ss:$40 sps:$4 sm:$0xff]   ;;  %v11377_v50 = vld [vmem:[%s11763_s25 + $0x280] ss:$40 sps:$4 sm:$0xff]   ;;  %v11379_v52 = vld [vmem:[%s11763_s25 + $0x2d4] ss:$40 sps:$4 sm:$0xff]  }
  0x2f   : > { %v11375_v49 = vld [vmem:[%s11763_s25 + $0x28c] ss:$40 sps:$4 sm:$0xff]   ;;  %v11378_v51 = vld [vmem:[%s11763_s25 + $0x288] ss:$40 sps:$4 sm:$0xff]   ;;  %v11381_v53 = vld [vmem:[%s11763_s25 + $0x2dc] ss:$40 sps:$4 sm:$0xff]  }
  0x30   : > { %8367 = vmatpush3.bf16.msra.mxu0 %v11770_v9  ;;  %8461 = vmatpush3.bf16.msra.mxu1 %v11770_v9  ;;  %v11383_v54 = vld [vmem:[%s11763_s25 + $0x2d0] ss:$40 sps:$4 sm:$0xff]   ;;  %v11385_v56 = vld [vmem:[%s11763_s25 + $0x324] ss:$40 sps:$4 sm:$0xff]   ;;  %v11389_v58 = vld [vmem:[%s11763_s25 + $0x320] ss:$40 sps:$4 sm:$0xff]  }
  0x31   : > { %8368 = vmatprep.subr.bf16.mxu0 %v11777_v10  ;;  %8462 = vmatprep.subr.bf16.mxu1 %v11777_v10  ;;  %v11384_v55 = vld [vmem:[%s11763_s25 + $0x2d8] ss:$40 sps:$4 sm:$0xff]   ;;  %v11387_v57 = vld [vmem:[%s11763_s25 + $0x32c] ss:$40 sps:$4 sm:$0xff]   ;;  %v11390_v59 = vld [vmem:[%s11763_s25 + $0x328] ss:$40 sps:$4 sm:$0xff]  }
  0x32   : > { %v11391_v60 = vld [vmem:[%s11763_s25 + $0x374] ss:$40 sps:$4 sm:$0xff]   ;;  %v432_v62 = vld [vmem:[%s11763_s25 + $0x3c0] sm:$0xff]  ;;  %v1048_v63 = vld [vmem:[%s11763_s25 + $0x3c8] sm:$0xff] }
  0x33   : > { %v11393_v61 = vld [vmem:[%s11763_s25 + $0x37c] ss:$40 sps:$4 sm:$0xff]   ;;  %v11396_v11 = vld [vmem:[%s11763_s25 + $0x378] ss:$40 sps:$4 sm:$0xff]   ;;  %v7780_v12 = vcombine.high %v432_v62, %v432_v62 }
  0x34   : > { %8369 = vmatpush3.bf16.msra.mxu0 %v11786_v13  ;;  %8463 = vmatpush3.bf16.msra.mxu1 %v11786_v13 }
  0x35   : > { %8370 = vmatprep.subr.bf16.mxu0 %v11793_v14  ;;  %8464 = vmatprep.subr.bf16.mxu1 %v11793_v14 }
  0x38   : > { %8371 = vmatpush3.bf16.msra.mxu0 %v11800_v15  ;;  %8465 = vmatpush3.bf16.msra.mxu1 %v11800_v15 }
  0x39   : > { %8372 = vmatprep.subr.bf16.mxu0 %v11807_v16  ;;  %8466 = vmatprep.subr.bf16.mxu1 %v11807_v16 }
  0x3c   : > { %8373 = vmatpush3.bf16.msra.mxu0 %v11814_v17  ;;  %8467 = vmatpush3.bf16.msra.mxu1 %v11814_v17 }
  0x3d   : > { %8640 = vmatprep.subr.bf16.mxu1 %v11703_v0  ;;  %8546 = vmatprep.subr.bf16.mxu0 %v11703_v0 }
  0x3f   : > { %695 = vmatmul.mubr.bf16.vlgmr.msra.gmra.mrb[0].mxu0 %v11325_v18  ;;  %1209 = vmatmul.mubr.bf16.vlgmr.msra.gmra.mrb[0].mxu1 %v11328_v19  ;;  %v7822_v18 = vcombine.high %v1048_v63, %v1048_v63  ;;  %v7779_v19 = vcombine.low %v432_v62, %v432_v62  ;;  %v11969_v62 = vld [vmem:[%s15636_s2] ss:$0 sm:$0xff] }
  0x40   : > { %8641 = vmatpush3.bf16.msra.mxu1 %v11709_v1  ;;  %8547 = vmatpush3.bf16.msra.mxu0 %v11709_v1 }
  0x41   : > { %702 = vmatprep.mubr.bf16.mxu0 %v11331_v20  ;;  %1216 = vmatprep.mubr.bf16.mxu1 %v11333_v21  ;;  %v7821_v20 = vcombine.low %v1048_v63, %v1048_v63  ;;  %v11403_v21 = vld [vmem:[%s11763_s25 + $0x14] ss:$40 sps:$4 sm:$0xff]  }
  0x42   : > { %8642 = vmatprep.subr.bf16.mxu1 %v11716_v2  ;;  %8548 = vmatprep.subr.bf16.mxu0 %v11716_v2 }
  0x44   : > { %8643 = vmatpush3.bf16.msra.mxu1 %v11723_v3  ;;  %8549 = vmatpush3.bf16.msra.mxu0 %v11723_v3 }
  0x45   : > { %8644 = vmatprep.subr.bf16.mxu1 %v11730_v4  ;;  %8550 = vmatprep.subr.bf16.mxu0 %v11730_v4 }
  0x47   : > { %703 = vmatmul.mubr.bf16.gmra.mrb[4].mxu0 %v11335_v22  ;;  %1217 = vmatmul.mubr.bf16.gmra.mrb[4].mxu1 %v11336_v23  ;;  %v11406_v22 = vld [vmem:[%s11763_s25 + $0x1c] ss:$40 sps:$4 sm:$0xff]   ;;  %v11401_v23 = vld [vmem:[%s11763_s25 + $0x10] ss:$40 sps:$4 sm:$0xff]  }
  0x48   : > { %710 = vmatprep.mubr.bf16.mxu0 %v11337_v24  ;;  %1224 = vmatprep.mubr.bf16.mxu1 %v11339_v25  ;;  %v11404_v24 = vld [vmem:[%s11763_s25 + $0x18] ss:$40 sps:$4 sm:$0xff]   ;;  %v11407_v25 = vld [vmem:[%s11763_s25 + $0x6c] ss:$40 sps:$4 sm:$0xff]  }
  0x49   : > { %8645 = vmatpush3.bf16.msra.mxu1 %v11737_v5  ;;  %8551 = vmatpush3.bf16.msra.mxu0 %v11737_v5 }
  0x4a   : > { %8646 = vmatprep.subr.bf16.mxu1 %v11744_v6  ;;  %8552 = vmatprep.subr.bf16.mxu0 %v11744_v6 }
  0x4d   : > { %8647 = vmatpush3.bf16.msra.mxu1 %v11751_v7  ;;  %8553 = vmatpush3.bf16.msra.mxu0 %v11751_v7 }
  0x4e   : > { %8648 = vmatprep.subr.bf16.mxu1 %v11758_v8  ;;  %8554 = vmatprep.subr.bf16.mxu0 %v11758_v8 }
  0x4f   : > { %711 = vmatmul.mubr.bf16.gmra.mrb[8].mxu0 %v11341_v26  ;;  %1225 = vmatmul.mubr.bf16.gmra.mrb[8].mxu1 %v11342_v27  ;;  %v11410_v26 = vld [vmem:[%s11763_s25 + $0x64] ss:$40 sps:$4 sm:$0xff]   ;;  %v11409_v27 = vld [vmem:[%s11763_s25 + $0x68] ss:$40 sps:$4 sm:$0xff]  }
  0x50   : > { %718 = vmatprep.mubr.bf16.mxu0 %v11343_v28  ;;  %1232 = vmatprep.mubr.bf16.mxu1 %v11345_v29  ;;  %v11412_v28 = vld [vmem:[%s11763_s25 + $0x60] ss:$40 sps:$4 sm:$0xff]   ;;  %v11413_v29 = vld [vmem:[%s11763_s25 + $0xbc] ss:$40 sps:$4 sm:$0xff]  }
  0x51   : > { %8649 = vmatpush3.bf16.msra.mxu1 %v11770_v9  ;;  %8555 = vmatpush3.bf16.msra.mxu0 %v11770_v9 }
  0x52   : > { %8650 = vmatprep.subr.bf16.mxu1 %v11777_v10  ;;  %8556 = vmatprep.subr.bf16.mxu0 %v11777_v10 }
  0x55   : > { %8651 = vmatpush3.bf16.msra.mxu1 %v11786_v13  ;;  %8557 = vmatpush3.bf16.msra.mxu0 %v11786_v13 }
  0x56   : > { %8652 = vmatprep.subr.bf16.mxu1 %v11793_v14  ;;  %8558 = vmatprep.subr.bf16.mxu0 %v11793_v14 }
  0x57   : > { %719 = vmatmul.mubr.bf16.gmra.mrb[12].mxu0 %v11347_v30  ;;  %1233 = vmatmul.mubr.bf16.gmra.mrb[12].mxu1 %v11348_v31  ;;  %v11416_v30 = vld [vmem:[%s11763_s25 + $0xb4] ss:$40 sps:$4 sm:$0xff]  }
  0x58   : > { %726 = vmatprep.mubr.bf16.mxu0 %v11349_v32  ;;  %1240 = vmatprep.mubr.bf16.mxu1 %v11351_v33  ;;  %v11419_v31 = vld [vmem:[%s11763_s25 + $0x10c] ss:$40 sps:$4 sm:$0xff]   ;;  %v11439_v33 = vld [vmem:[%s11763_s25 + $0x1f8] ss:$40 sps:$4 sm:$0xff]  }
  0x59   : > { %8653 = vmatpush3.bf16.msra.mxu1 %v11800_v15  ;;  %8559 = vmatpush3.bf16.msra.mxu0 %v11800_v15  ;;  %v11422_v32 = vld [vmem:[%s11763_s25 + $0x104] ss:$40 sps:$4 sm:$0xff]  }
  0x5a   : > { %8654 = vmatprep.subr.bf16.mxu1 %v11807_v16  ;;  %8560 = vmatprep.subr.bf16.mxu0 %v11807_v16 }
  0x5d   : > { %8655 = vmatpush3.bf16.msra.mxu1 %v11814_v17  ;;  %8561 = vmatpush3.bf16.msra.mxu0 %v11814_v17 }
  0x5e   : > { %8734 = vmatprep.subr.bf16.mxu0 %v11703_v0  ;;  %v11395_v0 = vld [vmem:[%s11763_s25 + $0x370] ss:$40 sps:$4 sm:$0xff]  }
  0x5f   : > { %727 = vmatmul.mubr.bf16.gmra.mrb[16].mxu0 %v11353_v34  ;;  %1241 = vmatmul.mubr.bf16.gmra.mrb[16].mxu1 %v11354_v35  ;;  %v11443_v34 = vld [vmem:[%s11763_s25 + $0x24c] ss:$40 sps:$4 sm:$0xff]  }
  0x60   : > { %734 = vmatprep.mubr.bf16.mxu0 %v11355_v36  ;;  %1248 = vmatprep.mubr.bf16.mxu1 %v11357_v37  ;;  %v11446_v35 = vld [vmem:[%s11763_s25 + $0x244] ss:$40 sps:$4 sm:$0xff]   ;;  %v11445_v36 = vld [vmem:[%s11763_s25 + $0x248] ss:$40 sps:$4 sm:$0xff]  }
  0x61   : > { %v11448_v37 = vld [vmem:[%s11763_s25 + $0x240] ss:$40 sps:$4 sm:$0xff]  }
  0x67   : > { %735 = vmatmul.mubr.bf16.gmra.mrb[20].mxu0 %v11359_v38  ;;  %1249 = vmatmul.mubr.bf16.gmra.mrb[20].mxu1 %v11360_v39  ;;  %v11449_v38 = vld [vmem:[%s11763_s25 + $0x29c] ss:$40 sps:$4 sm:$0xff]  }
  0x68   : > { %742 = vmatprep.mubr.bf16.mxu0 %v11361_v40  ;;  %1256 = vmatprep.mubr.bf16.mxu1 %v11363_v41  ;;  %v11452_v39 = vld [vmem:[%s11763_s25 + $0x294] ss:$40 sps:$4 sm:$0xff]   ;;  %v11451_v40 = vld [vmem:[%s11763_s25 + $0x298] ss:$40 sps:$4 sm:$0xff]  }
  0x69   : > { %v11454_v41 = vld [vmem:[%s11763_s25 + $0x290] ss:$40 sps:$4 sm:$0xff]  }
  0x6f   : > { %743 = vmatmul.mubr.bf16.gmra.mrb[24].mxu0 %v11365_v42  ;;  %1257 = vmatmul.mubr.bf16.gmra.mrb[24].mxu1 %v11366_v43  ;;  %v11455_v42 = vld [vmem:[%s11763_s25 + $0x2ec] ss:$40 sps:$4 sm:$0xff]  }
  0x70   : > { %750 = vmatprep.mubr.bf16.mxu0 %v11367_v44  ;;  %1264 = vmatprep.mubr.bf16.mxu1 %v11369_v45  ;;  %v11466_v43 = vld [vmem:[%s11763_s25 + $0x2e4] ss:$40 sps:$4 sm:$0xff]   ;;  %v11457_v44 = vld [vmem:[%s11763_s25 + $0x2e8] ss:$40 sps:$4 sm:$0xff]  }
  0x71   : > { %v11468_v45 = vld [vmem:[%s11763_s25 + $0x2e0] ss:$40 sps:$4 sm:$0xff]  }
  0x77   : > { %751 = vmatmul.mubr.bf16.gmra.mrb[28].mxu0 %v11371_v46  ;;  %1265 = vmatmul.mubr.bf16.gmra.mrb[28].mxu1 %v11372_v47  ;;  %v11458_v46 = vld [vmem:[%s11763_s25 + $0x33c] ss:$40 sps:$4 sm:$0xff]  }
  0x78   : > { %758 = vmatprep.mubr.bf16.mxu0 %v11373_v48  ;;  %1272 = vmatprep.mubr.bf16.mxu1 %v11375_v49  ;;  %v11469_v47 = vld [vmem:[%s11763_s25 + $0x334] ss:$40 sps:$4 sm:$0xff]   ;;  %v11460_v48 = vld [vmem:[%s11763_s25 + $0x338] ss:$40 sps:$4 sm:$0xff]  }
  0x79   : > { %v11471_v49 = vld [vmem:[%s11763_s25 + $0x330] ss:$40 sps:$4 sm:$0xff]  }
  0x7f   : > { %759 = vmatmul.mubr.bf16.gmra.mrb[32].mxu0 %v11377_v50  ;;  %1273 = vmatmul.mubr.bf16.gmra.mrb[32].mxu1 %v11378_v51  ;;  %v11461_v50 = vld [vmem:[%s11763_s25 + $0x38c] ss:$40 sps:$4 sm:$0xff]  }
  0x80   : > { %766 = vmatprep.mubr.bf16.mxu0 %v11379_v52  ;;  %1280 = vmatprep.mubr.bf16.mxu1 %v11381_v53  ;;  %v11472_v51 = vld [vmem:[%s11763_s25 + $0x384] ss:$40 sps:$4 sm:$0xff]   ;;  %v2175_v52 = vld [vmem:[%s11763_s25 + $0x3d8] sm:$0xff]  ;;  %v1662_v53 = vld [vmem:[%s11763_s25 + $0x3d0] sm:$0xff] }
  0x87   : > { %767 = vmatmul.mubr.bf16.gmra.mrb[36].mxu0 %v11383_v54  ;;  %1281 = vmatmul.mubr.bf16.gmra.mrb[36].mxu1 %v11384_v55  ;;  %v11463_v54 = vld [vmem:[%s11763_s25 + $0x388] ss:$40 sps:$4 sm:$0xff]  }
  0x88   : > { %774 = vmatprep.mubr.bf16.mxu0 %v11385_v56  ;;  %1288 = vmatprep.mubr.bf16.mxu1 %v11387_v57  ;;  %v11474_v55 = vld [vmem:[%s11763_s25 + $0x380] ss:$40 sps:$4 sm:$0xff]   ;;  %v7874_v56 = vcombine.high %v2175_v52, %v2175_v52  ;;  %v7848_v57 = vcombine.high %v1662_v53, %v1662_v53 }
  0x8f   : > { %775 = vmatmul.mubr.bf16.gmra.mrb[40].mxu0 %v11389_v58  ;;  %1289 = vmatmul.mubr.bf16.gmra.mrb[40].mxu1 %v11390_v59  ;;  %v7873_v58 = vcombine.low %v2175_v52, %v2175_v52  ;;  %v7847_v59 = vcombine.low %v1662_v53, %v1662_v53 }
  0x90   : > { %782 = vmatprep.mubr.bf16.mxu0 %v11391_v60  ;;  %1296 = vmatprep.mubr.bf16.mxu1 %v11393_v61 }
  0x97   : > { %783 = vmatmul.mubr.bf16.gmra.mrb[44].mxu0 %v11395_v0  ;;  %1297 = vmatmul.mubr.bf16.gmra.mrb[44].mxu1 %v11396_v11 }
  0x98   : > { %790 = vmatprep.mubr.bf16.mxu0 %v7780_v12  ;;  %1304 = vmatprep.mubr.bf16.mxu1 %v7822_v18 }
  0x9f   : > { %791 = vmatmul.mubr.bf16.gmra.mrb[48].mxu0 %v7779_v19  ;;  %1305 = vmatmul.mubr.bf16.gmra.mrb[48].mxu1 %v7821_v20 }
  0xa0   : > { %1822 = vmatprep.mubr.bf16.mxu0 %v11403_v21  ;;  %2335 = vmatprep.mubr.bf16.mxu1 %v11406_v22 }
  0xa7   : > { %1823 = vmatmul.mubr.bf16.vlgmr.msra.gmra.mrb[52].mxu0 %v11401_v23  ;;  %2336 = vmatmul.mubr.bf16.vlgmr.msra.gmra.mrb[52].mxu1 %v11404_v24 }
  0xa8   : > { %2343 = vmatprep.mubr.bf16.mxu1 %v11407_v25  ;;  %1830 = vmatprep.mubr.bf16.mxu0 %v11410_v26 }
  0xa9   : > { %8735 = vmatpush3.bf16.msra.mxu0 %v11709_v1  ;;  %v11415_v1 = vld [vmem:[%s11763_s25 + $0xb8] ss:$40 sps:$4 sm:$0xff]  }
  0xaa   : > { %8736 = vmatprep.subr.bf16.mxu0 %v11716_v2  ;;  %v11418_v2 = vld [vmem:[%s11763_s25 + $0xb0] ss:$40 sps:$4 sm:$0xff]  }
  0xad   : > { %8737 = vmatpush3.bf16.msra.mxu0 %v11723_v3  ;;  %v11421_v3 = vld [vmem:[%s11763_s25 + $0x108] ss:$40 sps:$4 sm:$0xff]  }
  0xae   : > { %8738 = vmatprep.subr.bf16.mxu0 %v11730_v4  ;;  %v11424_v4 = vld [vmem:[%s11763_s25 + $0x100] ss:$40 sps:$4 sm:$0xff]  }
  0xaf   : > { %2344 = vmatmul.mubr.bf16.gmra.mrb[56].mxu1 %v11409_v27  ;;  %1831 = vmatmul.mubr.bf16.gmra.mrb[56].mxu0 %v11412_v28 }
  0xb0   : > { %2351 = vmatprep.mubr.bf16.mxu1 %v11413_v29  ;;  %1838 = vmatprep.mubr.bf16.mxu0 %v11416_v30 }
  0xb1   : > { %8739 = vmatpush3.bf16.msra.mxu0 %v11737_v5  ;;  %v11425_v5 = vld [vmem:[%s11763_s25 + $0x15c] ss:$40 sps:$4 sm:$0xff]  }
  0xb2   : > { %8740 = vmatprep.subr.bf16.mxu0 %v11744_v6  ;;  %v11428_v6 = vld [vmem:[%s11763_s25 + $0x154] ss:$40 sps:$4 sm:$0xff]  }
  0xb5   : > { %8741 = vmatpush3.bf16.msra.mxu0 %v11751_v7  ;;  %v11427_v7 = vld [vmem:[%s11763_s25 + $0x158] ss:$40 sps:$4 sm:$0xff]  }
  0xb6   : > { %8742 = vmatprep.subr.bf16.mxu0 %v11758_v8  ;;  %v11430_v8 = vld [vmem:[%s11763_s25 + $0x150] ss:$40 sps:$4 sm:$0xff]  }
  0xb7   : > { %2352 = vmatmul.mubr.bf16.gmra.mrb[60].mxu1 %v11415_v1  ;;  %1839 = vmatmul.mubr.bf16.gmra.mrb[60].mxu0 %v11418_v2 }
  0xb8   : > { %2359 = vmatprep.mubr.bf16.mxu1 %v11419_v31  ;;  %1846 = vmatprep.mubr.bf16.mxu0 %v11422_v32 }
  0xb9   : > { %8743 = vmatpush3.bf16.msra.mxu0 %v11770_v9  ;;  %v11431_v9 = vld [vmem:[%s11763_s25 + $0x1ac] ss:$40 sps:$4 sm:$0xff]  }
  0xba   : > { %8744 = vmatprep.subr.bf16.mxu0 %v11777_v10  ;;  %v11434_v10 = vld [vmem:[%s11763_s25 + $0x1a4] ss:$40 sps:$4 sm:$0xff]  }
  0xbd   : > { %8745 = vmatpush3.bf16.msra.mxu0 %v11786_v13  ;;  %v11433_v13 = vld [vmem:[%s11763_s25 + $0x1a8] ss:$40 sps:$4 sm:$0xff]  }
  0xbe   : > { %8746 = vmatprep.subr.bf16.mxu0 %v11793_v14  ;;  %v11436_v14 = vld [vmem:[%s11763_s25 + $0x1a0] ss:$40 sps:$4 sm:$0xff]  }
  0xbf   : > { %2360 = vmatmul.mubr.bf16.gmra.mrb[64].mxu1 %v11421_v3  ;;  %1847 = vmatmul.mubr.bf16.gmra.mrb[64].mxu0 %v11424_v4 }
  0xc0   : > { %2367 = vmatprep.mubr.bf16.mxu1 %v11425_v5  ;;  %1854 = vmatprep.mubr.bf16.mxu0 %v11428_v6 }
  0xc1   : > { %8747 = vmatpush3.bf16.msra.mxu0 %v11800_v15  ;;  %v11437_v15 = vld [vmem:[%s11763_s25 + $0x1fc] ss:$40 sps:$4 sm:$0xff]  }
  0xc2   : > { %8748 = vmatprep.subr.bf16.mxu0 %v11807_v16  ;;  %v11440_v16 = vld [vmem:[%s11763_s25 + $0x1f4] ss:$40 sps:$4 sm:$0xff]  }
  0xc5   : > { %8749 = vmatpush3.bf16.msra.mxu0 %v11814_v17  ;;  %v11442_v17 = vld [vmem:[%s11763_s25 + $0x1f0] ss:$40 sps:$4 sm:$0xff]  }
  0xc7   : > { %2368 = vmatmul.mubr.bf16.gmra.mrb[68].mxu1 %v11427_v7  ;;  %1855 = vmatmul.mubr.bf16.gmra.mrb[68].mxu0 %v11430_v8 }
  0xc8   : > { %2375 = vmatprep.mubr.bf16.mxu1 %v11431_v9  ;;  %1862 = vmatprep.mubr.bf16.mxu0 %v11434_v10  ;;  %v11477_v9 = vld [vmem:[%s11763_s25 + $0x20] ss:$40 sps:$4 sm:$0xff]   ;;  %v11479_v10 = vld [vmem:[%s11763_s25 + $0x24] ss:$40 sps:$4 sm:$0xff]  }
  0xcf   : > { %2376 = vmatmul.mubr.bf16.gmra.mrb[72].mxu1 %v11433_v13  ;;  %1863 = vmatmul.mubr.bf16.gmra.mrb[72].mxu0 %v11436_v14 }
  0xd0   : > { %2383 = vmatprep.mubr.bf16.mxu1 %v11437_v15  ;;  %1870 = vmatprep.mubr.bf16.mxu0 %v11440_v16 }
  0xd7   : > { %2384 = vmatmul.mubr.bf16.gmra.mrb[76].mxu1 %v11439_v33  ;;  %1871 = vmatmul.mubr.bf16.gmra.mrb[76].mxu0 %v11442_v17 }
  0xd8   : > { %2391 = vmatprep.mubr.bf16.mxu1 %v11443_v34  ;;  %1878 = vmatprep.mubr.bf16.mxu0 %v11446_v35 }
  0xdf   : > { %2392 = vmatmul.mubr.bf16.gmra.mrb[80].mxu1 %v11445_v36  ;;  %1879 = vmatmul.mubr.bf16.gmra.mrb[80].mxu0 %v11448_v37 }
  0xe0   : > { %2399 = vmatprep.mubr.bf16.mxu1 %v11449_v38  ;;  %1886 = vmatprep.mubr.bf16.mxu0 %v11452_v39 }
  0xe7   : > { %2400 = vmatmul.mubr.bf16.gmra.mrb[84].mxu1 %v11451_v40  ;;  %1887 = vmatmul.mubr.bf16.gmra.mrb[84].mxu0 %v11454_v41 }
  0xe8   : > { %2407 = vmatprep.mubr.bf16.mxu1 %v11455_v42  ;;  %1894 = vmatprep.mubr.bf16.mxu0 %v11466_v43 }
  0xef   : > { %2408 = vmatmul.mubr.bf16.gmra.mrb[88].mxu1 %v11457_v44  ;;  %1895 = vmatmul.mubr.bf16.gmra.mrb[88].mxu0 %v11468_v45 }
  0xf0   : > { %2415 = vmatprep.mubr.bf16.mxu1 %v11458_v46  ;;  %1902 = vmatprep.mubr.bf16.mxu0 %v11469_v47  ;;  %v2766_v46 = vld [vmem:[%s11763_s25 + $0x70] sm:$0xff]  ;;  %v2767_v47 = vld [vmem:[%s11763_s25 + $0x98] sm:$0xff] }
  0xf7   : > { %2416 = vmatmul.mubr.bf16.gmra.mrb[92].mxu1 %v11460_v48  ;;  %1903 = vmatmul.mubr.bf16.gmra.mrb[92].mxu0 %v11471_v49  ;;  %v11480_v48 = vld [vmem:[%s11763_s25 + $0x74] ss:$40 sps:$4 sm:$0xff]  }
  0xf8   : > { %2423 = vmatprep.mubr.bf16.mxu1 %v11461_v50  ;;  %1910 = vmatprep.mubr.bf16.mxu0 %v11472_v51  ;;  %v7877_v51 = vcombine.low %v2766_v46, %v2767_v47 }
  0xff   : > { %2424 = vmatmul.mubr.bf16.gmra.mrb[96].mxu1 %v11463_v54  ;;  %1911 = vmatmul.mubr.bf16.gmra.mrb[96].mxu0 %v11474_v55 }
 0x100   : > { %2431 = vmatprep.mubr.bf16.mxu1 %v7874_v56  ;;  %1918 = vmatprep.mubr.bf16.mxu0 %v7848_v57 }
 0x107   : > { %2432 = vmatmul.mubr.bf16.gmra.mrb[100].mxu1 %v7873_v58  ;;  %1919 = vmatmul.mubr.bf16.gmra.mrb[100].mxu0 %v7847_v59 }
 0x108   : > { %2948 = vmatprep.mubr.bf16.mxu0 %v11479_v10 }
 0x10f   : > { %2949 = vmatmul.mubr.bf16.vlgmr.msra.gmra.mrb[104].mxu0 %v11477_v9 }
 0x110   : > { %2956 = vmatprep.mubr.bf16.mxu0 %v11480_v48 }
 0x112   : > { %v8374_v60 = vpop.f32.mrb[0].mxu0  ;;  %v8468_v61 = vpop.f32.mrb[0].mxu1 }
 0x113   : > { %v8375_v63 = vpop.f32.mrb[1].mxu0  ;;  %v8469_v0 = vpop.f32.mrb[1].mxu1 }
 0x114   : > { %v8376_v11 = vadd.f32 %v8375_v63, %v8374_v60  ;;  %v8470_v12 = vadd.f32 %v8469_v0, %v8468_v61  ;;  %v8377_v18 = vpop.f32.mrb[2].mxu0  ;;  %v8471_v19 = vpop.f32.mrb[2].mxu1 }
 0x115   : > { %v8378_v20 = vpop.f32.mrb[3].mxu0  ;;  %v8472_v21 = vpop.f32.mrb[3].mxu1 }
 0x116   : > { %v697_v22 = vadd.f32 %v8376_v11, %v11969_v62  ;;  %v1211_v23 = vadd.f32 %v8470_v12, %v11969_v62  ;;  %v8379_v24 = vadd.f32 %v8378_v20, %v8377_v18  ;;  %v8473_v25 = vadd.f32 %v8472_v21, %v8471_v19 }
 0x117   : > { %2957 = vmatmul.mubr.bf16.gmra.mrb[108].mxu0 %v7877_v51 }
 0x118   : > { %v1214_v26 = vadd.f32 %v8473_v25, %v11969_v62  ;;  %vm1312_vm0 = vcmp.gt.f32.partialorder %v1211_v23, 0.0  ;;  %v1337_v27 = vmul.f32 0.01, %v1211_v23  ;;  %vm798_vm1 = vcmp.gt.f32.partialorder %v697_v22, 0.0 }
 0x119   : > { %v823_v28 = vmul.f32 0.01, %v697_v22  ;;  %v700_v2 = vadd.f32 %v8379_v24, %v11969_v62 }
 0x11a   : > { %v8380_v29 = vpop.f32.mrb[4].mxu0  ;;  %v8474_v30 = vpop.f32.mrb[4].mxu1  ;;  %v11974_v1 = vsel %vm1312_vm0, %v1211_v23, %v1337_v27  ;;  %vm1313_vm2 = vcmp.gt.f32.partialorder %v1214_v26, 0.0  ;;  %v1338_v4 = vmul.f32 0.01, %v1214_v26 }
 0x11b   : > { %v8475_v31 = vpop.f32.mrb[5].mxu1  ;;  %1412 = vrot.lane.b32.xlu0 %v11974_v1, %s11590_s18  ;;  %v8381_v32 = vpop.f32.mrb[5].mxu0  ;;  %v11979_v3 = vsel %vm798_vm1, %v697_v22, %v823_v28  ;;  %v824_v34 = vmul.f32 0.01, %v700_v2  ;;  %vm799_vm3 = vcmp.gt.f32.partialorder %v700_v2, 0.0 }
 0x11c   : > { %v8476_v5 = vadd.f32 %v8475_v31, %v8474_v30  ;;  %v8382_v6 = vadd.f32 %v8381_v32, %v8380_v29  ;;  %898 = vrot.lane.b32.xlu1 %v11979_v3, %s11590_s18  ;;  %v8383_v7 = vpop.f32.mrb[6].mxu0  ;;  %v8477_v8 = vpop.f32.mrb[6].mxu1  ;;  %v11986_v17 = vsel %vm1313_vm2, %v1214_v26, %v1338_v4 }
 0x11d   : > { %v8384_v13 = vpop.f32.mrb[7].mxu0  ;;  %v8478_v14 = vpop.f32.mrb[7].mxu1  ;;  %v11991_v40 = vsel %vm799_vm3, %v700_v2, %v824_v34 }
 0x11e   : > { %v8385_v15 = vadd.f32 %v8384_v13, %v8383_v7  ;;  %v8479_v16 = vadd.f32 %v8478_v14, %v8477_v8  ;;  %v1219_v33 = vadd.f32 %v8476_v5, %v11969_v62  ;;  %v705_v37 = vadd.f32 %v8382_v6, %v11969_v62 }
 0x120   : > { %1414 = vrot.lane.b32.xlu1 %v11986_v17, %s11590_s18  ;;  %vm1314_vm4 = vcmp.gt.f32.partialorder %v1219_v33, 0.0  ;;  %v1339_v41 = vmul.f32 0.01, %v1219_v33  ;;  %v1222_v54 = vadd.f32 %v8479_v16, %v11969_v62  ;;  %v825_v56 = vmul.f32 0.01, %v705_v37 }
 0x121   : > { %vm800_vm5 = vcmp.gt.f32.partialorder %v705_v37, 0.0  ;;  %v708_v59 = vadd.f32 %v8385_v15, %v11969_v62 }
 0x122   : > { %v8386_v35 = vpop.f32.mrb[8].mxu0  ;;  %v8480_v36 = vpop.f32.mrb[8].mxu1  ;;  %v12000_v55 = vsel %vm1314_vm4, %v1219_v33, %v1339_v41  ;;  %v12005_v63 = vsel %vm800_vm5, %v705_v37, %v825_v56  ;;  %v1340_v0 = vmul.f32 0.01, %v1222_v54  ;;  %vm1315_vm6 = vcmp.gt.f32.partialorder %v1222_v54, 0.0 }
 0x123   : > { %v8387_v38 = vpop.f32.mrb[9].mxu0  ;;  %v8481_v39 = vpop.f32.mrb[9].mxu1  ;;  %v826_v26 = vmul.f32 0.01, %v708_v59  ;;  %vm801_vm7 = vcmp.gt.f32.partialorder %v708_v59, 0.0 }
 0x124   : > { %v8388_v42 = vadd.f32 %v8387_v38, %v8386_v35  ;;  %v8482_v43 = vadd.f32 %v8481_v39, %v8480_v36  ;;  %900 = vrot.lane.b32.xlu1 %v11991_v40, %s11590_s18  ;;  %v8389_v44 = vpop.f32.mrb[10].mxu0  ;;  %v8483_v45 = vpop.f32.mrb[10].mxu1  ;;  %v12014_v25 = vsel %vm1315_vm6, %v1222_v54, %v1340_v0 }
 0x125   : > { %v8390_v49 = vpop.f32.mrb[11].mxu0  ;;  %v8484_v50 = vpop.f32.mrb[11].mxu1  ;;  %v12019_v31 = vsel %vm801_vm7, %v708_v59, %v826_v26 }
 0x126   : > { %v8391_v52 = vadd.f32 %v8390_v49, %v8389_v44  ;;  %v8485_v53 = vadd.f32 %v8484_v50, %v8483_v45  ;;  %v1227_v24 = vadd.f32 %v8482_v43, %v11969_v62  ;;  %v713_v29 = vadd.f32 %v8388_v42, %v11969_v62 }
 0x128   : > { %1416 = vrot.lane.b32.xlu1 %v12000_v55, %s11590_s18  ;;  %v1341_v32 = vmul.f32 0.01, %v1227_v24  ;;  %vm1316_vm8 = vcmp.gt.f32.partialorder %v1227_v24, 0.0  ;;  %v1230_v14 = vadd.f32 %v8485_v53, %v11969_v62  ;;  %v827_v16 = vmul.f32 0.01, %v713_v29 }
 0x129   : > { %vm802_vm9 = vcmp.gt.f32.partialorder %v713_v29, 0.0  ;;  %v716_v35 = vadd.f32 %v8391_v52, %v11969_v62 }
 0x12a   : > { %v8392_v57 = vpop.f32.mrb[12].mxu0  ;;  %v8486_v58 = vpop.f32.mrb[12].mxu1  ;;  %v12032_v15 = vsel %vm1316_vm8, %v1227_v24, %v1341_v32  ;;  %v12037_v38 = vsel %vm802_vm9, %v713_v29, %v827_v16  ;;  %v1342_v39 = vmul.f32 0.01, %v1230_v14  ;;  %vm1317_vm10 = vcmp.gt.f32.partialorder %v1230_v14, 0.0 }
 0x12b   : > { %v8393_v60 = vpop.f32.mrb[13].mxu0  ;;  %v8487_v61 = vpop.f32.mrb[13].mxu1  ;;  %v828_v51 = vmul.f32 0.01, %v716_v35  ;;  %vm803_vm11 = vcmp.gt.f32.partialorder %v716_v35, 0.0 }
 0x12c   : > { %v8394_v11 = vadd.f32 %v8393_v60, %v8392_v57  ;;  %v8488_v12 = vadd.f32 %v8487_v61, %v8486_v58  ;;  %902 = vrot.lane.b32.xlu1 %v12005_v63, %s11590_s18  ;;  %v8395_v18 = vpop.f32.mrb[14].mxu0  ;;  %v8489_v19 = vpop.f32.mrb[14].mxu1  ;;  %v12050_v50 = vsel %vm1317_vm10, %v1230_v14, %v1342_v39  ;;  %v11482_v14 = vld [vmem:[%s11763_s25 + $0xc4] ss:$40 sps:$4 sm:$0xff]  }
 0x12d   : > { %v8396_v20 = vpop.f32.mrb[15].mxu0  ;;  %v8490_v21 = vpop.f32.mrb[15].mxu1  ;;  %v12055_v58 = vsel %vm803_vm11, %v716_v35, %v828_v51  ;;  %2964 = vmatprep.mubr.bf16.mxu0 %v11482_v14 }
 0x12e   : > { %v12009_v22 = vadd.f32 %v8396_v20, %v8395_v18  ;;  %v12011_v23 = vadd.f32 %v8490_v21, %v8489_v19  ;;  %v1235_v49 = vadd.f32 %v8488_v12, %v11969_v62  ;;  %v721_v54 = vadd.f32 %v8394_v11, %v11969_v62 }
 0x130   : > { %1418 = vrot.lane.b32.xlu1 %v12014_v25, %s11590_s18  ;;  %v1343_v59 = vmul.f32 0.01, %v1235_v49  ;;  %vm1318_vm12 = vcmp.gt.f32.partialorder %v1235_v49, 0.0  ;;  %v1238_v21 = vadd.f32 %v12011_v23, %v11969_v62  ;;  %v829_v26 = vmul.f32 0.01, %v721_v54 }
 0x131   : > { %vm804_vm13 = vcmp.gt.f32.partialorder %v721_v54, 0.0  ;;  %v724_v29 = vadd.f32 %v12009_v22, %v11969_v62 }
 0x132   : > { %v8398_v27 = vpop.f32.mrb[16].mxu0  ;;  %v8492_v28 = vpop.f32.mrb[16].mxu1  ;;  %v12069_v24 = vsel %vm1318_vm12, %v1235_v49, %v1343_v59  ;;  %v12075_v32 = vsel %vm804_vm13, %v721_v54, %v829_v26  ;;  %vm1319_vm14 = vcmp.gt.f32.partialorder %v1238_v21, 0.0 }
 0x133   : > { %v8399_v30 = vpop.f32.mrb[17].mxu0  ;;  %v8493_v2 = vpop.f32.mrb[17].mxu1  ;;  %v830_v39 = vmul.f32 0.01, %v724_v29  ;;  %vm805_vm15 = vcmp.gt.f32.partialorder %v724_v29, 0.0 }
 0x134   : > { %v12021_v4 = vadd.f32 %v8399_v30, %v8398_v27  ;;  %v12023_v5 = vadd.f32 %v8493_v2, %v8492_v28  ;;  %904 = vrot.lane.b32.xlu1 %v12019_v31, %s11590_s18  ;;  %v8401_v6 = vpop.f32.mrb[18].mxu0  ;;  %v8495_v7 = vpop.f32.mrb[18].mxu1 }
 0x135   : > { %v8402_v8 = vpop.f32.mrb[19].mxu0  ;;  %v8496_v9 = vpop.f32.mrb[19].mxu1 }
 0x136   : > { %v12027_v10 = vadd.f32 %v8402_v8, %v8401_v6  ;;  %v12029_v13 = vadd.f32 %v8496_v9, %v8495_v7  ;;  %v1344_v6 = vmul.f32 0.01, %v1238_v21  ;;  %v729_v49 = vadd.f32 %v12021_v4, %v11969_v62 }
 0x138   : > { %1420 = vrot.lane.b32.xlu1 %v12032_v15, %s11590_s18  ;;  %vm806_vm3 = vcmp.gt.f32.partialorder %v729_v49, 0.0 }
 0x13a   : > { %v8404_v33 = vpop.f32.mrb[20].mxu0  ;;  %v8498_v34 = vpop.f32.mrb[20].mxu1 }
 0x13b   : > { %v8405_v36 = vpop.f32.mrb[21].mxu0  ;;  %v8499_v37 = vpop.f32.mrb[21].mxu1 }
 0x13c   : > { %v12039_v41 = vadd.f32 %v8405_v36, %v8404_v33  ;;  %v12041_v42 = vadd.f32 %v8499_v37, %v8498_v34  ;;  %906 = vrot.lane.b32.xlu1 %v12037_v38, %s11590_s18  ;;  %v8407_v43 = vpop.f32.mrb[22].mxu0  ;;  %v8501_v44 = vpop.f32.mrb[22].mxu1  ;;  %v11484_v34 = vld [vmem:[%s11763_s25 + $0xc0] ss:$40 sps:$4 sm:$0xff]   ;;  %v1243_v36 = vadd.f32 %v12023_v5, %v11969_v62  ;;  %v12089_v37 = vsel %vm1319_vm14, %v1238_v21, %v1344_v6 }
 0x13d   : > { %v8408_v45 = vpop.f32.mrb[23].mxu0  ;;  %v8502_v46 = vpop.f32.mrb[23].mxu1  ;;  %2965 = vmatmul.mubr.bf16.gmra.mrb[112].mxu0 %v11484_v34  ;;  %v12096_v5 = vsel %vm805_vm15, %v724_v29, %v830_v39 }
 0x13e   : > { %v12045_v47 = vadd.f32 %v8408_v45, %v8407_v43  ;;  %v12047_v48 = vadd.f32 %v8502_v46, %v8501_v44  ;;  %vm1320_vm1 = vcmp.gt.f32.partialorder %v1243_v36, 0.0 }
 0x140   : > { %1422 = vrot.lane.b32.xlu1 %v12050_v50, %s11590_s18 }
 0x142   : > { %v8410_v52 = vpop.f32.mrb[24].mxu0  ;;  %v8504_v53 = vpop.f32.mrb[24].mxu1 }
 0x143   : > { %v8411_v56 = vpop.f32.mrb[25].mxu0  ;;  %v8505_v57 = vpop.f32.mrb[25].mxu1 }
 0x144   : > { %v12057_v60 = vadd.f32 %v8411_v56, %v8410_v52  ;;  %v12059_v61 = vadd.f32 %v8505_v57, %v8504_v53  ;;  %908 = vrot.lane.b32.xlu1 %v12055_v58, %s11590_s18  ;;  %v8413_v0 = vpop.f32.mrb[26].mxu0  ;;  %v8507_v12 = vpop.f32.mrb[26].mxu1  ;;  %v1345_v53 = vmul.f32 0.01, %v1243_v36 }
 0x145   : > { %v8414_v18 = vpop.f32.mrb[27].mxu0  ;;  %v8508_v19 = vpop.f32.mrb[27].mxu1 }
 0x146   : > { %v12063_v20 = vadd.f32 %v8414_v18, %v8413_v0  ;;  %v12065_v11 = vadd.f32 %v8508_v19, %v8507_v12  ;;  %v1246_v18 = vadd.f32 %v12029_v13, %v11969_v62 }
 0x148   : > { %1424 = vrot.lane.b32.xlu1 %v12069_v24, %s11590_s18  ;;  %vm1321_vm5 = vcmp.gt.f32.partialorder %v1246_v18, 0.0 }
 0x14a   : > { %v8416_v27 = vpop.f32.mrb[28].mxu0  ;;  %v8510_v28 = vpop.f32.mrb[28].mxu1 }
 0x14b   : > { %v8417_v30 = vpop.f32.mrb[29].mxu0  ;;  %v8511_v2 = vpop.f32.mrb[29].mxu1 }
 0x14c   : > { %v12077_v23 = vadd.f32 %v8417_v30, %v8416_v27  ;;  %v12079_v7 = vadd.f32 %v8511_v2, %v8510_v28  ;;  %910 = vrot.lane.b32.xlu1 %v12075_v32, %s11590_s18  ;;  %v8419_v8 = vpop.f32.mrb[30].mxu0  ;;  %v8513_v9 = vpop.f32.mrb[30].mxu1  ;;  %v12111_v27 = vsel %vm1320_vm1, %v1243_v36, %v1345_v53  ;;  %v831_v28 = vmul.f32 0.01, %v729_v49 }
 0x14d   : > { %v8420_v16 = vpop.f32.mrb[31].mxu0  ;;  %v8514_v33 = vpop.f32.mrb[31].mxu1 }
 0x14e   : > { %v12085_v22 = vadd.f32 %v8420_v16, %v8419_v8  ;;  %v8515_v35 = vadd.f32 %v8514_v33, %v8513_v9  ;;  %v1346_v8 = vmul.f32 0.01, %v1246_v18  ;;  %v732_v9 = vadd.f32 %v12027_v10, %v11969_v62 }
 0x14f   : > { %v12122_v33 = vsel %vm806_vm3, %v729_v49, %v831_v28  ;;  %v1251_v10 = vadd.f32 %v12041_v42, %v11969_v62  ;;  %v737_v28 = vadd.f32 %v12039_v41, %v11969_v62  ;;  %v11490_v41 = vld [vmem:[%s11763_s25 + $0x160] ss:$40 sps:$4 sm:$0xff]  }
 0x150   : > { %v1270_v43 = vadd.f32 %v8515_v35, %v11969_v62  ;;  %1426 = vrot.lane.b32.xlu1 %v12089_v37, %s11590_s18  ;;  %v11485_v35 = vld [vmem:[%s11763_s25 + $0x114] ss:$40 sps:$4 sm:$0xff]   ;;  %vm807_vm7 = vcmp.gt.f32.partialorder %v732_v9, 0.0 }
 0x151   : > { %2972 = vmatprep.mubr.bf16.mxu0 %v11485_v35  ;;  %vm1322_vm9 = vcmp.gt.f32.partialorder %v1251_v10, 0.0  ;;  %vm808_vm11 = vcmp.gt.f32.partialorder %v737_v28, 0.0 }
 0x152   : > { %v8422_v44 = vpop.f32.mrb[32].mxu0  ;;  %v8516_v45 = vpop.f32.mrb[32].mxu1  ;;  %vm1327_vm0 = vcmp.gt.f32.partialorder %v1270_v43, 0.0  ;;  %v1352_v46 = vmul.f32 0.01, %v1270_v43 }
 0x153   : > { %v8423_v51 = vpop.f32.mrb[33].mxu0  ;;  %v8517_v52 = vpop.f32.mrb[33].mxu1 }
 0x154   : > { %v12098_v54 = vadd.f32 %v8423_v51, %v8422_v44  ;;  %v8518_v56 = vadd.f32 %v8517_v52, %v8516_v45  ;;  %912 = vrot.lane.b32.xlu1 %v12096_v5, %s11590_s18  ;;  %v8425_v57 = vpop.f32.mrb[34].mxu0  ;;  %v8519_v59 = vpop.f32.mrb[34].mxu1  ;;  %v12102_v0 = vsel %vm1327_vm0, %v1270_v43, %v1352_v46  ;;  %v11487_v45 = vld [vmem:[%s11763_s25 + $0x110] ss:$40 sps:$4 sm:$0xff]  }
 0x155   : > { %v8520_v12 = vpop.f32.mrb[35].mxu1  ;;  %1442 = vrot.lane.b32.xlu0 %v12102_v0, %s11590_s18  ;;  %v8426_v4 = vpop.f32.mrb[35].mxu0  ;;  %2973 = vmatmul.mubr.bf16.gmra.mrb[116].mxu0 %v11487_v45 }
 0x156   : > { %v1275_v19 = vadd.f32 %v8518_v56, %v11969_v62  ;;  %v8521_v21 = vadd.f32 %v8520_v12, %v8519_v59  ;;  %v12109_v26 = vadd.f32 %v8426_v4, %v8425_v57  ;;  %v12140_v57 = vsel %vm1321_vm5, %v1246_v18, %v1346_v8  ;;  %v11488_v8 = vld [vmem:[%s11763_s25 + $0x164] ss:$40 sps:$4 sm:$0xff]  }
 0x157   : > { %v832_v59 = vmul.f32 0.01, %v732_v9  ;;  %2980 = vmatprep.mubr.bf16.mxu0 %v11488_v8  ;;  %v11491_v8 = vld [vmem:[%s11763_s25 + $0x1b4] ss:$40 sps:$4 sm:$0xff]  }
 0x158   : > { %15678 = vst [vmem:[#allocation6_spill] sm:$0xff] %v12109_v26  ;;  %v1278_v29 = vadd.f32 %v8521_v21, %v11969_v62  ;;  %1428 = vrot.lane.b32.xlu1 %v12111_v27, %s11590_s18  ;;  %vm1328_vm2 = vcmp.gt.f32.partialorder %v1275_v19, 0.0  ;;  %v1353_v30 = vmul.f32 0.01, %v1275_v19  ;;  %v1347_v21 = vmul.f32 0.01, %v1251_v10 }
 0x15a   : > { %v8428_v2 = vpop.f32.mrb[36].mxu0  ;;  %v8522_v6 = vpop.f32.mrb[36].mxu1  ;;  %v12116_v13 = vsel %vm1328_vm2, %v1275_v19, %v1353_v30  ;;  %vm1329_vm4 = vcmp.gt.f32.partialorder %v1278_v29, 0.0  ;;  %v1354_v34 = vmul.f32 0.01, %v1278_v29 }
 0x15b   : > { %v8523_v14 = vpop.f32.mrb[37].mxu1  ;;  %1444 = vrot.lane.b32.xlu0 %v12116_v13, %s11590_s18  ;;  %v8429_v16 = vpop.f32.mrb[37].mxu0 }
 0x15c   : > { %v8524_v36 = vadd.f32 %v8523_v14, %v8522_v6  ;;  %v12125_v39 = vadd.f32 %v8429_v16, %v8428_v2  ;;  %914 = vrot.lane.b32.xlu1 %v12122_v33, %s11590_s18  ;;  %v8431_v43 = vpop.f32.mrb[38].mxu0  ;;  %v8525_v44 = vpop.f32.mrb[38].mxu1  ;;  %v12136_v56 = vsel %vm1329_vm4, %v1278_v29, %v1354_v34  ;;  %v12149_v2 = vsel %vm807_vm7, %v732_v9, %v832_v59 }
 0x15d   : > { %v8432_v46 = vpop.f32.mrb[39].mxu0  ;;  %v8526_v51 = vpop.f32.mrb[39].mxu1  ;;  %15681 = vst [vmem:[#allocation9_spill] sm:$0xff] %v12136_v56  ;;  %v1254_v9 = vadd.f32 %v12047_v48, %v11969_v62  ;;  %2981 = vmatmul.mubr.bf16.gmra.mrb[120].mxu0 %v11490_v41  ;;  %v11493_v41 = vld [vmem:[%s11763_s25 + $0x1b0] ss:$40 sps:$4 sm:$0xff]  }
 0x15e   : > { %15679 = vst [vmem:[#allocation7_spill] sm:$0xff] %v12125_v39  ;;  %v1283_v49 = vadd.f32 %v8524_v36, %v11969_v62  ;;  %v12133_v52 = vadd.f32 %v8432_v46, %v8431_v43  ;;  %v8527_v53 = vadd.f32 %v8526_v51, %v8525_v44  ;;  %2988 = vmatprep.mubr.bf16.mxu0 %v11491_v8 }
 0x15f   : > { %1446 = vrot.lane.b32.xlu0 %v12136_v56, %s11590_s18  ;;  %vm1323_vm13 = vcmp.gt.f32.partialorder %v1254_v9, 0.0 }
 0x160   : > { %15680 = vst [vmem:[#allocation8_spill] sm:$0xff] %v12133_v52  ;;  %v1286_v42 = vadd.f32 %v8527_v53, %v11969_v62  ;;  %1430 = vrot.lane.b32.xlu1 %v12140_v57, %s11590_s18  ;;  %vm1330_vm6 = vcmp.gt.f32.partialorder %v1283_v49, 0.0  ;;  %v1355_v12 = vmul.f32 0.01, %v1283_v49  ;;  %v833_v53 = vmul.f32 0.01, %v737_v28 }
 0x162   : > { %v8434_v4 = vpop.f32.mrb[40].mxu0  ;;  %v8528_v19 = vpop.f32.mrb[40].mxu1  ;;  %v12147_v18 = vsel %vm1330_vm6, %v1283_v49, %v1355_v12  ;;  %v1356_v6 = vmul.f32 0.01, %v1286_v42  ;;  %vm1331_vm8 = vcmp.gt.f32.partialorder %v1286_v42, 0.0  ;;  %v12166_v49 = vsel %vm1322_vm9, %v1251_v10, %v1347_v21 }
 0x163   : > { %v8529_v29 = vpop.f32.mrb[41].mxu1  ;;  %15682 = vst [vmem:[#allocation10_spill] sm:$0xff] %v12147_v18  ;;  %v8435_v30 = vpop.f32.mrb[41].mxu0  ;;  %1448 = vrot.lane.b32.xlu0 %v12147_v18, %s11590_s18  ;;  %v740_v12 = vadd.f32 %v12045_v47, %v11969_v62  ;;  %v1348_v10 = vmul.f32 0.01, %v1254_v9 }
 0x164   : > { %v8530_v14 = vadd.f32 %v8529_v29, %v8528_v19  ;;  %v12154_v16 = vadd.f32 %v8435_v30, %v8434_v4  ;;  %916 = vrot.lane.b32.xlu1 %v12149_v2, %s11590_s18  ;;  %v8437_v34 = vpop.f32.mrb[42].mxu0  ;;  %v8531_v35 = vpop.f32.mrb[42].mxu1  ;;  %v12164_v51 = vsel %vm1331_vm8, %v1286_v42, %v1356_v6  ;;  %v12177_v30 = vsel %vm808_vm11, %v737_v28, %v833_v53 }
 0x165   : > { %v8438_v36 = vpop.f32.mrb[43].mxu0  ;;  %v8532_v43 = vpop.f32.mrb[43].mxu1  ;;  %15685 = vst [vmem:[#allocation13_spill] sm:$0xff] %v12164_v51  ;;  %v834_v53 = vmul.f32 0.01, %v740_v12  ;;  %2989 = vmatmul.mubr.bf16.gmra.mrb[124].mxu0 %v11493_v41  ;;  %vm809_vm14 = vcmp.gt.f32.partialorder %v740_v12, 0.0 }
 0x166   : > { %15683 = vst [vmem:[#allocation11_spill] sm:$0xff] %v12154_v16  ;;  %v1291_v44 = vadd.f32 %v8530_v14, %v11969_v62  ;;  %v12162_v45 = vadd.f32 %v8438_v36, %v8437_v34  ;;  %v8533_v46 = vadd.f32 %v8532_v43, %v8531_v35 }
 0x167   : > { %1450 = vrot.lane.b32.xlu0 %v12164_v51, %s11590_s18 }
 0x168   : > { %15684 = vst [vmem:[#allocation12_spill] sm:$0xff] %v12162_v45  ;;  %v1294_v59 = vadd.f32 %v8533_v46, %v11969_v62  ;;  %1432 = vrot.lane.b32.xlu1 %v12166_v49, %s11590_s18  ;;  %vm1332_vm10 = vcmp.gt.f32.partialorder %v1291_v44, 0.0  ;;  %v1357_v48 = vmul.f32 0.01, %v1291_v44 }
 0x16a   : > { %v8440_v42 = vpop.f32.mrb[44].mxu0  ;;  %v8534_v4 = vpop.f32.mrb[44].mxu1  ;;  %v12175_v21 = vsel %vm1332_vm10, %v1291_v44, %v1357_v48  ;;  %v1358_v6 = vmul.f32 0.01, %v1294_v59  ;;  %vm1333_vm12 = vcmp.gt.f32.partialorder %v1294_v59, 0.0  ;;  %v1259_v48 = vadd.f32 %v12059_v61, %v11969_v62 }
 0x16b   : > { %v8535_v19 = vpop.f32.mrb[45].mxu1  ;;  %15686 = vst [vmem:[#allocation14_spill] sm:$0xff] %v12175_v21  ;;  %v8441_v29 = vpop.f32.mrb[45].mxu0  ;;  %1452 = vrot.lane.b32.xlu0 %v12175_v21, %s11590_s18  ;;  %v745_v61 = vadd.f32 %v12057_v60, %v11969_v62 }
 0x16c   : > { %v8536_v14 = vadd.f32 %v8535_v19, %v8534_v4  ;;  %v12182_v34 = vadd.f32 %v8441_v29, %v8440_v42  ;;  %918 = vrot.lane.b32.xlu1 %v12177_v30, %s11590_s18  ;;  %v8443_v47 = vpop.f32.mrb[46].mxu0  ;;  %v8537_v35 = vpop.f32.mrb[46].mxu1  ;;  %v12192_v42 = vsel %vm1333_vm12, %v1294_v59, %v1358_v6  ;;  %v12194_v4 = vsel %vm1323_vm13, %v1254_v9, %v1348_v10 }
 0x16d   : > { %v8444_v36 = vpop.f32.mrb[47].mxu0  ;;  %v8538_v43 = vpop.f32.mrb[47].mxu1  ;;  %15689 = vst [vmem:[#allocation17_spill] sm:$0xff] %v12192_v42  ;;  %vm1324_vm1 = vcmp.gt.f32.partialorder %v1259_v48, 0.0  ;;  %vm810_vm3 = vcmp.gt.f32.partialorder %v745_v61, 0.0  ;;  %vm998_vm13 = vcmask 523264  }
 0x16e   : > { %15687 = vst [vmem:[#allocation15_spill] sm:$0xff] %v12182_v34  ;;  %v1299_v28 = vadd.f32 %v8536_v14, %v11969_v62  ;;  %v12188_v44 = vadd.f32 %v8444_v36, %v8443_v47  ;;  %v8539_v46 = vadd.f32 %v8538_v43, %v8537_v35  ;;  %v12201_v14 = vsel %vm809_vm14, %v740_v12, %v834_v53 }
 0x16f   : > { %1454 = vrot.lane.b32.xlu0 %v12192_v42, %s11590_s18  ;;  %v1349_v35 = vmul.f32 0.01, %v1259_v48  ;;  %v1262_v53 = vadd.f32 %v12065_v11, %v11969_v62  ;;  %v748_v11 = vadd.f32 %v12063_v20, %v11969_v62 }
 0x170   : > { %15688 = vst [vmem:[#allocation16_spill] sm:$0xff] %v12188_v44  ;;  %v1302_v19 = vadd.f32 %v8539_v46, %v11969_v62  ;;  %1434 = vrot.lane.b32.xlu1 %v12194_v4, %s11590_s18  ;;  %vm1334_vm15 = vcmp.gt.f32.partialorder %v1299_v28, 0.0  ;;  %v1359_v29 = vmul.f32 0.01, %v1299_v28 }
 0x171   : > { %vm1325_vm4 = vcmp.gt.f32.partialorder %v1262_v53, 0.0  ;;  %vm811_vm6 = vcmp.gt.f32.partialorder %v748_v11, 0.0 }
 0x172   : > { %v8540_v8 = vpop.f32.mrb[48].mxu1  ;;  %v8446_v47 = vpop.f32.mrb[48].mxu0  ;;  %v12205_v59 = vsel %vm1334_vm15, %v1299_v28, %v1359_v29  ;;  %v1360_v6 = vmul.f32 0.01, %v1302_v19  ;;  %vm1335_vm0 = vcmp.gt.f32.partialorder %v1302_v19, 0.0 }
 0x173   : > { %v8541_v9 = vpop.f32.mrb[49].mxu1  ;;  %15690 = vst [vmem:[#allocation18_spill] sm:$0xff] %v12205_v59  ;;  %v8447_v10 = vpop.f32.mrb[49].mxu0  ;;  %1456 = vrot.lane.b32.xlu0 %v12205_v59, %s11590_s18 }
 0x174   : > { %v8542_v41 = vadd.f32 %v8541_v9, %v8540_v8  ;;  %920 = vrot.lane.b32.xlu1 %v12201_v14, %s11590_s18  ;;  %v8543_v36 = vpop.f32.mrb[50].mxu1  ;;  %v12211_v12 = vadd.f32 %v8447_v10, %v8446_v47  ;;  %v8449_v43 = vpop.f32.mrb[50].mxu0  ;;  %v12216_v29 = vsel %vm1335_vm0, %v1302_v19, %v1360_v6  ;;  %v12218_v8 = vsel %vm1324_vm1, %v1259_v48, %v1349_v35 }
 0x175   : > { %v8544_v60 = vpop.f32.mrb[51].mxu1  ;;  %v8450_v46 = vpop.f32.mrb[51].mxu0  ;;  %15692 = vst [vmem:[#allocation20_spill] sm:$0xff] %v12216_v29  ;;  %v835_v9 = vmul.f32 0.01, %v745_v61 }
 0x176   : > { %15691 = vst [vmem:[#allocation19_spill] sm:$0xff] %v12211_v12  ;;  %v1307_v28 = vadd.f32 %v8542_v41, %v11969_v62  ;;  %v1350_v35 = vmul.f32 0.01, %v1262_v53 }
 0x177   : > { %1458 = vrot.lane.b32.xlu0 %v12216_v29, %s11590_s18  ;;  %v12228_v6 = vsel %vm810_vm3, %v745_v61, %v835_v9 }
 0x178   : > { %1436 = vrot.lane.b32.xlu1 %v12218_v8, %s11590_s18  ;;  %vm1336_vm2 = vcmp.gt.f32.partialorder %v1307_v28, 0.0  ;;  %v1361_v47 = vmul.f32 0.01, %v1307_v28 }
 0x17a   : > { %v8562_v10 = vpop.f32.mrb[52].mxu0  ;;  %v8656_v36 = vpop.f32.mrb[52].mxu1  ;;  %v12224_v41 = vsel %vm1336_vm2, %v1307_v28, %v1361_v47 }
 0x17b   : > { %15693 = vst [vmem:[#allocation21_spill] sm:$0xff] %v12224_v41  ;;  %v8657_v19 = vpop.f32.mrb[53].mxu1  ;;  %v8563_v48 = vpop.f32.mrb[53].mxu0  ;;  %1460 = vrot.lane.b32.xlu0 %v12224_v41, %s11590_s18 }
 0x17c   : > { %v8658_v43 = vadd.f32 %v8657_v19, %v8656_v36  ;;  %v8564_v60 = vadd.f32 %v8563_v48, %v8562_v10  ;;  %922 = vrot.lane.b32.xlu1 %v12228_v6, %s11590_s18  ;;  %v8565_v46 = vpop.f32.mrb[54].mxu0  ;;  %v8659_v29 = vpop.f32.mrb[54].mxu1  ;;  %v1267_v36 = vadd.f32 %v12079_v7, %v11969_v62  ;;  %v12240_v19 = vsel %vm1325_vm4, %v1262_v53, %v1350_v35 }
 0x17d   : > { %v8566_v28 = vpop.f32.mrb[55].mxu0  ;;  %v8660_v47 = vpop.f32.mrb[55].mxu1  ;;  %v836_v10 = vmul.f32 0.01, %v748_v11 }
 0x17e   : > { %v2338_v20 = vadd.f32 %v8658_v43, %v11969_v62  ;;  %v1825_v12 = vadd.f32 %v8564_v60, %v11969_v62  ;;  %v8567_v61 = vadd.f32 %v8566_v28, %v8565_v46  ;;  %v12236_v9 = vadd.f32 %v8660_v47, %v8659_v29 }
 0x17f   : > { %v753_v46 = vadd.f32 %v12077_v23, %v11969_v62  ;;  %v12251_v53 = vsel %vm811_vm6, %v748_v11, %v836_v10  ;;  %v1351_v28 = vmul.f32 0.01, %v1267_v36  ;;  %vm1326_vm8 = vcmp.gt.f32.partialorder %v1267_v36, 0.0 }
 0x180   : > { %1438 = vrot.lane.b32.xlu1 %v12240_v19, %s11590_s18  ;;  %vm2439_vm5 = vcmp.gt.f32.partialorder %v2338_v20, 0.0  ;;  %v2464_v48 = vmul.f32 0.01, %v2338_v20  ;;  %v1828_v41 = vadd.f32 %v8567_v61, %v11969_v62  ;;  %v1951_v29 = vmul.f32 0.01, %v1825_v12 }
 0x181   : > { %vm1926_vm7 = vcmp.gt.f32.partialorder %v1825_v12, 0.0  ;;  %v756_v23 = vadd.f32 %v12085_v22, %v11969_v62  ;;  %vm812_vm10 = vcmp.gt.f32.partialorder %v753_v46, 0.0  ;;  %v761_v22 = vadd.f32 %v12098_v54, %v11969_v62 }
 0x182   : > { %v8662_v43 = vpop.f32.mrb[56].mxu1  ;;  %v12245_v59 = vsel %vm2439_vm5, %v2338_v20, %v2464_v48  ;;  %v8568_v60 = vpop.f32.mrb[56].mxu0  ;;  %v1952_v34 = vmul.f32 0.01, %v1828_v41  ;;  %v12258_v21 = vsel %vm1926_vm7, %v1825_v12, %v1951_v29  ;;  %vm1927_vm9 = vcmp.gt.f32.partialorder %v1828_v41, 0.0 }
 0x183   : > { %v8663_v7 = vpop.f32.mrb[57].mxu1  ;;  %2539 = vrot.lane.b32.xlu0 %v12245_v59, %s11590_s18  ;;  %v8569_v35 = vpop.f32.mrb[57].mxu0  ;;  %vm813_vm11 = vcmp.gt.f32.partialorder %v756_v23, 0.0  ;;  %v2341_v39 = vadd.f32 %v12236_v9, %v11969_v62  ;;  %vm814_vm15 = vcmp.gt.f32.partialorder %v761_v22, 0.0 }
 0x184   : > { %v8664_v47 = vadd.f32 %v8663_v7, %v8662_v43  ;;  %924 = vrot.lane.b32.xlu1 %v12251_v53, %s11590_s18  ;;  %v8665_v20 = vpop.f32.mrb[58].mxu1  ;;  %v8570_v61 = vadd.f32 %v8569_v35, %v8568_v60  ;;  %v8571_v48 = vpop.f32.mrb[58].mxu0  ;;  %v12262_v43 = vsel %vm1326_vm8, %v1267_v36, %v1351_v28  ;;  %v837_v60 = vmul.f32 0.01, %v753_v46 }
 0x185   : > { %v8666_v44 = vpop.f32.mrb[59].mxu1  ;;  %v8572_v42 = vpop.f32.mrb[59].mxu0  ;;  %v838_v7 = vmul.f32 0.01, %v756_v23  ;;  %v12269_v12 = vsel %vm1927_vm9, %v1828_v41, %v1952_v34  ;;  %vm2440_vm1 = vcmp.gt.f32.partialorder %v2341_v39, 0.0 }
 0x186   : > { %v2346_v11 = vadd.f32 %v8664_v47, %v11969_v62  ;;  %v8667_v10 = vadd.f32 %v8666_v44, %v8665_v20  ;;  %v8573_v45 = vadd.f32 %v8572_v42, %v8571_v48  ;;  %v1833_v44 = vadd.f32 %v8570_v61, %v11969_v62 }
 0x187   : > { %2026 = vrot.lane.b32.xlu0 %v12258_v21, %s11590_s18  ;;  %v12273_v36 = vsel %vm812_vm10, %v753_v46, %v837_v60  ;;  %v12277_v41 = vsel %vm813_vm11, %v756_v23, %v838_v7  ;;  %v839_v48 = vmul.f32 0.01, %v761_v22 }
 0x188   : > { %1440 = vrot.lane.b32.xlu1 %v12262_v43, %s11590_s18  ;;  %v2466_v42 = vmul.f32 0.01, %v2346_v11  ;;  %vm2441_vm12 = vcmp.gt.f32.partialorder %v2346_v11, 0.0  ;;  %v2349_v16 = vadd.f32 %v8667_v10, %v11969_v62  ;;  %v1953_v60 = vmul.f32 0.01, %v1833_v44 }
 0x189   : > { %vm1928_vm14 = vcmp.gt.f32.partialorder %v1833_v44, 0.0 }
 0x18a   : > { %v8668_v29 = vpop.f32.mrb[60].mxu1  ;;  %v8574_v35 = vpop.f32.mrb[60].mxu0  ;;  %v12280_v46 = vsel %vm2441_vm12, %v2346_v11, %v2466_v42  ;;  %v12293_v10 = vsel %vm1928_vm14, %v1833_v44, %v1953_v60  ;;  %v2467_v9 = vmul.f32 0.01, %v2349_v16  ;;  %vm2442_vm0 = vcmp.gt.f32.partialorder %v2349_v16, 0.0 }
 0x18b   : > { %2028 = vrot.lane.b32.xlu0 %v12269_v12, %s11590_s18  ;;  %v8669_v28 = vpop.f32.mrb[61].mxu1  ;;  %v8575_v47 = vpop.f32.mrb[61].mxu0  ;;  %15694 = vst [vmem:[#allocation22_spill] sm:$0xff] %v12280_v46 }
 0x18c   : > { %926 = vrot.lane.b32.xlu1 %v12273_v36, %s11590_s18  ;;  %v8670_v54 = vadd.f32 %v8669_v28, %v8668_v29  ;;  %v8671_v20 = vpop.f32.mrb[62].mxu1  ;;  %v8576_v61 = vadd.f32 %v8575_v47, %v8574_v35  ;;  %v8577_v34 = vpop.f32.mrb[62].mxu0 }
 0x18d   : > { %v8672_v51 = vpop.f32.mrb[63].mxu1  ;;  %v8578_v56 = vpop.f32.mrb[63].mxu0 }
 0x18e   : > { %v899_v18 = vpop.permute.xlu1 %898  ;;  %v8673_v52 = vadd.f32 %v8672_v51, %v8671_v20  ;;  %v12287_v23 = vadd.f32 %v8578_v56, %v8577_v34  ;;  %v1836_v51 = vadd.f32 %v8573_v45, %v11969_v62  ;;  %v2465_v56 = vmul.f32 0.01, %v2341_v39 }
 0x18f   : > { %v973_v29 = vmax.f32 %v11979_v3, %v899_v18  ;;  %2543 = vrot.lane.b32.xlu0 %v12280_v46, %s11590_s18  ;;  %v12297_v3 = vsel %vm814_vm15, %v761_v22, %v839_v48  ;;  %v2354_v34 = vadd.f32 %v8670_v54, %v11969_v62  ;;  %v12306_v48 = vsel %vm2442_vm0, %v2349_v16, %v2467_v9  ;;  %v1413_v46 = vpop.permute.xlu0 %1412 }
 0x190   : > { %928 = vrot.lane.b32.xlu1 %v12277_v41, %s11590_s18  ;;  %15695 = vst [vmem:[#allocation23_spill] sm:$0xff] %v12297_v3  ;;  %15696 = vst [vmem:[#allocation24_spill] sm:$0xff] %v12306_v48  ;;  %v1954_v60 = vmul.f32 0.01, %v1836_v51  ;;  %vm1929_vm2 = vcmp.gt.f32.partialorder %v1836_v51, 0.0  ;;  %v1487_v16 = vmax.f32 %v11974_v1, %v1413_v46  ;;  %v1841_v54 = vadd.f32 %v8576_v61, %v11969_v62 }
 0x191   : > { %999 = vst.msk [vmem:[#allocation2] sm:$0xff] %vm998_vm13, %v973_v29  ;;  %vm2443_vm3 = vcmp.gt.f32.partialorder %v2354_v34, 0.0  ;;  %v2357_v1 = vadd.f32 %v8673_v52, %v11969_v62 }
 0x192   : > { %v1415_v11 = vpop.permute.xlu1 %1414  ;;  %v8674_v7 = vpop.f32.mrb[64].mxu1  ;;  %vm1930_vm4 = vcmp.gt.f32.partialorder %v1841_v54, 0.0 }
 0x193   : > { %2030 = vrot.lane.b32.xlu0 %v12293_v10, %s11590_s18  ;;  %v8675_v18 = vpop.f32.mrb[65].mxu1  ;;  %v8580_v42 = vpop.f32.mrb[64].mxu0  ;;  %vm2444_vm5 = vcmp.gt.f32.partialorder %v2357_v1, 0.0 }
 0x194   : > { %930 = vrot.lane.b32.xlu1 %v12297_v3, %s11590_s18  ;;  %v12301_v35 = vadd.f32 %v8675_v18, %v8674_v7  ;;  %v8677_v45 = vpop.f32.mrb[66].mxu1  ;;  %v8581_v44 = vpop.f32.mrb[65].mxu0  ;;  %v12314_v7 = vsel %vm2440_vm1, %v2341_v39, %v2465_v56 }
 0x195   : > { %v8678_v28 = vpop.f32.mrb[67].mxu1  ;;  %v12303_v47 = vadd.f32 %v8581_v44, %v8580_v42  ;;  %v8583_v20 = vpop.f32.mrb[66].mxu0  ;;  %v2468_v42 = vmul.f32 0.01, %v2354_v34 }
 0x196   : > { %v901_v22 = vpop.permute.xlu1 %900  ;;  %v12308_v29 = vadd.f32 %v8678_v28, %v8677_v45  ;;  %v8584_v26 = vpop.f32.mrb[67].mxu0  ;;  %v1488_v28 = vmax.f32 %v11986_v17, %v1415_v11  ;;  %v12347_v17 = vld [vmem:[%s15636_s2] ss:$0 sm:$0xff] }
 0x197   : > { %v974_v3 = vmax.f32 %v11991_v40, %v901_v22  ;;  %2545 = vrot.lane.b32.xlu0 %v12306_v48, %s11590_s18  ;;  %v12316_v18 = vadd.f32 %v8584_v26, %v8583_v20  ;;  %v12323_v40 = vsel %vm1929_vm2, %v1836_v51, %v1954_v60  ;;  %v12334_v22 = vsel %vm2443_vm3, %v2354_v34, %v2468_v42 }
 0x198   : > { %2541 = vrot.lane.b32.xlu1 %v12314_v7, %s11590_s18  ;;  %15697 = vst [vmem:[#allocation25_spill] sm:$0xff] %v12323_v40  ;;  %v1955_v60 = vmul.f32 0.01, %v1841_v54  ;;  %v1844_v52 = vadd.f32 %v12347_v17, %v12287_v23  ;;  %v2469_v42 = vmul.f32 0.01, %v2357_v1 }
 0x199   : > { %1000 = vst.msk [vmem:[#allocation2 + $0x18] sm:$0xff] %vm998_vm13, %v974_v3 }
 0x19a   : > { %v1417_v9 = vpop.permute.xlu1 %1416  ;;  %v8680_v45 = vpop.f32.mrb[68].mxu1  ;;  %v12353_v34 = vsel %vm1930_vm4, %v1841_v54, %v1955_v60  ;;  %vm1931_vm6 = vcmp.gt.f32.partialorder %v1844_v52, 0.0 }
 0x19b   : > { %2032 = vrot.lane.b32.xlu0 %v12323_v40, %s11590_s18  ;;  %v8681_v26 = vpop.f32.mrb[69].mxu1  ;;  %v8586_v39 = vpop.f32.mrb[68].mxu0 }
 0x19c   : > { %1537 = vrot.lane.b32.xlu1 %v1487_v16, %s11590_s18  ;;  %v12328_v56 = vadd.f32 %v8681_v26, %v8680_v45  ;;  %v8683_v3 = vpop.f32.mrb[70].mxu1  ;;  %v8587_v44 = vpop.f32.mrb[69].mxu0 }
 0x19d   : > { %v8684_v61 = vpop.f32.mrb[71].mxu1  ;;  %v12331_v46 = vadd.f32 %v8587_v44, %v8586_v39  ;;  %v8589_v51 = vpop.f32.mrb[70].mxu0  ;;  %v1956_v44 = vmul.f32 0.01, %v1844_v52 }
 0x19e   : > { %v903_v20 = vpop.permute.xlu1 %902  ;;  %v12336_v48 = vadd.f32 %v8684_v61, %v8683_v3  ;;  %v8590_v40 = vpop.f32.mrb[71].mxu0 }
 0x19f   : > { %v975_v16 = vmax.f32 %v12005_v63, %v903_v20  ;;  %2547 = vrot.lane.b32.xlu0 %v12334_v22, %s11590_s18  ;;  %v12341_v62 = vadd.f32 %v8590_v40, %v8589_v51  ;;  %v1489_v63 = vmax.f32 %v12000_v55, %v1417_v9  ;;  %v2362_v51 = vadd.f32 %v12347_v17, %v12301_v35 }
 0x1a0   : > { %1539 = vrot.lane.b32.xlu1 %v1488_v28, %s11590_s18  ;;  %v12365_v20 = vsel %vm2444_vm5, %v2357_v1, %v2469_v42  ;;  %v12378_v1 = vsel %vm1931_vm6, %v1844_v52, %v1956_v44  ;;  %v2365_v44 = vadd.f32 %v12347_v17, %v12308_v29  ;;  %v1852_v29 = vadd.f32 %v12347_v17, %v12316_v18 }
 0x1a1   : > { %1001 = vst.msk [vmem:[#allocation2 + $0x30] sm:$0xff] %vm998_vm13, %v975_v16  ;;  %15698 = vst [vmem:[#allocation26_spill] sm:$0xff] %v12378_v1  ;;  %vm2445_vm7 = vcmp.gt.f32.partialorder %v2362_v51, 0.0 }
 0x1a2   : > { %v1419_v11 = vpop.permute.xlu1 %1418  ;;  %v8686_v40 = vpop.f32.mrb[72].mxu1  ;;  %vm2446_vm9 = vcmp.gt.f32.partialorder %v2365_v44, 0.0  ;;  %vm1933_vm10 = vcmp.gt.f32.partialorder %v1852_v29, 0.0 }
 0x1a3   : > { %2034 = vrot.lane.b32.xlu0 %v12353_v34, %s11590_s18  ;;  %v8687_v45 = vpop.f32.mrb[73].mxu1  ;;  %v8592_v26 = vpop.f32.mrb[72].mxu0  ;;  %v1490_v9 = vmax.f32 %v12014_v25, %v1419_v11  ;;  %v1849_v25 = vadd.f32 %v12347_v17, %v12303_v47  ;;  %v2470_v11 = vmul.f32 0.01, %v2362_v51 }
 0x1a4   : > { %1541 = vrot.lane.b32.xlu1 %v1489_v63, %s11590_s18  ;;  %v12358_v39 = vadd.f32 %v8687_v45, %v8686_v40  ;;  %v8689_v23 = vpop.f32.mrb[74].mxu1  ;;  %v8593_v3 = vpop.f32.mrb[73].mxu0 }
 0x1a5   : > { %v8690_v61 = vpop.f32.mrb[75].mxu1  ;;  %v12360_v55 = vadd.f32 %v8593_v3, %v8592_v26  ;;  %v8595_v54 = vpop.f32.mrb[74].mxu0  ;;  %vm1932_vm8 = vcmp.gt.f32.partialorder %v1849_v25, 0.0 }
 0x1a6   : > { %v905_v28 = vpop.permute.xlu1 %904  ;;  %v12367_v60 = vadd.f32 %v8690_v61, %v8689_v23  ;;  %v8596_v16 = vpop.f32.mrb[75].mxu0 }
 0x1a7   : > { %v976_v63 = vmax.f32 %v12019_v31, %v905_v28  ;;  %2549 = vrot.lane.b32.xlu0 %v12365_v20, %s11590_s18  ;;  %v12372_v40 = vadd.f32 %v8596_v16, %v8595_v54  ;;  %v1957_v28 = vmul.f32 0.01, %v1849_v25 }
 0x1a8   : > { %1543 = vrot.lane.b32.xlu1 %v1490_v9, %s11590_s18  ;;  %v12390_v9 = vsel %vm2445_vm7, %v2362_v51, %v2470_v11  ;;  %v2471_v11 = vmul.f32 0.01, %v2365_v44 }
 0x1a9   : > { %1002 = vst.msk [vmem:[#allocation2 + $0x48] sm:$0xff] %vm998_vm13, %v976_v63  ;;  %15699 = vst [vmem:[#allocation27_spill] sm:$0xff] %v12390_v9  ;;  %v12402_v51 = vsel %vm1932_vm8, %v1849_v25, %v1957_v28  ;;  %v2370_v28 = vadd.f32 %v12347_v17, %v12328_v56  ;;  %v1857_v56 = vadd.f32 %v12347_v17, %v12331_v46 }
 0x1aa   : > { %v1421_v35 = vpop.permute.xlu1 %1420  ;;  %v8692_v42 = vpop.f32.mrb[76].mxu1  ;;  %15700 = vst [vmem:[#allocation28_spill] sm:$0xff] %v12402_v51 }
 0x1ab   : > { %v1491_v31 = vmax.f32 %v12032_v15, %v1421_v35  ;;  %2036 = vrot.lane.b32.xlu0 %v12378_v1, %s11590_s18  ;;  %v8693_v45 = vpop.f32.mrb[77].mxu1  ;;  %v8598_v26 = vpop.f32.mrb[76].mxu0  ;;  %vm2447_vm11 = vcmp.gt.f32.partialorder %v2370_v28, 0.0  ;;  %vm1934_vm12 = vcmp.gt.f32.partialorder %v1857_v56, 0.0 }
 0x1ac   : > { %v12383_v23 = vadd.f32 %v8693_v45, %v8692_v42  ;;  %v8695_v3 = vpop.f32.mrb[78].mxu1  ;;  %v8599_v61 = vpop.f32.mrb[77].mxu0 }
 0x1ad   : > { %1545 = vrot.lane.b32.xlu1 %v1491_v31, %s11590_s18  ;;  %v8696_v47 = vpop.f32.mrb[79].mxu1  ;;  %v12386_v54 = vadd.f32 %v8599_v61, %v8598_v26  ;;  %v8601_v52 = vpop.f32.mrb[78].mxu0 }
 0x1ae   : > { %v907_v15 = vpop.permute.xlu1 %906  ;;  %v12392_v16 = vadd.f32 %v8696_v47, %v8695_v3  ;;  %v8602_v63 = vpop.f32.mrb[79].mxu0 }
 0x1af   : > { %v977_v35 = vmax.f32 %v12037_v38, %v907_v15  ;;  %2551 = vrot.lane.b32.xlu0 %v12390_v9, %s11590_s18  ;;  %v12397_v42 = vadd.f32 %v8602_v63, %v8601_v52  ;;  %v12414_v63 = vsel %vm2446_vm9, %v2365_v44, %v2471_v11  ;;  %v2472_v11 = vmul.f32 0.01, %v2370_v28 }
 0x1b0   : > { %15701 = vst [vmem:[#allocation29_spill] sm:$0xff] %v12414_v63 }
 0x1b1   : > { %1003 = vst.msk [vmem:[#allocation2 + $0x60] sm:$0xff] %vm998_vm13, %v977_v35  ;;  %v1958_v35 = vmul.f32 0.01, %v1852_v29 }
 0x1b2   : > { %v1423_v31 = vpop.permute.xlu1 %1422  ;;  %v8698_v45 = vpop.f32.mrb[80].mxu1 }
 0x1b3   : > { %v1492_v26 = vmax.f32 %v12050_v50, %v1423_v31  ;;  %2038 = vrot.lane.b32.xlu0 %v12402_v51, %s11590_s18  ;;  %v8699_v38 = vpop.f32.mrb[81].mxu1  ;;  %v8604_v3 = vpop.f32.mrb[80].mxu0  ;;  %v12426_v44 = vsel %vm1933_vm10, %v1852_v29, %v1958_v35  ;;  %v2373_v35 = vadd.f32 %v12347_v17, %v12336_v48  ;;  %v1860_v48 = vadd.f32 %v12347_v17, %v12341_v62 }
 0x1b4   : > { %v12407_v61 = vadd.f32 %v8699_v38, %v8698_v45  ;;  %v8701_v47 = vpop.f32.mrb[82].mxu1  ;;  %v8605_v52 = vpop.f32.mrb[81].mxu0  ;;  %15702 = vst [vmem:[#allocation30_spill] sm:$0xff] %v12426_v44 }
 0x1b5   : > { %1547 = vrot.lane.b32.xlu1 %v1492_v26, %s11590_s18  ;;  %v8702_v18 = vpop.f32.mrb[83].mxu1  ;;  %v12410_v15 = vadd.f32 %v8605_v52, %v8604_v3  ;;  %v8607_v25 = vpop.f32.mrb[82].mxu0  ;;  %vm2448_vm14 = vcmp.gt.f32.partialorder %v2373_v35, 0.0  ;;  %vm1935_vm15 = vcmp.gt.f32.partialorder %v1860_v48, 0.0 }
 0x1b6   : > { %v909_v50 = vpop.permute.xlu1 %908  ;;  %v12416_v31 = vadd.f32 %v8702_v18, %v8701_v47  ;;  %v8608_v51 = vpop.f32.mrb[83].mxu0 }
 0x1b7   : > { %v978_v45 = vmax.f32 %v12055_v58, %v909_v50  ;;  %2553 = vrot.lane.b32.xlu0 %v12414_v63, %s11590_s18  ;;  %v12421_v26 = vadd.f32 %v8608_v51, %v8607_v25 }
 0x1b9   : > { %1004 = vst.msk [vmem:[#allocation2 + $0x78] sm:$0xff] %vm998_vm13, %v978_v45  ;;  %v12438_v45 = vsel %vm2447_vm11, %v2370_v28, %v2472_v11  ;;  %v2473_v11 = vmul.f32 0.01, %v2373_v35 }
 0x1ba   : > { %v1425_v38 = vpop.permute.xlu1 %1424  ;;  %v8704_v3 = vpop.f32.mrb[84].mxu1  ;;  %15703 = vst [vmem:[#allocation31_spill] sm:$0xff] %v12438_v45 }
 0x1bb   : > { %v1493_v47 = vmax.f32 %v12069_v24, %v1425_v38  ;;  %2040 = vrot.lane.b32.xlu0 %v12426_v44, %s11590_s18  ;;  %v8705_v58 = vpop.f32.mrb[85].mxu1  ;;  %v8610_v52 = vpop.f32.mrb[84].mxu0  ;;  %v1959_v38 = vmul.f32 0.01, %v1857_v56 }
 0x1bc   : > { %v12431_v51 = vadd.f32 %v8705_v58, %v8704_v3  ;;  %v8707_v18 = vpop.f32.mrb[86].mxu1  ;;  %v8611_v25 = vpop.f32.mrb[85].mxu0 }
 0x1bd   : > { %1549 = vrot.lane.b32.xlu1 %v1493_v47, %s11590_s18  ;;  %v8708_v46 = vpop.f32.mrb[87].mxu1  ;;  %v12434_v50 = vadd.f32 %v8611_v25, %v8610_v52  ;;  %v8613_v29 = vpop.f32.mrb[86].mxu0  ;;  %v12450_v28 = vsel %vm1934_vm12, %v1857_v56, %v1959_v38  ;;  %v3353_v56 = vld [vmem:[%s15637_s3 + $0x8] sm:$0xff] }
 0x1be   : > { %v911_v24 = vpop.permute.xlu1 %910  ;;  %v12440_v44 = vadd.f32 %v8708_v46, %v8707_v18  ;;  %v8614_v63 = vpop.f32.mrb[87].mxu0  ;;  %15704 = vst [vmem:[#allocation32_spill] sm:$0xff] %v12450_v28 }
 0x1bf   : > { %v979_v3 = vmax.f32 %v12075_v32, %v911_v24  ;;  %2555 = vrot.lane.b32.xlu0 %v12438_v45, %s11590_s18  ;;  %v12445_v47 = vadd.f32 %v8614_v63, %v8613_v29  ;;  %v3352_v63 = vld [vmem:[%s15637_s3] sm:$0xff]  ;;  %v1960_v45 = vmul.f32 0.01, %v1860_v48 }
 0x1c1   : > { %1005 = vst.msk [vmem:[#allocation2 + $0x90] sm:$0xff] %vm998_vm13, %v979_v3  ;;  %v15664_v3 = vmov 0.0|0.0  }
 0x1c2   : > { %v1427_v58 = vpop.permute.xlu1 %1426  ;;  %v8710_v52 = vpop.f32.mrb[88].mxu1  ;;  %10304 = vmatprep.subr.bf16.mxu1 %v15664_v3  ;;  %10364 = vmatprep.subr.bf16.mxu0 %v15664_v3 }
 0x1c3   : > { %v1494_v18 = vmax.f32 %v12089_v37, %v1427_v58  ;;  %2042 = vrot.lane.b32.xlu0 %v12450_v28, %s11590_s18  ;;  %v8711_v32 = vpop.f32.mrb[89].mxu1  ;;  %v8616_v25 = vpop.f32.mrb[88].mxu0  ;;  %v10305_v58 = vpack.c.bf16 %v3353_v56, %v3352_v63  ;;  %v12470_v28 = vsel %vm2448_vm14, %v2373_v35, %v2473_v11  ;;  %v3355_v35 = vld [vmem:[%s15637_s3 + $0x18] sm:$0xff] }
 0x1c4   : > { %v12458_v46 = vadd.f32 %v8711_v32, %v8710_v52  ;;  %v8713_v62 = vpop.f32.mrb[90].mxu1  ;;  %v8617_v29 = vpop.f32.mrb[89].mxu0  ;;  %v2378_v52 = vadd.f32 %v12347_v17, %v12358_v39  ;;  %15705 = vst [vmem:[#allocation33_spill] sm:$0xff] %v12470_v28  ;;  %v3354_v39 = vld [vmem:[%s15637_s3 + $0x10] sm:$0xff] }
 0x1c5   : > { %1551 = vrot.lane.b32.xlu1 %v1494_v18, %s11590_s18  ;;  %v8714_v37 = vpop.f32.mrb[91].mxu1  ;;  %v12464_v24 = vadd.f32 %v8617_v29, %v8616_v25  ;;  %v8619_v38 = vpop.f32.mrb[90].mxu0  ;;  %10306 = vmatpush1.bf16.msra.mxu1 %v10305_v58  ;;  %v10308_v11 = vpack.c.bf16 %v3355_v35, %v3354_v39 }
 0x1c6   : > { %v913_v32 = vpop.permute.xlu1 %912  ;;  %v12472_v9 = vadd.f32 %v8714_v37, %v8713_v62  ;;  %v8620_v1 = vpop.f32.mrb[91].mxu0  ;;  %10307 = vmatprep.subr.bf16.mxu1 %v15664_v3  ;;  %v12492_v62 = vsel %vm1935_vm15, %v1860_v48, %v1960_v45  ;;  %v2474_v29 = vmul.f32 0.01, %v2378_v52  ;;  %vm2449_vm0 = vcmp.gt.f32.partialorder %v2378_v52, 0.0 }
 0x1c7   : > { %v980_v18 = vmax.f32 %v12096_v5, %v913_v32  ;;  %2557 = vrot.lane.b32.xlu0 %v12470_v28, %s11590_s18  ;;  %v12478_v25 = vadd.f32 %v8620_v1, %v8619_v38  ;;  %v12488_v5 = vpop.permute.xlu0 %1442  ;;  %v1865_v1 = vadd.f32 %v12347_v17, %v12360_v55  ;;  %15707 = vst [vmem:[#allocation35_spill] sm:$0xff] %v12492_v62  ;;  %v3356_v32 = vld [vmem:[%s15637_s3 + $0x20] sm:$0xff] }
 0x1c9   : > { %15706 = vst [vmem:[#allocation34_spill] sm:$0xff] %v12478_v25  ;;  %1006 = vst.msk [vmem:[#allocation2 + $0xa8] sm:$0xff] %vm998_vm13, %v980_v18  ;;  %10309 = vmatpush1.bf16.msra.mxu1 %v10308_v11  ;;  %vm1936_vm1 = vcmp.gt.f32.partialorder %v1865_v1, 0.0 }
 0x1ca   : > { %v1429_v63 = vpop.permute.xlu1 %1428  ;;  %v8716_v56 = vpop.f32.mrb[92].mxu1  ;;  %10310 = vmatprep.subr.bf16.mxu1 %v15664_v3  ;;  %v1961_v3 = vmul.f32 0.01, %v1865_v1 }
 0x1cb   : > { %v1495_v37 = vmax.f32 %v12111_v27, %v1429_v63  ;;  %2044 = vrot.lane.b32.xlu0 %v12492_v62, %s11590_s18  ;;  %v8717_v38 = vpop.f32.mrb[93].mxu1  ;;  %v8622_v58 = vpop.f32.mrb[92].mxu0  ;;  %v3357_v27 = vld [vmem:[%s15637_s3 + $0x28] sm:$0xff]  ;;  %v2381_v63 = vadd.f32 %v12347_v17, %v12367_v60  ;;  %v3358_v60 = vld [vmem:[%s15637_s3 + $0x30] sm:$0xff] }
 0x1cc   : > { %v12500_v18 = vadd.f32 %v8717_v38, %v8716_v56  ;;  %v8719_v55 = vpop.f32.mrb[94].mxu1  ;;  %v8623_v45 = vpop.f32.mrb[93].mxu0  ;;  %v10311_v11 = vpack.c.bf16 %v3357_v27, %v3356_v32  ;;  %v12514_v38 = vsel %vm2449_vm0, %v2378_v52, %v2474_v29  ;;  %v3359_v52 = vld [vmem:[%s15637_s3 + $0x38] sm:$0xff]  ;;  %v12535_v27 = vsel %vm1936_vm1, %v1865_v1, %v1961_v3 }
 0x1cd   : > { %1553 = vrot.lane.b32.xlu1 %v1495_v37, %s11590_s18  ;;  %v12507_v48 = vpop.permute.xlu0 %1444  ;;  %v8720_v39 = vpop.f32.mrb[95].mxu1  ;;  %v12509_v35 = vadd.f32 %v8623_v45, %v8622_v58  ;;  %15708 = vst [vmem:[#allocation36_spill] sm:$0xff] %v12514_v38  ;;  %v15710_v58 = vmov 0.0|0.0   ;;  %v10314_v32 = vpack.c.bf16 %v3359_v52, %v3358_v60  ;;  %15712 = vst [vmem:[#allocation39_spill] sm:$0xff] %v12535_v27  ;;  %vm2450_vm2 = vcmp.gt.f32.partialorder %v2381_v63, 0.0 }
 0x1ce   : > { %v915_v56 = vpop.permute.xlu1 %914  ;;  %v12516_v62 = vadd.f32 %v8720_v39, %v8719_v55  ;;  %v8625_v28 = vpop.f32.mrb[94].mxu0  ;;  %10312 = vmatpush1.bf16.msra.mxu1 %v10311_v11  ;;  %v1868_v55 = vadd.f32 %v12347_v17, %v12372_v40  ;;  %v2475_v39 = vmul.f32 0.01, %v2381_v63  ;;  %v3361_v40 = vld [vmem:[%s15637_s3 + $0x48] sm:$0xff] }
 0x1cf   : > { %v981_v25 = vmax.f32 %v12122_v33, %v915_v56  ;;  %2559 = vrot.lane.b32.xlu0 %v12514_v38, %s11590_s18  ;;  %v8626_v37 = vpop.f32.mrb[95].mxu0  ;;  %10313 = vmatprep.subr.bf16.mxu1 %v15710_v58 }
 0x1d0   : > { %v12527_v29 = vadd.f32 %v8626_v37, %v8625_v28  ;;  %vm1937_vm3 = vcmp.gt.f32.partialorder %v1868_v55, 0.0 }
 0x1d1   : > { %1007 = vst.msk [vmem:[#allocation2 + $0xc0] sm:$0xff] %vm998_vm13, %v981_v25  ;;  %v12531_v33 = vpop.permute.xlu0 %1446  ;;  %v3360_v25 = vld [vmem:[%s15637_s3 + $0x40] sm:$0xff] }
 0x1d2   : > { %15709 = vst [vmem:[#allocation37_spill] sm:$0xff] %v12527_v29  ;;  %15711 = vst [vmem:[#allocation38_spill] sm:$0xff] %v12531_v33  ;;  %v1431_v45 = vpop.permute.xlu1 %1430  ;;  %v8722_v11 = vpop.f32.mrb[96].mxu1  ;;  %10315 = vmatpush1.bf16.msra.mxu1 %v10314_v32 }
 0x1d3   : > { %v1496_v56 = vmax.f32 %v12140_v57, %v1431_v45  ;;  %2046 = vrot.lane.b32.xlu0 %v12535_v27, %s11590_s18  ;;  %v8723_v28 = vpop.f32.mrb[97].mxu1  ;;  %v8628_v37 = vpop.f32.mrb[96].mxu0  ;;  %10316 = vmatprep.subr.bf16.mxu1 %v15710_v58  ;;  %v10317_v57 = vpack.c.bf16 %v3361_v40, %v3360_v25  ;;  %v2386_v27 = vadd.f32 %v12347_v17, %v12383_v23  ;;  %v3362_v23 = vld [vmem:[%s15637_s3 + $0x50] sm:$0xff] }
 0x1d4   : > { %v12546_v3 = vadd.f32 %v8723_v28, %v8722_v11  ;;  %v8725_v1 = vpop.f32.mrb[98].mxu1  ;;  %v8629_v60 = vpop.f32.mrb[97].mxu0  ;;  %v12557_v11 = vsel %vm2450_vm2, %v2381_v63, %v2475_v39  ;;  %v1962_v28 = vmul.f32 0.01, %v1868_v55  ;;  %vm1612_vm2 = vcmask 1048064  }
 0x1d5   : > { %1555 = vrot.lane.b32.xlu1 %v1496_v56, %s11590_s18  ;;  %v8726_v52 = vpop.f32.mrb[99].mxu1  ;;  %v12550_v45 = vadd.f32 %v8629_v60, %v8628_v37  ;;  %v8631_v32 = vpop.f32.mrb[98].mxu0  ;;  %15714 = vst [vmem:[#allocation41_spill] sm:$0xff] %v12557_v11  ;;  %v3363_v37 = vld [vmem:[%s15637_s3 + $0x58] sm:$0xff]  ;;  %v2476_v60 = vmul.f32 0.01, %v2386_v27 }
 0x1d6   : > { %v12554_v38 = vpop.permute.xlu0 %1448  ;;  %v917_v33 = vpop.permute.xlu1 %916  ;;  %v12559_v29 = vadd.f32 %v8726_v52, %v8725_v1  ;;  %10318 = vmatpush1.bf16.msra.mxu1 %v10317_v57  ;;  %v12578_v1 = vsel %vm1937_vm3, %v1868_v55, %v1962_v28  ;;  %vm2451_vm4 = vcmp.gt.f32.partialorder %v2386_v27, 0.0 }
 0x1d7   : > { %15713 = vst [vmem:[#allocation40_spill] sm:$0xff] %v12554_v38  ;;  %v982_v25 = vmax.f32 %v12149_v2, %v917_v33  ;;  %2561 = vrot.lane.b32.xlu0 %v12557_v11, %s11590_s18  ;;  %v8632_v56 = vpop.f32.mrb[99].mxu0  ;;  %10319 = vmatprep.subr.bf16.mxu1 %v15710_v58  ;;  %v10320_v2 = vpack.c.bf16 %v3363_v37, %v3362_v23  ;;  %15716 = vst [vmem:[#allocation43_spill] sm:$0xff] %v12578_v1 }
 0x1d8   : > { %v12570_v63 = vadd.f32 %v8632_v56, %v8631_v32  ;;  %v1873_v33 = vadd.f32 %v12347_v17, %v12386_v54  ;;  %v3365_v54 = vld [vmem:[%s15637_s3 + $0x68] sm:$0xff]  ;;  %v12600_v38 = vsel %vm2451_vm4, %v2386_v27, %v2476_v60 }
 0x1d9   : > { %1008 = vst.msk [vmem:[#allocation2 + $0xd8] sm:$0xff] %vm998_vm13, %v982_v25  ;;  %v3364_v25 = vld [vmem:[%s15637_s3 + $0x60] sm:$0xff] }
 0x1da   : > { %v12576_v39 = vpop.permute.xlu0 %1450  ;;  %v1433_v40 = vpop.permute.xlu1 %1432  ;;  %10321 = vmatpush1.bf16.msra.mxu1 %v10320_v2  ;;  %v10323_v28 = vpack.c.bf16 %v3365_v54, %v3364_v25  ;;  %v1963_v2 = vmul.f32 0.01, %v1873_v33  ;;  %vm1938_vm5 = vcmp.gt.f32.partialorder %v1873_v33, 0.0  ;;  %v3366_v25 = vld [vmem:[%s15637_s3 + $0x70] sm:$0xff] }
 0x1db   : > { %15715 = vst [vmem:[#allocation42_spill] sm:$0xff] %v12576_v39  ;;  %v1497_v52 = vmax.f32 %v12166_v49, %v1433_v40  ;;  %2048 = vrot.lane.b32.xlu0 %v12578_v1, %s11590_s18  ;;  %v8728_v57 = vpop.f32.mrb[100].mxu1  ;;  %v8634_v32 = vpop.f32.mrb[100].mxu0  ;;  %10322 = vmatprep.subr.bf16.mxu1 %v15710_v58  ;;  %v2389_v39 = vadd.f32 %v12347_v17, %v12392_v16  ;;  %v3367_v16 = vld [vmem:[%s15637_s3 + $0x78] sm:$0xff] }
 0x1dc   : > { %v8729_v56 = vpop.f32.mrb[101].mxu1  ;;  %v8635_v55 = vpop.f32.mrb[101].mxu0  ;;  %v10326_v27 = vpack.c.bf16 %v3367_v16, %v3366_v25  ;;  %v12617_v54 = vsel %vm1938_vm5, %v1873_v33, %v1963_v2 }
 0x1dd   : > { %1557 = vrot.lane.b32.xlu1 %v1497_v52, %s11590_s18  ;;  %v12590_v49 = vadd.f32 %v8729_v56, %v8728_v57  ;;  %v8731_v23 = vpop.f32.mrb[102].mxu1  ;;  %v12592_v37 = vadd.f32 %v8635_v55, %v8634_v32  ;;  %v8637_v40 = vpop.f32.mrb[102].mxu0  ;;  %v2477_v56 = vmul.f32 0.01, %v2389_v39  ;;  %vm2452_vm6 = vcmp.gt.f32.partialorder %v2389_v39, 0.0 }
 0x1de   : > { %v12597_v1 = vpop.permute.xlu0 %1452  ;;  %v919_v11 = vpop.permute.xlu1 %918  ;;  %10324 = vmatpush1.bf16.msra.mxu1 %v10323_v28  ;;  %v3368_v28 = vld [vmem:[%s15637_s3 + $0x80] sm:$0xff] }
 0x1df   : > { %v983_v52 = vmax.f32 %v12177_v30, %v919_v11  ;;  %2563 = vrot.lane.b32.xlu0 %v12600_v38, %s11590_s18  ;;  %v8732_v57 = vpop.f32.mrb[103].mxu1  ;;  %v8638_v32 = vpop.f32.mrb[103].mxu0  ;;  %10325 = vmatprep.subr.bf16.mxu1 %v15710_v58  ;;  %v1876_v30 = vadd.f32 %v12347_v17, %v12397_v42  ;;  %v3369_v42 = vld [vmem:[%s15637_s3 + $0x88] sm:$0xff]  ;;  %v12634_v2 = vsel %vm2452_vm6, %v2389_v39, %v2477_v56 }
 0x1e0   : > { %v10329_v23 = vpack.c.bf16 %v3369_v42, %v3368_v28  ;;  %v3370_v32 = vld [vmem:[%s15637_s3 + $0x90] sm:$0xff] }
 0x1e1   : > { %1009 = vst.msk [vmem:[#allocation2 + $0xf0] sm:$0xff] %vm998_vm13, %v983_v52  ;;  %v1964_v52 = vmul.f32 0.01, %v1876_v30  ;;  %vm1939_vm7 = vcmp.gt.f32.partialorder %v1876_v30, 0.0 }
 0x1e2   : > { %v12615_v11 = vpop.permute.xlu0 %1454  ;;  %v1435_v60 = vpop.permute.xlu1 %1434  ;;  %10327 = vmatpush1.bf16.msra.mxu1 %v10326_v27 }
 0x1e3   : > { %v1498_v55 = vmax.f32 %v12194_v4, %v1435_v60  ;;  %2050 = vrot.lane.b32.xlu0 %v12617_v54, %s11590_s18  ;;  %10328 = vmatprep.subr.bf16.mxu1 %v15710_v58  ;;  %v2394_v4 = vadd.f32 %v12347_v17, %v12407_v61  ;;  %v3371_v61 = vld [vmem:[%s15637_s3 + $0x98] sm:$0xff]  ;;  %v12649_v16 = vsel %vm1939_vm7, %v1876_v30, %v1964_v52  ;;  %v3374_v52 = vld [vmem:[%s15637_s3 + $0xb0] sm:$0xff] }
 0x1e4   : > { %v10332_v25 = vpack.c.bf16 %v3371_v61, %v3370_v32 }
 0x1e5   : > { %1559 = vrot.lane.b32.xlu1 %v1498_v55, %s11590_s18  ;;  %v2478_v27 = vmul.f32 0.01, %v2394_v4  ;;  %vm2453_vm8 = vcmp.gt.f32.partialorder %v2394_v4, 0.0  ;;  %v3372_v55 = vld [vmem:[%s15637_s3 + $0xa0] sm:$0xff] }
 0x1e6   : > { %v12632_v33 = vpop.permute.xlu0 %1456  ;;  %v921_v40 = vpop.permute.xlu1 %920  ;;  %10330 = vmatpush1.bf16.msra.mxu1 %v10329_v23 }
 0x1e7   : > { %v984_v57 = vmax.f32 %v12201_v14, %v921_v40  ;;  %2565 = vrot.lane.b32.xlu0 %v12634_v2, %s11590_s18  ;;  %10331 = vmatprep.subr.bf16.mxu1 %v15710_v58  ;;  %v1881_v14 = vadd.f32 %v12347_v17, %v12410_v15  ;;  %v3373_v15 = vld [vmem:[%s15637_s3 + $0xa8] sm:$0xff]  ;;  %v12666_v42 = vsel %vm2453_vm8, %v2394_v4, %v2478_v27 }
 0x1e8   : > { %v10335_v30 = vpack.c.bf16 %v3373_v15, %v3372_v55  ;;  %v1884_v4 = vadd.f32 %v12347_v17, %v12421_v26  ;;  %v3376_v26 = vld [vmem:[%s15637_s3 + $0xc0] sm:$0xff]  ;;  %v3377_v27 = vld [vmem:[%s15637_s3 + $0xc8] sm:$0xff]  ;;  %v2402_v15 = vadd.f32 %v12347_v17, %v12431_v51 }
 0x1e9   : > { %1010 = vst.msk [vmem:[#allocation2 + $0x108] sm:$0xff] %vm998_vm13, %v984_v57  ;;  %v1965_v23 = vmul.f32 0.01, %v1881_v14  ;;  %vm1940_vm9 = vcmp.gt.f32.partialorder %v1881_v14, 0.0  ;;  %v3375_v57 = vld [vmem:[%s15637_s3 + $0xb8] sm:$0xff]  ;;  %v10341_v55 = vpack.c.bf16 %v3377_v27, %v3376_v26 }
 0x1ea   : > { %v1437_v39 = vpop.permute.xlu1 %1436  ;;  %v12651_v60 = vpop.permute.xlu0 %1458  ;;  %10333 = vmatpush1.bf16.msra.mxu1 %v10332_v25  ;;  %vm1941_vm11 = vcmp.gt.f32.partialorder %v1884_v4, 0.0  ;;  %vm2455_vm12 = vcmp.gt.f32.partialorder %v2402_v15, 0.0 }
 0x1eb   : > { %v1499_v56 = vmax.f32 %v12218_v8, %v1437_v39  ;;  %2052 = vrot.lane.b32.xlu0 %v12649_v16, %s11590_s18  ;;  %10334 = vmatprep.subr.bf16.mxu1 %v15710_v58  ;;  %v2397_v8 = vadd.f32 %v12347_v17, %v12416_v31  ;;  %v10338_v31 = vpack.c.bf16 %v3375_v57, %v3374_v52  ;;  %v3378_v52 = vld [vmem:[%s15637_s3 + $0xd0] sm:$0xff]  ;;  %v3379_v57 = vld [vmem:[%s15637_s3 + $0xd8] sm:$0xff] }
 0x1ec   : > { %v12683_v61 = vsel %vm1940_vm9, %v1881_v14, %v1965_v23 }
 0x1ed   : > { %1561 = vrot.lane.b32.xlu1 %v1499_v56, %s11590_s18  ;;  %v2479_v25 = vmul.f32 0.01, %v2397_v8  ;;  %vm2454_vm10 = vcmp.gt.f32.partialorder %v2397_v8, 0.0  ;;  %v8750_v56 = vpop.f32.mrb[104].mxu0 }
 0x1ee   : > { %v923_v28 = vpop.permute.xlu1 %922  ;;  %10336 = vmatpush1.bf16.msra.mxu1 %v10335_v30  ;;  %v12679_v32 = vpop.permute.xlu0 %1460 }
 0x1ef   : > { %v985_v40 = vmax.f32 %v12228_v6, %v923_v28  ;;  %2567 = vrot.lane.b32.xlu0 %v12666_v42, %s11590_s18  ;;  %10337 = vmatprep.subr.bf16.mxu1 %v15710_v58  ;;  %v12700_v28 = vsel %vm2454_vm10, %v2397_v8, %v2479_v25 }
 0x1f1   : > { %1011 = vst.msk [vmem:[#allocation2 + $0x120] sm:$0xff] %vm998_vm13, %v985_v40  ;;  %v8751_v40 = vpop.f32.mrb[105].mxu0 }
 0x1f2   : > { %v1439_v6 = vpop.permute.xlu1 %1438  ;;  %10339 = vmatpush1.bf16.msra.mxu1 %v10338_v31  ;;  %v12711_v51 = vadd.f32 %v8751_v40, %v8750_v56  ;;  %v8753_v8 = vpop.f32.mrb[106].mxu0  ;;  %v10344_v31 = vpack.c.bf16 %v3379_v57, %v3378_v52  ;;  %v2405_v52 = vadd.f32 %v12347_v17, %v12440_v44 }
 0x1f3   : > { %v1500_v39 = vmax.f32 %v12240_v19, %v1439_v6  ;;  %2054 = vrot.lane.b32.xlu0 %v12683_v61, %s11590_s18  ;;  %v1966_v19 = vmul.f32 0.01, %v1884_v4  ;;  %10340 = vmatprep.subr.bf16.mxu1 %v15710_v58  ;;  %v8754_v25 = vpop.f32.mrb[107].mxu0 }
 0x1f4   : > { %v8756_v56 = vpop.f32.mrb[108].mxu0  ;;  %vm2456_vm15 = vcmp.gt.f32.partialorder %v2405_v52, 0.0 }
 0x1f5   : > { %1563 = vrot.lane.b32.xlu1 %v1500_v39, %s11590_s18  ;;  %v12695_v14 = vpop.permute.xlu0 %2539  ;;  %v12714_v6 = vsel %vm1941_vm11, %v1884_v4, %v1966_v19  ;;  %v1889_v39 = vadd.f32 %v12347_v17, %v12434_v50  ;;  %v8757_v4 = vpop.f32.mrb[109].mxu0  ;;  %v3380_v19 = vld [vmem:[%s15637_s3 + $0xe0] sm:$0xff] }
 0x1f6   : > { %v925_v30 = vpop.permute.xlu1 %924  ;;  %10342 = vmatpush1.bf16.msra.mxu1 %v10341_v55  ;;  %v12720_v55 = vadd.f32 %v8754_v25, %v8753_v8  ;;  %v12732_v50 = vadd.f32 %v8757_v4, %v8756_v56  ;;  %v1502_v56 = vmax.f32 %v12102_v0, %v12488_v5  ;;  %v2481_v4 = vmul.f32 0.01, %v2405_v52 }
 0x1f7   : > { %v986_v23 = vmax.f32 %v12251_v53, %v925_v30  ;;  %2569 = vrot.lane.b32.xlu0 %v12700_v28, %s11590_s18  ;;  %10343 = vmatprep.subr.bf16.mxu1 %v15710_v58  ;;  %v2480_v30 = vmul.f32 0.01, %v2402_v15  ;;  %vm1942_vm14 = vcmp.gt.f32.partialorder %v1889_v39, 0.0 }
 0x1f9   : > { %1012 = vst.msk [vmem:[#allocation2 + $0x138] sm:$0xff] %vm998_vm13, %v986_v23  ;;  %v2027_v53 = vpop.permute.xlu0 %2026  ;;  %v8759_v23 = vpop.f32.mrb[110].mxu0 }
 0x1fa   : > { %v2101_v26 = vmax.f32 %v12258_v21, %v2027_v53  ;;  %v1441_v27 = vpop.permute.xlu1 %1440  ;;  %v3381_v21 = vld [vmem:[%s15637_s3 + $0xe8] sm:$0xff]  ;;  %10345 = vmatpush1.bf16.msra.mxu1 %v10344_v31  ;;  %v8760_v8 = vpop.f32.mrb[111].mxu0  ;;  %v1967_v31 = vmul.f32 0.01, %v1889_v39 }
 0x1fb   : > { %v1501_v40 = vmax.f32 %v12262_v43, %v1441_v27  ;;  %2056 = vrot.lane.b32.xlu0 %v12714_v6, %s11590_s18  ;;  %v10347_v43 = vpack.c.bf16 %v3381_v21, %v3380_v19  ;;  %10346 = vmatprep.subr.bf16.mxu1 %v15710_v58  ;;  %v12740_v27 = vsel %vm2455_vm12, %v2402_v15, %v2480_v30  ;;  %v3383_v15 = vld [vmem:[%s15637_s3 + $0xf8] sm:$0xff] }
 0x1fc   : > { %2126 = vst.msk [vmem:[#allocation2 + $0x8] sm:$0xff] %vm998_vm13, %v2101_v26  ;;  %v12742_v26 = vadd.f32 %v8760_v8, %v8759_v23  ;;  %v1503_v19 = vmax.f32 %v12116_v13, %v12507_v48  ;;  %v12774_v48 = vsel %vm2456_vm15, %v2405_v52, %v2481_v4 }
 0x1fd   : > { %1565 = vrot.lane.b32.xlu1 %v1501_v40, %s11590_s18  ;;  %v2029_v57 = vpop.permute.xlu0 %2028  ;;  %v12761_v40 = vsel %vm1942_vm14, %v1889_v39, %v1967_v31  ;;  %v2418_v31 = vadd.f32 %v12347_v17, %v12500_v18  ;;  %v2421_v18 = vadd.f32 %v12347_v17, %v12516_v62 }
 0x1fe   : > { %v2102_v53 = vmax.f32 %v12269_v12, %v2029_v57  ;;  %v927_v25 = vpop.permute.xlu1 %926  ;;  %v3382_v12 = vld [vmem:[%s15637_s3 + $0xf0] sm:$0xff]  ;;  %10348 = vmatpush1.bf16.msra.mxu1 %v10347_v43  ;;  %v2614_v43 = vmax.f32 %v12245_v59, %v12695_v14 }
 0x1ff   : > { %v987_v44 = vmax.f32 %v12273_v36, %v927_v25  ;;  %2571 = vrot.lane.b32.xlu0 %v12740_v27, %s11590_s18  ;;  %v10350_v30 = vpack.c.bf16 %v3383_v15, %v3382_v12  ;;  %10349 = vmatprep.subr.bf16.mxu1 %v15710_v58  ;;  %v1892_v36 = vadd.f32 %v12347_v17, %v12445_v47  ;;  %v15717_v57 = vld [vmem:[#allocation23_spill] sm:$0xff]  ;;  %vm2459_vm4 = vcmp.gt.f32.partialorder %v2418_v31, 0.0 }
 0x200   : > { %2127 = vst.msk [vmem:[#allocation2 + $0x20] sm:$0xff] %vm998_vm13, %v2102_v53  ;;  %v2410_v47 = vadd.f32 %v12347_v17, %v12458_v46  ;;  %v2413_v46 = vadd.f32 %v12347_v17, %v12472_v9  ;;  %vm2460_vm5 = vcmp.gt.f32.partialorder %v2421_v18, 0.0 }
 0x201   : > { %1013 = vst.msk [vmem:[#allocation2 + $0x150] sm:$0xff] %vm998_vm13, %v987_v44  ;;  %1567 = vrot.lane.b32.xlu1 %v1502_v56, %s11590_s18  ;;  %v2544_v0 = vpop.permute.xlu0 %2543  ;;  %vm1943_vm0 = vcmp.gt.f32.partialorder %v1892_v36, 0.0  ;;  %v15718_v56 = vld [vmem:[#allocation25_spill] sm:$0xff] }
 0x202   : > { %v929_v5 = vpop.permute.xlu1 %928  ;;  %10351 = vmatpush1.bf16.msra.mxu1 %v10350_v30  ;;  %v2482_v59 = vmul.f32 0.01, %v2410_v47  ;;  %vm2457_vm1 = vcmp.gt.f32.partialorder %v2410_v47, 0.0  ;;  %v2483_v15 = vmul.f32 0.01, %v2413_v46  ;;  %v15719_v30 = vld [vmem:[#allocation22_spill] sm:$0xff] }
 0x203   : > { %v988_v21 = vmax.f32 %v12277_v41, %v929_v5  ;;  %2058 = vrot.lane.b32.xlu0 %v12761_v40, %s11590_s18  ;;  %10352 = vmatprep.subr.bf16.mxu1 %v15710_v58  ;;  %v1968_v41 = vmul.f32 0.01, %v1892_v36  ;;  %vm2458_vm3 = vcmp.gt.f32.partialorder %v2413_v46, 0.0 }
 0x204   : > { %v12795_v12 = vsel %vm2457_vm1, %v2410_v47, %v2482_v59  ;;  %v12805_v4 = vsel %vm2458_vm3, %v2413_v46, %v2483_v15  ;;  %v2485_v47 = vmul.f32 0.01, %v2421_v18  ;;  %v2434_v59 = vadd.f32 %v12347_v17, %v12590_v49 }
 0x205   : > { %1014 = vst.msk [vmem:[#allocation2 + $0x168] sm:$0xff] %vm998_vm13, %v988_v21  ;;  %1569 = vrot.lane.b32.xlu1 %v1503_v19, %s11590_s18  ;;  %v2031_v23 = vpop.permute.xlu0 %2030  ;;  %v12786_v53 = vsel %vm1943_vm0, %v1892_v36, %v1968_v41  ;;  %v2616_v36 = vmax.f32 %v15719_v30, %v2544_v0  ;;  %v2484_v19 = vmul.f32 0.01, %v2418_v31  ;;  %v15720_v21 = vld [vmem:[#allocation24_spill] sm:$0xff] }
 0x206   : > { %v2103_v39 = vmax.f32 %v12293_v10, %v2031_v23  ;;  %v931_v13 = vpop.permute.xlu1 %930  ;;  %v12826_v46 = vsel %vm2460_vm5, %v2421_v18, %v2485_v47  ;;  %vm2463_vm8 = vcmp.gt.f32.partialorder %v2434_v59, 0.0  ;;  %v15723_v18 = vld [vmem:[#allocation34_spill] sm:$0xff] }
 0x207   : > { %v989_v8 = vmax.f32 %v15717_v57, %v931_v13  ;;  %2573 = vrot.lane.b32.xlu0 %v12774_v48, %s11590_s18  ;;  %v12815_v41 = vsel %vm2459_vm4, %v2418_v31, %v2484_v19  ;;  %v1897_v31 = vadd.f32 %v12347_v17, %v12464_v24  ;;  %v1900_v24 = vadd.f32 %v12347_v17, %v15723_v18 }
 0x208   : > { %2128 = vst.msk [vmem:[#allocation2 + $0x38] sm:$0xff] %vm998_vm13, %v2103_v39  ;;  %v2426_v39 = vadd.f32 %v12347_v17, %v12546_v3 }
 0x209   : > { %1015 = vst.msk [vmem:[#allocation2 + $0x180] sm:$0xff] %vm998_vm13, %v989_v8  ;;  %2664 = vrot.lane.b32.xlu1 %v2614_v43, %s11590_s18  ;;  %v2546_v10 = vpop.permute.xlu0 %2545  ;;  %vm1944_vm9 = vcmp.gt.f32.partialorder %v1897_v31, 0.0  ;;  %vm1945_vm10 = vcmp.gt.f32.partialorder %v1900_v24, 0.0 }
 0x20a   : > { %v2542_v52 = vpop.permute.xlu1 %2541  ;;  %v2617_v0 = vmax.f32 %v15720_v21, %v2546_v10  ;;  %v2486_v8 = vmul.f32 0.01, %v2426_v39  ;;  %vm2461_vm6 = vcmp.gt.f32.partialorder %v2426_v39, 0.0 }
 0x20b   : > { %v2615_v14 = vmax.f32 %v12314_v7, %v2542_v52  ;;  %2060 = vrot.lane.b32.xlu0 %v12786_v53, %s11590_s18 }
 0x20d   : > { %2666 = vrot.lane.b32.xlu1 %v2615_v14, %s11590_s18  ;;  %v2033_v25 = vpop.permute.xlu0 %2032  ;;  %v15721_v14 = vld [vmem:[#allocation26_spill] sm:$0xff] }
 0x20e   : > { %v2104_v44 = vmax.f32 %v15718_v56, %v2033_v25  ;;  %v1538_v9 = vpop.permute.xlu1 %1537  ;;  %v12835_v25 = vsel %vm2461_vm6, %v2426_v39, %v2486_v8  ;;  %v12867_v8 = vld [vmem:[%s15636_s2] ss:$0 sm:$0xff] }
 0x20f   : > { %1613 = vst.msk [vmem:[#allocation2] sm:$0xff] %vm1612_vm2, %v1538_v9  ;;  %2575 = vrot.lane.b32.xlu0 %v12795_v12, %s11590_s18  ;;  %v15722_v9 = vld [vmem:[#allocation27_spill] sm:$0xff] }
 0x210   : > { %2129 = vst.msk [vmem:[#allocation2 + $0x50] sm:$0xff] %vm998_vm13, %v2104_v44  ;;  %v2488_v44 = vmul.f32 0.01, %v2434_v59  ;;  %v8762_v30 = vpop.f32.mrb[112].mxu0 }
 0x211   : > { %2668 = vrot.lane.b32.xlu1 %v2616_v36, %s11590_s18  ;;  %v2548_v7 = vpop.permute.xlu0 %2547  ;;  %v8763_v36 = vpop.f32.mrb[113].mxu0 }
 0x212   : > { %v1540_v5 = vpop.permute.xlu1 %1539  ;;  %v2618_v43 = vmax.f32 %v12334_v22, %v2548_v7  ;;  %v1969_v7 = vmul.f32 0.01, %v1897_v31  ;;  %v8765_v19 = vpop.f32.mrb[114].mxu0  ;;  %v12854_v39 = vsel %vm2463_vm8, %v2434_v59, %v2488_v44  ;;  %v11497_v44 = vld [vmem:[%s11763_s25 + $0x254] ss:$40 sps:$4 sm:$0xff]  }
 0x213   : > { %1614 = vst.msk [vmem:[#allocation2 + $0x18] sm:$0xff] %vm1612_vm2, %v1540_v5  ;;  %2577 = vrot.lane.b32.xlu0 %v12805_v4, %s11590_s18  ;;  %v12851_v5 = vadd.f32 %v8763_v36, %v8762_v30  ;;  %v1913_v36 = vadd.f32 %v12867_v8, %v12550_v45  ;;  %v1916_v45 = vadd.f32 %v12867_v8, %v12570_v63 }
 0x215   : > { %2670 = vrot.lane.b32.xlu1 %v2617_v0, %s11590_s18  ;;  %v2035_v23 = vpop.permute.xlu0 %2034  ;;  %v8766_v0 = vpop.f32.mrb[115].mxu0  ;;  %vm1948_vm14 = vcmp.gt.f32.partialorder %v1913_v36, 0.0  ;;  %v1974_v63 = vmul.f32 0.01, %v1916_v45  ;;  %vm1949_vm15 = vcmp.gt.f32.partialorder %v1916_v45, 0.0 }
 0x216   : > { %v2105_v62 = vmax.f32 %v12353_v34, %v2035_v23  ;;  %v1542_v13 = vpop.permute.xlu1 %1541  ;;  %v2429_v34 = vadd.f32 %v12347_v17, %v12559_v29  ;;  %v15724_v23 = vld [vmem:[#allocation28_spill] sm:$0xff]  ;;  %v1970_v17 = vmul.f32 0.01, %v1900_v24 }
 0x217   : > { %1615 = vst.msk [vmem:[#allocation2 + $0x30] sm:$0xff] %vm1612_vm2, %v1542_v13  ;;  %2579 = vrot.lane.b32.xlu0 %v12815_v41, %s11590_s18  ;;  %v11494_v13 = vld [vmem:[%s11763_s25 + $0x204] ss:$40 sps:$4 sm:$0xff]  }
 0x218   : > { %2130 = vst.msk [vmem:[#allocation2 + $0x68] sm:$0xff] %vm998_vm13, %v2105_v62  ;;  %v2487_v52 = vmul.f32 0.01, %v2429_v34  ;;  %vm2462_vm7 = vcmp.gt.f32.partialorder %v2429_v34, 0.0  ;;  %v12856_v62 = vadd.f32 %v8766_v0, %v8765_v19  ;;  %2996 = vmatprep.mubr.bf16.mxu0 %v11494_v13  ;;  %v15728_v19 = vld [vmem:[#allocation31_spill] sm:$0xff] }
 0x219   : > { %2672 = vrot.lane.b32.xlu1 %v2618_v43, %s11590_s18  ;;  %v2550_v57 = vpop.permute.xlu0 %2549 }
 0x21a   : > { %v2619_v3 = vmax.f32 %v12365_v20, %v2550_v57  ;;  %v1544_v10 = vpop.permute.xlu1 %1543  ;;  %v12844_v15 = vsel %vm2462_vm7, %v2429_v34, %v2487_v52  ;;  %v11496_v57 = vld [vmem:[%s11763_s25 + $0x200] ss:$40 sps:$4 sm:$0xff]   ;;  %v1905_v34 = vadd.f32 %v12867_v8, %v12509_v35 }
 0x21b   : > { %1616 = vst.msk [vmem:[#allocation2 + $0x48] sm:$0xff] %vm1612_vm2, %v1544_v10  ;;  %2581 = vrot.lane.b32.xlu0 %v12826_v46, %s11590_s18  ;;  %2997 = vmatmul.mubr.bf16.gmra.mrb[128].mxu0 %v11496_v57 }
 0x21c   : > { %v1971_v59 = vmul.f32 0.01, %v1905_v34  ;;  %vm1946_vm11 = vcmp.gt.f32.partialorder %v1905_v34, 0.0  ;;  %3004 = vmatprep.mubr.bf16.mxu0 %v11497_v44 }
 0x21d   : > { %2674 = vrot.lane.b32.xlu1 %v2619_v3, %s11590_s18  ;;  %v2037_v22 = vpop.permute.xlu0 %2036  ;;  %v12871_v3 = vsel %vm1944_vm9, %v1897_v31, %v1969_v7  ;;  %v15727_v31 = vld [vmem:[#allocation30_spill] sm:$0xff] }
 0x21e   : > { %v2106_v29 = vmax.f32 %v15721_v14, %v2037_v22  ;;  %v15725_v22 = vld [vmem:[#allocation29_spill] sm:$0xff]  ;;  %v12890_v7 = vsel %vm1946_vm11, %v1905_v34, %v1971_v59  ;;  %v15729_v34 = vld [vmem:[#allocation32_spill] sm:$0xff]  ;;  %v15730_v59 = vld [vmem:[#allocation6_spill] sm:$0xff] }
 0x21f   : > { %v1546_v20 = vpop.permute.xlu1 %1545  ;;  %2583 = vrot.lane.b32.xlu0 %v12835_v25, %s11590_s18  ;;  %v15726_v14 = vld [vmem:[#allocation37_spill] sm:$0xff] }
 0x220   : > { %2131 = vst.msk [vmem:[#allocation2 + $0x80] sm:$0xff] %vm998_vm13, %v2106_v29  ;;  %v1908_v29 = vadd.f32 %v12867_v8, %v15726_v14  ;;  %v764_v14 = vadd.f32 %v12867_v8, %v15730_v59 }
 0x221   : > { %1617 = vst.msk [vmem:[#allocation2 + $0x60] sm:$0xff] %vm1612_vm2, %v1546_v20  ;;  %v2552_v56 = vpop.permute.xlu0 %2551  ;;  %v12879_v20 = vsel %vm1945_vm10, %v1900_v24, %v1970_v17 }
 0x222   : > { %v2620_v49 = vmax.f32 %v15722_v9, %v2552_v56  ;;  %v1972_v30 = vmul.f32 0.01, %v1908_v29  ;;  %vm1947_vm12 = vcmp.gt.f32.partialorder %v1908_v29, 0.0  ;;  %vm815_vm0 = vcmp.gt.f32.partialorder %v764_v14, 0.0 }
 0x223   : > { %2585 = vrot.lane.b32.xlu0 %v12844_v15, %s11590_s18 }
 0x224   : > { %2676 = vrot.lane.b32.xlu1 %v2620_v49, %s11590_s18  ;;  %v11499_v49 = vld [vmem:[%s11763_s25 + $0x250] ss:$40 sps:$4 sm:$0xff]   ;;  %v12900_v13 = vsel %vm1947_vm12, %v1908_v29, %v1972_v30  ;;  %v1921_v29 = vadd.f32 %v12867_v8, %v12592_v37  ;;  %v12923_v37 = vsel %vm1949_vm15, %v1916_v45, %v1974_v63 }
 0x225   : > { %v2039_v21 = vpop.permute.xlu0 %2038  ;;  %3005 = vmatmul.mubr.bf16.gmra.mrb[132].mxu0 %v11499_v49  ;;  %v15731_v49 = vld [vmem:[#allocation33_spill] sm:$0xff]  ;;  %v11505_v45 = vld [vmem:[%s11763_s25 + $0x2f0] ss:$40 sps:$4 sm:$0xff]  }
 0x226   : > { %v2107_v47 = vmax.f32 %v15724_v23, %v2039_v21  ;;  %vm1950_vm1 = vcmp.gt.f32.partialorder %v1921_v29, 0.0 }
 0x227   : > { %v1548_v43 = vpop.permute.xlu1 %1547  ;;  %2587 = vrot.lane.b32.xlu0 %v12854_v39, %s11590_s18 }
 0x228   : > { %2132 = vst.msk [vmem:[#allocation2 + $0x98] sm:$0xff] %vm998_vm13, %v2107_v47  ;;  %v8768_v24 = vpop.f32.mrb[116].mxu0  ;;  %v1973_v47 = vmul.f32 0.01, %v1913_v36 }
 0x229   : > { %1618 = vst.msk [vmem:[#allocation2 + $0x78] sm:$0xff] %vm1612_vm2, %v1548_v43  ;;  %v2554_v10 = vpop.permute.xlu0 %2553  ;;  %v8769_v0 = vpop.f32.mrb[117].mxu0 }
 0x22a   : > { %v2621_v52 = vmax.f32 %v15725_v22, %v2554_v10  ;;  %v12895_v23 = vadd.f32 %v8769_v0, %v8768_v24  ;;  %v8771_v43 = vpop.f32.mrb[118].mxu0  ;;  %v840_v24 = vmul.f32 0.01, %v764_v14 }
 0x22b   : > { %2062 = vrot.lane.b32.xlu0 %v12871_v3, %s11590_s18  ;;  %v8772_v17 = vpop.f32.mrb[119].mxu0 }
 0x22c   : > { %2678 = vrot.lane.b32.xlu1 %v2621_v52, %s11590_s18  ;;  %v12903_v22 = vadd.f32 %v8772_v17, %v8771_v43  ;;  %v11500_v52 = vld [vmem:[%s11763_s25 + $0x2a4] ss:$40 sps:$4 sm:$0xff]   ;;  %v15732_v43 = vld [vmem:[#allocation35_spill] sm:$0xff] }
 0x22d   : > { %v2041_v35 = vpop.permute.xlu0 %2040  ;;  %3012 = vmatprep.mubr.bf16.mxu0 %v11500_v52 }
 0x22e   : > { %v2108_v56 = vmax.f32 %v15727_v31, %v2041_v35  ;;  %v11502_v31 = vld [vmem:[%s11763_s25 + $0x2a0] ss:$40 sps:$4 sm:$0xff]  }
 0x22f   : > { %v1550_v9 = vpop.permute.xlu1 %1549  ;;  %2064 = vrot.lane.b32.xlu0 %v12879_v20, %s11590_s18  ;;  %3013 = vmatmul.mubr.bf16.gmra.mrb[136].mxu0 %v11502_v31 }
 0x230   : > { %2133 = vst.msk [vmem:[#allocation2 + $0xb0] sm:$0xff] %vm998_vm13, %v2108_v56  ;;  %v12915_v56 = vsel %vm1948_vm14, %v1913_v36, %v1973_v47 }
 0x231   : > { %1619 = vst.msk [vmem:[#allocation2 + $0x90] sm:$0xff] %vm1612_vm2, %v1550_v9  ;;  %v2556_v18 = vpop.permute.xlu0 %2555  ;;  %v8774_v9 = vpop.f32.mrb[120].mxu0 }
 0x232   : > { %v2622_v21 = vmax.f32 %v15728_v19, %v2556_v18  ;;  %v8775_v18 = vpop.f32.mrb[121].mxu0 }
 0x233   : > { %2066 = vrot.lane.b32.xlu0 %v12890_v7, %s11590_s18  ;;  %v12920_v19 = vadd.f32 %v8775_v18, %v8774_v9  ;;  %v8777_v36 = vpop.f32.mrb[122].mxu0  ;;  %v15734_v9 = vld [vmem:[#allocation38_spill] sm:$0xff] }
 0x234   : > { %2680 = vrot.lane.b32.xlu1 %v2622_v21, %s11590_s18  ;;  %v1975_v21 = vmul.f32 0.01, %v1921_v29  ;;  %v8778_v47 = vpop.f32.mrb[123].mxu0 }
 0x235   : > { %v2043_v57 = vpop.permute.xlu0 %2042  ;;  %v12926_v17 = vadd.f32 %v8778_v47, %v8777_v36 }
 0x236   : > { %v2109_v10 = vmax.f32 %v15729_v34, %v2043_v57  ;;  %v11503_v34 = vld [vmem:[%s11763_s25 + $0x2f4] ss:$40 sps:$4 sm:$0xff]   ;;  %v12940_v31 = vsel %vm1950_vm1, %v1921_v29, %v1975_v21 }
 0x237   : > { %v1552_v35 = vpop.permute.xlu1 %1551  ;;  %2068 = vrot.lane.b32.xlu0 %v12900_v13, %s11590_s18  ;;  %3020 = vmatprep.mubr.bf16.mxu0 %v11503_v34  ;;  %v15736_v21 = vld [vmem:[#allocation36_spill] sm:$0xff] }
 0x238   : > { %2134 = vst.msk [vmem:[#allocation2 + $0xc8] sm:$0xff] %vm998_vm13, %v2109_v10  ;;  %v15733_v10 = vld [vmem:[#allocation7_spill] sm:$0xff]  ;;  %3021 = vmatmul.mubr.bf16.gmra.mrb[140].mxu0 %v11505_v45 }
 0x239   : > { %1620 = vst.msk [vmem:[#allocation2 + $0xa8] sm:$0xff] %vm1612_vm2, %v1552_v35  ;;  %v2558_v44 = vpop.permute.xlu0 %2557  ;;  %v769_v52 = vadd.f32 %v12867_v8, %v15733_v10  ;;  %v12933_v35 = vsel %vm815_vm0, %v764_v14, %v840_v24  ;;  %v11506_v10 = vld [vmem:[%s11763_s25 + $0x344] ss:$40 sps:$4 sm:$0xff]  }
 0x23a   : > { %v2623_v30 = vmax.f32 %v15731_v49, %v2558_v44  ;;  %v8780_v44 = vpop.f32.mrb[124].mxu0  ;;  %v15735_v49 = vld [vmem:[#allocation9_spill] sm:$0xff]  ;;  %3028 = vmatprep.mubr.bf16.mxu0 %v11506_v10 }
 0x23b   : > { %2070 = vrot.lane.b32.xlu0 %v12915_v56, %s11590_s18  ;;  %v8781_v14 = vpop.f32.mrb[125].mxu0  ;;  %v841_v18 = vmul.f32 0.01, %v769_v52  ;;  %vm816_vm3 = vcmp.gt.f32.partialorder %v769_v52, 0.0 }
 0x23c   : > { %2682 = vrot.lane.b32.xlu1 %v2623_v30, %s11590_s18  ;;  %v1504_v30 = vmax.f32 %v15735_v49, %v15734_v9  ;;  %v12946_v24 = vadd.f32 %v8781_v14, %v8780_v44  ;;  %v8783_v29 = vpop.f32.mrb[126].mxu0  ;;  %v11508_v49 = vld [vmem:[%s11763_s25 + $0x340] ss:$40 sps:$4 sm:$0xff]  }
 0x23d   : > { %v2045_v0 = vpop.permute.xlu0 %2044  ;;  %v8784_v47 = vpop.f32.mrb[127].mxu0  ;;  %v12957_v44 = vsel %vm816_vm3, %v769_v52, %v841_v18  ;;  %v15740_v14 = vld [vmem:[#allocation10_spill] sm:$0xff] }
 0x23e   : > { %v2110_v57 = vmax.f32 %v15732_v43, %v2045_v0  ;;  %v15737_v43 = vld [vmem:[#allocation39_spill] sm:$0xff]  ;;  %v12951_v34 = vadd.f32 %v8784_v47, %v8783_v29 }
 0x23f   : > { %v1554_v59 = vpop.permute.xlu1 %1553  ;;  %2072 = vrot.lane.b32.xlu0 %v12923_v37, %s11590_s18 }
 0x240   : > { %2135 = vst.msk [vmem:[#allocation2 + $0xe0] sm:$0xff] %vm998_vm13, %v2110_v57  ;;  %932 = vrot.lane.b32.xlu1 %v12933_v35, %s11590_s18  ;;  %3029 = vmatmul.mubr.bf16.gmra.mrb[144].mxu0 %v11508_v49  ;;  %v11511_v49 = vld [vmem:[%s11763_s25 + $0x390] ss:$40 sps:$4 sm:$0xff]  }
 0x241   : > { %1621 = vst.msk [vmem:[#allocation2 + $0xc0] sm:$0xff] %vm1612_vm2, %v1554_v59  ;;  %v2560_v63 = vpop.permute.xlu0 %2559  ;;  %v15738_v59 = vld [vmem:[#allocation8_spill] sm:$0xff] }
 0x242   : > { %v2624_v36 = vmax.f32 %v15736_v21, %v2560_v63  ;;  %v772_v45 = vadd.f32 %v12867_v8, %v15738_v59  ;;  %v15741_v21 = vld [vmem:[#allocation41_spill] sm:$0xff] }
 0x243   : > { %2074 = vrot.lane.b32.xlu0 %v12940_v31, %s11590_s18 }
 0x244   : > { %1571 = vrot.lane.b32.xlu1 %v1504_v30, %s11590_s18  ;;  %v15739_v30 = vld [vmem:[#allocation40_spill] sm:$0xff]  ;;  %v842_v52 = vmul.f32 0.01, %v772_v45  ;;  %vm817_vm4 = vcmp.gt.f32.partialorder %v772_v45, 0.0 }
 0x245   : > { %v2047_v0 = vpop.permute.xlu0 %2046  ;;  %v1505_v29 = vmax.f32 %v15740_v14, %v15739_v30  ;;  %v15744_v30 = vld [vmem:[#allocation42_spill] sm:$0xff]  ;;  %v15745_v14 = vld [vmem:[#allocation13_spill] sm:$0xff] }
 0x246   : > { %v2111_v57 = vmax.f32 %v15737_v43, %v2047_v0  ;;  %v15742_v0 = vld [vmem:[#allocation43_spill] sm:$0xff] }
 0x247   : > { %v1556_v9 = vpop.permute.xlu1 %1555  ;;  %2684 = vrot.lane.b32.xlu0 %v2624_v36, %s11590_s18  ;;  %v11509_v43 = vld [vmem:[%s11763_s25 + $0x394] ss:$40 sps:$4 sm:$0xff]  }
 0x248   : > { %2136 = vst.msk [vmem:[#allocation2 + $0xf8] sm:$0xff] %vm998_vm13, %v2111_v57  ;;  %934 = vrot.lane.b32.xlu1 %v12957_v44, %s11590_s18  ;;  %v15743_v57 = vld [vmem:[#allocation11_spill] sm:$0xff]  ;;  %3036 = vmatprep.mubr.bf16.mxu0 %v11509_v43 }
 0x249   : > { %1622 = vst.msk [vmem:[#allocation2 + $0xd8] sm:$0xff] %vm1612_vm2, %v1556_v9  ;;  %v2562_v63 = vpop.permute.xlu0 %2561  ;;  %v777_v10 = vadd.f32 %v12867_v8, %v15743_v57  ;;  %v12973_v9 = vsel %vm817_vm4, %v772_v45, %v842_v52  ;;  %3037 = vmatmul.mubr.bf16.gmra.mrb[148].mxu0 %v11511_v49  ;;  %v15747_v57 = vld [vmem:[#allocation14_spill] sm:$0xff] }
 0x24a   : > { %v2625_v36 = vmax.f32 %v15741_v21, %v2562_v63 }
 0x24b   : > { %vm818_vm5 = vcmp.gt.f32.partialorder %v777_v10, 0.0 }
 0x24c   : > { %2686 = vrot.lane.b32.xlu0 %v2625_v36, %s11590_s18  ;;  %1573 = vrot.lane.b32.xlu1 %v1505_v29, %s11590_s18  ;;  %v1506_v29 = vmax.f32 %v15745_v14, %v15744_v30  ;;  %v843_v36 = vmul.f32 0.01, %v777_v10  ;;  %v15748_v30 = vld [vmem:[#allocation15_spill] sm:$0xff] }
 0x24d   : > { %v2049_v18 = vpop.permute.xlu0 %2048  ;;  %v785_v14 = vadd.f32 %v12867_v8, %v15748_v30 }
 0x24e   : > { %v2112_v47 = vmax.f32 %v15742_v0, %v2049_v18  ;;  %v15746_v18 = vld [vmem:[#allocation12_spill] sm:$0xff]  ;;  %v12988_v43 = vsel %vm818_vm5, %v777_v10, %v843_v36 }
 0x24f   : > { %v1558_v59 = vpop.permute.xlu1 %1557  ;;  %v780_v0 = vadd.f32 %v12867_v8, %v15746_v18  ;;  %vm820_vm7 = vcmp.gt.f32.partialorder %v785_v14, 0.0 }
 0x250   : > { %2137 = vst.msk [vmem:[#allocation2 + $0x110] sm:$0xff] %vm998_vm13, %v2112_v47  ;;  %936 = vrot.lane.b32.xlu1 %v12973_v9, %s11590_s18 }
 0x251   : > { %1623 = vst.msk [vmem:[#allocation2 + $0xf0] sm:$0xff] %vm1612_vm2, %v1558_v59  ;;  %v2564_v63 = vpop.permute.xlu0 %2563  ;;  %v1507_v59 = vmax.f32 %v15747_v57, %v12597_v1  ;;  %vm819_vm6 = vcmp.gt.f32.partialorder %v780_v0, 0.0 }
 0x252   : > { %v2626_v21 = vmax.f32 %v12600_v38, %v2564_v63 }
 0x254   : > { %2688 = vrot.lane.b32.xlu0 %v2626_v21, %s11590_s18  ;;  %1575 = vrot.lane.b32.xlu1 %v1506_v29, %s11590_s18 }
 0x255   : > { %v2051_v45 = vpop.permute.xlu0 %2050 }
 0x256   : > { %v2113_v52 = vmax.f32 %v12617_v54, %v2051_v45  ;;  %v844_v54 = vmul.f32 0.01, %v780_v0 }
 0x257   : > { %v1560_v47 = vpop.permute.xlu1 %1559 }
 0x258   : > { %2138 = vst.msk [vmem:[#allocation2 + $0x128] sm:$0xff] %vm998_vm13, %v2113_v52  ;;  %938 = vrot.lane.b32.xlu1 %v12988_v43, %s11590_s18  ;;  %v13002_v21 = vsel %vm819_vm6, %v780_v0, %v844_v54  ;;  %v15750_v0 = vld [vmem:[#allocation16_spill] sm:$0xff] }
 0x259   : > { %1624 = vst.msk [vmem:[#allocation2 + $0x108] sm:$0xff] %vm1612_vm2, %v1560_v47  ;;  %v2566_v38 = vpop.permute.xlu0 %2565  ;;  %v788_v47 = vadd.f32 %v12867_v8, %v15750_v0 }
 0x25a   : > { %v2627_v49 = vmax.f32 %v12634_v2, %v2566_v38  ;;  %v15749_v2 = vld [vmem:[#allocation17_spill] sm:$0xff] }
 0x25b   : > { %v1508_v36 = vmax.f32 %v15749_v2, %v12615_v11  ;;  %vm821_vm8 = vcmp.gt.f32.partialorder %v788_v47, 0.0 }
 0x25c   : > { %2690 = vrot.lane.b32.xlu0 %v2627_v49, %s11590_s18  ;;  %1577 = vrot.lane.b32.xlu1 %v1507_v59, %s11590_s18 }
 0x25d   : > { %v2053_v10 = vpop.permute.xlu0 %2052 }
 0x25e   : > { %v2114_v63 = vmax.f32 %v12649_v16, %v2053_v10  ;;  %v845_v16 = vmul.f32 0.01, %v785_v14 }
 0x25f   : > { %v1562_v29 = vpop.permute.xlu1 %1561 }
 0x260   : > { %2139 = vst.msk [vmem:[#allocation2 + $0x140] sm:$0xff] %vm998_vm13, %v2114_v63  ;;  %940 = vrot.lane.b32.xlu1 %v13002_v21, %s11590_s18  ;;  %v13016_v57 = vsel %vm820_vm7, %v785_v14, %v845_v16  ;;  %v15752_v63 = vld [vmem:[#allocation19_spill] sm:$0xff]  ;;  %v2954_v16 = vadd.f32 %v12867_v8, %v12720_v55 }
 0x261   : > { %1625 = vst.msk [vmem:[#allocation2 + $0x120] sm:$0xff] %vm1612_vm2, %v1562_v29  ;;  %v2568_v1 = vpop.permute.xlu0 %2567  ;;  %v793_v30 = vadd.f32 %v12867_v8, %v15752_v63 }
 0x262   : > { %v2628_v45 = vmax.f32 %v12666_v42, %v2568_v1  ;;  %v15751_v42 = vld [vmem:[#allocation18_spill] sm:$0xff]  ;;  %vm3053_vm10 = vcmp.gt.f32.partialorder %v2954_v16, 0.0 }
 0x263   : > { %v1509_v59 = vmax.f32 %v15751_v42, %v12632_v33  ;;  %vm822_vm9 = vcmp.gt.f32.partialorder %v793_v30, 0.0 }
 0x264   : > { %2692 = vrot.lane.b32.xlu0 %v2628_v45, %s11590_s18  ;;  %1579 = vrot.lane.b32.xlu1 %v1508_v36, %s11590_s18 }
 0x265   : > { %v2055_v52 = vpop.permute.xlu0 %2054 }
 0x266   : > { %v2115_v18 = vmax.f32 %v12683_v61, %v2055_v52  ;;  %v846_v61 = vmul.f32 0.01, %v788_v47 }
 0x267   : > { %v1564_v38 = vpop.permute.xlu1 %1563 }
 0x268   : > { %2140 = vst.msk [vmem:[#allocation2 + $0x158] sm:$0xff] %vm998_vm13, %v2115_v18  ;;  %942 = vrot.lane.b32.xlu1 %v13016_v57, %s11590_s18  ;;  %v13030_v29 = vsel %vm821_vm8, %v788_v47, %v846_v61  ;;  %v2962_v47 = vadd.f32 %v12867_v8, %v12742_v26  ;;  %v2970_v26 = vadd.f32 %v12867_v8, %v12856_v62  ;;  %vm11592_vm8 = vmmov 0  }
 0x269   : > { %1626 = vst.msk [vmem:[#allocation2 + $0x138] sm:$0xff] %vm1612_vm2, %v1564_v38  ;;  %v2570_v11 = vpop.permute.xlu0 %2569  ;;  %v15754_v38 = vld [vmem:[#allocation21_spill] sm:$0xff] }
 0x26a   : > { %v2629_v49 = vmax.f32 %v12700_v28, %v2570_v11  ;;  %v15753_v28 = vld [vmem:[#allocation20_spill] sm:$0xff]  ;;  %v1511_v55 = vmax.f32 %v15754_v38, %v12679_v32  ;;  %v3080_v42 = vmul.f32 0.01, %v2962_v47  ;;  %vm3055_vm11 = vcmp.gt.f32.partialorder %v2962_v47, 0.0 }
 0x26b   : > { %v1510_v1 = vmax.f32 %v15753_v28, %v12651_v60  ;;  %v3078_v60 = vmul.f32 0.01, %v2954_v16  ;;  %vm3057_vm12 = vcmp.gt.f32.partialorder %v2970_v26, 0.0 }
 0x26c   : > { %2694 = vrot.lane.b32.xlu0 %v2629_v49, %s11590_s18  ;;  %1581 = vrot.lane.b32.xlu1 %v1509_v59, %s11590_s18 }
 0x26d   : > { %v2057_v54 = vpop.permute.xlu0 %2056  ;;  %v13059_v49 = vsel %vm3053_vm10, %v2954_v16, %v3078_v60  ;;  %v2986_v16 = vadd.f32 %v12867_v8, %v12926_v17 }
 0x26e   : > { %v2116_v10 = vmax.f32 %v12714_v6, %v2057_v54  ;;  %v847_v6 = vmul.f32 0.01, %v793_v30  ;;  %v3385_v54 = vld [vmem:[%s15637_s3 + $0x108] sm:$0xff] }
 0x26f   : > { %v1566_v14 = vpop.permute.xlu1 %1565  ;;  %vm3061_vm15 = vcmp.gt.f32.partialorder %v2986_v16, 0.0 }
 0x270   : > { %2141 = vst.msk [vmem:[#allocation2 + $0x170] sm:$0xff] %vm998_vm13, %v2116_v10  ;;  %944 = vrot.lane.b32.xlu1 %v13030_v29, %s11590_s18  ;;  %v13045_v0 = vsel %vm822_vm9, %v793_v30, %v847_v6  ;;  %v13074_v10 = vsel %vm3055_vm11, %v2962_v47, %v3080_v42  ;;  %v2978_v30 = vadd.f32 %v12867_v8, %v12903_v22  ;;  %v3389_v47 = vld [vmem:[%s15637_s3 + $0x128] sm:$0xff] }
 0x271   : > { %1627 = vst.msk [vmem:[#allocation2 + $0x150] sm:$0xff] %vm1612_vm2, %v1566_v14  ;;  %v2572_v33 = vpop.permute.xlu0 %2571 }
 0x272   : > { %v2630_v2 = vmax.f32 %v12740_v27, %v2572_v33  ;;  %vm3059_vm14 = vcmp.gt.f32.partialorder %v2978_v30, 0.0 }
 0x273   : > { %v1568_v36 = vpop.permute.xlu1 %1567 }
 0x274   : > { %1628 = vst.msk [vmem:[#allocation2 + $0x168] sm:$0xff] %vm1612_vm2, %v1568_v36  ;;  %2696 = vrot.lane.b32.xlu0 %v2630_v2, %s11590_s18  ;;  %1583 = vrot.lane.b32.xlu1 %v1510_v1, %s11590_s18  ;;  %v3386_v1 = vld [vmem:[%s15637_s3 + $0x110] sm:$0xff]  ;;  %v3387_v2 = vld [vmem:[%s15637_s3 + $0x118] sm:$0xff] }
 0x275   : > { %v2059_v45 = vpop.permute.xlu0 %2058 }
 0x276   : > { %v2117_v52 = vmax.f32 %v12761_v40, %v2059_v45  ;;  %v3084_v45 = vmul.f32 0.01, %v2978_v30 }
 0x277   : > { %v1570_v18 = vpop.permute.xlu1 %1569 }
 0x278   : > { %2142 = vst.msk [vmem:[#allocation2 + $0x188] sm:$0xff] %vm998_vm13, %v2117_v52  ;;  %946 = vrot.lane.b32.xlu1 %v13045_v0, %s11590_s18  ;;  %v10356_v52 = vpack.c.bf16 %v3387_v2, %v3386_v1 }
 0x279   : > { %1629 = vst.msk [vmem:[#allocation2 + $0x180] sm:$0xff] %vm1612_vm2, %v1570_v18  ;;  %v2574_v27 = vpop.permute.xlu0 %2573 }
 0x27a   : > { %v2631_v40 = vmax.f32 %v12774_v48, %v2574_v27  ;;  %v3384_v48 = vld [vmem:[%s15637_s3 + $0x100] sm:$0xff] }
 0x27b   : > { %v2665_v11 = vpop.permute.xlu1 %2664  ;;  %v10353_v14 = vpack.c.bf16 %v3385_v54, %v3384_v48  ;;  %v3388_v27 = vld [vmem:[%s15637_s3 + $0x120] sm:$0xff] }
 0x27c   : > { %2739 = vst.msk [vmem:[#allocation2 + $0x8] sm:$0xff] %vm1612_vm2, %v2665_v11  ;;  %2698 = vrot.lane.b32.xlu0 %v2631_v40, %s11590_s18  ;;  %1585 = vrot.lane.b32.xlu1 %v1511_v55, %s11590_s18  ;;  %v3086_v55 = vmul.f32 0.01, %v2986_v16  ;;  %v13106_v40 = vsel %vm3059_vm14, %v2978_v30, %v3084_v45  ;;  %v10359_v11 = vpack.c.bf16 %v3389_v47, %v3388_v27  ;;  %v3286_v30 = vld [vmem:[#allocation2 + $0x48] sm:$0xff] }
 0x27d   : > { %v2061_v59 = vpop.permute.xlu0 %2060  ;;  %v2959_v45 = vadd.f32 %v12867_v8, %v12732_v50 }
 0x27e   : > { %v2118_v61 = vmax.f32 %v12786_v53, %v2061_v59  ;;  %v3082_v53 = vmul.f32 0.01, %v2970_v26  ;;  %v13120_v54 = vsel %vm3061_vm15, %v2986_v16, %v3086_v55  ;;  %vm4454_vm15 = vcmask 130048  }
 0x27f   : > { %v2667_v32 = vpop.permute.xlu1 %2666  ;;  %vm3054_vm1 = vcmp.gt.f32.partialorder %v2959_v45, 0.0 }
 0x280   : > { %2143 = vst.msk [vmem:[#allocation2 + $0x1a0] sm:$0xff] %vm998_vm13, %v2118_v61  ;;  %3154 = vrot.lane.b32.xlu1 %v13059_v49, %s11590_s18  ;;  %v13089_v6 = vsel %vm3057_vm12, %v2970_v26, %v3082_v53  ;;  %v3390_v26 = vld [vmem:[%s15637_s3 + $0x130] sm:$0xff]  ;;  %v3391_v61 = vld [vmem:[%s15637_s3 + $0x138] sm:$0xff] }
 0x281   : > { %2740 = vst.msk [vmem:[#allocation2 + $0x20] sm:$0xff] %vm1612_vm2, %v2667_v32  ;;  %v2576_v62 = vpop.permute.xlu0 %2575 }
 0x282   : > { %v2632_v63 = vmax.f32 %v12795_v12, %v2576_v62  ;;  %v3277_v12 = vld [vmem:[#allocation2] sm:$0xff]  ;;  %v10362_v62 = vpack.c.bf16 %v3391_v61, %v3390_v26  ;;  %v2983_v26 = vadd.f32 %v12867_v8, %v12920_v19 }
 0x283   : > { %v2669_v33 = vpop.permute.xlu1 %2668  ;;  %v3278_v28 = vld [vmem:[#allocation2 + $0x8] sm:$0xff] }
 0x284   : > { %2741 = vst.msk [vmem:[#allocation2 + $0x38] sm:$0xff] %vm1612_vm2, %v2669_v33  ;;  %3538 = vmatprep.mubr.f32.mxu1 %v3278_v28  ;;  %2700 = vrot.lane.b32.xlu0 %v2632_v63, %s11590_s18  ;;  %v3289_v28 = vld [vmem:[#allocation2 + $0x60] sm:$0xff]  ;;  %vm3060_vm5 = vcmp.gt.f32.partialorder %v2983_v26, 0.0 }
 0x285   : > { %3158 = vrot.lane.b32.xlu1 %v13074_v10, %s11590_s18  ;;  %3539 = vmatmul.mubr.f32.vlgmr.msra.gmra.mrb[104].mxu1 %v3277_v12  ;;  %v2578_v22 = vpop.permute.xlu0 %2577 }
 0x286   : > { %v2633_v36 = vmax.f32 %v12805_v4, %v2578_v22  ;;  %10354 = vmatpush3.bf16.msra.mxu1 %v10353_v14  ;;  %v3280_v4 = vld [vmem:[#allocation2 + $0x18] sm:$0xff]  ;;  %v2951_v22 = vadd.f32 %v12867_v8, %v12711_v51 }
 0x287   : > { %v2671_v18 = vpop.permute.xlu1 %2670  ;;  %10355 = vmatprep.subr.bf16.mxu1 %v15710_v58 }
 0x288   : > { %v3281_v60 = vld [vmem:[#allocation2 + $0x20] sm:$0xff]  ;;  %2742 = vst.msk [vmem:[#allocation2 + $0x50] sm:$0xff] %vm1612_vm2, %v2671_v18  ;;  %2702 = vrot.lane.b32.xlu0 %v2633_v36, %s11590_s18  ;;  %v3077_v18 = vmul.f32 0.01, %v2951_v22  ;;  %vm3052_vm0 = vcmp.gt.f32.partialorder %v2951_v22, 0.0 }
 0x289   : > { %3543 = vmatprep.mubr.f32.mxu1 %v3281_v60  ;;  %v2580_v17 = vpop.permute.xlu0 %2579  ;;  %3162 = vrot.lane.b32.xlu1 %v13089_v6, %s11590_s18  ;;  %v2967_v60 = vadd.f32 %v12867_v8, %v12851_v5 }
 0x28a   : > { %3544 = vmatmul.mubr.f32.gmra.mrb[106].mxu1 %v3280_v4  ;;  %v2634_v38 = vmax.f32 %v12815_v41, %v2580_v17  ;;  %v3283_v41 = vld [vmem:[#allocation2 + $0x30] sm:$0xff]  ;;  %v13143_v50 = vsel %vm3052_vm0, %v2951_v22, %v3077_v18  ;;  %vm13357_vm0 = vmpackc.low %vm4454_vm15, %vm4454_vm15 }
 0x28b   : > { %10357 = vmatpush3.bf16.msra.mxu1 %v10356_v52  ;;  %v2673_v42 = vpop.permute.xlu1 %2672  ;;  %v3284_v59 = vld [vmem:[#allocation2 + $0x38] sm:$0xff]  ;;  %vm3056_vm3 = vcmp.gt.f32.partialorder %v2967_v60, 0.0 }
 0x28c   : > { %10358 = vmatprep.subr.bf16.mxu1 %v15710_v58  ;;  %2743 = vst.msk [vmem:[#allocation2 + $0x68] sm:$0xff] %vm1612_vm2, %v2673_v42  ;;  %3548 = vmatprep.mubr.f32.mxu1 %v3284_v59 }
 0x28d   : > { %2704 = vrot.lane.b32.xlu0 %v2634_v38, %s11590_s18  ;;  %v2582_v32 = vpop.permute.xlu0 %2581  ;;  %3166 = vrot.lane.b32.xlu1 %v13106_v40, %s11590_s18  ;;  %v3081_v38 = vmul.f32 0.01, %v2967_v60 }
 0x28e   : > { %3549 = vmatmul.mubr.f32.gmra.mrb[108].mxu1 %v3283_v41  ;;  %v2635_v48 = vmax.f32 %v12826_v46, %v2582_v32 }
 0x28f   : > { %10360 = vmatpush3.bf16.msra.mxu1 %v10359_v11  ;;  %v2675_v53 = vpop.permute.xlu1 %2674  ;;  %v3287_v63 = vld [vmem:[#allocation2 + $0x50] sm:$0xff]  ;;  %v13156_v42 = vsel %vm3056_vm3, %v2967_v60, %v3081_v38 }
 0x290   : > { %10361 = vmatprep.subr.bf16.mxu1 %v15710_v58  ;;  %2744 = vst.msk [vmem:[#allocation2 + $0x80] sm:$0xff] %vm1612_vm2, %v2675_v53  ;;  %3553 = vmatprep.mubr.f32.mxu1 %v3287_v63 }
 0x291   : > { %2706 = vrot.lane.b32.xlu0 %v2635_v48, %s11590_s18  ;;  %v2584_v14 = vpop.permute.xlu0 %2583  ;;  %3170 = vrot.lane.b32.xlu1 %v13120_v54, %s11590_s18  ;;  %v3085_v48 = vmul.f32 0.01, %v2983_v26 }
 0x292   : > { %3554 = vmatmul.mubr.f32.gmra.mrb[110].mxu1 %v3286_v30  ;;  %v2636_v46 = vmax.f32 %v12835_v25, %v2584_v14  ;;  %v3292_v25 = vld [vmem:[#allocation2 + $0x78] sm:$0xff]  ;;  %v2994_v14 = vadd.f32 %v12867_v8, %v12951_v34  ;;  %v2788_v34 = vld [vmem:[%s11763_s25 + $0x3e0] sm:$0xff]  ;;  %s373_s25 = scalar_lea.vmem %s15643_s9, %s7753_s21 }
 0x293   : > { %10363 = vmatpush3.bf16.msra.mxu1 %v10362_v62  ;;  %v3290_v33 = vld [vmem:[#allocation2 + $0x68] sm:$0xff]  ;;  %v13173_v30 = vsel %vm3060_vm5, %v2983_v26, %v3085_v48  ;;  %v7900_v22 = vcombine.high %v2788_v34, %v2788_v34 }
 0x294   : > { %10428 = vmatprep.subr.bf16.mxu1 %v15710_v58  ;;  %3558 = vmatprep.mubr.f32.mxu1 %v3290_v33  ;;  %vm3063_vm7 = vcmp.gt.f32.partialorder %v2994_v14, 0.0 }
 0x295   : > { %2708 = vrot.lane.b32.xlu0 %v2636_v46, %s11590_s18  ;;  %v2586_v1 = vpop.permute.xlu0 %2585  ;;  %3044 = vmatprep.mubr.bf16.mxu0 %v7900_v22  ;;  %v3325_v22 = vld [vmem:[#allocation2 + $0x180] sm:$0xff] }
 0x296   : > { %3559 = vmatmul.mubr.f32.gmra.mrb[112].mxu1 %v3289_v28  ;;  %v2637_v2 = vmax.f32 %v12844_v15, %v2586_v1  ;;  %v2677_v12 = vpop.permute.xlu1 %2676  ;;  %v3079_v15 = vmul.f32 0.01, %v2959_v45  ;;  %v3088_v1 = vmul.f32 0.01, %v2994_v14 }
 0x297   : > { %2745 = vst.msk [vmem:[#allocation2 + $0x98] sm:$0xff] %vm1612_vm2, %v2677_v12  ;;  %v3293_v36 = vld [vmem:[#allocation2 + $0x80] sm:$0xff] }
 0x298   : > { %3563 = vmatprep.mubr.f32.mxu1 %v3293_v36  ;;  %v13148_v5 = vsel %vm3054_vm1, %v2959_v45, %v3079_v15  ;;  %v7899_v45 = vcombine.low %v2788_v34, %v2788_v34  ;;  %v11593_v15 = vmov 0.0  }
 0x299   : > { %2710 = vrot.lane.b32.xlu0 %v2637_v2, %s11590_s18  ;;  %v2588_v16 = vpop.permute.xlu0 %2587 }
 0x29a   : > { %3564 = vmatmul.mubr.f32.gmra.mrb[114].mxu1 %v3292_v25  ;;  %v2638_v52 = vmax.f32 %v12854_v39, %v2588_v16  ;;  %v3295_v39 = vld [vmem:[#allocation2 + $0x90] sm:$0xff]  ;;  %v13191_v25 = vsel %vm3063_vm7, %v2994_v14, %v3088_v1  ;;  %3045 = vmatmul.mubr.bf16.gmra.mrb[152].mxu0 %v7899_v45  ;;  %v3322_v1 = vld [vmem:[#allocation2 + $0x168] sm:$0xff] }
 0x29b   : > { %9426 = vmatprep.mubr.msk.f32.mxu0 %vm11592_vm8, %v11593_v15 }
 0x29d   : > { %2712 = vrot.lane.b32.xlu0 %v2638_v52, %s11590_s18  ;;  %v2063_v51 = vpop.permute.xlu0 %2062 }
 0x29e   : > { %v2119_v27 = vmax.f32 %v12871_v3, %v2063_v51  ;;  %v2679_v47 = vpop.permute.xlu1 %2678  ;;  %v3296_v4 = vld [vmem:[#allocation2 + $0x98] sm:$0xff]  ;;  %v2975_v3 = vadd.f32 %v12867_v8, %v12895_v23 }
 0x29f   : > { %2746 = vst.msk [vmem:[#allocation2 + $0xb0] sm:$0xff] %vm1612_vm2, %v2679_v47  ;;  %3568 = vmatprep.mubr.f32.mxu1 %v3296_v4 }
 0x2a0   : > { %2144 = vst.msk [vmem:[#allocation2 + $0x1b8] sm:$0xff] %vm998_vm13, %v2119_v27  ;;  %3569 = vmatmul.mubr.f32.gmra.mrb[116].mxu1 %v3295_v39  ;;  %v3083_v59 = vmul.f32 0.01, %v2975_v3  ;;  %vm3058_vm4 = vcmp.gt.f32.partialorder %v2975_v3, 0.0  ;;  %v3307_v39 = vld [vmem:[#allocation2 + $0xf0] sm:$0xff] }
 0x2a1   : > { %3152 = vrot.lane.b32.xlu0 %v13143_v50, %s11590_s18  ;;  %v2065_v17 = vpop.permute.xlu0 %2064 }
 0x2a2   : > { %v2120_v55 = vmax.f32 %v12879_v20, %v2065_v17  ;;  %v3298_v20 = vld [vmem:[#allocation2 + $0xa8] sm:$0xff]  ;;  %v13165_v62 = vsel %vm3058_vm4, %v2975_v3, %v3083_v59 }
 0x2a4   : > { %2145 = vst.msk [vmem:[#allocation2 + $0x1d0] sm:$0xff] %vm998_vm13, %v2120_v55  ;;  %v3310_v55 = vld [vmem:[#allocation2 + $0x108] sm:$0xff] }
 0x2a5   : > { %3156 = vrot.lane.b32.xlu0 %v13148_v5, %s11590_s18  ;;  %v2067_v11 = vpop.permute.xlu0 %2066 }
 0x2a6   : > { %v2121_v61 = vmax.f32 %v12890_v7, %v2067_v11  ;;  %v2681_v41 = vpop.permute.xlu1 %2680  ;;  %v3299_v32 = vld [vmem:[#allocation2 + $0xb0] sm:$0xff]  ;;  %v2991_v7 = vadd.f32 %v12867_v8, %v12946_v24 }
 0x2a7   : > { %2747 = vst.msk [vmem:[#allocation2 + $0xc8] sm:$0xff] %vm1612_vm2, %v2681_v41  ;;  %3573 = vmatprep.mubr.f32.mxu1 %v3299_v32  ;;  %v3313_v41 = vld [vmem:[#allocation2 + $0x120] sm:$0xff] }
 0x2a8   : > { %2146 = vst.msk [vmem:[#allocation2 + $0x1e8] sm:$0xff] %vm998_vm13, %v2121_v61  ;;  %3574 = vmatmul.mubr.f32.gmra.mrb[118].mxu1 %v3298_v20  ;;  %v3087_v63 = vmul.f32 0.01, %v2991_v7  ;;  %vm3062_vm6 = vcmp.gt.f32.partialorder %v2991_v7, 0.0 }
 0x2a9   : > { %3160 = vrot.lane.b32.xlu0 %v13156_v42, %s11590_s18  ;;  %v2069_v23 = vpop.permute.xlu0 %2068 }
 0x2aa   : > { %v2122_v19 = vmax.f32 %v12900_v13, %v2069_v23  ;;  %v3301_v13 = vld [vmem:[#allocation2 + $0xc0] sm:$0xff]  ;;  %v13182_v2 = vsel %vm3062_vm6, %v2991_v7, %v3087_v63  ;;  %v3316_v7 = vld [vmem:[#allocation2 + $0x138] sm:$0xff] }
 0x2ac   : > { %2147 = vst.msk [vmem:[#allocation2 + $0x200] sm:$0xff] %vm998_vm13, %v2122_v19 }
 0x2ad   : > { %3164 = vrot.lane.b32.xlu0 %v13165_v62, %s11590_s18  ;;  %v2071_v53 = vpop.permute.xlu0 %2070 }
 0x2ae   : > { %v2123_v46 = vmax.f32 %v12915_v56, %v2071_v53  ;;  %v2683_v33 = vpop.permute.xlu1 %2682  ;;  %v3302_v24 = vld [vmem:[#allocation2 + $0xc8] sm:$0xff] }
 0x2af   : > { %2748 = vst.msk [vmem:[#allocation2 + $0xe0] sm:$0xff] %vm1612_vm2, %v2683_v33  ;;  %3578 = vmatprep.mubr.f32.mxu1 %v3302_v24 }
 0x2b0   : > { %2148 = vst.msk [vmem:[#allocation2 + $0x218] sm:$0xff] %vm998_vm13, %v2123_v46  ;;  %3579 = vmatmul.mubr.f32.gmra.mrb[120].mxu1 %v3301_v13  ;;  %v3319_v46 = vld [vmem:[#allocation2 + $0x150] sm:$0xff] }
 0x2b1   : > { %3168 = vrot.lane.b32.xlu0 %v13173_v30, %s11590_s18  ;;  %v2073_v28 = vpop.permute.xlu0 %2072 }
 0x2b2   : > { %v2124_v8 = vmax.f32 %v12923_v37, %v2073_v28  ;;  %v933_v56 = vpop.permute.xlu1 %932 }
 0x2b3   : > { %v990_v12 = vmax.f32 %v12933_v35, %v933_v56  ;;  %v3304_v35 = vld [vmem:[#allocation2 + $0xd8] sm:$0xff] }
 0x2b4   : > { %2149 = vst.msk [vmem:[#allocation2 + $0x230] sm:$0xff] %vm998_vm13, %v2124_v8 }
 0x2b5   : > { %3172 = vrot.lane.b32.xlu0 %v13182_v2, %s11590_s18  ;;  %1016 = vst.msk [vmem:[#allocation2 + $0x198] sm:$0xff] %vm998_vm13, %v990_v12  ;;  %v2075_v36 = vpop.permute.xlu0 %2074 }
 0x2b6   : > { %v2125_v37 = vmax.f32 %v12940_v31, %v2075_v36  ;;  %v1572_v16 = vpop.permute.xlu1 %1571  ;;  %v3305_v52 = vld [vmem:[#allocation2 + $0xe0] sm:$0xff] }
 0x2b7   : > { %1630 = vst.msk [vmem:[#allocation2 + $0x198] sm:$0xff] %vm1612_vm2, %v1572_v16  ;;  %3583 = vmatprep.mubr.f32.mxu1 %v3305_v52 }
 0x2b8   : > { %2150 = vst.msk [vmem:[#allocation2 + $0x248] sm:$0xff] %vm998_vm13, %v2125_v37  ;;  %3584 = vmatmul.mubr.f32.gmra.mrb[122].mxu1 %v3304_v35 }
 0x2b9   : > { %3174 = vrot.lane.b32.xlu0 %v13191_v25, %s11590_s18  ;;  %v2685_v18 = vpop.permute.xlu0 %2684 }
 0x2ba   : > { %2749 = vst.msk [vmem:[#allocation2 + $0xf8] sm:$0xff] %vm1612_vm2, %v2685_v18  ;;  %v935_v31 = vpop.permute.xlu1 %934 }
 0x2bb   : > { %v991_v51 = vmax.f32 %v12957_v44, %v935_v31 }
 0x2bd   : > { %1017 = vst.msk [vmem:[#allocation2 + $0x1b0] sm:$0xff] %vm998_vm13, %v991_v51 }
 0x2be   : > { %v2687_v60 = vpop.permute.xlu0 %2686  ;;  %v1574_v27 = vpop.permute.xlu1 %1573  ;;  %v3328_v52 = vld [vmem:[#allocation2 + $0x198] sm:$0xff] }
 0x2bf   : > { %2750 = vst.msk [vmem:[#allocation2 + $0x110] sm:$0xff] %vm1612_vm2, %v2687_v60  ;;  %1631 = vst.msk [vmem:[#allocation2 + $0x1b0] sm:$0xff] %vm1612_vm2, %v1574_v27 }
 0x2c1   : > { %v3308_v47 = vld [vmem:[#allocation2 + $0xf8] sm:$0xff] }
 0x2c2   : > { %3588 = vmatprep.mubr.f32.mxu1 %v3308_v47  ;;  %v937_v4 = vpop.permute.xlu1 %936 }
 0x2c3   : > { %v992_v17 = vmax.f32 %v12973_v9, %v937_v4  ;;  %3589 = vmatmul.mubr.f32.gmra.mrb[124].mxu1 %v3307_v39 }
 0x2c5   : > { %1018 = vst.msk [vmem:[#allocation2 + $0x1c8] sm:$0xff] %vm998_vm13, %v992_v17 }
 0x2c6   : > { %v2689_v38 = vpop.permute.xlu0 %2688  ;;  %v1576_v3 = vpop.permute.xlu1 %1575  ;;  %v3311_v44 = vld [vmem:[#allocation2 + $0x110] sm:$0xff] }
 0x2c7   : > { %2751 = vst.msk [vmem:[#allocation2 + $0x128] sm:$0xff] %vm1612_vm2, %v2689_v38  ;;  %1632 = vst.msk [vmem:[#allocation2 + $0x1c8] sm:$0xff] %vm1612_vm2, %v1576_v3  ;;  %3593 = vmatprep.mubr.f32.mxu1 %v3311_v44 }
 0x2c8   : > { %3594 = vmatmul.mubr.f32.gmra.mrb[126].mxu1 %v3310_v55 }
 0x2ca   : > { %v939_v11 = vpop.permute.xlu1 %938 }
 0x2cb   : > { %v993_v59 = vmax.f32 %v12988_v43, %v939_v11  ;;  %v13245_v11 = vld [vmem:[%s15636_s2] ss:$0 sm:$0xff] }
 0x2cd   : > { %1019 = vst.msk [vmem:[#allocation2 + $0x1e0] sm:$0xff] %vm998_vm13, %v993_v59 }
 0x2ce   : > { %v2691_v26 = vpop.permute.xlu0 %2690  ;;  %v1578_v9 = vpop.permute.xlu1 %1577  ;;  %v3314_v61 = vld [vmem:[#allocation2 + $0x128] sm:$0xff] }
 0x2cf   : > { %2752 = vst.msk [vmem:[#allocation2 + $0x140] sm:$0xff] %vm1612_vm2, %v2691_v26  ;;  %1633 = vst.msk [vmem:[#allocation2 + $0x1e0] sm:$0xff] %vm1612_vm2, %v1578_v9  ;;  %3598 = vmatprep.mubr.f32.mxu1 %v3314_v61  ;;  %v3334_v26 = vld [vmem:[#allocation2 + $0x1c8] sm:$0xff] }
 0x2d0   : > { %3599 = vmatmul.mubr.f32.gmra.mrb[128].mxu1 %v3313_v41 }
 0x2d2   : > { %v941_v32 = vpop.permute.xlu1 %940 }
 0x2d3   : > { %v994_v20 = vmax.f32 %v13002_v21, %v941_v32 }
 0x2d5   : > { %1020 = vst.msk [vmem:[#allocation2 + $0x1f8] sm:$0xff] %vm998_vm13, %v994_v20 }
 0x2d6   : > { %v2693_v23 = vpop.permute.xlu0 %2692  ;;  %v1580_v48 = vpop.permute.xlu1 %1579  ;;  %v3317_v43 = vld [vmem:[#allocation2 + $0x140] sm:$0xff] }
 0x2d7   : > { %2753 = vst.msk [vmem:[#allocation2 + $0x158] sm:$0xff] %vm1612_vm2, %v2693_v23  ;;  %1634 = vst.msk [vmem:[#allocation2 + $0x1f8] sm:$0xff] %vm1612_vm2, %v1580_v48  ;;  %3603 = vmatprep.mubr.f32.mxu1 %v3317_v43 }
 0x2d8   : > { %3604 = vmatmul.mubr.f32.gmra.mrb[130].mxu1 %v3316_v7 }
 0x2da   : > { %v943_v19 = vpop.permute.xlu1 %942 }
 0x2db   : > { %v995_v53 = vmax.f32 %v13016_v57, %v943_v19  ;;  %v3337_v19 = vld [vmem:[#allocation2 + $0x1e0] sm:$0xff] }
 0x2dd   : > { %1021 = vst.msk [vmem:[#allocation2 + $0x210] sm:$0xff] %vm998_vm13, %v995_v53 }
 0x2de   : > { %v2695_v63 = vpop.permute.xlu0 %2694  ;;  %v1582_v14 = vpop.permute.xlu1 %1581  ;;  %v3320_v21 = vld [vmem:[#allocation2 + $0x158] sm:$0xff] }
 0x2df   : > { %2754 = vst.msk [vmem:[#allocation2 + $0x170] sm:$0xff] %vm1612_vm2, %v2695_v63  ;;  %1635 = vst.msk [vmem:[#allocation2 + $0x210] sm:$0xff] %vm1612_vm2, %v1582_v14  ;;  %3608 = vmatprep.mubr.f32.mxu1 %v3320_v21 }
 0x2e0   : > { %3609 = vmatmul.mubr.f32.gmra.mrb[132].mxu1 %v3319_v46  ;;  %v3340_v46 = vld [vmem:[#allocation2 + $0x1f8] sm:$0xff] }
 0x2e2   : > { %v945_v33 = vpop.permute.xlu1 %944 }
 0x2e3   : > { %v996_v24 = vmax.f32 %v13030_v29, %v945_v33 }
 0x2e5   : > { %1022 = vst.msk [vmem:[#allocation2 + $0x228] sm:$0xff] %vm998_vm13, %v996_v24 }
 0x2e6   : > { %v2697_v13 = vpop.permute.xlu0 %2696  ;;  %v1584_v28 = vpop.permute.xlu1 %1583  ;;  %v3323_v57 = vld [vmem:[#allocation2 + $0x170] sm:$0xff] }
 0x2e7   : > { %2755 = vst.msk [vmem:[#allocation2 + $0x188] sm:$0xff] %vm1612_vm2, %v2697_v13  ;;  %1636 = vst.msk [vmem:[#allocation2 + $0x228] sm:$0xff] %vm1612_vm2, %v1584_v28  ;;  %3613 = vmatprep.mubr.f32.mxu1 %v3323_v57 }
 0x2e8   : > { %3614 = vmatmul.mubr.f32.gmra.mrb[134].mxu1 %v3322_v1 }
 0x2ea   : > { %v947_v8 = vpop.permute.xlu1 %946 }
 0x2eb   : > { %v997_v56 = vmax.f32 %v13045_v0, %v947_v8 }
 0x2ed   : > { %1023 = vst.msk [vmem:[#allocation2 + $0x240] sm:$0xff] %vm998_vm13, %v997_v56 }
 0x2ee   : > { %v2699_v34 = vpop.permute.xlu0 %2698  ;;  %v1586_v12 = vpop.permute.xlu1 %1585  ;;  %v3326_v29 = vld [vmem:[#allocation2 + $0x188] sm:$0xff] }
 0x2ef   : > { %2756 = vst.msk [vmem:[#allocation2 + $0x1a0] sm:$0xff] %vm1612_vm2, %v2699_v34  ;;  %1637 = vst.msk [vmem:[#allocation2 + $0x240] sm:$0xff] %vm1612_vm2, %v1586_v12  ;;  %3618 = vmatprep.mubr.f32.mxu1 %v3326_v29  ;;  %v8786_v51 = vpop.f32.mrb[128].mxu0  ;;  %v3343_v34 = vld [vmem:[#allocation2 + $0x210] sm:$0xff] }
 0x2f0   : > { %3619 = vmatmul.mubr.f32.gmra.mrb[136].mxu1 %v3325_v22  ;;  %v8787_v60 = vpop.f32.mrb[129].mxu0 }
 0x2f1   : > { %v13237_v4 = vadd.f32 %v8787_v60, %v8786_v51  ;;  %v8789_v39 = vpop.f32.mrb[130].mxu0 }
 0x2f2   : > { %v3155_v36 = vpop.permute.xlu1 %3154  ;;  %v8790_v38 = vpop.f32.mrb[131].mxu0 }
 0x2f3   : > { %v3228_v45 = vmax.f32 %v13059_v49, %v3155_v36  ;;  %v8791_v44 = vadd.f32 %v8790_v38, %v8789_v39 }
 0x2f5   : > { %3253 = vst.msk [vmem:[#allocation2 + $0x28] sm:$0xff] %vm998_vm13, %v3228_v45  ;;  %v3002_v59 = vadd.f32 %v13245_v11, %v8791_v44 }
 0x2f6   : > { %v2701_v37 = vpop.permute.xlu0 %2700  ;;  %v3329_v16 = vld [vmem:[#allocation2 + $0x1a0] sm:$0xff] }
 0x2f7   : > { %2757 = vst.msk [vmem:[#allocation2 + $0x1b8] sm:$0xff] %vm1612_vm2, %v2701_v37  ;;  %v3159_v0 = vpop.permute.xlu1 %3158  ;;  %3623 = vmatprep.mubr.f32.mxu1 %v3329_v16  ;;  %v3090_v61 = vmul.f32 0.01, %v3002_v59  ;;  %vm3065_vm9 = vcmp.gt.f32.partialorder %v3002_v59, 0.0  ;;  %v3346_v16 = vld [vmem:[#allocation2 + $0x228] sm:$0xff] }
 0x2f8   : > { %v3230_v35 = vmax.f32 %v13074_v10, %v3159_v0  ;;  %3624 = vmatmul.mubr.f32.gmra.mrb[138].mxu1 %v3328_v52  ;;  %v3331_v10 = vld [vmem:[#allocation2 + $0x1b0] sm:$0xff]  ;;  %v8792_v41 = vpop.f32.mrb[132].mxu0 }
 0x2f9   : > { %v8793_v32 = vpop.f32.mrb[133].mxu0  ;;  %v13253_v7 = vsel %vm3065_vm9, %v3002_v59, %v3090_v61 }
 0x2fa   : > { %3255 = vst.msk [vmem:[#allocation2 + $0x58] sm:$0xff] %vm998_vm13, %v3230_v35  ;;  %v2703_v18 = vpop.permute.xlu0 %2702  ;;  %v13251_v48 = vadd.f32 %v8793_v32, %v8792_v41  ;;  %v8795_v43 = vpop.f32.mrb[134].mxu0  ;;  %3178 = vrot.lane.b32.xlu0 %v13253_v7, %s11590_s18 }
 0x2fb   : > { %2758 = vst.msk [vmem:[#allocation2 + $0x1d0] sm:$0xff] %vm1612_vm2, %v2703_v18  ;;  %v3163_v31 = vpop.permute.xlu1 %3162  ;;  %v8796_v53 = vpop.f32.mrb[135].mxu0 }
 0x2fc   : > { %v3232_v49 = vmax.f32 %v13089_v6, %v3163_v31  ;;  %v3282_v61 = vld [vmem:[#allocation2 + $0x28] sm:$0xff] }
 0x2fe   : > { %v3332_v47 = vld [vmem:[#allocation2 + $0x1b8] sm:$0xff]  ;;  %3257 = vst.msk [vmem:[#allocation2 + $0x88] sm:$0xff] %vm998_vm13, %v3232_v49 }
 0x2ff   : > { %v2705_v27 = vpop.permute.xlu0 %2704  ;;  %3628 = vmatprep.mubr.f32.mxu1 %v3332_v47  ;;  %v3167_v17 = vpop.permute.xlu1 %3166 }
 0x300   : > { %2759 = vst.msk [vmem:[#allocation2 + $0x1e8] sm:$0xff] %vm1612_vm2, %v2705_v27  ;;  %3629 = vmatmul.mubr.f32.gmra.mrb[140].mxu1 %v3331_v10  ;;  %v3234_v3 = vmax.f32 %v13106_v40, %v3167_v17 }
 0x302   : > { %v3335_v55 = vld [vmem:[#allocation2 + $0x1d0] sm:$0xff]  ;;  %3259 = vst.msk [vmem:[#allocation2 + $0xb8] sm:$0xff] %vm998_vm13, %v3234_v3  ;;  %v8798_v24 = vpop.f32.mrb[136].mxu0 }
 0x303   : > { %v2707_v6 = vpop.permute.xlu0 %2706  ;;  %3633 = vmatprep.mubr.f32.mxu1 %v3335_v55  ;;  %v3171_v9 = vpop.permute.xlu1 %3170 }
 0x304   : > { %2760 = vst.msk [vmem:[#allocation2 + $0x200] sm:$0xff] %vm1612_vm2, %v2707_v6  ;;  %3634 = vmatmul.mubr.f32.gmra.mrb[142].mxu1 %v3334_v26  ;;  %v3236_v40 = vmax.f32 %v13120_v54, %v3171_v9  ;;  %v8797_v54 = vadd.f32 %v8796_v53, %v8795_v43  ;;  %v8799_v13 = vpop.f32.mrb[137].mxu0 }
 0x305   : > { %v13260_v1 = vadd.f32 %v8799_v13, %v8798_v24  ;;  %v8801_v8 = vpop.f32.mrb[138].mxu0 }
 0x306   : > { %3261 = vst.msk [vmem:[#allocation2 + $0xe8] sm:$0xff] %vm998_vm13, %v3236_v40  ;;  %v3010_v21 = vadd.f32 %v13245_v11, %v8797_v54  ;;  %v8802_v12 = vpop.f32.mrb[139].mxu0 }
 0x307   : > { %v2709_v20 = vpop.permute.xlu0 %2708  ;;  %v3338_v23 = vld [vmem:[#allocation2 + $0x1e8] sm:$0xff]  ;;  %v8803_v29 = vadd.f32 %v8802_v12, %v8801_v8 }
 0x308   : > { %2761 = vst.msk [vmem:[#allocation2 + $0x218] sm:$0xff] %vm1612_vm2, %v2709_v20  ;;  %3638 = vmatprep.mubr.f32.mxu1 %v3338_v23  ;;  %v3092_v33 = vmul.f32 0.01, %v3010_v21  ;;  %vm3067_vm10 = vcmp.gt.f32.partialorder %v3010_v21, 0.0  ;;  %v3294_v12 = vld [vmem:[#allocation2 + $0x88] sm:$0xff] }
 0x309   : > { %3639 = vmatmul.mubr.f32.gmra.mrb[144].mxu1 %v3337_v19  ;;  %v3018_v45 = vadd.f32 %v13245_v11, %v8803_v29  ;;  %v3300_v29 = vld [vmem:[#allocation2 + $0xb8] sm:$0xff] }
 0x30a   : > { %v13262_v56 = vsel %vm3067_vm10, %v3010_v21, %v3092_v33  ;;  %v3288_v33 = vld [vmem:[#allocation2 + $0x58] sm:$0xff] }
 0x30b   : > { %v2711_v63 = vpop.permute.xlu0 %2710  ;;  %v3341_v14 = vld [vmem:[#allocation2 + $0x200] sm:$0xff]  ;;  %3182 = vrot.lane.b32.xlu0 %v13262_v56, %s11590_s18  ;;  %v3094_v0 = vmul.f32 0.01, %v3018_v45  ;;  %v8804_v52 = vpop.f32.mrb[140].mxu0 }
 0x30c   : > { %2762 = vst.msk [vmem:[#allocation2 + $0x230] sm:$0xff] %vm1612_vm2, %v2711_v63  ;;  %3643 = vmatprep.mubr.f32.mxu1 %v3341_v14  ;;  %v8805_v35 = vpop.f32.mrb[141].mxu0 }
 0x30d   : > { %3644 = vmatmul.mubr.f32.gmra.mrb[146].mxu1 %v3340_v46  ;;  %v13270_v49 = vadd.f32 %v8805_v35, %v8804_v52  ;;  %v8807_v51 = vpop.f32.mrb[142].mxu0 }
 0x30e   : > { %v8808_v47 = vpop.f32.mrb[143].mxu0 }
 0x30f   : > { %v2713_v28 = vpop.permute.xlu0 %2712  ;;  %v3344_v57 = vld [vmem:[#allocation2 + $0x218] sm:$0xff]  ;;  %v8809_v39 = vadd.f32 %v8808_v47, %v8807_v51 }
 0x310   : > { %2763 = vst.msk [vmem:[#allocation2 + $0x248] sm:$0xff] %vm1612_vm2, %v2713_v28  ;;  %3648 = vmatprep.mubr.f32.mxu1 %v3344_v57  ;;  %vm3069_vm2 = vcmp.gt.f32.partialorder %v3018_v45, 0.0 }
 0x311   : > { %3649 = vmatmul.mubr.f32.gmra.mrb[148].mxu1 %v3343_v34  ;;  %v13272_v60 = vsel %vm3069_vm2, %v3018_v45, %v3094_v0  ;;  %v3026_v17 = vadd.f32 %v13245_v11, %v8809_v39 }
 0x312   : > { %3186 = vrot.lane.b32.xlu0 %v13272_v60, %s11590_s18 }
 0x313   : > { %v3153_v22 = vpop.permute.xlu0 %3152  ;;  %v3347_v36 = vld [vmem:[#allocation2 + $0x230] sm:$0xff]  ;;  %v8810_v44 = vpop.f32.mrb[144].mxu0  ;;  %vm3071_vm11 = vcmp.gt.f32.partialorder %v3026_v17, 0.0 }
 0x314   : > { %v3227_v37 = vmax.f32 %v13143_v50, %v3153_v22  ;;  %3653 = vmatprep.mubr.f32.mxu1 %v3347_v36  ;;  %v3349_v50 = vld [vmem:[#allocation2 + $0x240] sm:$0xff]  ;;  %v8811_v6 = vpop.f32.mrb[145].mxu0  ;;  %v3306_v36 = vld [vmem:[#allocation2 + $0xe8] sm:$0xff] }
 0x315   : > { %3654 = vmatmul.mubr.f32.gmra.mrb[150].mxu1 %v3346_v16  ;;  %v13286_v59 = vadd.f32 %v8811_v6, %v8810_v44  ;;  %v8813_v26 = vpop.f32.mrb[146].mxu0 }
 0x316   : > { %3252 = vst.msk [vmem:[#allocation2 + $0x10] sm:$0xff] %vm998_vm13, %v3227_v37  ;;  %v8814_v40 = vpop.f32.mrb[147].mxu0 }
 0x317   : > { %v3157_v18 = vpop.permute.xlu0 %3156  ;;  %v3350_v31 = vld [vmem:[#allocation2 + $0x248] sm:$0xff]  ;;  %v8815_v41 = vadd.f32 %v8814_v40, %v8813_v26  ;;  %v4058_v26 = vld [vmem:[%s15639_s5 + $0x20] sm:$0xff] }
 0x318   : > { %v3229_v27 = vmax.f32 %v13148_v5, %v3157_v18  ;;  %3658 = vmatprep.mubr.f32.mxu1 %v3350_v31  ;;  %v3096_v5 = vmul.f32 0.01, %v3026_v17  ;;  %v4054_v18 = vld [vmem:[%s15639_s5] sm:$0xff]  ;;  %v4055_v31 = vld [vmem:[%s15639_s5 + $0x8] sm:$0xff] }
 0x319   : > { %3659 = vmatmul.mubr.f32.gmra.mrb[152].mxu1 %v3349_v50  ;;  %v3034_v20 = vadd.f32 %v13245_v11, %v8815_v41  ;;  %v10365_v51 = vpack.c.bf16 %v4055_v31, %v4054_v18  ;;  %v4060_v41 = vld [vmem:[%s15639_s5 + $0x30] sm:$0xff]  ;;  %v3007_v18 = vadd.f32 %v13245_v11, %v13251_v48  ;;  %v3015_v48 = vadd.f32 %v13245_v11, %v13260_v1 }
 0x31a   : > { %3254 = vst.msk [vmem:[#allocation2 + $0x40] sm:$0xff] %vm998_vm13, %v3229_v27  ;;  %9319 = vmatprep.mubr.msk.f32.mxu1 %vm11592_vm8, %v11593_v15  ;;  %v13288_v9 = vsel %vm3071_vm11, %v3026_v17, %v3096_v5  ;;  %v4056_v5 = vld [vmem:[%s15639_s5 + $0x10] sm:$0xff] }
 0x31b   : > { %v3161_v10 = vpop.permute.xlu0 %3160  ;;  %3190 = vrot.lane.b32.xlu0 %v13288_v9, %s11590_s18  ;;  %vm3073_vm12 = vcmp.gt.f32.partialorder %v3034_v20, 0.0  ;;  %10367 = vmatpush3.bf16.xpose.msk.msra.mxu0 %vm13357_vm0, %v10365_v51  ;;  %vm3066_vm5 = vcmp.gt.f32.partialorder %v3007_v18, 0.0  ;;  %vm3068_vm6 = vcmp.gt.f32.partialorder %v3015_v48, 0.0 }
 0x31c   : > { %v3231_v38 = vmax.f32 %v13156_v42, %v3161_v10  ;;  %v8816_v19 = vpop.f32.mrb[148].mxu0  ;;  %10368 = vmatprep.subr.bf16.mxu0 %v15710_v58 }
 0x31d   : > { %v3279_v3 = vld [vmem:[#allocation2 + $0x10] sm:$0xff]  ;;  %v8817_v53 = vpop.f32.mrb[149].mxu0 }
 0x31e   : > { %9320 = vmatmul.mubr.msk.f32.vlgmr.msra.gmra.mrb[104].mxu1 %vm998_vm13, %v3279_v3  ;;  %3256 = vst.msk [vmem:[#allocation2 + $0x70] sm:$0xff] %vm998_vm13, %v3231_v38  ;;  %v13303_v63 = vadd.f32 %v8817_v53, %v8816_v19  ;;  %v8819_v14 = vpop.f32.mrb[150].mxu0  ;;  %v4062_v19 = vld [vmem:[%s15639_s5 + $0x40] sm:$0xff]  ;;  %v4063_v53 = vld [vmem:[%s15639_s5 + $0x48] sm:$0xff] }
 0x31f   : > { %9322 = vmatprep.mubr.msk.f32.mxu1 %vm11592_vm8, %v11593_v15  ;;  %v3165_v55 = vpop.permute.xlu0 %3164  ;;  %v8820_v46 = vpop.f32.mrb[151].mxu0 }
 0x320   : > { %v3233_v42 = vmax.f32 %v13165_v62, %v3165_v55  ;;  %v3098_v62 = vmul.f32 0.01, %v3034_v20  ;;  %v8821_v24 = vadd.f32 %v8820_v46, %v8819_v14  ;;  %v4089_v14 = vld [vmem:[%s15639_s5 + $0x118] sm:$0xff]  ;;  %v4064_v46 = vld [vmem:[%s15639_s5 + $0x50] sm:$0xff] }
 0x321   : > { %v3285_v43 = vld [vmem:[#allocation2 + $0x40] sm:$0xff] }
 0x322   : > { %9323 = vmatmul.mubr.msk.f32.gmra.mrb[106].mxu1 %vm998_vm13, %v3282_v61  ;;  %3258 = vst.msk [vmem:[#allocation2 + $0xa0] sm:$0xff] %vm998_vm13, %v3233_v42  ;;  %v13305_v21 = vsel %vm3073_vm12, %v3034_v20, %v3098_v62  ;;  %v3042_v28 = vadd.f32 %v13245_v11, %v8821_v24  ;;  %v4090_v24 = vld [vmem:[%s15639_s5 + $0x120] sm:$0xff] }
 0x323   : > { %9325 = vmatprep.mubr.msk.f32.mxu1 %vm11592_vm8, %v11593_v15  ;;  %v3169_v32 = vpop.permute.xlu0 %3168  ;;  %3194 = vrot.lane.b32.xlu0 %v13305_v21, %s11590_s18 }
 0x324   : > { %v3235_v23 = vmax.f32 %v13173_v30, %v3169_v32  ;;  %vm3075_vm14 = vcmp.gt.f32.partialorder %v3042_v28, 0.0  ;;  %v4061_v32 = vld [vmem:[%s15639_s5 + $0x38] sm:$0xff] }
 0x325   : > { %v3291_v8 = vld [vmem:[#allocation2 + $0x70] sm:$0xff]  ;;  %v10377_v20 = vpack.c.bf16 %v4061_v32, %v4060_v41 }
 0x326   : > { %9326 = vmatmul.mubr.msk.f32.gmra.mrb[108].mxu1 %vm998_vm13, %v3285_v43  ;;  %3260 = vst.msk [vmem:[#allocation2 + $0xd0] sm:$0xff] %vm998_vm13, %v3235_v23  ;;  %v4086_v23 = vld [vmem:[%s15639_s5 + $0x100] sm:$0xff]  ;;  %v4087_v43 = vld [vmem:[%s15639_s5 + $0x108] sm:$0xff] }
 0x327   : > { %9328 = vmatprep.mubr.msk.f32.mxu1 %vm11592_vm8, %v11593_v15  ;;  %v3173_v54 = vpop.permute.xlu0 %3172  ;;  %v10429_v62 = vpack.c.bf16 %v4087_v43, %v4086_v23 }
 0x328   : > { %v3237_v30 = vmax.f32 %v13182_v2, %v3173_v54  ;;  %v3100_v2 = vmul.f32 0.01, %v3042_v28  ;;  %v4088_v54 = vld [vmem:[%s15639_s5 + $0x110] sm:$0xff] }
 0x329   : > { %10431 = vmatpush3.bf16.xpose.msk.msra.mxu1 %vm13357_vm0, %v10429_v62  ;;  %v3039_v62 = vadd.f32 %v13245_v11, %v13303_v63 }
 0x32a   : > { %9329 = vmatmul.mubr.msk.f32.gmra.mrb[110].mxu1 %vm998_vm13, %v3288_v33  ;;  %3262 = vst.msk [vmem:[#allocation2 + $0x100] sm:$0xff] %vm998_vm13, %v3237_v30  ;;  %v13320_v34 = vsel %vm3075_vm14, %v3042_v28, %v3100_v2  ;;  %10432 = vmatprep.subr.bf16.mxu1 %v15710_v58  ;;  %v10433_v30 = vpack.c.bf16 %v4089_v14, %v4088_v54  ;;  %v4065_v33 = vld [vmem:[%s15639_s5 + $0x58] sm:$0xff]  ;;  %v4067_v2 = vld [vmem:[%s15639_s5 + $0x68] sm:$0xff] }
 0x32b   : > { %9331 = vmatprep.mubr.msk.f32.mxu1 %vm11592_vm8, %v11593_v15  ;;  %v3175_v13 = vpop.permute.xlu0 %3174  ;;  %3198 = vrot.lane.b32.xlu0 %v13320_v34, %s11590_s18  ;;  %v10385_v28 = vpack.c.bf16 %v4065_v33, %v4064_v46  ;;  %vm3074_vm11 = vcmp.gt.f32.partialorder %v3039_v62, 0.0 }
 0x32c   : > { %v3238_v57 = vmax.f32 %v13191_v25, %v3175_v13  ;;  %v3297_v25 = vld [vmem:[#allocation2 + $0xa0] sm:$0xff]  ;;  %v4091_v13 = vld [vmem:[%s15639_s5 + $0x128] sm:$0xff] }
 0x32d   : > { %v3303_v22 = vld [vmem:[#allocation2 + $0xd0] sm:$0xff] }
 0x32e   : > { %9332 = vmatmul.mubr.msk.f32.gmra.mrb[112].mxu1 %vm998_vm13, %v3291_v8  ;;  %3263 = vst.msk [vmem:[#allocation2 + $0x118] sm:$0xff] %vm998_vm13, %v3238_v57  ;;  %v10437_v57 = vpack.c.bf16 %v4091_v13, %v4090_v24  ;;  %v4066_v8 = vld [vmem:[%s15639_s5 + $0x60] sm:$0xff] }
 0x32f   : > { %9334 = vmatprep.mubr.msk.f32.mxu1 %vm11592_vm8, %v11593_v15 }
 0x331   : > { %v3309_v45 = vld [vmem:[#allocation2 + $0x100] sm:$0xff]  ;;  %10435 = vmatpush3.bf16.xpose.msk.msra.mxu1 %vm13357_vm0, %v10433_v30 }
 0x332   : > { %9335 = vmatmul.mubr.msk.f32.gmra.mrb[114].mxu1 %vm998_vm13, %v3294_v12  ;;  %10436 = vmatprep.subr.bf16.mxu1 %v15710_v58  ;;  %v4068_v12 = vld [vmem:[%s15639_s5 + $0x70] sm:$0xff] }
 0x333   : > { %9337 = vmatprep.mubr.msk.f32.mxu1 %vm11592_vm8, %v11593_v15 }
 0x335   : > { %v3312_v37 = vld [vmem:[#allocation2 + $0x118] sm:$0xff] }
 0x336   : > { %9338 = vmatmul.mubr.msk.f32.gmra.mrb[116].mxu1 %vm998_vm13, %v3297_v25  ;;  %v4069_v25 = vld [vmem:[%s15639_s5 + $0x78] sm:$0xff] }
 0x337   : > { %9340 = vmatprep.mubr.msk.f32.mxu1 %vm11592_vm8, %v11593_v15 }
 0x339   : > { %10439 = vmatpush3.bf16.xpose.msk.msra.mxu1 %vm13357_vm0, %v10437_v57  ;;  %v4097_v57 = vld [vmem:[%s15639_s5 + $0x158] sm:$0xff] }
 0x33a   : > { %9341 = vmatmul.mubr.msk.f32.gmra.mrb[118].mxu1 %vm998_vm13, %v3300_v29  ;;  %10440 = vmatprep.subr.bf16.mxu1 %v15710_v58  ;;  %v10393_v29 = vpack.c.bf16 %v4069_v25, %v4068_v12 }
 0x33b   : > { %9343 = vmatprep.mubr.msk.f32.mxu1 %vm11592_vm8, %v11593_v15 }
 0x33e   : > { %9344 = vmatmul.mubr.msk.f32.gmra.mrb[120].mxu1 %vm998_vm13, %v3303_v22  ;;  %v13467_v22 = vld [vmem:[%s15638_s4] ss:$0 sm:$0xff] }
 0x33f   : > { %9346 = vmatprep.mubr.msk.f32.mxu1 %vm11592_vm8, %v11593_v15 }
 0x342   : > { %9347 = vmatmul.mubr.msk.f32.gmra.mrb[122].mxu1 %vm998_vm13, %v3306_v36  ;;  %v2999_v36 = vadd.f32 %v13245_v11, %v13237_v4 }
 0x343   : > { %9349 = vmatprep.mubr.msk.f32.mxu1 %vm11592_vm8, %v11593_v15 }
 0x344   : > { %v3089_v4 = vmul.f32 0.01, %v2999_v36  ;;  %vm3064_vm3 = vcmp.gt.f32.partialorder %v2999_v36, 0.0 }
 0x346   : > { %9350 = vmatmul.mubr.msk.f32.gmra.mrb[124].mxu1 %vm998_vm13, %v3309_v45  ;;  %v4092_v45 = vld [vmem:[%s15639_s5 + $0x130] sm:$0xff] }
 0x347   : > { %9352 = vmatprep.mubr.msk.f32.mxu1 %vm11592_vm8, %v11593_v15 }
 0x34a   : > { %9353 = vmatmul.mubr.msk.f32.gmra.mrb[126].mxu1 %vm998_vm13, %v3312_v37  ;;  %v4093_v37 = vld [vmem:[%s15639_s5 + $0x138] sm:$0xff] }
 0x34b   : > { %9355 = vmatprep.mubr.msk.f32.mxu1 %vm11592_vm8, %v11593_v15 }
 0x36c   : > { %v3179_v16 = vpop.permute.xlu0 %3178 }
 0x36d   : > { %v3240_v0 = vmax.f32 %v13253_v7, %v3179_v16 }
 0x36f   : > { %3265 = vst.msk [vmem:[#allocation2 + $0x148] sm:$0xff] %vm998_vm13, %v3240_v0  ;;  %v10441_v0 = vpack.c.bf16 %v4093_v37, %v4092_v45 }
 0x371   : > { %10443 = vmatpush3.bf16.xpose.msk.msra.mxu1 %vm13357_vm0, %v10441_v0 }
 0x372   : > { %10444 = vmatprep.subr.bf16.mxu1 %v15710_v58 }
 0x37d   : > { %v3183_v52 = vpop.permute.xlu0 %3182 }
 0x37e   : > { %v3242_v35 = vmax.f32 %v13262_v56, %v3183_v52  ;;  %v8822_v56 = vpop.f32.mrb[152].mxu0 }
 0x37f   : > { %v8823_v47 = vpop.f32.mrb[153].mxu0 }
 0x380   : > { %3267 = vst.msk [vmem:[#allocation2 + $0x178] sm:$0xff] %vm998_vm13, %v3242_v35  ;;  %v13366_v39 = vadd.f32 %v8823_v47, %v8822_v56  ;;  %v8825_v10 = vpop.f32.mrb[154].mxu0  ;;  %v3091_v47 = vmul.f32 0.01, %v3007_v18 }
 0x381   : > { %v8826_v17 = vpop.f32.mrb[155].mxu0 }
 0x382   : > { %v13490_v17 = vsel %vm3064_vm3, %v2999_v36, %v3089_v4  ;;  %v13500_v1 = vsel %vm3066_vm5, %v3007_v18, %v3091_v47  ;;  %v3047_v30 = vadd.f32 %v13245_v11, %v13366_v39  ;;  %v4099_v47 = vld [vmem:[%s15639_s5 + $0x168] sm:$0xff] }
 0x384   : > { %v3187_v27 = vpop.permute.xlu0 %3186  ;;  %v3101_v39 = vmul.f32 0.01, %v3047_v30  ;;  %vm3076_vm12 = vcmp.gt.f32.partialorder %v3047_v30, 0.0 }
 0x385   : > { %v3244_v50 = vmax.f32 %v13272_v60, %v3187_v27  ;;  %v4057_v60 = vld [vmem:[%s15639_s5 + $0x18] sm:$0xff] }
 0x386   : > { %v10369_v44 = vpack.c.bf16 %v4057_v60, %v4056_v5  ;;  %v3023_v60 = vadd.f32 %v13245_v11, %v13270_v49  ;;  %v13556_v36 = vsel %vm3076_vm12, %v3047_v30, %v3101_v39 }
 0x387   : > { %3269 = vst.msk [vmem:[#allocation2 + $0x1a8] sm:$0xff] %vm998_vm13, %v3244_v50 }
 0x388   : > { %10371 = vmatpush3.bf16.xpose.msk.msra.mxu0 %vm13357_vm0, %v10369_v44  ;;  %v3093_v44 = vmul.f32 0.01, %v3015_v48  ;;  %vm3070_vm9 = vcmp.gt.f32.partialorder %v3023_v60, 0.0 }
 0x389   : > { %10372 = vmatprep.subr.bf16.mxu0 %v15710_v58 }
 0x38a   : > { %v13513_v32 = vsel %vm3068_vm6, %v3015_v48, %v3093_v44 }
 0x38d   : > { %v3191_v38 = vpop.permute.xlu0 %3190 }
 0x38e   : > { %v3246_v3 = vmax.f32 %v13288_v9, %v3191_v38  ;;  %v4059_v9 = vld [vmem:[%s15639_s5 + $0x28] sm:$0xff] }
 0x38f   : > { %v10373_v42 = vpack.c.bf16 %v4059_v9, %v4058_v26  ;;  %v4095_v26 = vld [vmem:[%s15639_s5 + $0x148] sm:$0xff] }
 0x390   : > { %3271 = vst.msk [vmem:[#allocation2 + $0x1d8] sm:$0xff] %vm998_vm13, %v3246_v3 }
 0x391   : > { %10375 = vmatpush3.bf16.xpose.msk.msra.mxu0 %vm13357_vm0, %v10373_v42 }
 0x392   : > { %10376 = vmatprep.subr.bf16.mxu0 %v15710_v58 }
 0x395   : > { %v3195_v6 = vpop.permute.xlu0 %3194 }
 0x396   : > { %v3248_v55 = vmax.f32 %v13305_v21, %v3195_v6  ;;  %v10381_v21 = vpack.c.bf16 %v4063_v53, %v4062_v19 }
 0x398   : > { %3273 = vst.msk [vmem:[#allocation2 + $0x208] sm:$0xff] %vm998_vm13, %v3248_v55  ;;  %v4094_v55 = vld [vmem:[%s15639_s5 + $0x140] sm:$0xff] }
 0x399   : > { %10379 = vmatpush3.bf16.xpose.msk.msra.mxu0 %vm13357_vm0, %v10377_v20  ;;  %v10445_v42 = vpack.c.bf16 %v4095_v26, %v4094_v55 }
 0x39a   : > { %10380 = vmatprep.subr.bf16.mxu0 %v15710_v58 }
 0x39b   : > { %10447 = vmatpush3.bf16.xpose.msk.msra.mxu1 %vm13357_vm0, %v10445_v42 }
 0x39c   : > { %10448 = vmatprep.subr.bf16.mxu1 %v15710_v58 }
 0x39d   : > { %v3199_v40 = vpop.permute.xlu0 %3198 }
 0x39e   : > { %v3250_v61 = vmax.f32 %v13320_v34, %v3199_v40  ;;  %v10389_v34 = vpack.c.bf16 %v4067_v2, %v4066_v8  ;;  %v3095_v40 = vmul.f32 0.01, %v3023_v60 }
 0x3a0   : > { %3275 = vst.msk [vmem:[#allocation2 + $0x238] sm:$0xff] %vm998_vm13, %v3250_v61  ;;  %v3031_v61 = vadd.f32 %v13245_v11, %v13286_v59  ;;  %v13526_v19 = vsel %vm3070_vm9, %v3023_v60, %v3095_v40 }
 0x3a1   : > { %10383 = vmatpush3.bf16.xpose.msk.msra.mxu0 %vm13357_vm0, %v10381_v21  ;;  %v3099_v21 = vmul.f32 0.01, %v3039_v62 }
 0x3a2   : > { %10384 = vmatprep.subr.bf16.mxu0 %v15710_v58  ;;  %v3097_v59 = vmul.f32 0.01, %v3031_v61  ;;  %vm3072_vm10 = vcmp.gt.f32.partialorder %v3031_v61, 0.0 }
 0x3a3   : > { %v13547_v8 = vsel %vm3074_vm11, %v3039_v62, %v3099_v21  ;;  %v4070_v21 = vld [vmem:[%s15639_s5 + $0x80] sm:$0xff] }
 0x3a4   : > { %v13533_v46 = vsel %vm3072_vm10, %v3031_v61, %v3097_v59 }
 0x3a9   : > { %10387 = vmatpush3.bf16.xpose.msk.msra.mxu0 %vm13357_vm0, %v10385_v28  ;;  %v4096_v28 = vld [vmem:[%s15639_s5 + $0x150] sm:$0xff] }
 0x3aa   : > { %10388 = vmatprep.subr.bf16.mxu0 %v15710_v58  ;;  %v10449_v11 = vpack.c.bf16 %v4097_v57, %v4096_v28 }
 0x3ac   : > { %10451 = vmatpush3.bf16.xpose.msk.msra.mxu1 %vm13357_vm0, %v10449_v11  ;;  %v4072_v11 = vld [vmem:[%s15639_s5 + $0x90] sm:$0xff] }
 0x3ad   : > { %10452 = vmatprep.subr.bf16.mxu1 %v15710_v58 }
 0x3b1   : > { %10391 = vmatpush3.bf16.xpose.msk.msra.mxu0 %vm13357_vm0, %v10389_v34 }
 0x3b2   : > { %10392 = vmatprep.subr.bf16.mxu0 %v15710_v58 }
 0x3b9   : > { %10395 = vmatpush3.bf16.xpose.msk.msra.mxu0 %vm13357_vm0, %v10393_v29 }
 0x3ba   : > { %10396 = vmatprep.subr.bf16.mxu0 %v15710_v58 }
 0x3f1   : > { %v3730_v16 = vpop.f32.mrb[104].mxu1 }
 0x3f2   : > { %v11188_v52 = vadd.f32 %v13467_v22, %v3730_v16  ;;  %v9321_v35 = vpop.f32.mrb[105].mxu1 }
 0x3f4   : > { %vm3854_vm1 = vcmp.gt.f32.partialorder %v11188_v52, 0.0  ;;  %v3879_v31 = vmul.f32 0.01, %v11188_v52 }
 0x3f5   : > { %v3735_v51 = vpop.f32.mrb[106].mxu1 }
 0x3f6   : > { %v11189_v27 = vadd.f32 %v13467_v22, %v3735_v51  ;;  %v9324_v56 = vpop.f32.mrb[107].mxu1  ;;  %v13484_v50 = vsel %vm3854_vm1, %v11188_v52, %v3879_v31 }
 0x3f7   : > { %3954 = vrot.lane.b32.xlu1 %v13484_v50, %s11594_s28  ;;  %v4098_v56 = vld [vmem:[%s15639_s5 + $0x160] sm:$0xff] }
 0x3f8   : > { %vm3855_vm4 = vcmp.gt.f32.partialorder %v11189_v27, 0.0  ;;  %v3880_v10 = vmul.f32 0.01, %v11189_v27  ;;  %v10453_v48 = vpack.c.bf16 %v4099_v47, %v4098_v56  ;;  %v3324_v56 = vld [vmem:[#allocation2 + $0x178] sm:$0xff] }
 0x3f9   : > { %v3740_v38 = vpop.f32.mrb[108].mxu1 }
 0x3fa   : > { %v9327_v3 = vpop.f32.mrb[109].mxu1  ;;  %v13492_v5 = vsel %vm3855_vm4, %v11189_v27, %v3880_v10  ;;  %v11190_v34 = vadd.f32 %v13467_v22, %v3740_v38  ;;  %10455 = vmatpush3.bf16.xpose.msk.msra.mxu1 %vm13357_vm0, %v10453_v48 }
 0x3fb   : > { %3176 = vrot.lane.b32.xlu1 %v13490_v17, %s11590_s18  ;;  %3956 = vrot.lane.b32.xlu0 %v13492_v5, %s11594_s28 }
 0x3fc   : > { %v3881_v37 = vmul.f32 0.01, %v11190_v34  ;;  %vm3856_vm1 = vcmp.gt.f32.partialorder %v11190_v34, 0.0  ;;  %10456 = vmatprep.subr.bf16.mxu1 %v15710_v58 }
 0x3fd   : > { %v3745_v6 = vpop.f32.mrb[110].mxu1 }
 0x3fe   : > { %v11191_v49 = vadd.f32 %v13467_v22, %v3745_v6  ;;  %v9330_v9 = vpop.f32.mrb[111].mxu1  ;;  %v13567_v27 = vsel %vm3856_vm1, %v11190_v34, %v3881_v37 }
 0x3ff   : > { %3180 = vrot.lane.b32.xlu1 %v13500_v1, %s11590_s18 }
 0x400   : > { %vm3857_vm7 = vcmp.gt.f32.partialorder %v11191_v49, 0.0  ;;  %v3882_v41 = vmul.f32 0.01, %v11191_v49 }
 0x401   : > { %v3750_v20 = vpop.f32.mrb[112].mxu1 }
 0x402   : > { %v9333_v23 = vpop.f32.mrb[113].mxu1  ;;  %v13518_v43 = vsel %vm3857_vm7, %v11191_v49, %v3882_v41  ;;  %v11192_v16 = vadd.f32 %v13467_v22, %v3750_v20  ;;  %v4100_v20 = vld [vmem:[%s15639_s5 + $0x170] sm:$0xff] }
 0x403   : > { %3184 = vrot.lane.b32.xlu1 %v13513_v32, %s11590_s18  ;;  %3960 = vrot.lane.b32.xlu0 %v13518_v43, %s11594_s28  ;;  %v4101_v23 = vld [vmem:[%s15639_s5 + $0x178] sm:$0xff] }
 0x404   : > { %v3883_v18 = vmul.f32 0.01, %v11192_v16  ;;  %vm3858_vm3 = vcmp.gt.f32.partialorder %v11192_v16, 0.0 }
 0x405   : > { %v3755_v53 = vpop.f32.mrb[114].mxu1 }
 0x406   : > { %v11193_v54 = vadd.f32 %v13467_v22, %v3755_v53  ;;  %v9336_v14 = vpop.f32.mrb[115].mxu1  ;;  %v13580_v6 = vsel %vm3858_vm3, %v11192_v16, %v3883_v18  ;;  %v3318_v16 = vld [vmem:[#allocation2 + $0x148] sm:$0xff]  ;;  %v4077_v18 = vld [vmem:[%s15639_s5 + $0xb8] sm:$0xff] }
 0x407   : > { %3188 = vrot.lane.b32.xlu1 %v13526_v19, %s11590_s18 }
 0x408   : > { %vm3859_vm2 = vcmp.gt.f32.partialorder %v11193_v54, 0.0  ;;  %v3884_v63 = vmul.f32 0.01, %v11193_v54 }
 0x409   : > { %v3760_v33 = vpop.f32.mrb[116].mxu1 }
 0x40a   : > { %v9339_v24 = vpop.f32.mrb[117].mxu1  ;;  %v13535_v13 = vsel %vm3859_vm2, %v11193_v54, %v3884_v63  ;;  %v11194_v4 = vadd.f32 %v13467_v22, %v3760_v33  ;;  %v10457_v54 = vpack.c.bf16 %v4101_v23, %v4100_v20  ;;  %v4071_v63 = vld [vmem:[%s15639_s5 + $0x88] sm:$0xff] }
 0x40b   : > { %3192 = vrot.lane.b32.xlu1 %v13533_v46, %s11590_s18  ;;  %3964 = vrot.lane.b32.xlu0 %v13535_v13, %s11594_s28  ;;  %v10397_v33 = vpack.c.bf16 %v4071_v63, %v4070_v21  ;;  %v3342_v23 = vld [vmem:[#allocation2 + $0x208] sm:$0xff] }
 0x40c   : > { %v3885_v3 = vmul.f32 0.01, %v11194_v4  ;;  %vm3860_vm5 = vcmp.gt.f32.partialorder %v11194_v4, 0.0  ;;  %10459 = vmatpush3.bf16.xpose.msk.msra.mxu1 %vm13357_vm0, %v10457_v54  ;;  %v4085_v54 = vld [vmem:[%s15639_s5 + $0xf8] sm:$0xff] }
 0x40d   : > { %v3765_v2 = vpop.f32.mrb[118].mxu1  ;;  %10492 = vmatprep.subr.bf16.mxu1 %v15710_v58 }
 0x40e   : > { %v11195_v12 = vadd.f32 %v13467_v22, %v3765_v2  ;;  %v9342_v25 = vpop.f32.mrb[119].mxu1  ;;  %v13591_v61 = vsel %vm3860_vm5, %v11194_v4, %v3885_v3 }
 0x40f   : > { %3196 = vrot.lane.b32.xlu1 %v13547_v8, %s11590_s18  ;;  %v4074_v25 = vld [vmem:[%s15639_s5 + $0xa0] sm:$0xff] }
 0x410   : > { %vm3861_vm14 = vcmp.gt.f32.partialorder %v11195_v12, 0.0  ;;  %v3886_v29 = vmul.f32 0.01, %v11195_v12 }
 0x411   : > { %v3770_v45 = vpop.f32.mrb[120].mxu1 }
 0x412   : > { %v9345_v0 = vpop.f32.mrb[121].mxu1  ;;  %v13559_v52 = vsel %vm3861_vm14, %v11195_v12, %v3886_v29  ;;  %v11196_v60 = vadd.f32 %v13467_v22, %v3770_v45  ;;  %v4075_v29 = vld [vmem:[%s15639_s5 + $0xa8] sm:$0xff] }
 0x413   : > { %3200 = vrot.lane.b32.xlu1 %v13556_v36, %s11590_s18  ;;  %3968 = vrot.lane.b32.xlu0 %v13559_v52, %s11594_s28  ;;  %s7664_s18 = sshll.u32 %s362_s30, 4  ;;  %s15593_s18 = int_to_ptr.vmem [resolvable:$true] %s7664_s18 }
 0x414   : > { %v3887_v49 = vmul.f32 0.01, %v11196_v60  ;;  %vm3862_vm6 = vcmp.gt.f32.partialorder %v11196_v60, 0.0  ;;  %s11526_s21 = scalar_lea.vmem %s15593_s18, 128  ;;  %p11533_p1 = scmp.lt.s32.totalorder %s15593_s18, %s11531_s27 }
 0x415   : > { %v3775_v35 = vpop.f32.mrb[122].mxu1  ;;  %p11527_p12 = scmp.ne.s32.totalorder %s15593_s18, %s11526_s21  ;;  %p11534_p2 = scmp.lt.s32.totalorder %s11532_s0, %s11526_s21 }
 0x416   : > { %v11197_v31 = vadd.f32 %v13467_v22, %v3775_v35  ;;  %v9348_v51 = vpop.f32.mrb[123].mxu1  ;;  %v13601_v59 = vsel %vm3862_vm6, %v11196_v60, %v3887_v49  ;;  %v4080_v60 = vld [vmem:[%s15639_s5 + $0xd0] sm:$0xff] }
 0x417   : > { %3958 = vrot.lane.b32.xlu1 %v13567_v27, %s11594_s28  ;;  %p11528_p13 = pnand %p11527_p12, %p11690_p5  ;;  %p11535_p3 = por %p11534_p2, %p11533_p1 }
 0x418   : > { %vm3863_vm4 = vcmp.gt.f32.partialorder %v11197_v31, 0.0  ;;  %v3888_v10 = vmul.f32 0.01, %v11197_v31 }
 0x419   : > { %v3780_v38 = vpop.f32.mrb[124].mxu1  ;;  %p11529_p0 = pneg %p11528_p13 }
 0x41a   : > { %v9351_v44 = vpop.f32.mrb[125].mxu1  ;;  %v13582_v55 = vsel %vm3863_vm4, %v11197_v31, %v3888_v10  ;;  %v11198_v9 = vadd.f32 %v13467_v22, %v3780_v38  ;;  %v4079_v10 = vld [vmem:[%s15639_s5 + $0xc8] sm:$0xff] }
 0x41b   : > { %3962 = vrot.lane.b32.xlu1 %v13580_v6, %s11594_s28  ;;  %3972 = vrot.lane.b32.xlu0 %v13582_v55, %s11594_s28  ;;  %v4081_v44 = vld [vmem:[%s15639_s5 + $0xd8] sm:$0xff]  ;;  %p11536_p4 = pnand %p11535_p3, %p11529_p0 }
 0x41c   : > { %v3889_v62 = vmul.f32 0.01, %v11198_v9  ;;  %vm3864_vm9 = vcmp.gt.f32.partialorder %v11198_v9, 0.0  ;;  %v10417_v49 = vpack.c.bf16 %v4081_v44, %v4080_v60  ;;  %v4113_v60 = vld [vmem:[%s15639_s5 + $0x1d8] sm:$0xff]  ;;  %v4128_v44 = vld [vmem:[%s15639_s5 + $0x250] sm:$0xff] }
 0x41d   : > { %v3785_v26 = vpop.f32.mrb[126].mxu1 }
 0x41e   : > { %v11199_v42 = vadd.f32 %v13467_v22, %v3785_v26  ;;  %v9354_v40 = vpop.f32.mrb[127].mxu1  ;;  %v13612_v14 = vsel %vm3864_vm9, %v11198_v9, %v3889_v62  ;;  %v3336_v9 = vld [vmem:[#allocation2 + $0x1d8] sm:$0xff]  ;;  %v4084_v62 = vld [vmem:[%s15639_s5 + $0xf0] sm:$0xff] }
 0x41f   : > { %3966 = vrot.lane.b32.xlu1 %v13591_v61, %s11594_s28  ;;  %v4083_v40 = vld [vmem:[%s15639_s5 + $0xe8] sm:$0xff]  ;;  %v10425_v63 = vpack.c.bf16 %v4085_v54, %v4084_v62  ;;  %v4116_v54 = vld [vmem:[%s15639_s5 + $0x1f0] sm:$0xff] }
 0x420   : > { %vm3865_vm7 = vcmp.gt.f32.partialorder %v11199_v42, 0.0  ;;  %v3890_v41 = vmul.f32 0.01, %v11199_v42 }
 0x422   : > { %v13603_v53 = vsel %vm3865_vm7, %v11199_v42, %v3890_v41  ;;  %v4082_v42 = vld [vmem:[%s15639_s5 + $0xe0] sm:$0xff] }
 0x423   : > { %3970 = vrot.lane.b32.xlu1 %v13601_v59, %s11594_s28  ;;  %3976 = vrot.lane.b32.xlu0 %v13603_v53, %s11594_s28  ;;  %v10421_v20 = vpack.c.bf16 %v4083_v40, %v4082_v42  ;;  %v4114_v42 = vld [vmem:[%s15639_s5 + $0x1e0] sm:$0xff]  ;;  %v4115_v40 = vld [vmem:[%s15639_s5 + $0x1e8] sm:$0xff] }
 0x427   : > { %3974 = vrot.lane.b32.xlu1 %v13612_v14, %s11594_s28 }
 0x469   : > { %v3955_v30 = vpop.permute.xlu1 %3954 }
 0x46a   : > { %v4029_v24 = vmax.f32 %v13484_v50, %v3955_v30  ;;  %v4073_v50 = vld [vmem:[%s15639_s5 + $0x98] sm:$0xff] }
 0x46b   : > { %v10401_v2 = vpack.c.bf16 %v4073_v50, %v4072_v11  ;;  %v3348_v30 = vld [vmem:[#allocation2 + $0x238] sm:$0xff] }
 0x46c   : > { %9427 = vmatmul.mubr.msk.f32.vlgmr.msra.gmra.mrb[156].mxu0 %vm4454_vm15, %v4029_v24  ;;  %v4103_v24 = vld [vmem:[%s15639_s5 + $0x188] sm:$0xff] }
 0x46d   : > { %10399 = vmatpush3.bf16.xpose.msk.msra.mxu0 %vm13357_vm0, %v10397_v33  ;;  %v3177_v28 = vpop.permute.xlu1 %3176  ;;  %9461 = vmatprep.mubr.msk.f32.mxu0 %vm11592_vm8, %v11593_v15  ;;  %v4102_v33 = vld [vmem:[%s15639_s5 + $0x180] sm:$0xff]  ;;  %v3957_v11 = vpop.permute.xlu0 %3956 }
 0x46e   : > { %v3239_v57 = vmax.f32 %v13490_v17, %v3177_v28  ;;  %10400 = vmatprep.subr.bf16.mxu0 %v15710_v58  ;;  %v4118_v28 = vld [vmem:[%s15639_s5 + $0x200] sm:$0xff] }
 0x470   : > { %3264 = vst.msk [vmem:[#allocation2 + $0x130] sm:$0xff] %vm998_vm13, %v3239_v57  ;;  %v4119_v57 = vld [vmem:[%s15639_s5 + $0x208] sm:$0xff] }
 0x471   : > { %v3181_v39 = vpop.permute.xlu1 %3180 }
 0x472   : > { %v3241_v34 = vmax.f32 %v13500_v1, %v3181_v39 }
 0x474   : > { %3266 = vst.msk [vmem:[#allocation2 + $0x160] sm:$0xff] %vm998_vm13, %v3241_v34  ;;  %v10493_v34 = vpack.c.bf16 %v4119_v57, %v4118_v28  ;;  %v4134_v28 = vld [vmem:[%s15639_s5 + $0x280] sm:$0xff]  ;;  %v4135_v57 = vld [vmem:[%s15639_s5 + $0x288] sm:$0xff] }
 0x475   : > { %10403 = vmatpush3.bf16.xpose.msk.msra.mxu0 %vm13357_vm0, %v10401_v2  ;;  %v3185_v17 = vpop.permute.xlu1 %3184  ;;  %v10461_v2 = vpack.c.bf16 %v4103_v24, %v4102_v33 }
 0x476   : > { %v3243_v12 = vmax.f32 %v13513_v32, %v3185_v17  ;;  %10404 = vmatprep.subr.bf16.mxu0 %v15710_v58  ;;  %v10405_v32 = vpack.c.bf16 %v4075_v29, %v4074_v25  ;;  %v4030_v17 = vmax.f32 %v13492_v5, %v3957_v11  ;;  %v4104_v25 = vld [vmem:[%s15639_s5 + $0x190] sm:$0xff]  ;;  %v4105_v5 = vld [vmem:[%s15639_s5 + $0x198] sm:$0xff]  ;;  %v4150_v11 = vld [vmem:[%s15639_s5 + $0x300] sm:$0xff] }
 0x477   : > { %v3315_v45 = vld [vmem:[#allocation2 + $0x130] sm:$0xff]  ;;  %v4121_v29 = vld [vmem:[%s15639_s5 + $0x218] sm:$0xff] }
 0x478   : > { %3268 = vst.msk [vmem:[#allocation2 + $0x190] sm:$0xff] %vm998_vm13, %v3243_v12  ;;  %9356 = vmatmul.mubr.msk.f32.gmra.mrb[128].mxu1 %vm998_vm13, %v3315_v45  ;;  %v10465_v45 = vpack.c.bf16 %v4105_v5, %v4104_v25  ;;  %v4136_v5 = vld [vmem:[%s15639_s5 + $0x290] sm:$0xff] }
 0x479   : > { %v3189_v1 = vpop.permute.xlu1 %3188  ;;  %9358 = vmatprep.mubr.msk.f32.mxu1 %vm11592_vm8, %v11593_v15 }
 0x47a   : > { %v3245_v37 = vmax.f32 %v13526_v19, %v3189_v1  ;;  %v4076_v19 = vld [vmem:[%s15639_s5 + $0xb0] sm:$0xff] }
 0x47b   : > { %v3321_v4 = vld [vmem:[#allocation2 + $0x160] sm:$0xff] }
 0x47c   : > { %3270 = vst.msk [vmem:[#allocation2 + $0x1c0] sm:$0xff] %vm998_vm13, %v3245_v37  ;;  %9359 = vmatmul.mubr.msk.f32.gmra.mrb[130].mxu1 %vm998_vm13, %v3318_v16  ;;  %v4107_v37 = vld [vmem:[%s15639_s5 + $0x1a8] sm:$0xff]  ;;  %v4122_v16 = vld [vmem:[%s15639_s5 + $0x220] sm:$0xff] }
 0x47d   : > { %10407 = vmatpush3.bf16.xpose.msk.msra.mxu0 %vm13357_vm0, %v10405_v32  ;;  %v3193_v0 = vpop.permute.xlu1 %3192  ;;  %9361 = vmatprep.mubr.msk.f32.mxu1 %vm11592_vm8, %v11593_v15  ;;  %v4106_v32 = vld [vmem:[%s15639_s5 + $0x1a0] sm:$0xff] }
 0x47e   : > { %v3247_v35 = vmax.f32 %v13533_v46, %v3193_v0  ;;  %10408 = vmatprep.subr.bf16.mxu0 %v15710_v58  ;;  %v10409_v46 = vpack.c.bf16 %v4077_v18, %v4076_v19  ;;  %v4123_v0 = vld [vmem:[%s15639_s5 + $0x228] sm:$0xff]  ;;  %v4108_v18 = vld [vmem:[%s15639_s5 + $0x1b0] sm:$0xff] }
 0x47f   : > { %v3327_v38 = vld [vmem:[#allocation2 + $0x190] sm:$0xff]  ;;  %v10501_v19 = vpack.c.bf16 %v4123_v0, %v4122_v16  ;;  %v4155_v16 = vld [vmem:[%s15639_s5 + $0x328] sm:$0xff] }
 0x480   : > { %3272 = vst.msk [vmem:[#allocation2 + $0x1f0] sm:$0xff] %vm998_vm13, %v3247_v35  ;;  %9362 = vmatmul.mubr.msk.f32.gmra.mrb[132].mxu1 %vm998_vm13, %v3321_v4  ;;  %v10469_v35 = vpack.c.bf16 %v4107_v37, %v4106_v32  ;;  %v4109_v4 = vld [vmem:[%s15639_s5 + $0x1b8] sm:$0xff]  ;;  %v4139_v32 = vld [vmem:[%s15639_s5 + $0x2a8] sm:$0xff]  ;;  %v4154_v37 = vld [vmem:[%s15639_s5 + $0x320] sm:$0xff] }
 0x481   : > { %v3197_v31 = vpop.permute.xlu1 %3196  ;;  %9364 = vmatprep.mubr.msk.f32.mxu1 %vm11592_vm8, %v11593_v15 }
 0x482   : > { %v3249_v51 = vmax.f32 %v13547_v8, %v3197_v31  ;;  %v4078_v8 = vld [vmem:[%s15639_s5 + $0xc0] sm:$0xff]  ;;  %v4124_v31 = vld [vmem:[%s15639_s5 + $0x230] sm:$0xff] }
 0x483   : > { %v10413_v3 = vpack.c.bf16 %v4079_v10, %v4078_v8  ;;  %v3333_v26 = vld [vmem:[#allocation2 + $0x1c0] sm:$0xff]  ;;  %v4127_v10 = vld [vmem:[%s15639_s5 + $0x248] sm:$0xff] }
 0x484   : > { %3274 = vst.msk [vmem:[#allocation2 + $0x220] sm:$0xff] %vm998_vm13, %v3249_v51  ;;  %9365 = vmatmul.mubr.msk.f32.gmra.mrb[134].mxu1 %vm998_vm13, %v3324_v56  ;;  %v10473_v51 = vpack.c.bf16 %v4109_v4, %v4108_v18  ;;  %v4126_v8 = vld [vmem:[%s15639_s5 + $0x240] sm:$0xff]  ;;  %v4141_v18 = vld [vmem:[%s15639_s5 + $0x2b8] sm:$0xff]  ;;  %v4156_v4 = vld [vmem:[%s15639_s5 + $0x330] sm:$0xff] }
 0x485   : > { %10411 = vmatpush3.bf16.xpose.msk.msra.mxu0 %vm13357_vm0, %v10409_v46  ;;  %v3201_v47 = vpop.permute.xlu1 %3200  ;;  %9367 = vmatprep.mubr.msk.f32.mxu1 %vm11592_vm8, %v11593_v15  ;;  %v4125_v46 = vld [vmem:[%s15639_s5 + $0x238] sm:$0xff] }
 0x486   : > { %v3251_v48 = vmax.f32 %v13556_v36, %v3201_v47  ;;  %10412 = vmatprep.subr.bf16.mxu0 %v15710_v58  ;;  %v3330_v36 = vld [vmem:[#allocation2 + $0x1a8] sm:$0xff]  ;;  %v10505_v56 = vpack.c.bf16 %v4125_v46, %v4124_v31  ;;  %v4110_v47 = vld [vmem:[%s15639_s5 + $0x1c0] sm:$0xff]  ;;  %v4157_v31 = vld [vmem:[%s15639_s5 + $0x338] sm:$0xff] }
 0x487   : > { %v3339_v41 = vld [vmem:[#allocation2 + $0x1f0] sm:$0xff] }
 0x488   : > { %3276 = vst.msk [vmem:[#allocation2 + $0x250] sm:$0xff] %vm998_vm13, %v3251_v48  ;;  %9368 = vmatmul.mubr.msk.f32.gmra.mrb[136].mxu1 %vm998_vm13, %v3327_v38  ;;  %v4111_v48 = vld [vmem:[%s15639_s5 + $0x1c8] sm:$0xff] }
 0x489   : > { %9370 = vmatprep.mubr.msk.f32.mxu1 %vm11592_vm8, %v11593_v15  ;;  %v3959_v50 = vpop.permute.xlu1 %3958  ;;  %v10477_v38 = vpack.c.bf16 %v4111_v48, %v4110_v47  ;;  %v4143_v47 = vld [vmem:[%s15639_s5 + $0x2c8] sm:$0xff]  ;;  %v4158_v48 = vld [vmem:[%s15639_s5 + $0x340] sm:$0xff] }
 0x48a   : > { %v4031_v12 = vmax.f32 %v13567_v27, %v3959_v50  ;;  %v4120_v27 = vld [vmem:[%s15639_s5 + $0x210] sm:$0xff]  ;;  %v4151_v50 = vld [vmem:[%s15639_s5 + $0x308] sm:$0xff] }
 0x48b   : > { %v3345_v21 = vld [vmem:[#allocation2 + $0x220] sm:$0xff]  ;;  %v10497_v1 = vpack.c.bf16 %v4121_v29, %v4120_v27  ;;  %v4153_v27 = vld [vmem:[%s15639_s5 + $0x318] sm:$0xff] }
 0x48c   : > { %9371 = vmatmul.mubr.msk.f32.gmra.mrb[138].mxu1 %vm998_vm13, %v3330_v36  ;;  %v4112_v36 = vld [vmem:[%s15639_s5 + $0x1d0] sm:$0xff] }
 0x48d   : > { %10415 = vmatpush3.bf16.xpose.msk.msra.mxu0 %vm13357_vm0, %v10413_v3  ;;  %9373 = vmatprep.mubr.msk.f32.mxu1 %vm11592_vm8, %v11593_v15  ;;  %v10509_v3 = vpack.c.bf16 %v4127_v10, %v4126_v8  ;;  %v4159_v8 = vld [vmem:[%s15639_s5 + $0x348] sm:$0xff] }
 0x48e   : > { %10416 = vmatprep.subr.bf16.mxu0 %v15710_v58 }
 0x48f   : > { %v3351_v39 = vld [vmem:[#allocation2 + $0x250] sm:$0xff] }
 0x490   : > { %9374 = vmatmul.mubr.msk.f32.gmra.mrb[140].mxu1 %vm998_vm13, %v3333_v26  ;;  %v4129_v26 = vld [vmem:[%s15639_s5 + $0x258] sm:$0xff] }
 0x491   : > { %9376 = vmatprep.mubr.msk.f32.mxu1 %vm11592_vm8, %v11593_v15 }
 0x494   : > { %9377 = vmatmul.mubr.msk.f32.gmra.mrb[142].mxu1 %vm998_vm13, %v3336_v9  ;;  %v10513_v9 = vpack.c.bf16 %v4129_v26, %v4128_v44  ;;  %v4161_v44 = vld [vmem:[%s15639_s5 + $0x358] sm:$0xff] }
 0x495   : > { %10419 = vmatpush3.bf16.xpose.msk.msra.mxu0 %vm13357_vm0, %v10417_v49  ;;  %9379 = vmatprep.mubr.msk.f32.mxu1 %vm11592_vm8, %v11593_v15  ;;  %v10481_v49 = vpack.c.bf16 %v4113_v60, %v4112_v36  ;;  %v4145_v36 = vld [vmem:[%s15639_s5 + $0x2d8] sm:$0xff]  ;;  %v4160_v60 = vld [vmem:[%s15639_s5 + $0x350] sm:$0xff] }
 0x496   : > { %10420 = vmatprep.subr.bf16.mxu0 %v15710_v58 }
 0x498   : > { %9380 = vmatmul.mubr.msk.f32.gmra.mrb[144].mxu1 %vm998_vm13, %v3339_v41  ;;  %v4130_v41 = vld [vmem:[%s15639_s5 + $0x260] sm:$0xff] }
 0x499   : > { %9382 = vmatprep.mubr.msk.f32.mxu1 %vm11592_vm8, %v11593_v15 }
 0x49c   : > { %9383 = vmatmul.mubr.msk.f32.gmra.mrb[146].mxu1 %vm998_vm13, %v3342_v23  ;;  %v10485_v23 = vpack.c.bf16 %v4115_v40, %v4114_v42  ;;  %v4147_v42 = vld [vmem:[%s15639_s5 + $0x2e8] sm:$0xff]  ;;  %v4162_v40 = vld [vmem:[%s15639_s5 + $0x360] sm:$0xff] }
 0x49d   : > { %10423 = vmatpush3.bf16.xpose.msk.msra.mxu0 %vm13357_vm0, %v10421_v20  ;;  %9385 = vmatprep.mubr.msk.f32.mxu1 %vm11592_vm8, %v11593_v15  ;;  %v4131_v20 = vld [vmem:[%s15639_s5 + $0x268] sm:$0xff] }
 0x49e   : > { %10424 = vmatprep.subr.bf16.mxu0 %v15710_v58  ;;  %v10517_v62 = vpack.c.bf16 %v4131_v20, %v4130_v41  ;;  %v4163_v41 = vld [vmem:[%s15639_s5 + $0x368] sm:$0xff] }
 0x4a0   : > { %9386 = vmatmul.mubr.msk.f32.gmra.mrb[148].mxu1 %vm998_vm13, %v3345_v21  ;;  %v4117_v21 = vld [vmem:[%s15639_s5 + $0x1f8] sm:$0xff] }
 0x4a1   : > { %9388 = vmatprep.mubr.msk.f32.mxu1 %vm11592_vm8, %v11593_v15  ;;  %v10489_v33 = vpack.c.bf16 %v4117_v21, %v4116_v54  ;;  %v4149_v54 = vld [vmem:[%s15639_s5 + $0x2f8] sm:$0xff]  ;;  %v4164_v21 = vld [vmem:[%s15639_s5 + $0x370] sm:$0xff] }
 0x4a4   : > { %9389 = vmatmul.mubr.msk.f32.gmra.mrb[150].mxu1 %vm998_vm13, %v3348_v30  ;;  %v4133_v30 = vld [vmem:[%s15639_s5 + $0x278] sm:$0xff] }
 0x4a5   : > { %10427 = vmatpush3.bf16.xpose.msk.msra.mxu0 %vm13357_vm0, %v10425_v63  ;;  %9391 = vmatprep.mubr.msk.f32.mxu1 %vm11592_vm8, %v11593_v15  ;;  %v4132_v63 = vld [vmem:[%s15639_s5 + $0x270] sm:$0xff] }
 0x4a6   : > { %10460 = vmatprep.subr.bf16.mxu0 %v15710_v58  ;;  %v10521_v24 = vpack.c.bf16 %v4133_v30, %v4132_v63  ;;  %v4165_v63 = vld [vmem:[%s15639_s5 + $0x378] sm:$0xff] }
 0x4a8   : > { %9392 = vmatmul.mubr.msk.f32.gmra.mrb[152].mxu1 %vm998_vm13, %v3351_v39  ;;  %v3961_v39 = vpop.permute.xlu0 %3960 }
 0x4a9   : > { %9496 = vmatprep.mubr.msk.f32.mxu1 %vm11592_vm8, %v11593_v15 }
 0x4ac   : > { %9462 = vmatmul.mubr.msk.f32.vlgmr.msra.gmra.mrb[158].mxu0 %vm4454_vm15, %v4030_v17  ;;  %9497 = vmatmul.mubr.msk.f32.vlgmr.msra.gmra.mrb[154].mxu1 %vm4454_vm15, %v4031_v12  ;;  %v10557_v17 = vpack.c.bf16 %v4151_v50, %v4150_v11  ;;  %v4032_v12 = vmax.f32 %v13518_v43, %v3961_v39  ;;  %v4137_v43 = vld [vmem:[%s15639_s5 + $0x298] sm:$0xff]  ;;  %v4183_v11 = vld [vmem:[%s15639_s5 + $0x408] sm:$0xff]  ;;  %v3965_v50 = vpop.permute.xlu0 %3964 }
 0x4ad   : > { %10463 = vmatpush3.bf16.xpose.msk.msra.mxu0 %vm13357_vm0, %v10461_v2  ;;  %10495 = vmatpush3.bf16.xpose.msk.msra.mxu1 %vm13357_vm0, %v10493_v34  ;;  %v3963_v2 = vpop.permute.xlu1 %3962  ;;  %v10525_v34 = vpack.c.bf16 %v4135_v57, %v4134_v28  ;;  %v10529_v29 = vpack.c.bf16 %v4137_v43, %v4136_v5  ;;  %v4167_v28 = vld [vmem:[%s15639_s5 + $0x388] sm:$0xff]  ;;  %v4182_v57 = vld [vmem:[%s15639_s5 + $0x400] sm:$0xff]  ;;  %v4185_v5 = vld [vmem:[%s15639_s5 + $0x418] sm:$0xff] }
 0x4ae   : > { %10464 = vmatprep.subr.bf16.mxu0 %v15710_v58  ;;  %10496 = vmatprep.subr.bf16.mxu1 %v15710_v58  ;;  %v4033_v25 = vmax.f32 %v13580_v6, %v3963_v2  ;;  %v4152_v6 = vld [vmem:[%s15639_s5 + $0x310] sm:$0xff] }
 0x4af   : > { %9531 = vmatprep.mubr.msk.f32.mxu0 %vm11592_vm8, %v11593_v15  ;;  %9566 = vmatprep.mubr.msk.f32.mxu1 %vm11592_vm8, %v11593_v15 }
 0x4b1   : > { %v3967_v39 = vpop.permute.xlu1 %3966 }
 0x4b5   : > { %10467 = vmatpush3.bf16.xpose.msk.msra.mxu0 %vm13357_vm0, %v10465_v45  ;;  %10499 = vmatpush3.bf16.xpose.msk.msra.mxu1 %vm13357_vm0, %v10497_v1  ;;  %v10561_v45 = vpack.c.bf16 %v4153_v27, %v4152_v6  ;;  %v4138_v1 = vld [vmem:[%s15639_s5 + $0x2a0] sm:$0xff] }
 0x4b6   : > { %10468 = vmatprep.subr.bf16.mxu0 %v15710_v58  ;;  %10500 = vmatprep.subr.bf16.mxu1 %v15710_v58  ;;  %v10533_v0 = vpack.c.bf16 %v4139_v32, %v4138_v1  ;;  %v4170_v27 = vld [vmem:[%s15639_s5 + $0x3a0] sm:$0xff]  ;;  %v4187_v1 = vld [vmem:[%s15639_s5 + $0x428] sm:$0xff] }
 0x4bd   : > { %10471 = vmatpush3.bf16.xpose.msk.msra.mxu0 %vm13357_vm0, %v10469_v35  ;;  %10503 = vmatpush3.bf16.xpose.msk.msra.mxu1 %vm13357_vm0, %v10501_v19  ;;  %v10565_v35 = vpack.c.bf16 %v4155_v16, %v4154_v37  ;;  %v4140_v19 = vld [vmem:[%s15639_s5 + $0x2b0] sm:$0xff] }
 0x4be   : > { %10472 = vmatprep.subr.bf16.mxu0 %v15710_v58  ;;  %10504 = vmatprep.subr.bf16.mxu1 %v15710_v58  ;;  %v10537_v46 = vpack.c.bf16 %v4141_v18, %v4140_v19  ;;  %v4172_v16 = vld [vmem:[%s15639_s5 + $0x3b0] sm:$0xff]  ;;  %v4189_v19 = vld [vmem:[%s15639_s5 + $0x438] sm:$0xff] }
 0x4c5   : > { %10475 = vmatpush3.bf16.xpose.msk.msra.mxu0 %vm13357_vm0, %v10473_v51  ;;  %10507 = vmatpush3.bf16.xpose.msk.msra.mxu1 %vm13357_vm0, %v10505_v56  ;;  %v10569_v51 = vpack.c.bf16 %v4157_v31, %v4156_v4  ;;  %v4142_v56 = vld [vmem:[%s15639_s5 + $0x2c0] sm:$0xff] }
 0x4c6   : > { %10476 = vmatprep.subr.bf16.mxu0 %v15710_v58  ;;  %10508 = vmatprep.subr.bf16.mxu1 %v15710_v58  ;;  %v10541_v10 = vpack.c.bf16 %v4143_v47, %v4142_v56  ;;  %v4175_v56 = vld [vmem:[%s15639_s5 + $0x3c8] sm:$0xff]  ;;  %v4190_v47 = vld [vmem:[%s15639_s5 + $0x440] sm:$0xff] }
 0x4cd   : > { %10479 = vmatpush3.bf16.xpose.msk.msra.mxu0 %vm13357_vm0, %v10477_v38  ;;  %10511 = vmatpush3.bf16.xpose.msk.msra.mxu1 %vm13357_vm0, %v10509_v3  ;;  %v10573_v38 = vpack.c.bf16 %v4159_v8, %v4158_v48  ;;  %v4144_v3 = vld [vmem:[%s15639_s5 + $0x2d0] sm:$0xff]  ;;  %v4191_v48 = vld [vmem:[%s15639_s5 + $0x448] sm:$0xff] }
 0x4ce   : > { %10480 = vmatprep.subr.bf16.mxu0 %v15710_v58  ;;  %10512 = vmatprep.subr.bf16.mxu1 %v15710_v58  ;;  %v10545_v26 = vpack.c.bf16 %v4145_v36, %v4144_v3 }
 0x4d5   : > { %10483 = vmatpush3.bf16.xpose.msk.msra.mxu0 %vm13357_vm0, %v10481_v49  ;;  %10515 = vmatpush3.bf16.xpose.msk.msra.mxu1 %vm13357_vm0, %v10513_v9  ;;  %v10577_v49 = vpack.c.bf16 %v4161_v44, %v4160_v60  ;;  %v4146_v9 = vld [vmem:[%s15639_s5 + $0x2e0] sm:$0xff]  ;;  %v4176_v60 = vld [vmem:[%s15639_s5 + $0x3d0] sm:$0xff] }
 0x4d6   : > { %10484 = vmatprep.subr.bf16.mxu0 %v15710_v58  ;;  %10516 = vmatprep.subr.bf16.mxu1 %v15710_v58  ;;  %v10549_v20 = vpack.c.bf16 %v4147_v42, %v4146_v9  ;;  %v4193_v9 = vld [vmem:[%s15639_s5 + $0x458] sm:$0xff] }
 0x4dd   : > { %10487 = vmatpush3.bf16.xpose.msk.msra.mxu0 %vm13357_vm0, %v10485_v23  ;;  %10519 = vmatpush3.bf16.xpose.msk.msra.mxu1 %vm13357_vm0, %v10517_v62  ;;  %v10581_v23 = vpack.c.bf16 %v4163_v41, %v4162_v40  ;;  %v4148_v62 = vld [vmem:[%s15639_s5 + $0x2f0] sm:$0xff] }
 0x4de   : > { %10488 = vmatprep.subr.bf16.mxu0 %v15710_v58  ;;  %10520 = vmatprep.subr.bf16.mxu1 %v15710_v58  ;;  %v10553_v30 = vpack.c.bf16 %v4149_v54, %v4148_v62 }
 0x4e5   : > { %10491 = vmatpush3.bf16.xpose.msk.msra.mxu0 %vm13357_vm0, %v10489_v33  ;;  %10523 = vmatpush3.bf16.xpose.msk.msra.mxu1 %vm13357_vm0, %v10521_v24  ;;  %v10585_v33 = vpack.c.bf16 %v4165_v63, %v4164_v21  ;;  %v4166_v24 = vld [vmem:[%s15639_s5 + $0x380] sm:$0xff] }
 0x4e6   : > { %10524 = vmatprep.subr.bf16.mxu0 %v15710_v58  ;;  %10556 = vmatprep.subr.bf16.mxu1 %v15710_v58  ;;  %v10589_v2 = vpack.c.bf16 %v4167_v28, %v4166_v24  ;;  %v4178_v24 = vld [vmem:[%s15639_s5 + $0x3e0] sm:$0xff] }
 0x4ec   : > { %9532 = vmatmul.mubr.msk.f32.vlgmr.msra.gmra.mrb[160].mxu0 %vm4454_vm15, %v4032_v12  ;;  %9567 = vmatmul.mubr.msk.f32.vlgmr.msra.gmra.mrb[156].mxu1 %vm4454_vm15, %v4033_v25  ;;  %v4035_v12 = vmax.f32 %v13591_v61, %v3967_v39  ;;  %v4168_v25 = vld [vmem:[%s15639_s5 + $0x390] sm:$0xff]  ;;  %v14193_v39 = vld [vmem:[%s15638_s4] ss:$0 sm:$0xff] }
 0x4ed   : > { %10527 = vmatpush3.bf16.xpose.msk.msra.mxu0 %vm13357_vm0, %v10525_v34  ;;  %10559 = vmatpush3.bf16.xpose.msk.msra.mxu1 %vm13357_vm0, %v10557_v17  ;;  %v10621_v34 = vpack.c.bf16 %v4183_v11, %v4182_v57  ;;  %v4034_v17 = vmax.f32 %v13535_v13, %v3965_v50  ;;  %v4169_v13 = vld [vmem:[%s15639_s5 + $0x398] sm:$0xff]  ;;  %v4184_v61 = vld [vmem:[%s15639_s5 + $0x410] sm:$0xff]  ;;  %v4194_v57 = vld [vmem:[%s15639_s5 + $0x460] sm:$0xff] }
 0x4ee   : > { %10528 = vmatprep.subr.bf16.mxu0 %v15710_v58  ;;  %10560 = vmatprep.subr.bf16.mxu1 %v15710_v58  ;;  %v10593_v43 = vpack.c.bf16 %v4169_v13, %v4168_v25  ;;  %v10625_v6 = vpack.c.bf16 %v4185_v5, %v4184_v61  ;;  %v4195_v11 = vld [vmem:[%s15639_s5 + $0x468] sm:$0xff] }
 0x4ef   : > { %9601 = vmatprep.mubr.msk.f32.mxu0 %vm11592_vm8, %v11593_v15  ;;  %9636 = vmatprep.mubr.msk.f32.mxu1 %vm11592_vm8, %v11593_v15  ;;  %v10645_v25 = vpack.c.bf16 %v4195_v11, %v4194_v57 }
 0x4f5   : > { %10531 = vmatpush3.bf16.xpose.msk.msra.mxu0 %vm13357_vm0, %v10529_v29  ;;  %10563 = vmatpush3.bf16.xpose.msk.msra.mxu1 %vm13357_vm0, %v10561_v45  ;;  %v4171_v29 = vld [vmem:[%s15639_s5 + $0x3a8] sm:$0xff]  ;;  %v4186_v45 = vld [vmem:[%s15639_s5 + $0x420] sm:$0xff] }
 0x4f6   : > { %10532 = vmatprep.subr.bf16.mxu0 %v15710_v58  ;;  %10564 = vmatprep.subr.bf16.mxu1 %v15710_v58  ;;  %v10597_v32 = vpack.c.bf16 %v4171_v29, %v4170_v27  ;;  %v10629_v37 = vpack.c.bf16 %v4187_v1, %v4186_v45  ;;  %v4180_v27 = vld [vmem:[%s15639_s5 + $0x3f0] sm:$0xff]  ;;  %v4181_v45 = vld [vmem:[%s15639_s5 + $0x3f8] sm:$0xff] }
 0x4f7   : > { %v4196_v1 = vld [vmem:[%s15639_s5 + $0x470] sm:$0xff] }
 0x4fd   : > { %10535 = vmatpush3.bf16.xpose.msk.msra.mxu0 %vm13357_vm0, %v10533_v0  ;;  %10567 = vmatpush3.bf16.xpose.msk.msra.mxu1 %vm13357_vm0, %v10565_v35  ;;  %v4173_v0 = vld [vmem:[%s15639_s5 + $0x3b8] sm:$0xff]  ;;  %v4188_v35 = vld [vmem:[%s15639_s5 + $0x430] sm:$0xff] }
 0x4fe   : > { %10536 = vmatprep.subr.bf16.mxu0 %v15710_v58  ;;  %10568 = vmatprep.subr.bf16.mxu1 %v15710_v58  ;;  %v10601_v31 = vpack.c.bf16 %v4173_v0, %v4172_v16 }
 0x505   : > { %10539 = vmatpush3.bf16.xpose.msk.msra.mxu0 %vm13357_vm0, %v10537_v46  ;;  %10571 = vmatpush3.bf16.xpose.msk.msra.mxu1 %vm13357_vm0, %v10569_v51  ;;  %v10633_v46 = vpack.c.bf16 %v4189_v19, %v4188_v35  ;;  %v4174_v51 = vld [vmem:[%s15639_s5 + $0x3c0] sm:$0xff]  ;;  %v10617_v19 = vpack.c.bf16 %v4181_v45, %v4180_v27  ;;  %v4203_v45 = vld [vmem:[%s15639_s5 + $0x4a8] sm:$0xff] }
 0x506   : > { %10540 = vmatprep.subr.bf16.mxu0 %v15710_v58  ;;  %10572 = vmatprep.subr.bf16.mxu1 %v15710_v58  ;;  %v10605_v8 = vpack.c.bf16 %v4175_v56, %v4174_v51  ;;  %v4202_v27 = vld [vmem:[%s15639_s5 + $0x4a0] sm:$0xff] }
 0x50d   : > { %10543 = vmatpush3.bf16.xpose.msk.msra.mxu0 %vm13357_vm0, %v10541_v10  ;;  %10575 = vmatpush3.bf16.xpose.msk.msra.mxu1 %vm13357_vm0, %v10573_v38  ;;  %v10637_v10 = vpack.c.bf16 %v4191_v48, %v4190_v47  ;;  %v4198_v48 = vld [vmem:[%s15639_s5 + $0x480] sm:$0xff] }
 0x50e   : > { %10544 = vmatprep.subr.bf16.mxu0 %v15710_v58  ;;  %10576 = vmatprep.subr.bf16.mxu1 %v15710_v58 }
 0x515   : > { %10547 = vmatpush3.bf16.xpose.msk.msra.mxu0 %vm13357_vm0, %v10545_v26  ;;  %10579 = vmatpush3.bf16.xpose.msk.msra.mxu1 %vm13357_vm0, %v10577_v49  ;;  %v4177_v26 = vld [vmem:[%s15639_s5 + $0x3d8] sm:$0xff]  ;;  %v4192_v49 = vld [vmem:[%s15639_s5 + $0x450] sm:$0xff] }
 0x516   : > { %10548 = vmatprep.subr.bf16.mxu0 %v15710_v58  ;;  %10580 = vmatprep.subr.bf16.mxu1 %v15710_v58  ;;  %v10641_v62 = vpack.c.bf16 %v4193_v9, %v4192_v49 }
 0x51d   : > { %10551 = vmatpush3.bf16.xpose.msk.msra.mxu0 %vm13357_vm0, %v10549_v20  ;;  %10583 = vmatpush3.bf16.xpose.msk.msra.mxu1 %vm13357_vm0, %v10581_v23  ;;  %v10609_v23 = vpack.c.bf16 %v4177_v26, %v4176_v60  ;;  %v3971_v60 = vpop.permute.xlu1 %3970 }
 0x51e   : > { %10552 = vmatprep.subr.bf16.mxu0 %v15710_v58  ;;  %10584 = vmatprep.subr.bf16.mxu1 %v15710_v58 }
 0x525   : > { %10555 = vmatpush3.bf16.xpose.msk.msra.mxu0 %vm13357_vm0, %v10553_v30  ;;  %10587 = vmatpush3.bf16.xpose.msk.msra.mxu1 %vm13357_vm0, %v10585_v33 }
 0x526   : > { %10588 = vmatprep.subr.bf16.mxu0 %v15710_v58  ;;  %10620 = vmatprep.subr.bf16.mxu1 %v15710_v58 }
 0x52c   : > { %9602 = vmatmul.mubr.msk.f32.vlgmr.msra.gmra.mrb[162].mxu0 %vm4454_vm15, %v4034_v17  ;;  %9637 = vmatmul.mubr.msk.f32.vlgmr.msra.gmra.mrb[158].mxu1 %vm4454_vm15, %v4035_v12 }
 0x52d   : > { %10591 = vmatpush3.bf16.xpose.msk.msra.mxu0 %vm13357_vm0, %v10589_v2  ;;  %10623 = vmatpush3.bf16.xpose.msk.msra.mxu1 %vm13357_vm0, %v10621_v34 }
 0x52e   : > { %10592 = vmatprep.subr.bf16.mxu0 %v15710_v58  ;;  %10624 = vmatprep.subr.bf16.mxu1 %v15710_v58 }
 0x52f   : > { %9671 = vmatprep.mubr.msk.f32.mxu0 %vm11592_vm8, %v11593_v15  ;;  %9706 = vmatprep.mubr.msk.f32.mxu1 %vm11592_vm8, %v11593_v15 }
 0x535   : > { %10595 = vmatpush3.bf16.xpose.msk.msra.mxu0 %vm13357_vm0, %v10593_v43  ;;  %10627 = vmatpush3.bf16.xpose.msk.msra.mxu1 %vm13357_vm0, %v10625_v6 }
 0x536   : > { %10596 = vmatprep.subr.bf16.mxu0 %v15710_v58  ;;  %10628 = vmatprep.subr.bf16.mxu1 %v15710_v58 }
 0x53d   : > { %10599 = vmatpush3.bf16.xpose.msk.msra.mxu0 %vm13357_vm0, %v10597_v32  ;;  %10631 = vmatpush3.bf16.xpose.msk.msra.mxu1 %vm13357_vm0, %v10629_v37  ;;  %v4197_v32 = vld [vmem:[%s15639_s5 + $0x478] sm:$0xff] }
 0x53e   : > { %10600 = vmatprep.subr.bf16.mxu0 %v15710_v58  ;;  %10632 = vmatprep.subr.bf16.mxu1 %v15710_v58 }
 0x53f   : > { %v14123_v18 = vpop.f32.mrb[156].mxu0 }
 0x540   : > { %v9428_v4 = vpop.f32.mrb[157].mxu0 }
 0x541   : > { %v10649_v4 = vpack.c.bf16 %v4197_v32, %v4196_v1  ;;  %v4218_v1 = vld [vmem:[%s15639_s5 + $0x520] sm:$0xff]  ;;  %v4219_v32 = vld [vmem:[%s15639_s5 + $0x528] sm:$0xff] }
 0x545   : > { %10603 = vmatpush3.bf16.xpose.msk.msra.mxu0 %vm13357_vm0, %v10601_v31  ;;  %10635 = vmatpush3.bf16.xpose.msk.msra.mxu1 %vm13357_vm0, %v10633_v46 }
 0x546   : > { %10604 = vmatprep.subr.bf16.mxu0 %v15710_v58  ;;  %10636 = vmatprep.subr.bf16.mxu1 %v15710_v58 }
 0x54b   : > { %v3790_v38 = vpop.f32.mrb[128].mxu1 }
 0x54c   : > { %v11200_v3 = vadd.f32 %v13467_v22, %v3790_v38  ;;  %v9357_v36 = vpop.f32.mrb[129].mxu1  ;;  %v4199_v38 = vld [vmem:[%s15639_s5 + $0x488] sm:$0xff] }
 0x54d   : > { %10607 = vmatpush3.bf16.xpose.msk.msra.mxu0 %vm13357_vm0, %v10605_v8  ;;  %10639 = vmatpush3.bf16.xpose.msk.msra.mxu1 %vm13357_vm0, %v10637_v10  ;;  %v3969_v8 = vpop.permute.xlu0 %3968  ;;  %v4215_v36 = vld [vmem:[%s15639_s5 + $0x508] sm:$0xff] }
 0x54e   : > { %vm3866_vm13 = vcmp.gt.f32.partialorder %v11200_v3, 0.0  ;;  %v3891_v44 = vmul.f32 0.01, %v11200_v3  ;;  %10608 = vmatprep.subr.bf16.mxu0 %v15710_v58  ;;  %10640 = vmatprep.subr.bf16.mxu1 %v15710_v58 }
 0x54f   : > { %v3795_v42 = vpop.f32.mrb[130].mxu1 }
 0x550   : > { %v11201_v40 = vadd.f32 %v13467_v22, %v3795_v42  ;;  %v9360_v41 = vpop.f32.mrb[131].mxu1  ;;  %v14163_v20 = vsel %vm3866_vm13, %v11200_v3, %v3891_v44  ;;  %v4214_v3 = vld [vmem:[%s15639_s5 + $0x500] sm:$0xff]  ;;  %v10653_v42 = vpack.c.bf16 %v4199_v38, %v4198_v48  ;;  %vm7632_vm13 = vcmask 72704  }
 0x551   : > { %3978 = vrot.lane.b32.xlu1 %v14163_v20, %s11594_s28  ;;  %v4036_v41 = vmax.f32 %v13559_v52, %v3969_v8  ;;  %v4200_v52 = vld [vmem:[%s15639_s5 + $0x490] sm:$0xff] }
 0x552   : > { %vm3867_vm10 = vcmp.gt.f32.partialorder %v11201_v40, 0.0  ;;  %v3892_v54 = vmul.f32 0.01, %v11201_v40 }
 0x553   : > { %v3800_v21 = vpop.f32.mrb[132].mxu1 }
 0x554   : > { %v11202_v63 = vadd.f32 %v13467_v22, %v3800_v21  ;;  %v9363_v30 = vpop.f32.mrb[133].mxu1  ;;  %v14168_v33 = vsel %vm3867_vm10, %v11201_v40, %v3892_v54  ;;  %v4179_v22 = vld [vmem:[%s15639_s5 + $0x3e8] sm:$0xff]  ;;  %v10685_v40 = vpack.c.bf16 %v4215_v36, %v4214_v3  ;;  %v4220_v3 = vld [vmem:[%s15639_s5 + $0x530] sm:$0xff]  ;;  %v4221_v36 = vld [vmem:[%s15639_s5 + $0x538] sm:$0xff] }
 0x555   : > { %10611 = vmatpush3.bf16.xpose.msk.msra.mxu0 %vm13357_vm0, %v10609_v23  ;;  %10643 = vmatpush3.bf16.xpose.msk.msra.mxu1 %vm13357_vm0, %v10641_v62  ;;  %v10613_v12 = vpack.c.bf16 %v4179_v22, %v4178_v24  ;;  %v4037_v23 = vmax.f32 %v13601_v59, %v3971_v60  ;;  %v4201_v24 = vld [vmem:[%s15639_s5 + $0x498] sm:$0xff] }
 0x556   : > { %vm3868_vm2 = vcmp.gt.f32.partialorder %v11202_v63, 0.0  ;;  %v3893_v28 = vmul.f32 0.01, %v11202_v63  ;;  %3980 = vrot.lane.b32.xlu0 %v14168_v33, %s11594_s28  ;;  %10612 = vmatprep.subr.bf16.mxu0 %v15710_v58  ;;  %v4217_v22 = vld [vmem:[%s15639_s5 + $0x518] sm:$0xff] }
 0x557   : > { %v3805_v50 = vpop.f32.mrb[134].mxu1  ;;  %10644 = vmatprep.subr.bf16.mxu1 %v15710_v58 }
 0x558   : > { %v11203_v2 = vadd.f32 %v14193_v39, %v3805_v50  ;;  %v9366_v34 = vpop.f32.mrb[135].mxu1  ;;  %v14196_v17 = vsel %vm3868_vm2, %v11202_v63, %v3893_v28  ;;  %v4216_v28 = vld [vmem:[%s15639_s5 + $0x510] sm:$0xff] }
 0x559   : > { %3982 = vrot.lane.b32.xlu1 %v14196_v17, %s11594_s28  ;;  %v10657_v34 = vpack.c.bf16 %v4201_v24, %v4200_v52  ;;  %v4208_v24 = vld [vmem:[%s15639_s5 + $0x4d0] sm:$0xff] }
 0x55a   : > { %vm3869_vm11 = vcmp.gt.f32.partialorder %v11203_v2, 0.0  ;;  %v3894_v13 = vmul.f32 0.01, %v11203_v2 }
 0x55b   : > { %v3810_v61 = vpop.f32.mrb[136].mxu1 }
 0x55c   : > { %v11204_v5 = vadd.f32 %v14193_v39, %v3810_v61  ;;  %v9369_v43 = vpop.f32.mrb[137].mxu1  ;;  %v14201_v6 = vsel %vm3869_vm11, %v11203_v2, %v3894_v13 }
 0x55d   : > { %10615 = vmatpush3.bf16.xpose.msk.msra.mxu0 %vm13357_vm0, %v10613_v12  ;;  %10647 = vmatpush3.bf16.xpose.msk.msra.mxu1 %vm13357_vm0, %v10645_v25  ;;  %v10689_v12 = vpack.c.bf16 %v4217_v22, %v4216_v28  ;;  %v4209_v28 = vld [vmem:[%s15639_s5 + $0x4d8] sm:$0xff]  ;;  %v4224_v22 = vld [vmem:[%s15639_s5 + $0x550] sm:$0xff] }
 0x55e   : > { %vm3870_vm12 = vcmp.gt.f32.partialorder %v11204_v5, 0.0  ;;  %v3895_v29 = vmul.f32 0.01, %v11204_v5  ;;  %3984 = vrot.lane.b32.xlu0 %v14201_v6, %s11594_s28  ;;  %10616 = vmatprep.subr.bf16.mxu0 %v15710_v58 }
 0x55f   : > { %v3815_v37 = vpop.f32.mrb[138].mxu1  ;;  %10648 = vmatprep.subr.bf16.mxu1 %v15710_v58 }
 0x560   : > { %v11205_v16 = vadd.f32 %v14193_v39, %v3815_v37  ;;  %v9372_v0 = vpop.f32.mrb[139].mxu1  ;;  %v14224_v35 = vsel %vm3870_vm12, %v11204_v5, %v3895_v29 }
 0x561   : > { %3986 = vrot.lane.b32.xlu1 %v14224_v35, %s11594_s28 }
 0x562   : > { %vm3871_vm14 = vcmp.gt.f32.partialorder %v11205_v16, 0.0  ;;  %v3896_v31 = vmul.f32 0.01, %v11205_v16 }
 0x563   : > { %v3820_v46 = vpop.f32.mrb[140].mxu1 }
 0x564   : > { %v11206_v51 = vadd.f32 %v14193_v39, %v3820_v46  ;;  %v9375_v56 = vpop.f32.mrb[141].mxu1  ;;  %v14229_v47 = vsel %vm3871_vm14, %v11205_v16, %v3896_v31  ;;  %v10693_v31 = vpack.c.bf16 %v4219_v32, %v4218_v1  ;;  %v4229_v1 = vld [vmem:[%s15639_s5 + $0x578] sm:$0xff] }
 0x565   : > { %10619 = vmatpush3.bf16.xpose.msk.msra.mxu0 %vm13357_vm0, %v10617_v19  ;;  %10651 = vmatpush3.bf16.xpose.msk.msra.mxu1 %vm13357_vm0, %v10649_v4  ;;  %v10661_v4 = vpack.c.bf16 %v4203_v45, %v4202_v27  ;;  %v4212_v27 = vld [vmem:[%s15639_s5 + $0x4f0] sm:$0xff] }
 0x566   : > { %vm3872_vm1 = vcmp.gt.f32.partialorder %v11206_v51, 0.0  ;;  %v3897_v10 = vmul.f32 0.01, %v11206_v51  ;;  %3988 = vrot.lane.b32.xlu0 %v14229_v47, %s11594_s28  ;;  %10652 = vmatprep.subr.bf16.mxu0 %v15710_v58  ;;  %v4228_v45 = vld [vmem:[%s15639_s5 + $0x570] sm:$0xff] }
 0x567   : > { %v3825_v44 = vpop.f32.mrb[142].mxu1  ;;  %10684 = vmatprep.subr.bf16.mxu1 %v15710_v58 }
 0x568   : > { %v11207_v26 = vadd.f32 %v14193_v39, %v3825_v44  ;;  %v9378_v49 = vpop.f32.mrb[143].mxu1  ;;  %v14252_v9 = vsel %vm3872_vm1, %v11206_v51, %v3897_v10  ;;  %v4204_v10 = vld [vmem:[%s15639_s5 + $0x4b0] sm:$0xff] }
 0x569   : > { %3990 = vrot.lane.b32.xlu1 %v14252_v9, %s11594_s28 }
 0x56a   : > { %vm3873_vm3 = vcmp.gt.f32.partialorder %v11207_v26, 0.0  ;;  %v3898_v62 = vmul.f32 0.01, %v11207_v26 }
 0x56b   : > { %v3830_v54 = vpop.f32.mrb[144].mxu1 }
 0x56c   : > { %v11208_v21 = vadd.f32 %v14193_v39, %v3830_v54  ;;  %9672 = vmatmul.mubr.msk.f32.vlgmr.msra.gmra.mrb[164].mxu0 %vm4454_vm15, %v4036_v41  ;;  %9707 = vmatmul.mubr.msk.f32.vlgmr.msra.gmra.mrb[160].mxu1 %vm4454_vm15, %v4037_v23  ;;  %v9381_v63 = vpop.f32.mrb[145].mxu1  ;;  %v14261_v30 = vsel %vm3873_vm3, %v11207_v26, %v3898_v62  ;;  %v10697_v23 = vpack.c.bf16 %v4221_v36, %v4220_v3  ;;  %v4207_v54 = vld [vmem:[%s15639_s5 + $0x4c8] sm:$0xff]  ;;  %v4249_v3 = vld [vmem:[%s15639_s5 + $0x618] sm:$0xff] }
 0x56d   : > { %10655 = vmatpush3.bf16.xpose.msk.msra.mxu0 %vm13357_vm0, %v10653_v42  ;;  %10687 = vmatpush3.bf16.xpose.msk.msra.mxu1 %vm13357_vm0, %v10685_v40  ;;  %v4223_v63 = vld [vmem:[%s15639_s5 + $0x548] sm:$0xff] }
 0x56e   : > { %vm3874_vm4 = vcmp.gt.f32.partialorder %v11208_v21, 0.0  ;;  %v3899_v59 = vmul.f32 0.01, %v11208_v21  ;;  %3992 = vrot.lane.b32.xlu0 %v14261_v30, %s11594_s28  ;;  %10656 = vmatprep.subr.bf16.mxu0 %v15710_v58 }
 0x56f   : > { %v3835_v57 = vpop.f32.mrb[146].mxu1  ;;  %10688 = vmatprep.subr.bf16.mxu1 %v15710_v58  ;;  %9741 = vmatprep.mubr.msk.f32.mxu0 %vm11592_vm8, %v11593_v15 }
 0x570   : > { %v11209_v11 = vadd.f32 %v14193_v39, %v3835_v57  ;;  %v9384_v50 = vpop.f32.mrb[147].mxu1  ;;  %v14286_v2 = vsel %vm3874_vm4, %v11208_v21, %v3899_v59  ;;  %9776 = vmatprep.mubr.msk.f32.mxu1 %vm11592_vm8, %v11593_v15  ;;  %v4222_v21 = vld [vmem:[%s15639_s5 + $0x540] sm:$0xff]  ;;  %v4225_v57 = vld [vmem:[%s15639_s5 + $0x558] sm:$0xff] }
 0x571   : > { %3994 = vrot.lane.b32.xlu1 %v14286_v2, %s11594_s28  ;;  %v10701_v59 = vpack.c.bf16 %v4223_v63, %v4222_v21  ;;  %v10705_v50 = vpack.c.bf16 %v4225_v57, %v4224_v22  ;;  %v4252_v21 = vld [vmem:[%s15639_s5 + $0x630] sm:$0xff]  ;;  %v4253_v63 = vld [vmem:[%s15639_s5 + $0x638] sm:$0xff] }
 0x572   : > { %vm3875_vm5 = vcmp.gt.f32.partialorder %v11209_v11, 0.0  ;;  %v3900_v25 = vmul.f32 0.01, %v11209_v11 }
 0x573   : > { %v3840_v13 = vpop.f32.mrb[148].mxu1 }
 0x574   : > { %v11210_v61 = vadd.f32 %v14193_v39, %v3840_v13  ;;  %v9387_v5 = vpop.f32.mrb[149].mxu1  ;;  %v14293_v43 = vsel %vm3875_vm5, %v11209_v11, %v3900_v25  ;;  %v10673_v11 = vpack.c.bf16 %v4209_v28, %v4208_v24  ;;  %v4226_v25 = vld [vmem:[%s15639_s5 + $0x560] sm:$0xff]  ;;  %v4227_v13 = vld [vmem:[%s15639_s5 + $0x568] sm:$0xff] }
 0x575   : > { %10659 = vmatpush3.bf16.xpose.msk.msra.mxu0 %vm13357_vm0, %v10657_v34  ;;  %10691 = vmatpush3.bf16.xpose.msk.msra.mxu1 %vm13357_vm0, %v10689_v12  ;;  %v4210_v34 = vld [vmem:[%s15639_s5 + $0x4e0] sm:$0xff]  ;;  %v4211_v12 = vld [vmem:[%s15639_s5 + $0x4e8] sm:$0xff]  ;;  %v10709_v5 = vpack.c.bf16 %v4227_v13, %v4226_v25 }
 0x576   : > { %vm3876_vm6 = vcmp.gt.f32.partialorder %v11210_v61, 0.0  ;;  %v3901_v29 = vmul.f32 0.01, %v11210_v61  ;;  %3996 = vrot.lane.b32.xlu0 %v14293_v43, %s11594_s28  ;;  %10660 = vmatprep.subr.bf16.mxu0 %v15710_v58  ;;  %v4255_v25 = vld [vmem:[%s15639_s5 + $0x648] sm:$0xff] }
 0x577   : > { %v3845_v37 = vpop.f32.mrb[150].mxu1  ;;  %10692 = vmatprep.subr.bf16.mxu1 %v15710_v58 }
 0x578   : > { %v11211_v16 = vadd.f32 %v14193_v39, %v3845_v37  ;;  %v9390_v0 = vpop.f32.mrb[151].mxu1  ;;  %v14316_v19 = vsel %vm3876_vm6, %v11210_v61, %v3901_v29  ;;  %v10677_v61 = vpack.c.bf16 %v4211_v12, %v4210_v34  ;;  %v4213_v29 = vld [vmem:[%s15639_s5 + $0x4f8] sm:$0xff]  ;;  %v10713_v37 = vpack.c.bf16 %v4229_v1, %v4228_v45  ;;  %v4238_v34 = vld [vmem:[%s15639_s5 + $0x5c0] sm:$0xff] }
 0x579   : > { %3998 = vrot.lane.b32.xlu1 %v14316_v19, %s11594_s28  ;;  %v10681_v32 = vpack.c.bf16 %v4213_v29, %v4212_v27  ;;  %v4231_v0 = vld [vmem:[%s15639_s5 + $0x588] sm:$0xff]  ;;  %v4254_v12 = vld [vmem:[%s15639_s5 + $0x640] sm:$0xff]  ;;  %v4241_v27 = vld [vmem:[%s15639_s5 + $0x5d8] sm:$0xff] }
 0x57a   : > { %vm3877_vm7 = vcmp.gt.f32.partialorder %v11211_v16, 0.0  ;;  %v3902_v46 = vmul.f32 0.01, %v11211_v16  ;;  %v4256_v29 = vld [vmem:[%s15639_s5 + $0x650] sm:$0xff]  ;;  %v4257_v45 = vld [vmem:[%s15639_s5 + $0x658] sm:$0xff] }
 0x57b   : > { %v3850_v51 = vpop.f32.mrb[152].mxu1 }
 0x57c   : > { %v11212_v56 = vadd.f32 %v14193_v39, %v3850_v51  ;;  %v9393_v48 = vpop.f32.mrb[153].mxu1  ;;  %v14321_v8 = vsel %vm3877_vm7, %v11211_v16, %v3902_v46  ;;  %v4205_v39 = vld [vmem:[%s15639_s5 + $0x4b8] sm:$0xff]  ;;  %v4230_v16 = vld [vmem:[%s15639_s5 + $0x580] sm:$0xff]  ;;  %v3973_v46 = vpop.permute.xlu0 %3972 }
 0x57d   : > { %10663 = vmatpush3.bf16.xpose.msk.msra.mxu0 %vm13357_vm0, %v10661_v4  ;;  %10695 = vmatpush3.bf16.xpose.msk.msra.mxu1 %vm13357_vm0, %v10693_v31  ;;  %v10665_v41 = vpack.c.bf16 %v4205_v39, %v4204_v10  ;;  %v4246_v4 = vld [vmem:[%s15639_s5 + $0x600] sm:$0xff]  ;;  %v4247_v31 = vld [vmem:[%s15639_s5 + $0x608] sm:$0xff]  ;;  %v3975_v51 = vpop.permute.xlu1 %3974  ;;  %v4038_v10 = vmax.f32 %v13582_v55, %v3973_v46  ;;  %v4232_v39 = vld [vmem:[%s15639_s5 + $0x590] sm:$0xff] }
 0x57e   : > { %vm3878_vm9 = vcmp.gt.f32.partialorder %v11212_v56, 0.0  ;;  %v3903_v38 = vmul.f32 0.01, %v11212_v56  ;;  %4000 = vrot.lane.b32.xlu0 %v14321_v8, %s11594_s28  ;;  %10664 = vmatprep.subr.bf16.mxu0 %v15710_v58  ;;  %v10749_v48 = vpack.c.bf16 %v4247_v31, %v4246_v4  ;;  %v4233_v55 = vld [vmem:[%s15639_s5 + $0x598] sm:$0xff]  ;;  %v4259_v4 = vld [vmem:[%s15639_s5 + $0x668] sm:$0xff] }
 0x57f   : > { %v4693_v60 = vpop.f32.mrb[158].mxu0  ;;  %v4814_v44 = vpop.f32.mrb[154].mxu1  ;;  %10696 = vmatprep.subr.bf16.mxu1 %v15710_v58  ;;  %v10721_v36 = vpack.c.bf16 %v4233_v55, %v4232_v39  ;;  %v4262_v55 = vld [vmem:[%s15639_s5 + $0x680] sm:$0xff] }
 0x580   : > { %v7480_v26 = vadd.f32 %v4693_v60, %v14123_v18  ;;  %v9463_v49 = vpop.f32.mrb[159].mxu0  ;;  %v9498_v42 = vpop.f32.mrb[155].mxu1  ;;  %v14344_v40 = vsel %vm3878_vm9, %v11212_v56, %v3903_v38  ;;  %v4206_v18 = vld [vmem:[%s15639_s5 + $0x4c0] sm:$0xff]  ;;  %v10717_v56 = vpack.c.bf16 %v4231_v0, %v4230_v16  ;;  %v4039_v38 = vmax.f32 %v13612_v14, %v3975_v51  ;;  %v4248_v14 = vld [vmem:[%s15639_s5 + $0x610] sm:$0xff]  ;;  %v4243_v16 = vld [vmem:[%s15639_s5 + $0x5e8] sm:$0xff] }
 0x581   : > { %4002 = vrot.lane.b32.xlu1 %v14344_v40, %s11594_s28  ;;  %v10669_v52 = vpack.c.bf16 %v4207_v54, %v4206_v18  ;;  %v10753_v60 = vpack.c.bf16 %v4249_v3, %v4248_v14  ;;  %v4250_v49 = vld [vmem:[%s15639_s5 + $0x620] sm:$0xff]  ;;  %v4251_v42 = vld [vmem:[%s15639_s5 + $0x628] sm:$0xff]  ;;  %v4236_v18 = vld [vmem:[%s15639_s5 + $0x5b0] sm:$0xff] }
 0x582   : > { %v14348_v62 = vadd.f32 %v7480_v26, %v4814_v44  ;;  %v4234_v44 = vld [vmem:[%s15639_s5 + $0x5a0] sm:$0xff]  ;;  %v4235_v26 = vld [vmem:[%s15639_s5 + $0x5a8] sm:$0xff]  ;;  %v4237_v54 = vld [vmem:[%s15639_s5 + $0x5b8] sm:$0xff] }
 0x583   : > { %v10729_v57 = vpack.c.bf16 %v4237_v54, %v4236_v18  ;;  %v4258_v0 = vld [vmem:[%s15639_s5 + $0x660] sm:$0xff]  ;;  %v4244_v51 = vld [vmem:[%s15639_s5 + $0x5f0] sm:$0xff]  ;;  %v4263_v14 = vld [vmem:[%s15639_s5 + $0x688] sm:$0xff] }
 0x584   : > { %v10773_v46 = vpack.c.bf16 %v4259_v4, %v4258_v0  ;;  %v4278_v3 = vld [vmem:[%s15639_s5 + $0x700] sm:$0xff]  ;;  %v4281_v18 = vld [vmem:[%s15639_s5 + $0x718] sm:$0xff]  ;;  %v4272_v4 = vld [vmem:[%s15639_s5 + $0x6d0] sm:$0xff] }
 0x585   : > { %10667 = vmatpush3.bf16.xpose.msk.msra.mxu0 %vm13357_vm0, %v10665_v41  ;;  %10699 = vmatpush3.bf16.xpose.msk.msra.mxu1 %vm13357_vm0, %v10697_v23  ;;  %v10725_v41 = vpack.c.bf16 %v4235_v26, %v4234_v44  ;;  %v10757_v23 = vpack.c.bf16 %v4251_v42, %v4250_v49  ;;  %v10781_v26 = vpack.c.bf16 %v4263_v14, %v4262_v55  ;;  %v4291_v55 = vld [vmem:[%s15639_s5 + $0x768] sm:$0xff] }
 0x586   : > { %10668 = vmatprep.subr.bf16.mxu0 %v15710_v58  ;;  %10700 = vmatprep.subr.bf16.mxu1 %v15710_v58 }
 0x58d   : > { %10671 = vmatpush3.bf16.xpose.msk.msra.mxu0 %vm13357_vm0, %v10669_v52  ;;  %10703 = vmatpush3.bf16.xpose.msk.msra.mxu1 %vm13357_vm0, %v10701_v59 }
 0x58e   : > { %10672 = vmatprep.subr.bf16.mxu0 %v15710_v58  ;;  %10704 = vmatprep.subr.bf16.mxu1 %v15710_v58 }
 0x595   : > { %10675 = vmatpush3.bf16.xpose.msk.msra.mxu0 %vm13357_vm0, %v10673_v11  ;;  %10707 = vmatpush3.bf16.xpose.msk.msra.mxu1 %vm13357_vm0, %v10705_v50  ;;  %v10761_v11 = vpack.c.bf16 %v4253_v63, %v4252_v21  ;;  %v4266_v63 = vld [vmem:[%s15639_s5 + $0x6a0] sm:$0xff] }
 0x596   : > { %10676 = vmatprep.subr.bf16.mxu0 %v15710_v58  ;;  %10708 = vmatprep.subr.bf16.mxu1 %v15710_v58 }
 0x59d   : > { %10679 = vmatpush3.bf16.xpose.msk.msra.mxu0 %vm13357_vm0, %v10677_v61  ;;  %10711 = vmatpush3.bf16.xpose.msk.msra.mxu1 %vm13357_vm0, %v10709_v5  ;;  %v10765_v61 = vpack.c.bf16 %v4255_v25, %v4254_v12  ;;  %v4240_v5 = vld [vmem:[%s15639_s5 + $0x5d0] sm:$0xff] }
 0x59e   : > { %10680 = vmatprep.subr.bf16.mxu0 %v15710_v58  ;;  %10712 = vmatprep.subr.bf16.mxu1 %v15710_v58  ;;  %v10737_v1 = vpack.c.bf16 %v4241_v27, %v4240_v5 }
 0x5a5   : > { %10683 = vmatpush3.bf16.xpose.msk.msra.mxu0 %vm13357_vm0, %v10681_v32  ;;  %10715 = vmatpush3.bf16.xpose.msk.msra.mxu1 %vm13357_vm0, %v10713_v37  ;;  %v10769_v32 = vpack.c.bf16 %v4257_v45, %v4256_v29  ;;  %v4242_v37 = vld [vmem:[%s15639_s5 + $0x5e0] sm:$0xff] }
 0x5a6   : > { %10716 = vmatprep.subr.bf16.mxu0 %v15710_v58  ;;  %10748 = vmatprep.subr.bf16.mxu1 %v15710_v58  ;;  %v10741_v31 = vpack.c.bf16 %v4243_v16, %v4242_v37  ;;  %v4287_v37 = vld [vmem:[%s15639_s5 + $0x748] sm:$0xff] }
 0x5ac   : > { %9742 = vmatmul.mubr.msk.f32.vlgmr.msra.gmra.mrb[166].mxu0 %vm4454_vm15, %v4038_v10  ;;  %9777 = vmatmul.mubr.msk.f32.vlgmr.msra.gmra.mrb[162].mxu1 %vm4454_vm15, %v4039_v38  ;;  %v4261_v10 = vld [vmem:[%s15639_s5 + $0x678] sm:$0xff] }
 0x5ad   : > { %10719 = vmatpush3.bf16.xpose.msk.msra.mxu0 %vm13357_vm0, %v10717_v56  ;;  %10751 = vmatpush3.bf16.xpose.msk.msra.mxu1 %vm13357_vm0, %v10749_v48  ;;  %v4245_v56 = vld [vmem:[%s15639_s5 + $0x5f8] sm:$0xff]  ;;  %v4260_v48 = vld [vmem:[%s15639_s5 + $0x670] sm:$0xff] }
 0x5ae   : > { %10720 = vmatprep.subr.bf16.mxu0 %v15710_v58  ;;  %10752 = vmatprep.subr.bf16.mxu1 %v15710_v58  ;;  %v10745_v38 = vpack.c.bf16 %v4245_v56, %v4244_v51  ;;  %v10777_v39 = vpack.c.bf16 %v4261_v10, %v4260_v48  ;;  %v4289_v51 = vld [vmem:[%s15639_s5 + $0x758] sm:$0xff]  ;;  %v4274_v10 = vld [vmem:[%s15639_s5 + $0x6e0] sm:$0xff] }
 0x5af   : > { %9811 = vmatprep.mubr.msk.f32.mxu0 %vm11592_vm8, %v11593_v15  ;;  %9846 = vmatprep.mubr.msk.f32.mxu1 %vm11592_vm8, %v11593_v15 }
 0x5b5   : > { %10723 = vmatpush3.bf16.xpose.msk.msra.mxu0 %vm13357_vm0, %v10721_v36  ;;  %10755 = vmatpush3.bf16.xpose.msk.msra.mxu1 %vm13357_vm0, %v10753_v60  ;;  %v4279_v36 = vld [vmem:[%s15639_s5 + $0x708] sm:$0xff]  ;;  %v3977_v60 = vpop.permute.xlu0 %3976 }
 0x5b6   : > { %10724 = vmatprep.subr.bf16.mxu0 %v15710_v58  ;;  %10756 = vmatprep.subr.bf16.mxu1 %v15710_v58  ;;  %v10813_v49 = vpack.c.bf16 %v4279_v36, %v4278_v3  ;;  %v4040_v42 = vmax.f32 %v13603_v53, %v3977_v60  ;;  %v4265_v53 = vld [vmem:[%s15639_s5 + $0x698] sm:$0xff]  ;;  %v4276_v36 = vld [vmem:[%s15639_s5 + $0x6f0] sm:$0xff] }
 0x5b7   : > { %v4277_v60 = vld [vmem:[%s15639_s5 + $0x6f8] sm:$0xff] }
 0x5bd   : > { %10727 = vmatpush3.bf16.xpose.msk.msra.mxu0 %vm13357_vm0, %v10725_v41  ;;  %10759 = vmatpush3.bf16.xpose.msk.msra.mxu1 %vm13357_vm0, %v10757_v23  ;;  %v4264_v23 = vld [vmem:[%s15639_s5 + $0x690] sm:$0xff] }
 0x5be   : > { %10728 = vmatprep.subr.bf16.mxu0 %v15710_v58  ;;  %10760 = vmatprep.subr.bf16.mxu1 %v15710_v58  ;;  %v10785_v54 = vpack.c.bf16 %v4265_v53, %v4264_v23  ;;  %v4295_v23 = vld [vmem:[%s15639_s5 + $0x788] sm:$0xff]  ;;  %v4310_v53 = vld [vmem:[%s15639_s5 + $0x800] sm:$0xff] }
 0x5bf   : > { %v4935_v52 = vpop.f32.mrb[160].mxu0  ;;  %v5056_v59 = vpop.f32.mrb[156].mxu1 }
 0x5c0   : > { %v7482_v24 = vadd.f32 %v14348_v62, %v4935_v52  ;;  %v9533_v28 = vpop.f32.mrb[161].mxu0  ;;  %v9568_v22 = vpop.f32.mrb[157].mxu1  ;;  %v4239_v62 = vld [vmem:[%s15639_s5 + $0x5c8] sm:$0xff] }
 0x5c1   : > { %v10733_v13 = vpack.c.bf16 %v4239_v62, %v4238_v34  ;;  %v4267_v52 = vld [vmem:[%s15639_s5 + $0x6a8] sm:$0xff]  ;;  %v4284_v34 = vld [vmem:[%s15639_s5 + $0x730] sm:$0xff]  ;;  %v4285_v62 = vld [vmem:[%s15639_s5 + $0x738] sm:$0xff] }
 0x5c2   : > { %v14503_v50 = vadd.f32 %v7482_v24, %v5056_v59  ;;  %v4282_v59 = vld [vmem:[%s15639_s5 + $0x720] sm:$0xff]  ;;  %v4283_v24 = vld [vmem:[%s15639_s5 + $0x728] sm:$0xff]  ;;  %v10789_v28 = vpack.c.bf16 %v4267_v52, %v4266_v63  ;;  %v10825_v29 = vpack.c.bf16 %v4285_v62, %v4284_v34 }
 0x5c3   : > { %v3979_v44 = vpop.permute.xlu1 %3978  ;;  %v10821_v22 = vpack.c.bf16 %v4283_v24, %v4282_v59  ;;  %v4296_v24 = vld [vmem:[%s15639_s5 + $0x790] sm:$0xff]  ;;  %v4299_v34 = vld [vmem:[%s15639_s5 + $0x7a8] sm:$0xff]  ;;  %v4314_v62 = vld [vmem:[%s15639_s5 + $0x820] sm:$0xff] }
 0x5c4   : > { %v4041_v41 = vmax.f32 %v14163_v20, %v3979_v44  ;;  %v4280_v20 = vld [vmem:[%s15639_s5 + $0x710] sm:$0xff] }
 0x5c5   : > { %10731 = vmatpush3.bf16.xpose.msk.msra.mxu0 %vm13357_vm0, %v10729_v57  ;;  %10763 = vmatpush3.bf16.xpose.msk.msra.mxu1 %vm13357_vm0, %v10761_v11  ;;  %v10817_v21 = vpack.c.bf16 %v4281_v18, %v4280_v20  ;;  %v4268_v57 = vld [vmem:[%s15639_s5 + $0x6b0] sm:$0xff]  ;;  %v4269_v11 = vld [vmem:[%s15639_s5 + $0x6b8] sm:$0xff]  ;;  %v4311_v20 = vld [vmem:[%s15639_s5 + $0x808] sm:$0xff] }
 0x5c6   : > { %10732 = vmatprep.subr.bf16.mxu0 %v15710_v58  ;;  %10764 = vmatprep.subr.bf16.mxu1 %v15710_v58  ;;  %v10793_v27 = vpack.c.bf16 %v4269_v11, %v4268_v57  ;;  %v4292_v44 = vld [vmem:[%s15639_s5 + $0x770] sm:$0xff]  ;;  %v10877_v63 = vpack.c.bf16 %v4311_v20, %v4310_v53  ;;  %v4298_v11 = vld [vmem:[%s15639_s5 + $0x7a0] sm:$0xff]  ;;  %v4309_v53 = vld [vmem:[%s15639_s5 + $0x7f8] sm:$0xff] }
 0x5c7   : > { %v4324_v20 = vld [vmem:[%s15639_s5 + $0x870] sm:$0xff] }
 0x5c8   : > { %v3981_v18 = vpop.permute.xlu0 %3980 }
 0x5c9   : > { %v4042_v52 = vmax.f32 %v14168_v33, %v3981_v18  ;;  %v4297_v33 = vld [vmem:[%s15639_s5 + $0x798] sm:$0xff] }
 0x5ca   : > { %v4325_v18 = vld [vmem:[%s15639_s5 + $0x878] sm:$0xff] }
 0x5cd   : > { %10735 = vmatpush3.bf16.xpose.msk.msra.mxu0 %vm13357_vm0, %v10733_v13  ;;  %10767 = vmatpush3.bf16.xpose.msk.msra.mxu1 %vm13357_vm0, %v10765_v61 }
 0x5ce   : > { %10736 = vmatprep.subr.bf16.mxu0 %v15710_v58  ;;  %10768 = vmatprep.subr.bf16.mxu1 %v15710_v58 }
 0x5d5   : > { %10739 = vmatpush3.bf16.xpose.msk.msra.mxu0 %vm13357_vm0, %v10737_v1  ;;  %10771 = vmatpush3.bf16.xpose.msk.msra.mxu1 %vm13357_vm0, %v10769_v32  ;;  %v4270_v1 = vld [vmem:[%s15639_s5 + $0x6c0] sm:$0xff] }
 0x5d6   : > { %10740 = vmatprep.subr.bf16.mxu0 %v15710_v58  ;;  %10772 = vmatprep.subr.bf16.mxu1 %v15710_v58  ;;  %v4286_v32 = vld [vmem:[%s15639_s5 + $0x740] sm:$0xff] }
 0x5d7   : > { %v10829_v0 = vpack.c.bf16 %v4287_v37, %v4286_v32 }
 0x5dd   : > { %10743 = vmatpush3.bf16.xpose.msk.msra.mxu0 %vm13357_vm0, %v10741_v31  ;;  %10775 = vmatpush3.bf16.xpose.msk.msra.mxu1 %vm13357_vm0, %v10773_v46  ;;  %v4273_v31 = vld [vmem:[%s15639_s5 + $0x6d8] sm:$0xff]  ;;  %v4288_v46 = vld [vmem:[%s15639_s5 + $0x750] sm:$0xff] }
 0x5de   : > { %10744 = vmatprep.subr.bf16.mxu0 %v15710_v58  ;;  %10776 = vmatprep.subr.bf16.mxu1 %v15710_v58  ;;  %v10801_v56 = vpack.c.bf16 %v4273_v31, %v4272_v4  ;;  %v10833_v48 = vpack.c.bf16 %v4289_v51, %v4288_v46  ;;  %v4302_v46 = vld [vmem:[%s15639_s5 + $0x7c0] sm:$0xff] }
 0x5df   : > { %v4318_v51 = vld [vmem:[%s15639_s5 + $0x840] sm:$0xff] }
 0x5e5   : > { %10747 = vmatpush3.bf16.xpose.msk.msra.mxu0 %vm13357_vm0, %v10745_v38  ;;  %10779 = vmatpush3.bf16.xpose.msk.msra.mxu1 %vm13357_vm0, %v10777_v39  ;;  %v4275_v38 = vld [vmem:[%s15639_s5 + $0x6e8] sm:$0xff]  ;;  %v4290_v39 = vld [vmem:[%s15639_s5 + $0x760] sm:$0xff] }
 0x5e6   : > { %10780 = vmatprep.subr.bf16.mxu0 %v15710_v58  ;;  %10812 = vmatprep.subr.bf16.mxu1 %v15710_v58  ;;  %v10805_v14 = vpack.c.bf16 %v4275_v38, %v4274_v10  ;;  %v10837_v3 = vpack.c.bf16 %v4291_v55, %v4290_v39  ;;  %v4304_v38 = vld [vmem:[%s15639_s5 + $0x7d0] sm:$0xff]  ;;  %v4305_v39 = vld [vmem:[%s15639_s5 + $0x7d8] sm:$0xff] }
 0x5e7   : > { %v4320_v55 = vld [vmem:[%s15639_s5 + $0x850] sm:$0xff] }
 0x5ec   : > { %9812 = vmatmul.mubr.msk.f32.vlgmr.msra.gmra.mrb[168].mxu0 %vm4454_vm15, %v4040_v42  ;;  %9847 = vmatmul.mubr.msk.f32.vlgmr.msra.gmra.mrb[164].mxu1 %vm4454_vm15, %v4041_v41  ;;  %v4294_v41 = vld [vmem:[%s15639_s5 + $0x780] sm:$0xff] }
 0x5ed   : > { %10783 = vmatpush3.bf16.xpose.msk.msra.mxu0 %vm13357_vm0, %v10781_v26  ;;  %10815 = vmatpush3.bf16.xpose.msk.msra.mxu1 %vm13357_vm0, %v10813_v49  ;;  %v4293_v26 = vld [vmem:[%s15639_s5 + $0x778] sm:$0xff]  ;;  %v10809_v49 = vpack.c.bf16 %v4277_v60, %v4276_v36  ;;  %v4306_v60 = vld [vmem:[%s15639_s5 + $0x7e0] sm:$0xff] }
 0x5ee   : > { %10784 = vmatprep.subr.bf16.mxu0 %v15710_v58  ;;  %10816 = vmatprep.subr.bf16.mxu1 %v15710_v58  ;;  %v10841_v42 = vpack.c.bf16 %v4293_v26, %v4292_v44  ;;  %v4307_v44 = vld [vmem:[%s15639_s5 + $0x7e8] sm:$0xff]  ;;  %v4322_v26 = vld [vmem:[%s15639_s5 + $0x860] sm:$0xff] }
 0x5ef   : > { %9881 = vmatprep.mubr.msk.f32.mxu0 %vm11592_vm8, %v11593_v15  ;;  %9916 = vmatprep.mubr.msk.f32.mxu1 %vm11592_vm8, %v11593_v15 }
 0x5f5   : > { %10787 = vmatpush3.bf16.xpose.msk.msra.mxu0 %vm13357_vm0, %v10785_v54  ;;  %10819 = vmatpush3.bf16.xpose.msk.msra.mxu1 %vm13357_vm0, %v10817_v21  ;;  %v3983_v54 = vpop.permute.xlu1 %3982  ;;  %v10845_v21 = vpack.c.bf16 %v4295_v23, %v4294_v41  ;;  %v4308_v23 = vld [vmem:[%s15639_s5 + $0x7f0] sm:$0xff] }
 0x5f6   : > { %10788 = vmatprep.subr.bf16.mxu0 %v15710_v58  ;;  %10820 = vmatprep.subr.bf16.mxu1 %v15710_v58  ;;  %v4043_v59 = vmax.f32 %v14196_v17, %v3983_v54  ;;  %v4312_v17 = vld [vmem:[%s15639_s5 + $0x810] sm:$0xff]  ;;  %v10873_v54 = vpack.c.bf16 %v4309_v53, %v4308_v23  ;;  %v4339_v23 = vld [vmem:[%s15639_s5 + $0x8e8] sm:$0xff]  ;;  %v4354_v53 = vld [vmem:[%s15639_s5 + $0x960] sm:$0xff] }
 0x5fd   : > { %10791 = vmatpush3.bf16.xpose.msk.msra.mxu0 %vm13357_vm0, %v10789_v28  ;;  %10823 = vmatpush3.bf16.xpose.msk.msra.mxu1 %vm13357_vm0, %v10821_v22  ;;  %v4313_v28 = vld [vmem:[%s15639_s5 + $0x818] sm:$0xff]  ;;  %v10849_v22 = vpack.c.bf16 %v4297_v33, %v4296_v24  ;;  %v4343_v24 = vld [vmem:[%s15639_s5 + $0x908] sm:$0xff]  ;;  %v3985_v33 = vpop.permute.xlu0 %3984 }
 0x5fe   : > { %10792 = vmatprep.subr.bf16.mxu0 %v15710_v58  ;;  %10824 = vmatprep.subr.bf16.mxu1 %v15710_v58  ;;  %v10881_v57 = vpack.c.bf16 %v4313_v28, %v4312_v17  ;;  %v3987_v17 = vpop.permute.xlu1 %3986 }
 0x5ff   : > { %v5177_v12 = vpop.f32.mrb[162].mxu0  ;;  %v5298_v25 = vpop.f32.mrb[158].mxu1 }
 0x600   : > { %v7484_v13 = vadd.f32 %v14503_v50, %v5177_v12  ;;  %v9603_v61 = vpop.f32.mrb[163].mxu0  ;;  %v9638_v5 = vpop.f32.mrb[159].mxu1  ;;  %v4271_v50 = vld [vmem:[%s15639_s5 + $0x6c8] sm:$0xff] }
 0x601   : > { %v10797_v16 = vpack.c.bf16 %v4271_v50, %v4270_v1  ;;  %v4315_v12 = vld [vmem:[%s15639_s5 + $0x828] sm:$0xff]  ;;  %v4300_v61 = vld [vmem:[%s15639_s5 + $0x7b0] sm:$0xff]  ;;  %v4301_v5 = vld [vmem:[%s15639_s5 + $0x7b8] sm:$0xff] }
 0x602   : > { %v14658_v45 = vadd.f32 %v7484_v13, %v5298_v25  ;;  %v10853_v25 = vpack.c.bf16 %v4299_v34, %v4298_v11  ;;  %v10885_v13 = vpack.c.bf16 %v4315_v12, %v4314_v62  ;;  %v4045_v11 = vmax.f32 %v14224_v35, %v3987_v17  ;;  %v4328_v34 = vld [vmem:[%s15639_s5 + $0x890] sm:$0xff]  ;;  %v4345_v62 = vld [vmem:[%s15639_s5 + $0x918] sm:$0xff]  ;;  %v4358_v17 = vld [vmem:[%s15639_s5 + $0x980] sm:$0xff] }
 0x603   : > { %v4344_v35 = vld [vmem:[%s15639_s5 + $0x910] sm:$0xff] }
 0x605   : > { %10795 = vmatpush3.bf16.xpose.msk.msra.mxu0 %vm13357_vm0, %v10793_v27  ;;  %10827 = vmatpush3.bf16.xpose.msk.msra.mxu1 %vm13357_vm0, %v10825_v29  ;;  %v4316_v27 = vld [vmem:[%s15639_s5 + $0x830] sm:$0xff]  ;;  %v4317_v29 = vld [vmem:[%s15639_s5 + $0x838] sm:$0xff] }
 0x606   : > { %10796 = vmatprep.subr.bf16.mxu0 %v15710_v58  ;;  %10828 = vmatprep.subr.bf16.mxu1 %v15710_v58  ;;  %v10889_v4 = vpack.c.bf16 %v4317_v29, %v4316_v27  ;;  %v4347_v27 = vld [vmem:[%s15639_s5 + $0x928] sm:$0xff] }
 0x60d   : > { %10799 = vmatpush3.bf16.xpose.msk.msra.mxu0 %vm13357_vm0, %v10797_v16  ;;  %10831 = vmatpush3.bf16.xpose.msk.msra.mxu1 %vm13357_vm0, %v10829_v0  ;;  %v10857_v0 = vpack.c.bf16 %v4301_v5, %v4300_v61  ;;  %v4331_v61 = vld [vmem:[%s15639_s5 + $0x8a8] sm:$0xff]  ;;  %v4346_v5 = vld [vmem:[%s15639_s5 + $0x920] sm:$0xff] }
 0x60e   : > { %10800 = vmatprep.subr.bf16.mxu0 %v15710_v58  ;;  %10832 = vmatprep.subr.bf16.mxu1 %v15710_v58 }
 0x615   : > { %10803 = vmatpush3.bf16.xpose.msk.msra.mxu0 %vm13357_vm0, %v10801_v56  ;;  %10835 = vmatpush3.bf16.xpose.msk.msra.mxu1 %vm13357_vm0, %v10833_v48  ;;  %v4319_v56 = vld [vmem:[%s15639_s5 + $0x848] sm:$0xff] }
 0x616   : > { %10804 = vmatprep.subr.bf16.mxu0 %v15710_v58  ;;  %10836 = vmatprep.subr.bf16.mxu1 %v15710_v58  ;;  %v10893_v10 = vpack.c.bf16 %v4319_v56, %v4318_v51 }
 0x61d   : > { %10807 = vmatpush3.bf16.xpose.msk.msra.mxu0 %vm13357_vm0, %v10805_v14  ;;  %10839 = vmatpush3.bf16.xpose.msk.msra.mxu1 %vm13357_vm0, %v10837_v3  ;;  %v4321_v14 = vld [vmem:[%s15639_s5 + $0x858] sm:$0xff]  ;;  %v10865_v3 = vpack.c.bf16 %v4305_v39, %v4304_v38  ;;  %v4334_v38 = vld [vmem:[%s15639_s5 + $0x8c0] sm:$0xff] }
 0x61e   : > { %10808 = vmatprep.subr.bf16.mxu0 %v15710_v58  ;;  %10840 = vmatprep.subr.bf16.mxu1 %v15710_v58  ;;  %v10897_v36 = vpack.c.bf16 %v4321_v14, %v4320_v55  ;;  %v4350_v39 = vld [vmem:[%s15639_s5 + $0x940] sm:$0xff]  ;;  %v4351_v55 = vld [vmem:[%s15639_s5 + $0x948] sm:$0xff] }
 0x625   : > { %10811 = vmatpush3.bf16.xpose.msk.msra.mxu0 %vm13357_vm0, %v10809_v49  ;;  %10843 = vmatpush3.bf16.xpose.msk.msra.mxu1 %vm13357_vm0, %v10841_v42  ;;  %v4323_v49 = vld [vmem:[%s15639_s5 + $0x868] sm:$0xff]  ;;  %v10869_v42 = vpack.c.bf16 %v4307_v44, %v4306_v60  ;;  %v4337_v60 = vld [vmem:[%s15639_s5 + $0x8d8] sm:$0xff]  ;;  %v4352_v44 = vld [vmem:[%s15639_s5 + $0x950] sm:$0xff] }
 0x626   : > { %10844 = vmatprep.subr.bf16.mxu0 %v15710_v58  ;;  %10876 = vmatprep.subr.bf16.mxu1 %v15710_v58  ;;  %v10901_v41 = vpack.c.bf16 %v4323_v49, %v4322_v26  ;;  %v4353_v26 = vld [vmem:[%s15639_s5 + $0x958] sm:$0xff] }
 0x62c   : > { %9882 = vmatmul.mubr.msk.f32.vlgmr.msra.gmra.mrb[170].mxu0 %vm4454_vm15, %v4042_v52  ;;  %9917 = vmatmul.mubr.msk.f32.vlgmr.msra.gmra.mrb[166].mxu1 %vm4454_vm15, %v4043_v59  ;;  %v4327_v52 = vld [vmem:[%s15639_s5 + $0x888] sm:$0xff]  ;;  %v4342_v59 = vld [vmem:[%s15639_s5 + $0x900] sm:$0xff] }
 0x62d   : > { %10847 = vmatpush3.bf16.xpose.msk.msra.mxu0 %vm13357_vm0, %v10845_v21  ;;  %10879 = vmatpush3.bf16.xpose.msk.msra.mxu1 %vm13357_vm0, %v10877_v63  ;;  %v10905_v21 = vpack.c.bf16 %v4325_v18, %v4324_v20  ;;  %v4326_v63 = vld [vmem:[%s15639_s5 + $0x880] sm:$0xff]  ;;  %v4355_v20 = vld [vmem:[%s15639_s5 + $0x968] sm:$0xff] }
 0x62e   : > { %10848 = vmatprep.subr.bf16.mxu0 %v15710_v58  ;;  %10880 = vmatprep.subr.bf16.mxu1 %v15710_v58  ;;  %v10909_v28 = vpack.c.bf16 %v4327_v52, %v4326_v63  ;;  %v4341_v63 = vld [vmem:[%s15639_s5 + $0x8f8] sm:$0xff]  ;;  %v4356_v52 = vld [vmem:[%s15639_s5 + $0x970] sm:$0xff] }
 0x62f   : > { %9951 = vmatprep.mubr.msk.f32.mxu0 %vm11592_vm8, %v11593_v15  ;;  %9986 = vmatprep.mubr.msk.f32.mxu1 %vm11592_vm8, %v11593_v15 }
 0x635   : > { %10851 = vmatpush3.bf16.xpose.msk.msra.mxu0 %vm13357_vm0, %v10849_v22  ;;  %10883 = vmatpush3.bf16.xpose.msk.msra.mxu1 %vm13357_vm0, %v10881_v57  ;;  %v10941_v22 = vpack.c.bf16 %v4343_v24, %v4342_v59  ;;  %v4044_v57 = vmax.f32 %v14201_v6, %v3985_v33  ;;  %v4329_v6 = vld [vmem:[%s15639_s5 + $0x898] sm:$0xff] }
 0x636   : > { %10852 = vmatprep.subr.bf16.mxu0 %v15710_v58  ;;  %10884 = vmatprep.subr.bf16.mxu1 %v15710_v58  ;;  %v10913_v12 = vpack.c.bf16 %v4329_v6, %v4328_v34  ;;  %v4357_v59 = vld [vmem:[%s15639_s5 + $0x978] sm:$0xff]  ;;  %v3991_v34 = vpop.permute.xlu1 %3990 }
 0x637   : > { %v10969_v33 = vpack.c.bf16 %v4357_v59, %v4356_v52  ;;  %v4372_v59 = vld [vmem:[%s15639_s5 + $0x9f0] sm:$0xff] }
 0x63d   : > { %10855 = vmatpush3.bf16.xpose.msk.msra.mxu0 %vm13357_vm0, %v10853_v25  ;;  %10887 = vmatpush3.bf16.xpose.msk.msra.mxu1 %vm13357_vm0, %v10885_v13  ;;  %v10945_v25 = vpack.c.bf16 %v4345_v62, %v4344_v35  ;;  %v4330_v13 = vld [vmem:[%s15639_s5 + $0x8a0] sm:$0xff] }
 0x63e   : > { %10856 = vmatprep.subr.bf16.mxu0 %v15710_v58  ;;  %10888 = vmatprep.subr.bf16.mxu1 %v15710_v58  ;;  %v10917_v29 = vpack.c.bf16 %v4331_v61, %v4330_v13  ;;  %v4377_v13 = vld [vmem:[%s15639_s5 + $0xa18] sm:$0xff] }
 0x63f   : > { %v5419_v1 = vpop.f32.mrb[164].mxu0  ;;  %v5540_v50 = vpop.f32.mrb[160].mxu1 }
 0x640   : > { %v7486_v32 = vadd.f32 %v14658_v45, %v5419_v1  ;;  %v9673_v37 = vpop.f32.mrb[165].mxu0  ;;  %v9708_v16 = vpop.f32.mrb[161].mxu1  ;;  %v4303_v45 = vld [vmem:[%s15639_s5 + $0x7c8] sm:$0xff]  ;;  %v10949_v1 = vpack.c.bf16 %v4347_v27, %v4346_v5  ;;  %v4362_v27 = vld [vmem:[%s15639_s5 + $0x9a0] sm:$0xff] }
 0x641   : > { %v10861_v48 = vpack.c.bf16 %v4303_v45, %v4302_v46  ;;  %v4348_v37 = vld [vmem:[%s15639_s5 + $0x930] sm:$0xff]  ;;  %v4349_v16 = vld [vmem:[%s15639_s5 + $0x938] sm:$0xff] }
 0x642   : > { %v14813_v31 = vadd.f32 %v7486_v32, %v5540_v50  ;;  %v4332_v50 = vld [vmem:[%s15639_s5 + $0x8b0] sm:$0xff]  ;;  %v4333_v32 = vld [vmem:[%s15639_s5 + $0x8b8] sm:$0xff] }
 0x643   : > { %v10921_v56 = vpack.c.bf16 %v4333_v32, %v4332_v50  ;;  %v4379_v50 = vld [vmem:[%s15639_s5 + $0xa28] sm:$0xff] }
 0x645   : > { %10859 = vmatpush3.bf16.xpose.msk.msra.mxu0 %vm13357_vm0, %v10857_v0  ;;  %10891 = vmatpush3.bf16.xpose.msk.msra.mxu1 %vm13357_vm0, %v10889_v4 }
 0x646   : > { %10860 = vmatprep.subr.bf16.mxu0 %v15710_v58  ;;  %10892 = vmatprep.subr.bf16.mxu1 %v15710_v58 }
 0x64d   : > { %10863 = vmatpush3.bf16.xpose.msk.msra.mxu0 %vm13357_vm0, %v10861_v48  ;;  %10895 = vmatpush3.bf16.xpose.msk.msra.mxu1 %vm13357_vm0, %v10893_v10  ;;  %v10953_v48 = vpack.c.bf16 %v4349_v16, %v4348_v37  ;;  %v4364_v16 = vld [vmem:[%s15639_s5 + $0x9b0] sm:$0xff] }
 0x64e   : > { %10864 = vmatprep.subr.bf16.mxu0 %v15710_v58  ;;  %10896 = vmatprep.subr.bf16.mxu1 %v15710_v58 }
 0x655   : > { %10867 = vmatpush3.bf16.xpose.msk.msra.mxu0 %vm13357_vm0, %v10865_v3  ;;  %10899 = vmatpush3.bf16.xpose.msk.msra.mxu1 %vm13357_vm0, %v10897_v36  ;;  %v10957_v3 = vpack.c.bf16 %v4351_v55, %v4350_v39  ;;  %v4336_v36 = vld [vmem:[%s15639_s5 + $0x8d0] sm:$0xff] }
 0x656   : > { %10868 = vmatprep.subr.bf16.mxu0 %v15710_v58  ;;  %10900 = vmatprep.subr.bf16.mxu1 %v15710_v58  ;;  %v10929_v49 = vpack.c.bf16 %v4337_v60, %v4336_v36  ;;  %v4383_v36 = vld [vmem:[%s15639_s5 + $0xa48] sm:$0xff] }
 0x65d   : > { %10871 = vmatpush3.bf16.xpose.msk.msra.mxu0 %vm13357_vm0, %v10869_v42  ;;  %10903 = vmatpush3.bf16.xpose.msk.msra.mxu1 %vm13357_vm0, %v10901_v41  ;;  %v10961_v42 = vpack.c.bf16 %v4353_v26, %v4352_v44  ;;  %v4338_v41 = vld [vmem:[%s15639_s5 + $0x8e0] sm:$0xff]  ;;  %v4368_v26 = vld [vmem:[%s15639_s5 + $0x9d0] sm:$0xff] }
 0x65e   : > { %10872 = vmatprep.subr.bf16.mxu0 %v15710_v58  ;;  %10904 = vmatprep.subr.bf16.mxu1 %v15710_v58  ;;  %v10933_v18 = vpack.c.bf16 %v4339_v23, %v4338_v41  ;;  %v4385_v41 = vld [vmem:[%s15639_s5 + $0xa58] sm:$0xff] }
 0x665   : > { %10875 = vmatpush3.bf16.xpose.msk.msra.mxu0 %vm13357_vm0, %v10873_v54  ;;  %10907 = vmatpush3.bf16.xpose.msk.msra.mxu1 %vm13357_vm0, %v10905_v21  ;;  %v10965_v54 = vpack.c.bf16 %v4355_v20, %v4354_v53  ;;  %v4340_v21 = vld [vmem:[%s15639_s5 + $0x8f0] sm:$0xff]  ;;  %v4370_v20 = vld [vmem:[%s15639_s5 + $0x9e0] sm:$0xff] }
 0x666   : > { %10908 = vmatprep.subr.bf16.mxu0 %v15710_v58  ;;  %10940 = vmatprep.subr.bf16.mxu1 %v15710_v58  ;;  %v10937_v24 = vpack.c.bf16 %v4341_v63, %v4340_v21  ;;  %v4387_v21 = vld [vmem:[%s15639_s5 + $0xa68] sm:$0xff] }
 0x66c   : > { %9952 = vmatmul.mubr.msk.f32.vlgmr.msra.gmra.mrb[172].mxu0 %vm4454_vm15, %v4044_v57  ;;  %9987 = vmatmul.mubr.msk.f32.vlgmr.msra.gmra.mrb[168].mxu1 %vm4454_vm15, %v4045_v11  ;;  %v4375_v57 = vld [vmem:[%s15639_s5 + $0xa08] sm:$0xff]  ;;  %v3989_v11 = vpop.permute.xlu0 %3988 }
 0x66d   : > { %10911 = vmatpush3.bf16.xpose.msk.msra.mxu0 %vm13357_vm0, %v10909_v28  ;;  %10943 = vmatpush3.bf16.xpose.msk.msra.mxu1 %vm13357_vm0, %v10941_v22  ;;  %v4359_v28 = vld [vmem:[%s15639_s5 + $0x988] sm:$0xff]  ;;  %v4374_v22 = vld [vmem:[%s15639_s5 + $0xa00] sm:$0xff]  ;;  %v4046_v62 = vmax.f32 %v14229_v47, %v3989_v11  ;;  %v4361_v47 = vld [vmem:[%s15639_s5 + $0x998] sm:$0xff] }
 0x66e   : > { %10912 = vmatprep.subr.bf16.mxu0 %v15710_v58  ;;  %10944 = vmatprep.subr.bf16.mxu1 %v15710_v58  ;;  %v10973_v6 = vpack.c.bf16 %v4359_v28, %v4358_v17  ;;  %v11005_v35 = vpack.c.bf16 %v4375_v57, %v4374_v22  ;;  %v4389_v17 = vld [vmem:[%s15639_s5 + $0xa78] sm:$0xff]  ;;  %v4390_v57 = vld [vmem:[%s15639_s5 + $0xa80] sm:$0xff]  ;;  %v4391_v11 = vld [vmem:[%s15639_s5 + $0xa88] sm:$0xff] }
 0x66f   : > { %10021 = vmatprep.mubr.msk.f32.mxu0 %vm11592_vm8, %v11593_v15  ;;  %10056 = vmatprep.mubr.msk.f32.mxu1 %vm11592_vm8, %v11593_v15 }
 0x675   : > { %10915 = vmatpush3.bf16.xpose.msk.msra.mxu0 %vm13357_vm0, %v10913_v12  ;;  %10947 = vmatpush3.bf16.xpose.msk.msra.mxu1 %vm13357_vm0, %v10945_v25  ;;  %v4047_v12 = vmax.f32 %v14252_v9, %v3991_v34  ;;  %v4360_v25 = vld [vmem:[%s15639_s5 + $0x990] sm:$0xff]  ;;  %v4406_v34 = vld [vmem:[%s15639_s5 + $0xb00] sm:$0xff] }
 0x676   : > { %10916 = vmatprep.subr.bf16.mxu0 %v15710_v58  ;;  %10948 = vmatprep.subr.bf16.mxu1 %v15710_v58  ;;  %v4376_v9 = vld [vmem:[%s15639_s5 + $0xa10] sm:$0xff]  ;;  %v10977_v61 = vpack.c.bf16 %v4361_v47, %v4360_v25 }
 0x677   : > { %v11009_v5 = vpack.c.bf16 %v4377_v13, %v4376_v9  ;;  %v4392_v13 = vld [vmem:[%s15639_s5 + $0xa90] sm:$0xff] }
 0x67d   : > { %10919 = vmatpush3.bf16.xpose.msk.msra.mxu0 %vm13357_vm0, %v10917_v29  ;;  %10951 = vmatpush3.bf16.xpose.msk.msra.mxu1 %vm13357_vm0, %v10949_v1  ;;  %v4363_v29 = vld [vmem:[%s15639_s5 + $0x9a8] sm:$0xff]  ;;  %v4378_v1 = vld [vmem:[%s15639_s5 + $0xa20] sm:$0xff] }
 0x67e   : > { %10920 = vmatprep.subr.bf16.mxu0 %v15710_v58  ;;  %10952 = vmatprep.subr.bf16.mxu1 %v15710_v58  ;;  %v10981_v32 = vpack.c.bf16 %v4363_v29, %v4362_v27  ;;  %v11013_v37 = vpack.c.bf16 %v4379_v50, %v4378_v1  ;;  %v4394_v29 = vld [vmem:[%s15639_s5 + $0xaa0] sm:$0xff]  ;;  %v4395_v1 = vld [vmem:[%s15639_s5 + $0xaa8] sm:$0xff] }
 0x67f   : > { %v5661_v0 = vpop.f32.mrb[166].mxu0  ;;  %v5782_v4 = vpop.f32.mrb[162].mxu1  ;;  %v4410_v50 = vld [vmem:[%s15639_s5 + $0xb20] sm:$0xff] }
 0x680   : > { %v7488_v46 = vadd.f32 %v14813_v31, %v5661_v0  ;;  %v9743_v45 = vpop.f32.mrb[167].mxu0  ;;  %v9778_v51 = vpop.f32.mrb[163].mxu1  ;;  %v4335_v31 = vld [vmem:[%s15639_s5 + $0x8c8] sm:$0xff]  ;;  %v4365_v0 = vld [vmem:[%s15639_s5 + $0x9b8] sm:$0xff] }
 0x681   : > { %v10925_v14 = vpack.c.bf16 %v4335_v31, %v4334_v38  ;;  %v10985_v31 = vpack.c.bf16 %v4365_v0, %v4364_v16  ;;  %v4396_v0 = vld [vmem:[%s15639_s5 + $0xab0] sm:$0xff] }
 0x682   : > { %v14968_v10 = vadd.f32 %v7488_v46, %v5782_v4  ;;  %v4380_v4 = vld [vmem:[%s15639_s5 + $0xa30] sm:$0xff]  ;;  %v4381_v46 = vld [vmem:[%s15639_s5 + $0xa38] sm:$0xff] }
 0x683   : > { %v11017_v39 = vpack.c.bf16 %v4381_v46, %v4380_v4  ;;  %v4397_v4 = vld [vmem:[%s15639_s5 + $0xab8] sm:$0xff]  ;;  %v4412_v46 = vld [vmem:[%s15639_s5 + $0xb30] sm:$0xff] }
 0x685   : > { %10923 = vmatpush3.bf16.xpose.msk.msra.mxu0 %vm13357_vm0, %v10921_v56  ;;  %10955 = vmatpush3.bf16.xpose.msk.msra.mxu1 %vm13357_vm0, %v10953_v48 }
 0x686   : > { %10924 = vmatprep.subr.bf16.mxu0 %v15710_v58  ;;  %10956 = vmatprep.subr.bf16.mxu1 %v15710_v58 }
 0x68d   : > { %10927 = vmatpush3.bf16.xpose.msk.msra.mxu0 %vm13357_vm0, %v10925_v14  ;;  %10959 = vmatpush3.bf16.xpose.msk.msra.mxu1 %vm13357_vm0, %v10957_v3  ;;  %v4366_v14 = vld [vmem:[%s15639_s5 + $0x9c0] sm:$0xff] }
 0x68e   : > { %10928 = vmatprep.subr.bf16.mxu0 %v15710_v58  ;;  %10960 = vmatprep.subr.bf16.mxu1 %v15710_v58  ;;  %v4382_v3 = vld [vmem:[%s15639_s5 + $0xa40] sm:$0xff] }
 0x68f   : > { %v11021_v44 = vpack.c.bf16 %v4383_v36, %v4382_v3  ;;  %v4398_v3 = vld [vmem:[%s15639_s5 + $0xac0] sm:$0xff] }
 0x690   : > { %v4414_v36 = vld [vmem:[%s15639_s5 + $0xb40] sm:$0xff] }
 0x695   : > { %10931 = vmatpush3.bf16.xpose.msk.msra.mxu0 %vm13357_vm0, %v10929_v49  ;;  %10963 = vmatpush3.bf16.xpose.msk.msra.mxu1 %vm13357_vm0, %v10961_v42  ;;  %v4369_v49 = vld [vmem:[%s15639_s5 + $0x9d8] sm:$0xff]  ;;  %v4384_v42 = vld [vmem:[%s15639_s5 + $0xa50] sm:$0xff] }
 0x696   : > { %10932 = vmatprep.subr.bf16.mxu0 %v15710_v58  ;;  %10964 = vmatprep.subr.bf16.mxu1 %v15710_v58  ;;  %v10993_v23 = vpack.c.bf16 %v4369_v49, %v4368_v26  ;;  %v11025_v53 = vpack.c.bf16 %v4385_v41, %v4384_v42  ;;  %v4400_v49 = vld [vmem:[%s15639_s5 + $0xad0] sm:$0xff]  ;;  %v4401_v42 = vld [vmem:[%s15639_s5 + $0xad8] sm:$0xff] }
 0x697   : > { %v4416_v41 = vld [vmem:[%s15639_s5 + $0xb50] sm:$0xff] }
 0x69d   : > { %10935 = vmatpush3.bf16.xpose.msk.msra.mxu0 %vm13357_vm0, %v10933_v18  ;;  %10967 = vmatpush3.bf16.xpose.msk.msra.mxu1 %vm13357_vm0, %v10965_v54  ;;  %v4371_v18 = vld [vmem:[%s15639_s5 + $0x9e8] sm:$0xff]  ;;  %v4386_v54 = vld [vmem:[%s15639_s5 + $0xa60] sm:$0xff] }
 0x69e   : > { %10936 = vmatprep.subr.bf16.mxu0 %v15710_v58  ;;  %10968 = vmatprep.subr.bf16.mxu1 %v15710_v58  ;;  %v10997_v63 = vpack.c.bf16 %v4371_v18, %v4370_v20  ;;  %v11029_v52 = vpack.c.bf16 %v4387_v21, %v4386_v54  ;;  %v4402_v18 = vld [vmem:[%s15639_s5 + $0xae0] sm:$0xff]  ;;  %v4403_v54 = vld [vmem:[%s15639_s5 + $0xae8] sm:$0xff] }
 0x69f   : > { %v4418_v21 = vld [vmem:[%s15639_s5 + $0xb60] sm:$0xff] }
 0x6a5   : > { %10939 = vmatpush3.bf16.xpose.msk.msra.mxu0 %vm13357_vm0, %v10937_v24  ;;  %10971 = vmatpush3.bf16.xpose.msk.msra.mxu1 %vm13357_vm0, %v10969_v33  ;;  %v4373_v24 = vld [vmem:[%s15639_s5 + $0x9f8] sm:$0xff]  ;;  %v4388_v33 = vld [vmem:[%s15639_s5 + $0xa70] sm:$0xff] }
 0x6a6   : > { %10972 = vmatprep.subr.bf16.mxu0 %v15710_v58  ;;  %11004 = vmatprep.subr.bf16.mxu1 %v15710_v58  ;;  %v11001_v28 = vpack.c.bf16 %v4373_v24, %v4372_v59  ;;  %v11033_v22 = vpack.c.bf16 %v4389_v17, %v4388_v33  ;;  %v4404_v24 = vld [vmem:[%s15639_s5 + $0xaf0] sm:$0xff]  ;;  %v4405_v33 = vld [vmem:[%s15639_s5 + $0xaf8] sm:$0xff] }
 0x6a7   : > { %v4420_v17 = vld [vmem:[%s15639_s5 + $0xb70] sm:$0xff] }
 0x6ac   : > { %10022 = vmatmul.mubr.msk.f32.vlgmr.msra.gmra.mrb[174].mxu0 %vm4454_vm15, %v4046_v62  ;;  %10057 = vmatmul.mubr.msk.f32.vlgmr.msra.gmra.mrb[170].mxu1 %vm4454_vm15, %v4047_v12  ;;  %v3995_v62 = vpop.permute.xlu1 %3994  ;;  %v11037_v12 = vpack.c.bf16 %v4391_v11, %v4390_v57  ;;  %v4422_v11 = vld [vmem:[%s15639_s5 + $0xb80] sm:$0xff] }
 0x6ad   : > { %10975 = vmatpush3.bf16.xpose.msk.msra.mxu0 %vm13357_vm0, %v10973_v6  ;;  %11007 = vmatpush3.bf16.xpose.msk.msra.mxu1 %vm13357_vm0, %v11005_v35  ;;  %v4407_v6 = vld [vmem:[%s15639_s5 + $0xb08] sm:$0xff]  ;;  %v3993_v35 = vpop.permute.xlu0 %3992  ;;  %v4049_v9 = vmax.f32 %v14286_v2, %v3995_v62  ;;  %v4408_v2 = vld [vmem:[%s15639_s5 + $0xb10] sm:$0xff] }
 0x6ae   : > { %10976 = vmatprep.subr.bf16.mxu0 %v15710_v58  ;;  %11008 = vmatprep.subr.bf16.mxu1 %v15710_v58  ;;  %v11069_v25 = vpack.c.bf16 %v4407_v6, %v4406_v34  ;;  %v4048_v47 = vmax.f32 %v14261_v30, %v3993_v35  ;;  %v4393_v30 = vld [vmem:[%s15639_s5 + $0xa98] sm:$0xff]  ;;  %v4423_v34 = vld [vmem:[%s15639_s5 + $0xb88] sm:$0xff]  ;;  %v4438_v6 = vld [vmem:[%s15639_s5 + $0xc00] sm:$0xff] }
 0x6af   : > { %10091 = vmatprep.mubr.msk.f32.mxu0 %vm11592_vm8, %v11593_v15  ;;  %10126 = vmatprep.mubr.msk.f32.mxu1 %vm11592_vm8, %v11593_v15  ;;  %v4439_v35 = vld [vmem:[%s15639_s5 + $0xc08] sm:$0xff] }
 0x6b1   : > { %v3997_v62 = vpop.permute.xlu0 %3996 }
 0x6b5   : > { %10979 = vmatpush3.bf16.xpose.msk.msra.mxu0 %vm13357_vm0, %v10977_v61  ;;  %11011 = vmatpush3.bf16.xpose.msk.msra.mxu1 %vm13357_vm0, %v11009_v5  ;;  %v4409_v61 = vld [vmem:[%s15639_s5 + $0xb18] sm:$0xff]  ;;  %v11041_v5 = vpack.c.bf16 %v4393_v30, %v4392_v13  ;;  %v4424_v30 = vld [vmem:[%s15639_s5 + $0xb90] sm:$0xff] }
 0x6b6   : > { %10980 = vmatprep.subr.bf16.mxu0 %v15710_v58  ;;  %11012 = vmatprep.subr.bf16.mxu1 %v15710_v58  ;;  %v11073_v27 = vpack.c.bf16 %v4409_v61, %v4408_v2  ;;  %v4441_v2 = vld [vmem:[%s15639_s5 + $0xc18] sm:$0xff] }
 0x6bd   : > { %10983 = vmatpush3.bf16.xpose.msk.msra.mxu0 %vm13357_vm0, %v10981_v32  ;;  %11015 = vmatpush3.bf16.xpose.msk.msra.mxu1 %vm13357_vm0, %v11013_v37  ;;  %v4411_v32 = vld [vmem:[%s15639_s5 + $0xb28] sm:$0xff]  ;;  %v11045_v37 = vpack.c.bf16 %v4395_v1, %v4394_v29  ;;  %v4442_v1 = vld [vmem:[%s15639_s5 + $0xc20] sm:$0xff] }
 0x6be   : > { %10984 = vmatprep.subr.bf16.mxu0 %v15710_v58  ;;  %11016 = vmatprep.subr.bf16.mxu1 %v15710_v58  ;;  %v11077_v16 = vpack.c.bf16 %v4411_v32, %v4410_v50  ;;  %v4427_v29 = vld [vmem:[%s15639_s5 + $0xba8] sm:$0xff] }
 0x6bf   : > { %v5903_v45 = vpop.f32.mrb[168].mxu0  ;;  %v6024_v51 = vpop.f32.mrb[164].mxu1  ;;  %v4443_v50 = vld [vmem:[%s15639_s5 + $0xc28] sm:$0xff] }
 0x6c0   : > { %v7490_v56 = vadd.f32 %v14968_v10, %v5903_v45  ;;  %v9813_v48 = vpop.f32.mrb[169].mxu0  ;;  %v9848_v38 = vpop.f32.mrb[165].mxu1  ;;  %v4367_v10 = vld [vmem:[%s15639_s5 + $0x9c8] sm:$0xff]  ;;  %v4413_v45 = vld [vmem:[%s15639_s5 + $0xb38] sm:$0xff] }
 0x6c1   : > { %v10989_v60 = vpack.c.bf16 %v4367_v10, %v4366_v14  ;;  %v11081_v14 = vpack.c.bf16 %v4413_v45, %v4412_v46  ;;  %v4445_v46 = vld [vmem:[%s15639_s5 + $0xc38] sm:$0xff] }
 0x6c2   : > { %v15123_v55 = vadd.f32 %v7490_v56, %v6024_v51 }
 0x6c5   : > { %10987 = vmatpush3.bf16.xpose.msk.msra.mxu0 %vm13357_vm0, %v10985_v31  ;;  %11019 = vmatpush3.bf16.xpose.msk.msra.mxu1 %vm13357_vm0, %v11017_v39  ;;  %v11049_v39 = vpack.c.bf16 %v4397_v4, %v4396_v0  ;;  %v4429_v0 = vld [vmem:[%s15639_s5 + $0xbb8] sm:$0xff]  ;;  %v4444_v4 = vld [vmem:[%s15639_s5 + $0xc30] sm:$0xff] }
 0x6c6   : > { %10988 = vmatprep.subr.bf16.mxu0 %v15710_v58  ;;  %11020 = vmatprep.subr.bf16.mxu1 %v15710_v58 }
 0x6cd   : > { %10991 = vmatpush3.bf16.xpose.msk.msra.mxu0 %vm13357_vm0, %v10989_v60  ;;  %11023 = vmatpush3.bf16.xpose.msk.msra.mxu1 %vm13357_vm0, %v11021_v44  ;;  %v4415_v60 = vld [vmem:[%s15639_s5 + $0xb48] sm:$0xff] }
 0x6ce   : > { %10992 = vmatprep.subr.bf16.mxu0 %v15710_v58  ;;  %11024 = vmatprep.subr.bf16.mxu1 %v15710_v58  ;;  %v11085_v26 = vpack.c.bf16 %v4415_v60, %v4414_v36  ;;  %v4447_v36 = vld [vmem:[%s15639_s5 + $0xc48] sm:$0xff] }
 0x6d5   : > { %10995 = vmatpush3.bf16.xpose.msk.msra.mxu0 %vm13357_vm0, %v10993_v23  ;;  %11027 = vmatpush3.bf16.xpose.msk.msra.mxu1 %vm13357_vm0, %v11025_v53  ;;  %v4417_v23 = vld [vmem:[%s15639_s5 + $0xb58] sm:$0xff]  ;;  %v11057_v53 = vpack.c.bf16 %v4401_v42, %v4400_v49  ;;  %v4448_v42 = vld [vmem:[%s15639_s5 + $0xc50] sm:$0xff] }
 0x6d6   : > { %10996 = vmatprep.subr.bf16.mxu0 %v15710_v58  ;;  %11028 = vmatprep.subr.bf16.mxu1 %v15710_v58  ;;  %v11089_v20 = vpack.c.bf16 %v4417_v23, %v4416_v41  ;;  %v4433_v49 = vld [vmem:[%s15639_s5 + $0xbd8] sm:$0xff] }
 0x6d7   : > { %v4449_v41 = vld [vmem:[%s15639_s5 + $0xc58] sm:$0xff] }
 0x6dd   : > { %10999 = vmatpush3.bf16.xpose.msk.msra.mxu0 %vm13357_vm0, %v10997_v63  ;;  %11031 = vmatpush3.bf16.xpose.msk.msra.mxu1 %vm13357_vm0, %v11029_v52  ;;  %v4419_v63 = vld [vmem:[%s15639_s5 + $0xb68] sm:$0xff]  ;;  %v11061_v52 = vpack.c.bf16 %v4403_v54, %v4402_v18  ;;  %v4450_v54 = vld [vmem:[%s15639_s5 + $0xc60] sm:$0xff] }
 0x6de   : > { %11000 = vmatprep.subr.bf16.mxu0 %v15710_v58  ;;  %11032 = vmatprep.subr.bf16.mxu1 %v15710_v58  ;;  %v11093_v59 = vpack.c.bf16 %v4419_v63, %v4418_v21  ;;  %v4435_v18 = vld [vmem:[%s15639_s5 + $0xbe8] sm:$0xff] }
 0x6df   : > { %v4451_v21 = vld [vmem:[%s15639_s5 + $0xc68] sm:$0xff] }
 0x6e5   : > { %11003 = vmatpush3.bf16.xpose.msk.msra.mxu0 %vm13357_vm0, %v11001_v28  ;;  %11035 = vmatpush3.bf16.xpose.msk.msra.mxu1 %vm13357_vm0, %v11033_v22  ;;  %v4421_v28 = vld [vmem:[%s15639_s5 + $0xb78] sm:$0xff]  ;;  %v11065_v22 = vpack.c.bf16 %v4405_v33, %v4404_v24  ;;  %v4452_v33 = vld [vmem:[%s15639_s5 + $0xc70] sm:$0xff] }
 0x6e6   : > { %11036 = vmatprep.subr.bf16.mxu0 %v15710_v58  ;;  %11068 = vmatprep.subr.bf16.mxu1 %v15710_v58  ;;  %v11097_v57 = vpack.c.bf16 %v4421_v28, %v4420_v17  ;;  %v4437_v24 = vld [vmem:[%s15639_s5 + $0xbf8] sm:$0xff] }
 0x6e7   : > { %v4453_v17 = vld [vmem:[%s15639_s5 + $0xc78] sm:$0xff] }
 0x6ec   : > { %10092 = vmatmul.mubr.msk.f32.vlgmr.msra.gmra.mrb[176].mxu0 %vm4454_vm15, %v4048_v47  ;;  %10127 = vmatmul.mubr.msk.f32.vlgmr.msra.gmra.mrb[172].mxu1 %vm4454_vm15, %v4049_v9  ;;  %v11133_v47 = vpack.c.bf16 %v4439_v35, %v4438_v6  ;;  %v4050_v9 = vmax.f32 %v14293_v43, %v3997_v62  ;;  %v4425_v43 = vld [vmem:[%s15639_s5 + $0xb98] sm:$0xff] }
 0x6ed   : > { %11039 = vmatpush3.bf16.xpose.msk.msra.mxu0 %vm13357_vm0, %v11037_v12  ;;  %11071 = vmatpush3.bf16.xpose.msk.msra.mxu1 %vm13357_vm0, %v11069_v25  ;;  %v3999_v12 = vpop.permute.xlu1 %3998  ;;  %v11101_v25 = vpack.c.bf16 %v4423_v34, %v4422_v11  ;;  %v11105_v61 = vpack.c.bf16 %v4425_v43, %v4424_v30  ;;  %v7519_v43 = vld [vmem:[%s15641_s7 + $0x20] sm:$0xff] }
 0x6ee   : > { %11040 = vmatprep.subr.bf16.mxu0 %v15710_v58  ;;  %11072 = vmatprep.subr.bf16.mxu1 %v15710_v58  ;;  %v4051_v13 = vmax.f32 %v14316_v19, %v3999_v12  ;;  %v4440_v19 = vld [vmem:[%s15639_s5 + $0xc10] sm:$0xff] }
 0x6ef   : > { %10161 = vmatprep.mubr.msk.f32.mxu0 %vm11592_vm8, %v11593_v15  ;;  %10196 = vmatprep.mubr.msk.f32.mxu1 %vm11592_vm8, %v11593_v15 }
 0x6f1   : > { %v4003_v11 = vpop.permute.xlu1 %4002 }
 0x6f2   : > { %v4053_v6 = vmax.f32 %v14344_v40, %v4003_v11  ;;  %v7517_v40 = vld [vmem:[%s15641_s7 + $0x10] sm:$0xff] }
 0x6f5   : > { %11043 = vmatpush3.bf16.xpose.msk.msra.mxu0 %vm13357_vm0, %v11041_v5  ;;  %11075 = vmatpush3.bf16.xpose.msk.msra.mxu1 %vm13357_vm0, %v11073_v27  ;;  %v11137_v5 = vpack.c.bf16 %v4441_v2, %v4440_v19  ;;  %v4426_v27 = vld [vmem:[%s15639_s5 + $0xba0] sm:$0xff]  ;;  %v7520_v19 = vld [vmem:[%s15641_s7 + $0x28] sm:$0xff] }
 0x6f6   : > { %11044 = vmatprep.subr.bf16.mxu0 %v15710_v58  ;;  %11076 = vmatprep.subr.bf16.mxu1 %v15710_v58  ;;  %v11109_v32 = vpack.c.bf16 %v4427_v29, %v4426_v27  ;;  %v11171_v2 = vpack.c.bf16 %v7520_v19, %v7519_v43  ;;  %v7523_v29 = vld [vmem:[%s15641_s7 + $0x40] sm:$0xff] }
 0x6fd   : > { %11047 = vmatpush3.bf16.xpose.msk.msra.mxu0 %vm13357_vm0, %v11045_v37  ;;  %11079 = vmatpush3.bf16.xpose.msk.msra.mxu1 %vm13357_vm0, %v11077_v16  ;;  %v11141_v37 = vpack.c.bf16 %v4443_v50, %v4442_v1  ;;  %v4428_v16 = vld [vmem:[%s15639_s5 + $0xbb0] sm:$0xff]  ;;  %v7524_v1 = vld [vmem:[%s15641_s7 + $0x48] sm:$0xff] }
 0x6fe   : > { %11048 = vmatprep.subr.bf16.mxu0 %v15710_v58  ;;  %11080 = vmatprep.subr.bf16.mxu1 %v15710_v58  ;;  %v11177_v50 = vpack.c.bf16 %v7524_v1, %v7523_v29 }
 0x6ff   : > { %v6145_v51 = vpop.f32.mrb[170].mxu0  ;;  %v6266_v56 = vpop.f32.mrb[166].mxu1 }
 0x700   : > { %v7492_v48 = vadd.f32 %v15123_v55, %v6145_v51  ;;  %v9883_v38 = vpop.f32.mrb[171].mxu0  ;;  %v9918_v31 = vpop.f32.mrb[167].mxu1  ;;  %v4399_v55 = vld [vmem:[%s15639_s5 + $0xac8] sm:$0xff] }
 0x701   : > { %v11053_v44 = vpack.c.bf16 %v4399_v55, %v4398_v3  ;;  %v11113_v31 = vpack.c.bf16 %v4429_v0, %v4428_v16  ;;  %v4430_v3 = vld [vmem:[%s15639_s5 + $0xbc0] sm:$0xff] }
 0x702   : > { %v15278_v10 = vadd.f32 %v7492_v48, %v6266_v56  ;;  %v4446_v55 = vld [vmem:[%s15639_s5 + $0xc40] sm:$0xff] }
 0x705   : > { %11051 = vmatpush3.bf16.xpose.msk.msra.mxu0 %vm13357_vm0, %v11049_v39  ;;  %11083 = vmatpush3.bf16.xpose.msk.msra.mxu1 %vm13357_vm0, %v11081_v14  ;;  %v11145_v39 = vpack.c.bf16 %v4445_v46, %v4444_v4  ;;  %v7527_v46 = vld [vmem:[%s15641_s7 + $0x60] sm:$0xff] }
 0x706   : > { %11052 = vmatprep.subr.bf16.mxu0 %v15710_v58  ;;  %11084 = vmatprep.subr.bf16.mxu1 %v15710_v58 }
 0x70d   : > { %11055 = vmatpush3.bf16.xpose.msk.msra.mxu0 %vm13357_vm0, %v11053_v44  ;;  %11087 = vmatpush3.bf16.xpose.msk.msra.mxu1 %vm13357_vm0, %v11085_v26  ;;  %v11149_v44 = vpack.c.bf16 %v4447_v36, %v4446_v55  ;;  %v4432_v26 = vld [vmem:[%s15639_s5 + $0xbd0] sm:$0xff] }
 0x70e   : > { %11056 = vmatprep.subr.bf16.mxu0 %v15710_v58  ;;  %11088 = vmatprep.subr.bf16.mxu1 %v15710_v58  ;;  %v11121_v23 = vpack.c.bf16 %v4433_v49, %v4432_v26 }
 0x715   : > { %11059 = vmatpush3.bf16.xpose.msk.msra.mxu0 %vm13357_vm0, %v11057_v53  ;;  %11091 = vmatpush3.bf16.xpose.msk.msra.mxu1 %vm13357_vm0, %v11089_v20  ;;  %v11153_v53 = vpack.c.bf16 %v4449_v41, %v4448_v42  ;;  %v4434_v20 = vld [vmem:[%s15639_s5 + $0xbe0] sm:$0xff] }
 0x716   : > { %11060 = vmatprep.subr.bf16.mxu0 %v15710_v58  ;;  %11092 = vmatprep.subr.bf16.mxu1 %v15710_v58  ;;  %v11125_v63 = vpack.c.bf16 %v4435_v18, %v4434_v20 }
 0x71d   : > { %11063 = vmatpush3.bf16.xpose.msk.msra.mxu0 %vm13357_vm0, %v11061_v52  ;;  %11095 = vmatpush3.bf16.xpose.msk.msra.mxu1 %vm13357_vm0, %v11093_v59  ;;  %v11157_v52 = vpack.c.bf16 %v4451_v21, %v4450_v54  ;;  %v4436_v59 = vld [vmem:[%s15639_s5 + $0xbf0] sm:$0xff] }
 0x71e   : > { %11064 = vmatprep.subr.bf16.mxu0 %v15710_v58  ;;  %11096 = vmatprep.subr.bf16.mxu1 %v15710_v58  ;;  %v11129_v28 = vpack.c.bf16 %v4437_v24, %v4436_v59 }
 0x725   : > { %11067 = vmatpush3.bf16.xpose.msk.msra.mxu0 %vm13357_vm0, %v11065_v22  ;;  %11099 = vmatpush3.bf16.xpose.msk.msra.mxu1 %vm13357_vm0, %v11097_v57  ;;  %v11161_v22 = vpack.c.bf16 %v4453_v17, %v4452_v33  ;;  %v4001_v57 = vpop.permute.xlu0 %4000 }
 0x726   : > { %11100 = vmatprep.subr.bf16.mxu0 %v15710_v58  ;;  %11132 = vmatprep.subr.bf16.mxu1 %v15710_v58  ;;  %v4052_v34 = vmax.f32 %v14321_v8, %v4001_v57  ;;  %v7516_v8 = vld [vmem:[%s15641_s7 + $0x8] sm:$0xff] }
 0x72c   : > { %10162 = vmatmul.mubr.msk.f32.vlgmr.msra.gmra.mrb[178].mxu0 %vm4454_vm15, %v4050_v9  ;;  %10197 = vmatmul.mubr.msk.f32.vlgmr.msra.gmra.mrb[174].mxu1 %vm4454_vm15, %v4051_v13  ;;  %v7515_v9 = vld [vmem:[%s15641_s7] sm:$0xff] }
 0x72d   : > { %11103 = vmatpush3.bf16.xpose.msk.msra.mxu0 %vm13357_vm0, %v11101_v25  ;;  %11135 = vmatpush3.bf16.xpose.msk.msra.mxu1 %vm13357_vm0, %v11133_v47  ;;  %v11165_v13 = vpack.c.bf16 %v7516_v8, %v7515_v9 }
 0x72e   : > { %11104 = vmatprep.subr.bf16.mxu0 %v15710_v58  ;;  %11136 = vmatprep.subr.bf16.mxu1 %v15710_v58 }
 0x72f   : > { %10231 = vmatprep.mubr.msk.f32.mxu0 %vm11592_vm8, %v11593_v15  ;;  %10266 = vmatprep.mubr.msk.f32.mxu1 %vm11592_vm8, %v11593_v15 }
 0x735   : > { %11107 = vmatpush3.bf16.xpose.msk.msra.mxu0 %vm13357_vm0, %v11105_v61  ;;  %11139 = vmatpush3.bf16.xpose.msk.msra.mxu1 %vm13357_vm0, %v11137_v5  ;;  %v7521_v61 = vld [vmem:[%s15641_s7 + $0x30] sm:$0xff]  ;;  %v7522_v5 = vld [vmem:[%s15641_s7 + $0x38] sm:$0xff] }
 0x736   : > { %11108 = vmatprep.subr.bf16.mxu0 %v15710_v58  ;;  %11140 = vmatprep.subr.bf16.mxu1 %v15710_v58  ;;  %v11174_v27 = vpack.c.bf16 %v7522_v5, %v7521_v61 }
 0x73d   : > { %11111 = vmatpush3.bf16.xpose.msk.msra.mxu0 %vm13357_vm0, %v11109_v32  ;;  %11143 = vmatpush3.bf16.xpose.msk.msra.mxu1 %vm13357_vm0, %v11141_v37  ;;  %v7525_v32 = vld [vmem:[%s15641_s7 + $0x50] sm:$0xff]  ;;  %v7526_v37 = vld [vmem:[%s15641_s7 + $0x58] sm:$0xff] }
 0x73e   : > { %11112 = vmatprep.subr.bf16.mxu0 %v15710_v58  ;;  %11144 = vmatprep.subr.bf16.mxu1 %v15710_v58  ;;  %v11180_v16 = vpack.c.bf16 %v7526_v37, %v7525_v32 }
 0x73f   : > { %v6387_v45 = vpop.f32.mrb[172].mxu0  ;;  %v6508_v51 = vpop.f32.mrb[168].mxu1 }
 0x740   : > { %v7494_v56 = vadd.f32 %v15278_v10, %v6387_v45  ;;  %v9953_v48 = vpop.f32.mrb[173].mxu0  ;;  %v9988_v38 = vpop.f32.mrb[169].mxu1  ;;  %v4431_v10 = vld [vmem:[%s15639_s5 + $0xbc8] sm:$0xff] }
 0x741   : > { %v11117_v60 = vpack.c.bf16 %v4431_v10, %v4430_v3  ;;  %v7528_v45 = vld [vmem:[%s15641_s7 + $0x68] sm:$0xff] }
 0x742   : > { %v7495_v14 = vadd.f32 %v7494_v56, %v6508_v51  ;;  %v11183_v38 = vpack.c.bf16 %v7528_v45, %v7527_v46 }
 0x745   : > { %11115 = vmatpush3.bf16.xpose.msk.msra.mxu0 %vm13357_vm0, %v11113_v31  ;;  %11147 = vmatpush3.bf16.xpose.msk.msra.mxu1 %vm13357_vm0, %v11145_v39  ;;  %v7529_v39 = vld [vmem:[%s15641_s7 + $0x70] sm:$0xff] }
 0x746   : > { %11116 = vmatprep.subr.bf16.mxu0 %v15710_v58  ;;  %11148 = vmatprep.subr.bf16.mxu1 %v15710_v58 }
 0x74d   : > { %11119 = vmatpush3.bf16.xpose.msk.msra.mxu0 %vm13357_vm0, %v11117_v60  ;;  %11151 = vmatpush3.bf16.xpose.msk.msra.mxu1 %vm13357_vm0, %v11149_v44 }
 0x74e   : > { %11120 = vmatprep.subr.bf16.mxu0 %v15710_v58  ;;  %11152 = vmatprep.subr.bf16.mxu1 %v15710_v58 }
 0x755   : > { %11123 = vmatpush3.bf16.xpose.msk.msra.mxu0 %vm13357_vm0, %v11121_v23  ;;  %11155 = vmatpush3.bf16.xpose.msk.msra.mxu1 %vm13357_vm0, %v11153_v53  ;;  %v8352_v53 = vld [vmem:[%s15640_s6] ss:$0 sm:$0xff] }
 0x756   : > { %11124 = vmatprep.subr.bf16.mxu0 %v15710_v58  ;;  %11156 = vmatprep.subr.bf16.mxu1 %v15710_v58 }
 0x75d   : > { %11127 = vmatpush3.bf16.xpose.msk.msra.mxu0 %vm13357_vm0, %v11125_v63  ;;  %11159 = vmatpush3.bf16.xpose.msk.msra.mxu1 %vm13357_vm0, %v11157_v52  ;;  %v8353_v63 = vld [vmem:[%s15642_s8] ss:$0 sm:$0xff] }
 0x75e   : > { %11128 = vmatprep.subr.bf16.mxu0 %v15710_v58  ;;  %11160 = vmatprep.subr.bf16.mxu1 %v15710_v58 }
 0x765   : > { %11131 = vmatpush3.bf16.xpose.msk.msra.mxu0 %vm13357_vm0, %v11129_v28  ;;  %11163 = vmatpush3.bf16.xpose.msk.msra.mxu1 %vm13357_vm0, %v11161_v22  ;;  %vm7608_vm0 = vcmask 31744  }
 0x766   : > { %11164 = vmatprep.subr.bf16.mxu0 %v15710_v58 }
 0x76c   : > { %10232 = vmatmul.mubr.msk.f32.vlgmr.msra.gmra.mrb[180].mxu0 %vm4454_vm15, %v4052_v34  ;;  %10267 = vmatmul.mubr.msk.f32.vlgmr.msra.gmra.mrb[176].mxu1 %vm4454_vm15, %v4053_v6  ;;  %vm7621_vm15 = vcmask 105504  }
 0x76d   : > { %10301 = vmatprep.mubr.msk.f32.mxu0 %vm11592_vm8, %v11593_v15  ;;  %v7518_v15 = vld [vmem:[%s15641_s7 + $0x18] sm:$0xff]  ;;  %11166 = vmatpush3.bf16.msra.mxu0 %v11165_v13 }
 0x76e   : > { %v11168_v30 = vpack.c.bf16 %v7518_v15, %v7517_v40  ;;  %11167 = vmatprep.subr.bf16.mxu0 %v15710_v58 }
 0x771   : > { %11169 = vmatpush3.bf16.msra.mxu0 %v11168_v30 }
 0x772   : > { %11170 = vmatprep.subr.bf16.mxu0 %v15710_v58 }
 0x775   : > { %11172 = vmatpush3.bf16.msra.mxu0 %v11171_v2 }
 0x776   : > { %11173 = vmatprep.subr.bf16.mxu0 %v15710_v58 }
 0x779   : > { %11175 = vmatpush3.bf16.msra.mxu0 %v11174_v27 }
 0x77a   : > { %11176 = vmatprep.subr.bf16.mxu0 %v15710_v58 }
 0x77d   : > { %11178 = vmatpush3.bf16.msra.mxu0 %v11177_v50 }
 0x77e   : > { %11179 = vmatprep.subr.bf16.mxu0 %v15710_v58 }
 0x77f   : > { %v6629_v35 = vpop.f32.mrb[174].mxu0  ;;  %v6750_v62 = vpop.f32.mrb[170].mxu1 }
 0x780   : > { %v7496_v12 = vadd.f32 %v7495_v14, %v6629_v35  ;;  %v10023_v7 = vpop.f32.mrb[175].mxu0  ;;  %v10058_v25 = vpop.f32.mrb[171].mxu1  ;;  %v7530_v14 = vld [vmem:[%s15641_s7 + $0x78] sm:$0xff] }
 0x781   : > { %11181 = vmatpush3.bf16.msra.mxu0 %v11180_v16  ;;  %v11186_v3 = vpack.c.bf16 %v7530_v14, %v7529_v39 }
 0x782   : > { %v7497_v47 = vadd.f32 %v7496_v12, %v6750_v62  ;;  %11182 = vmatprep.subr.bf16.mxu0 %v15710_v58 }
 0x785   : > { %11184 = vmatpush3.bf16.msra.mxu0 %v11183_v38 }
 0x786   : > { %11185 = vmatprep.subr.bf16.mxu0 %v15710_v58 }
 0x789   : > { %11187 = vmatpush3.bf16.msra.mxu0 %v11186_v3 }
 0x7bf   : > { %v6871_v0 = vpop.f32.mrb[176].mxu0  ;;  %v6992_v4 = vpop.f32.mrb[172].mxu1 }
 0x7c0   : > { %v7498_v51 = vadd.f32 %v7497_v47, %v6871_v0  ;;  %v10093_v56 = vpop.f32.mrb[177].mxu0  ;;  %v10128_v48 = vpop.f32.mrb[173].mxu1 }
 0x7c2   : > { %v7499_v31 = vadd.f32 %v7498_v51, %v6992_v4 }
 0x7ff   : > { %v7113_v10 = vpop.f32.mrb[178].mxu0  ;;  %v7234_v55 = vpop.f32.mrb[174].mxu1 }
 0x800   : > { %v7500_v36 = vadd.f32 %v7499_v31, %v7113_v10  ;;  %v10163_v60 = vpop.f32.mrb[179].mxu0  ;;  %v10198_v44 = vpop.f32.mrb[175].mxu1 }
 0x802   : > { %v7501_v26 = vadd.f32 %v7500_v36, %v7234_v55 }
 0x83f   : > { %v7355_v49 = vpop.f32.mrb[180].mxu0  ;;  %v7476_v42 = vpop.f32.mrb[176].mxu1 }
 0x840   : > { %v7502_v41 = vadd.f32 %v7501_v26, %v7355_v49  ;;  %v10233_v58 = vpop.f32.mrb[181].mxu0  ;;  %v10268_v23 = vpop.f32.mrb[177].mxu1 }
 0x842   : > { %v7503_v20 = vadd.f32 %v7502_v41, %v7476_v42 }
 0x844   : > { %v7511_v18 = vadd.f32 %v8352_v53, %v7503_v20 }
 0x846   : > { %v7513_v54 = vmul.f32 0.01, %v7511_v18  ;;  %vm7512_vm8 = vcmp.gt.f32.partialorder %v7511_v18, 0.0 }
 0x848   : > { %v7514_v21 = vsel %vm7512_vm8, %v7511_v18, %v7513_v54 }
 0x849   : > { %10302 = vmatmul.mubr.f32.vlgmr.msra.gmra.mrb[182].mxu0 %v7514_v21 }
 0x91c   : > { %v7604_v52 = vpop.f32.mrb[182].mxu0 }
 0x91d   : > { %v7605_v59 = vadd.f32 %v8353_v63, %v7604_v52  ;;  %v10303_v24 = vpop.f32.mrb[183].mxu0 }
 0x91f   : > { %v7622_v33 = vsel %vm7621_vm15, %v7605_v59, -inf  ;;  %v7609_v11 = vsel %vm7608_vm0, %v7605_v59, -inf }
 0x920   : > { %7623 = vmax.xlane.f32.xlu0 %v7622_v33 }
 0x9ad   : > { %v7624_v17 = vpop.xlane.xlu0 %7623 }
 0x9ae   : > { %v7625_v28 = vsub.f32 %v7605_v59, %v7624_v17 }
 0x9b0   : > { %v7626_v22 = vmul.f32 1.442695, %v7625_v28 }
 0x9b2   : > { %11514 = vpow2.f32 %v7626_v22 }
 0x9bc   : > { %v11515_v57 = vpop.eup %11514 }
 0x9bd   : > { %7629 = vrot.lane.b32.xlu1 %v11515_v57, %s11595_s12 }
 0x9e1   : > { %7610 = vmax.xlane.f32.xlu1 %v7609_v11 }
 0xa2f   : > { %v7630_v34 = vpop.permute.xlu1 %7629 }
 0xa30   : > { %v7633_v6 = vsel %vm7632_vm13, %v7630_v34, 0.0 }
 0xa31   : > { %7634 = vadd.xlane.f32.xlu0 %v7633_v6 }
 0xa6e   : > { %v7611_v35 = vpop.xlane.xlu1 %7610 }
 0xa6f   : > { %v7612_v62 = vsub.f32 %v7605_v59, %v7611_v35 }
 0xa71   : > { %v7613_v12 = vmul.f32 1.442695, %v7612_v62 }
 0xa73   : > { %11516 = vpow2.f32 %v7613_v12 }
 0xa7d   : > { %v11517_v7 = vpop.eup %11516 }
 0xa7e   : > { %v7615_v25 = vsel %vm7608_vm0, %v11517_v7, 0.0 }
 0xa7f   : > { %7616 = vadd.xlane.f32.xlu0 %v7615_v25 }
 0xabe   : > { %v7635_v47 = vpop.xlane.xlu0 %7634 }
 0xabf   : > { %11518 = vrcp.f32 %v7635_v47 }
 0xac9   : > { %v11519_v9 = vpop.eup %11518 }
 0xaca   : > { %v7637_v8 = vmul.f32 %v11519_v9, %v11515_v57 }
 0xacc   : > { %7639 = vrot.lane.b32.xlu0 %v7637_v8, %s11595_s12 }
 0xb0c   : > { %v7617_v40 = vpop.xlane.xlu0 %7616 }
 0xb0d   : > { %11520 = vrcp.f32 %v7617_v40 }
 0xb17   : > { %v11521_v13 = vpop.eup %11520 }
 0xb18   : > { %v7619_v15 = vmul.f32 %v11521_v13, %v11517_v7 }
 0xb1a   : > { %7620 = vst.msk [vmem:[%s373_s25] sm:$0xff] %vm7608_vm0, %v7619_v15 }
 0xb3e   : > { %v7640_v30 = vpop.permute.xlu0 %7639 }
 0xb3f   : > { %7642 = vst.msk [vmem:[%s362_s30] sm:$0xff] %vm7632_vm13, %v7640_v30 }
 0xb40   : > { %11539 = shalt.err (!%p11536_p4)
}
 0xb41   : > { %s11540_s28 = scalar_lea.hbm %s15591_s1, 128  ;;  %s11544_s29 = scalar_lea.hbm %s15644_s10, 256 }
 0xb42   : > { %p11541_p7 = scmp.ne.s32.totalorder %s15591_s1, %s11540_s28  ;;  %p11545_p10 = scmp.lt.u32.totalorder %s15591_s1, %s15644_s10 }
 0xb43   : > { %p11546_p11 = scmp.lt.u32.totalorder %s11544_s29, %s11540_s28  ;;  %p11548_p13 = scmp.lt.u32.totalorder %s11540_s28, %s15591_s1 }
 0xb44   : > { %p11542_p8 = pnand %p11541_p7, %p11690_p5 }
 0xb45   : > { %p11547_p12 = por %p11546_p11, %p11545_p10 }
 0xb46   : > { %p11543_p9 = pneg %p11542_p8 }
 0xb47   : > { %p11549_p0 = por %p11548_p13, %p11547_p12 }
 0xb49   : > { %p11550_p1 = pnand %p11549_p0, %p11543_p9 }
 0xb4b   : > { %11553 = shalt.err (!%p11550_p1)
}
 0xb4c   : > { %11264 = dma.vmem_to_hbm [thread:$0]  (%p11690_p5), %s15593_s18, 128, %s15591_s1, %s7648_s20  }
 0xb4d PF: > { %p11270_p2 = scmp.ge.s32.totalorder %s11588_s16, 2  ;;  %s7683_s12 = sand.u32 1, %s11576_s13  }
 0xb4e   : > { %s7684_s21 = scalar_lea.sflag [#allocation4], %s7683_s12 }
 0xb4f   : > { %p11267_p3 = pnand %p11270_p2, %p11694_p6 }
 0xb51   : > { %11571 = dma.done.wait (!%p11267_p3), %s7684_s21, 128  }
 0xb52   : > { %11573 = vsyncadd (!%p11267_p3), %s7684_s21, 4294967168  ;;  %p21_p4 = scmp.ge.s32.totalorder %s11677_s19, 4   ;;  %s15757_s13 = smov %s11580_s14 }
 0xb53   : > { %s15758_s14 = smov %s11584_s15  ;;  %s15759_s15 = smov %s11688_s22 }
 0xb54   : > { %s15760_s16 = smov %s11677_s19  ;;  %23 = sbr.rel (!%p21_p4) target bundleno = 6 (0x6), region = 103 }
 0xb5b   :  { %7689 = vsyncpa [#allocation4], 1 }
 0xb5c   :  { %7691 = vsyncpa [#allocation4 + $0x1], 1 }

</bundles_post_ra>
